<compile_context>
chip_gen: v5e
topology: v5e:2x2
jax: 0.10.0
libtpu: 0.0.40
codegen_flags: <defaults>
</compile_context>

<pallas_src>
import jax
import jax.numpy as jnp
from jax.experimental import pallas as pl
from jax.experimental.pallas import tpu as pltpu

INPUT_SIZE = 784
HIDDEN_SIZE = 500
OUTPUT_SIZE = 10

HIDDEN_PAD = 512   # 4 * 128 -> lane-aligned hidden dim (zero padding, math unchanged)
MAX_TILE = 1024    # max batch rows per grid step


def _round_up(n, m):
    return (n + m - 1) // m * m


def _cdiv(a, b):
    return -(-a // b)


def _choose_tile(B):
    """Pick a batch tile: big (amortize per-step overhead), multiple of 8,
    and giving a grid of >= 2 steps when the batch allows (v7x megacore)."""
    B8 = _round_up(max(B, 8), 8)
    if B8 <= 256:
        return B8                       # tiny batch: single step, minimal padding
    n_tiles = max(2, _cdiv(B8, MAX_TILE))
    return _round_up(_cdiv(B8, n_tiles), 8)


def mlp_kernel(x_ref, w1_ref, b1_ref, w2_ref, b2_ref, o_ref):
    # Cast x f32 -> bf16 in-kernel (VPU slack) instead of a wrapper-side pass.
    x = x_ref[...].astype(jnp.bfloat16)
    # fc1: [tb, 784]bf16 @ [784, 512]bf16 -> f32 accumulation on the MXU.
    h = jnp.dot(x, w1_ref[...], preferred_element_type=jnp.float32)
    h = jnp.maximum(h + b1_ref[...], 0.0)                       # bias + ReLU in f32
    # fc2: [tb, 512]bf16 @ [512, 10]bf16 -> f32 accumulation.
    y = jnp.dot(h.astype(jnp.bfloat16), w2_ref[...],
                preferred_element_type=jnp.float32)
    o_ref[...] = (y + b2_ref[...]).astype(o_ref.dtype)


def prepare_params(w1, b1, w2, b2):
    """One-time weight prep (pad hidden dim to 512, cast weights to bf16).

    w1: [784, 500], b1: [500], w2: [500, 10], b2: [10]  (weights as [in, out]).
    """
    hp = HIDDEN_PAD - HIDDEN_SIZE
    w1_p = jnp.pad(w1, ((0, 0), (0, hp))).astype(jnp.bfloat16)          # [784, 512]
    b1_p = jnp.pad(b1, (0, hp)).astype(jnp.float32).reshape(1, -1)      # [1, 512]
    w2_p = jnp.pad(w2, ((0, hp), (0, 0))).astype(jnp.bfloat16)          # [512, 10]
    b2_p = b2.astype(jnp.float32).reshape(1, -1)                        # [1, 10]
    return w1_p, b1_p, w2_p, b2_p


def mlp_forward(x, params, *, tb=None):
    """x: [B, 784] f32.  params: output of prepare_params()."""
    w1_p, b1_p, w2_p, b2_p = params
    B = x.shape[0]

    tb_eff = _choose_tile(B) if tb is None else _round_up(min(tb, _round_up(B, 8)), 8)
    B_pad = _round_up(B, tb_eff)
    if B_pad != B:
        # Only pads ragged batches (batch rows, not features); zero rows are
        # sliced off below and never affect valid rows.
        x = jnp.pad(x, ((0, B_pad - B), (0, 0)))
    grid = (B_pad // tb_eff,)

    out = pl.pallas_call(
        mlp_kernel,
        out_shape=jax.ShapeDtypeStruct((B_pad, OUTPUT_SIZE), jnp.float32),
        grid_spec=pltpu.PrefetchScalarGridSpec(
            num_scalar_prefetch=0,
            grid=grid,
            in_specs=[
                # x: tile over batch; full (unpadded) 784 feature dim.
                pl.BlockSpec((tb_eff, INPUT_SIZE), lambda i: (i, 0)),
                # weights / biases: full arrays, same block every step
                # (resident in VMEM across the whole grid).
                pl.BlockSpec((INPUT_SIZE, HIDDEN_PAD), lambda i: (0, 0)),
                pl.BlockSpec((1, HIDDEN_PAD), lambda i: (0, 0)),
                pl.BlockSpec((HIDDEN_PAD, OUTPUT_SIZE), lambda i: (0, 0)),
                pl.BlockSpec((1, OUTPUT_SIZE), lambda i: (0, 0)),
            ],
            out_specs=pl.BlockSpec((tb_eff, OUTPUT_SIZE), lambda i: (i, 0)),
        ),
        compiler_params=pltpu.CompilerParams(
            dimension_semantics=("parallel",),
            # Covers double-buffered f32 x tiles (up to ~6 MiB at tb=1024),
            # the resident bf16 weights, and the f32 hidden activation, with
            # plenty of headroom; also lifts v5e's 16 MiB scoped default.
            vmem_limit_bytes=32 * 1024 * 1024,
        ),
    )(x, w1_p, b1_p, w2_p, b2_p)

    return out[:B] if B_pad != B else out


def init_params(key):
    """nn.Linear-style init (uniform +/- 1/sqrt(fan_in)); weights stored [in, out]."""
    k1, k2, k3, k4 = jax.random.split(key, 4)
    bound1 = 1.0 / (INPUT_SIZE ** 0.5)
    bound2 = 1.0 / (HIDDEN_SIZE ** 0.5)
    w1 = jax.random.uniform(k1, (INPUT_SIZE, HIDDEN_SIZE), jnp.float32,
                            minval=-bound1, maxval=bound1)
    b1 = jax.random.uniform(k2, (HIDDEN_SIZE,), jnp.float32,
                            minval=-bound1, maxval=bound1)
    w2 = jax.random.uniform(k3, (HIDDEN_SIZE, OUTPUT_SIZE), jnp.float32,
                            minval=-bound2, maxval=bound2)
    b2 = jax.random.uniform(k4, (OUTPUT_SIZE,), jnp.float32,
                            minval=-bound2, maxval=bound2)
    return w1, b1, w2, b2


def _reference_f32(x, w1, b1, w2, b2):
    return jnp.maximum(x @ w1 + b1[None, :], 0.0) @ w2 + b2[None, :]


if __name__ == "__main__":
    key = jax.random.PRNGKey(0)
    kx, kp = jax.random.split(key)
    w1, b1, w2, b2 = init_params(kp)
    params = jax.block_until_ready(prepare_params(w1, b1, w2, b2))  # one-time prep

    # Multi-grid-step case (grid = 2 with the auto tile of 256 at B=512).
    batch = 512
    x = jax.random.normal(kx, (batch, INPUT_SIZE), jnp.float32)
    out = jax.block_until_ready(mlp_forward(x, params))
    ref = _reference_f32(x, w1, b1, w2, b2)
    assert out.shape == (batch, OUTPUT_SIZE)
    # bf16 MXU operands / f32 accumulation vs full-f32 reference: loose tolerance.
    assert jnp.allclose(out, ref, atol=2e-2, rtol=2e-2)

    # Small, non-multiple-of-8 batch exercises the ragged-batch padding path.
    batch_s = 24
    x_s = x[:batch_s]
    out_s = jax.block_until_ready(mlp_forward(x_s, params))
    ref_s = _reference_f32(x_s, w1, b1, w2, b2)
    assert out_s.shape == (batch_s, OUTPUT_SIZE)
    assert jnp.allclose(out_s, ref_s, atol=2e-2, rtol=2e-2)

    print("KERNEL_OK")
</pallas_src>

<mosaic_0001>
module attributes {stable_mosaic.version = 11 : i64} {
  func.func @mlp_kernel(%arg0: i32, %arg1: memref<256x784xf32, #tpu.memory_space<vmem>>, %arg2: memref<784x512xbf16, #tpu.memory_space<vmem>>, %arg3: memref<1x512xf32, #tpu.memory_space<vmem>>, %arg4: memref<512x10xbf16, #tpu.memory_space<vmem>>, %arg5: memref<1x10xf32, #tpu.memory_space<vmem>>, %arg6: memref<256x10xf32, #tpu.memory_space<vmem>>) attributes {dimension_semantics = [#tpu.dimension_semantics<parallel>], iteration_bounds = array<i64: 2>, scalar_prefetch = 0 : i64, scratch_operands = 0 : i64, tpu.core_type = #tpu.core_type<tc>, window_params = [{transform_indices = @transform_0, window_bounds = array<i64: 256, 784>}, {pipeline_mode = #tpu.pipeline_mode<synchronous>, transform_indices = @transform_1, window_bounds = array<i64: 784, 512>}, {pipeline_mode = #tpu.pipeline_mode<synchronous>, transform_indices = @transform_2, window_bounds = array<i64: 1, 512>}, {pipeline_mode = #tpu.pipeline_mode<synchronous>, transform_indices = @transform_3, window_bounds = array<i64: 512, 10>}, {pipeline_mode = #tpu.pipeline_mode<synchronous>, transform_indices = @transform_4, window_bounds = array<i64: 1, 10>}, {transform_indices = @transform_5, window_bounds = array<i64: 256, 10>}]} {
    %c0 = arith.constant 0 : index
    %c0_0 = arith.constant 0 : index
    %0 = vector.load %arg1[%c0, %c0_0] : memref<256x784xf32, #tpu.memory_space<vmem>>, vector<256x784xf32>
    %1 = arith.truncf %0 : vector<256x784xf32> to vector<256x784xbf16>
    %c0_1 = arith.constant 0 : index
    %c0_2 = arith.constant 0 : index
    %2 = vector.load %arg2[%c0_1, %c0_2] : memref<784x512xbf16, #tpu.memory_space<vmem>>, vector<784x512xbf16>
    %cst = arith.constant dense<0.000000e+00> : vector<256x512xf32>
    %3 = tpu.matmul %1, %2, %cst {dimension_numbers = #tpu.dot_dimension_numbers<[1], [0], [0], [1], [0, 0, 1, 1], [], []>} : vector<256x784xbf16>, vector<784x512xbf16>, vector<256x512xf32> -> vector<256x512xf32>
    %c0_3 = arith.constant 0 : index
    %c0_4 = arith.constant 0 : index
    %4 = vector.load %arg3[%c0_3, %c0_4] : memref<1x512xf32, #tpu.memory_space<vmem>>, vector<1x512xf32>
    %5 = vector.broadcast %4 : vector<1x512xf32> to vector<256x512xf32>
    %6 = arith.addf %3, %5 : vector<256x512xf32>
    %cst_5 = arith.constant 0.000000e+00 : f32
    %7 = vector.broadcast %cst_5 : f32 to vector<256x512xf32>
    %8 = arith.maximumf %6, %7 : vector<256x512xf32>
    %9 = arith.truncf %8 : vector<256x512xf32> to vector<256x512xbf16>
    %c0_6 = arith.constant 0 : index
    %c0_7 = arith.constant 0 : index
    %10 = vector.load %arg4[%c0_6, %c0_7] : memref<512x10xbf16, #tpu.memory_space<vmem>>, vector<512x10xbf16>
    %cst_8 = arith.constant dense<0.000000e+00> : vector<256x10xf32>
    %11 = tpu.matmul %9, %10, %cst_8 {dimension_numbers = #tpu.dot_dimension_numbers<[1], [0], [0], [1], [0, 0, 1, 1], [], []>} : vector<256x512xbf16>, vector<512x10xbf16>, vector<256x10xf32> -> vector<256x10xf32>
    %c0_9 = arith.constant 0 : index
    %c0_10 = arith.constant 0 : index
    %12 = vector.load %arg5[%c0_9, %c0_10] : memref<1x10xf32, #tpu.memory_space<vmem>>, vector<1x10xf32>
    %13 = vector.broadcast %12 : vector<1x10xf32> to vector<256x10xf32>
    %14 = arith.addf %11, %13 : vector<256x10xf32>
    %c0_11 = arith.constant 0 : index
    %c0_12 = arith.constant 0 : index
    %15 = vector.load %arg6[%c0_11, %c0_12] : memref<256x10xf32, #tpu.memory_space<vmem>>, vector<256x10xf32>
    tpu.vector_store %arg6[%c0_11, %c0_12], %14 {strides = array<i32>} : memref<256x10xf32, #tpu.memory_space<vmem>>, vector<256x10xf32>,
    return
  }
  func.func @transform_0(%arg0: i32) -> (i32, i32) {
    %c0_i32 = arith.constant 0 : i32
    %c0_i32_0 = arith.constant 0 : i32
    return %arg0, %c0_i32 : i32, i32
  }
  func.func @transform_1(%arg0: i32) -> (i32, i32) {
    %c0_i32 = arith.constant 0 : i32
    %c0_i32_0 = arith.constant 0 : i32
    %c0_i32_1 = arith.constant 0 : i32
    return %c0_i32, %c0_i32_0 : i32, i32
  }
  func.func @transform_2(%arg0: i32) -> (i32, i32) {
    %c0_i32 = arith.constant 0 : i32
    %c0_i32_0 = arith.constant 0 : i32
    %c0_i32_1 = arith.constant 0 : i32
    return %c0_i32, %c0_i32_0 : i32, i32
  }
  func.func @transform_3(%arg0: i32) -> (i32, i32) {
    %c0_i32 = arith.constant 0 : i32
    %c0_i32_0 = arith.constant 0 : i32
    %c0_i32_1 = arith.constant 0 : i32
    return %c0_i32, %c0_i32_0 : i32, i32
  }
  func.func @transform_4(%arg0: i32) -> (i32, i32) {
    %c0_i32 = arith.constant 0 : i32
    %c0_i32_0 = arith.constant 0 : i32
    %c0_i32_1 = arith.constant 0 : i32
    return %c0_i32, %c0_i32_0 : i32, i32
  }
  func.func @transform_5(%arg0: i32) -> (i32, i32) {
    %c0_i32 = arith.constant 0 : i32
    %c0_i32_0 = arith.constant 0 : i32
    return %arg0, %c0_i32 : i32, i32
  }
}

</mosaic_0001>

<bundles_post_ra>
// kernel: tpu_custom_call.1
= control target key start
LH: loop header
LB: loop body
LE: loop exit
PB: predicated region body
PF: predicated region fallthrough
CT: control target
= control target key end

     0   :  { %s6457_s18 = smov 0   ;;  %s9734_s0 = inlined_call_operand.vmem [shape: f32[512,784], index: 0, kind: input, shape index: {}]   ;;  %s9735_s1 = inlined_call_operand.vmem [shape: bf16[784,512], index: 1, kind: input, shape index: {}]   ;;  %s9736_s2 = inlined_call_operand.vmem [shape: f32[1,512], index: 2, kind: input, shape index: {}]   ;;  %s9737_s3 = inlined_call_operand.vmem [shape: bf16[512,10], index: 3, kind: input, shape index: {}]   ;;  %s9738_s4 = inlined_call_operand.vmem [shape: f32[1,10], index: 4, kind: input, shape index: {}]   ;;  %s9739_s5 = inlined_call_operand.vmem [shape: f32[512,10], index: 5, kind: output, shape index: {}]  }
   0x1 LB: > { %s5192_s19 = sadd.s32 4294967295, %s6425_s18   ;;  %p5196_p0 = scmp.ge.s32.totalorder %s6425_s18, 1  ;;  %s6425_s18 = sphi %s6457_s18, %s15_s18  }
   0x2   : > { %p189_p1 = scmp.lt.s32.totalorder %s6425_s18, 3 }
   0x4   : > { %p190_p2 = pnand %p5196_p0, %p189_p1 }
   0x6   : > { %193 = sbr.rel (%p190_p2) target bundleno = 2227 (0x8b3), region = 40 }
   0xb   : > { %v5315_v0 = vld [vmem:[%s9735_s1 + $0xe0] sm:$0xf]  ;;  %v6209_v1 = vld [vmem:[%s9735_s1 + $0xec] sm:$0xf0]  ;;  %s5197_s13 = sshll.u32 %s5192_s19, 5  ;;  %vm1754_vm0 = vcmask 130048  }
   0xc   : > { %v5443_v2 = vld [vmem:[%s9735_s1 + $0x1e0] sm:$0xf]  ;;  %v5316_v3 = vor.u32 %v6209_v1, %v5315_v0  ;;  %v6241_v4 = vld [vmem:[%s9735_s1 + $0x1ec] sm:$0xf0]  ;;  %p219_p3 = scmp.lt.s32.totalorder %s5197_s13, 63  ;;  %vm5103_vm1 = vcmask 80896  }
   0xd   : > { %v5571_v5 = vld [vmem:[%s9735_s1 + $0x2e0] sm:$0xf]  ;;  %v6273_v6 = vld [vmem:[%s9735_s1 + $0x2ec] sm:$0xf0]  ;;  %v5444_v7 = vor.u32 %v6241_v4, %v5443_v2 }
   0xe   : > { %v5572_v8 = vor.u32 %v6273_v6, %v5571_v5  ;;  %v5699_v9 = vld [vmem:[%s9735_s1 + $0x3e0] sm:$0xf]  ;;  %v6305_v10 = vld [vmem:[%s9735_s1 + $0x3ec] sm:$0xf0]  ;;  %1803 = vmatpush.bf16.msra.mxu0 %v5316_v3  ;;  %s10446_s13 = smov (!%p219_p3, %s5197_s13), 63 }
   0xf   : > { %v5299_v11 = vld [vmem:[%s9735_s1 + $0xc0] sm:$0xf]  ;;  %v5700_v12 = vor.u32 %v6305_v10, %v5699_v9  ;;  %v6205_v13 = vld [vmem:[%s9735_s1 + $0xcc] sm:$0xf0]  ;;  %1892 = vmatpush.bf16.msra.mxu1 %v5444_v7  ;;  %s6407_s8 = smul.u32 56, %s10446_s13  ;;  %s5200_s15 = sshll.u32 %s10446_s13, 3 }
  0x10   : > { %v5427_v14 = vld [vmem:[%s9735_s1 + $0x1c0] sm:$0xf]  ;;  %v6237_v15 = vld [vmem:[%s9735_s1 + $0x1cc] sm:$0xf0]  ;;  %1981 = vmatpush.bf16.msra.mxu2 %v5572_v8  ;;  %v5300_v16 = vor.u32 %v6205_v13, %v5299_v11  ;;  %s9606_s17 = scalar_lea.vmem %s9739_s5, %s5200_s15 }
  0x11   : > { %v5428_v17 = vor.u32 %v6237_v15, %v5427_v14  ;;  %v5555_v18 = vld [vmem:[%s9735_s1 + $0x2c0] sm:$0xf]  ;;  %v6269_v19 = vld [vmem:[%s9735_s1 + $0x2cc] sm:$0xf0]  ;;  %2070 = vmatpush.bf16.msra.mxu3 %v5700_v12  ;;  %s6680_s19 = scalar_lea.vmem %s9734_s0, %s6407_s8 }
  0x12   : > { %v5683_v20 = vld [vmem:[%s9735_s1 + $0x3c0] sm:$0xf]  ;;  %v5556_v21 = vor.u32 %v6269_v19, %v5555_v18  ;;  %v6301_v22 = vld [vmem:[%s9735_s1 + $0x3cc] sm:$0xf0]  ;;  %1804 = vmatpush.bf16.msra.mxu0 %v5300_v16 }
  0x13   : > { %v5283_v23 = vld [vmem:[%s9735_s1 + $0xa0] sm:$0xf]  ;;  %v6201_v24 = vld [vmem:[%s9735_s1 + $0xac] sm:$0xf0]  ;;  %v5684_v25 = vor.u32 %v6301_v22, %v5683_v20  ;;  %1893 = vmatpush.bf16.msra.mxu1 %v5428_v17 }
  0x14   : > { %v5411_v26 = vld [vmem:[%s9735_s1 + $0x1a0] sm:$0xf]  ;;  %v6233_v27 = vld [vmem:[%s9735_s1 + $0x1ac] sm:$0xf0]  ;;  %v5284_v29 = vor.u32 %v6201_v24, %v5283_v23  ;;  %1982 = vmatpush.bf16.msra.mxu2 %v5556_v21 }
  0x15   : > { %v5539_v28 = vld [vmem:[%s9735_s1 + $0x2a0] sm:$0xf]  ;;  %v6265_v30 = vld [vmem:[%s9735_s1 + $0x2ac] sm:$0xf0]  ;;  %v5412_v33 = vor.u32 %v6233_v27, %v5411_v26  ;;  %2071 = vmatpush.bf16.msra.mxu3 %v5684_v25 }
  0x16   : > { %v5667_v31 = vld [vmem:[%s9735_s1 + $0x3a0] sm:$0xf]  ;;  %v6297_v32 = vld [vmem:[%s9735_s1 + $0x3ac] sm:$0xf0]  ;;  %v5540_v34 = vor.u32 %v6265_v30, %v5539_v28  ;;  %1805 = vmatpush.bf16.msra.mxu0 %v5284_v29 }
  0x17   : > { %v5267_v35 = vld [vmem:[%s9735_s1 + $0x80] sm:$0xf]  ;;  %v6197_v36 = vld [vmem:[%s9735_s1 + $0x8c] sm:$0xf0]  ;;  %v5668_v38 = vor.u32 %v6297_v32, %v5667_v31  ;;  %1894 = vmatpush.bf16.msra.mxu1 %v5412_v33  ;;  %v6207_v32 = vld [vmem:[%s9735_s1 + $0xe4] sm:$0xf] }
  0x18   : > { %v5395_v37 = vld [vmem:[%s9735_s1 + $0x180] sm:$0xf]  ;;  %v6229_v39 = vld [vmem:[%s9735_s1 + $0x18c] sm:$0xf0]  ;;  %v5268_v44 = vor.u32 %v6197_v36, %v5267_v35  ;;  %1983 = vmatpush.bf16.msra.mxu2 %v5540_v34  ;;  %v5317_v33 = vld [vmem:[%s9735_s1 + $0xf0] sm:$0xf0] }
  0x19   : > { %v5523_v40 = vld [vmem:[%s9735_s1 + $0x280] sm:$0xf]  ;;  %v6261_v41 = vld [vmem:[%s9735_s1 + $0x28c] sm:$0xf0]  ;;  %v5396_v45 = vor.u32 %v6229_v39, %v5395_v37  ;;  %2072 = vmatpush.bf16.msra.mxu3 %v5668_v38 }
  0x1a   : > { %v5651_v42 = vld [vmem:[%s9735_s1 + $0x380] sm:$0xf]  ;;  %v6293_v43 = vld [vmem:[%s9735_s1 + $0x38c] sm:$0xf0]  ;;  %v5524_v46 = vor.u32 %v6261_v41, %v5523_v40  ;;  %1806 = vmatpush.bf16.msra.mxu0 %v5268_v44  ;;  %v239_v41 = vld [vmem:[%s6680_s19 + $0x38] sm:$0xff] }
  0x1b   : > { %v5251_v47 = vld [vmem:[%s9735_s1 + $0x60] sm:$0xf]  ;;  %v6193_v48 = vld [vmem:[%s9735_s1 + $0x6c] sm:$0xf0]  ;;  %v5652_v50 = vor.u32 %v6293_v43, %v5651_v42  ;;  %1895 = vmatpush.bf16.msra.mxu1 %v5396_v45  ;;  %v233_v42 = vld [vmem:[%s6680_s19 + $0x8] sm:$0xff] }
  0x1c   : > { %v5379_v49 = vld [vmem:[%s9735_s1 + $0x160] sm:$0xf]  ;;  %v6225_v51 = vld [vmem:[%s9735_s1 + $0x16c] sm:$0xf0]  ;;  %v5252_v56 = vor.u32 %v6193_v48, %v5251_v47  ;;  %1984 = vmatpush.bf16.msra.mxu2 %v5524_v46  ;;  %v241_v47 = vld [vmem:[%s6680_s19 + $0x48] sm:$0xff]  ;;  %v5320_v48 = vor.u32 %v6207_v32, %v5317_v33 }
  0x1d   : > { %v5507_v52 = vld [vmem:[%s9735_s1 + $0x260] sm:$0xf]  ;;  %v6257_v53 = vld [vmem:[%s9735_s1 + $0x26c] sm:$0xf0]  ;;  %v5380_v57 = vor.u32 %v6225_v51, %v5379_v49  ;;  %2073 = vmatpush.bf16.msra.mxu3 %v5652_v50  ;;  %v235_v51 = vld [vmem:[%s6680_s19 + $0x18] sm:$0xff] }
  0x1e   : > { %v5635_v54 = vld [vmem:[%s9735_s1 + $0x360] sm:$0xf]  ;;  %v6289_v55 = vld [vmem:[%s9735_s1 + $0x36c] sm:$0xf0]  ;;  %v5508_v58 = vor.u32 %v6257_v53, %v5507_v52  ;;  %1807 = vmatpush.bf16.msra.mxu0 %v5252_v56 }
  0x1f   : > { %v5235_v59 = vld [vmem:[%s9735_s1 + $0x40] sm:$0xf]  ;;  %v6189_v60 = vld [vmem:[%s9735_s1 + $0x4c] sm:$0xf0]  ;;  %v5636_v62 = vor.u32 %v6289_v55, %v5635_v54  ;;  %1896 = vmatpush.bf16.msra.mxu1 %v5380_v57 }
  0x20   : > { %v5363_v61 = vld [vmem:[%s9735_s1 + $0x140] sm:$0xf]  ;;  %v6221_v63 = vld [vmem:[%s9735_s1 + $0x14c] sm:$0xf0]  ;;  %v5236_v4 = vor.u32 %v6189_v60, %v5235_v59  ;;  %1985 = vmatpush.bf16.msra.mxu2 %v5508_v58  ;;  %v6203_v58 = vld [vmem:[%s9735_s1 + $0xc4] sm:$0xf] }
  0x21   : > { %v5491_v0 = vld [vmem:[%s9735_s1 + $0x240] sm:$0xf]  ;;  %v6253_v1 = vld [vmem:[%s9735_s1 + $0x24c] sm:$0xf0]  ;;  %v5364_v7 = vor.u32 %v6221_v63, %v5363_v61  ;;  %2074 = vmatpush.bf16.msra.mxu3 %v5636_v62  ;;  %v5301_v60 = vld [vmem:[%s9735_s1 + $0xd0] sm:$0xf0] }
  0x22   : > { %v5619_v2 = vld [vmem:[%s9735_s1 + $0x340] sm:$0xf]  ;;  %v6285_v3 = vld [vmem:[%s9735_s1 + $0x34c] sm:$0xf0]  ;;  %v5492_v8 = vor.u32 %v6253_v1, %v5491_v0  ;;  %1808 = vmatpush.bf16.msra.mxu0 %v5236_v4  ;;  %v5304_v63 = vor.u32 %v6203_v58, %v5301_v60 }
  0x23   : > { %v5219_v5 = vld [vmem:[%s9735_s1 + $0x20] sm:$0xf]  ;;  %v6185_v6 = vld [vmem:[%s9735_s1 + $0x2c] sm:$0xf0]  ;;  %v5620_v12 = vor.u32 %v6285_v3, %v5619_v2  ;;  %1897 = vmatpush.bf16.msra.mxu1 %v5364_v7  ;;  %v253_v2 = vld [vmem:[%s6680_s19 + $0xa8] sm:$0xff] }
  0x24   : > { %v5347_v9 = vld [vmem:[%s9735_s1 + $0x120] sm:$0xf]  ;;  %v6217_v10 = vld [vmem:[%s9735_s1 + $0x12c] sm:$0xf0]  ;;  %v5220_v17 = vor.u32 %v6185_v6, %v5219_v5  ;;  %1986 = vmatpush.bf16.msra.mxu2 %v5492_v8  ;;  %v247_v3 = vld [vmem:[%s6680_s19 + $0x78] sm:$0xff] }
  0x25   : > { %v5475_v11 = vld [vmem:[%s9735_s1 + $0x220] sm:$0xf]  ;;  %v6249_v13 = vld [vmem:[%s9735_s1 + $0x22c] sm:$0xf0]  ;;  %v5348_v21 = vor.u32 %v6217_v10, %v5347_v9  ;;  %2075 = vmatpush.bf16.msra.mxu3 %v5620_v12  ;;  %v255_v6 = vld [vmem:[%s6680_s19 + $0xb8] sm:$0xff] }
  0x26   : > { %v5603_v14 = vld [vmem:[%s9735_s1 + $0x320] sm:$0xf]  ;;  %v6281_v15 = vld [vmem:[%s9735_s1 + $0x32c] sm:$0xf0]  ;;  %v5476_v22 = vor.u32 %v6249_v13, %v5475_v11  ;;  %1809 = vmatpush.bf16.msra.mxu0 %v5220_v17  ;;  %v249_v7 = vld [vmem:[%s6680_s19 + $0x88] sm:$0xff] }
  0x27   : > { %v5203_v16 = vld [vmem:[%s9735_s1] sm:$0xf]  ;;  %v6181_v18 = vld [vmem:[%s9735_s1 + $0xc] sm:$0xf0]  ;;  %v5604_v25 = vor.u32 %v6281_v15, %v5603_v14  ;;  %1898 = vmatpush.bf16.msra.mxu1 %v5348_v21  ;;  %v267_v14 = vld [vmem:[%s6680_s19 + $0x118] sm:$0xff] }
  0x28   : > { %v5331_v19 = vld [vmem:[%s9735_s1 + $0x100] sm:$0xf]  ;;  %v6213_v20 = vld [vmem:[%s9735_s1 + $0x10c] sm:$0xf0]  ;;  %v5204_v30 = vor.u32 %v6181_v18, %v5203_v16  ;;  %1987 = vmatpush.bf16.msra.mxu2 %v5476_v22  ;;  %v261_v15 = vld [vmem:[%s6680_s19 + $0xe8] sm:$0xff] }
  0x29   : > { %v5459_v23 = vld [vmem:[%s9735_s1 + $0x200] sm:$0xf]  ;;  %v6245_v24 = vld [vmem:[%s9735_s1 + $0x20c] sm:$0xf0]  ;;  %v5332_v34 = vor.u32 %v6213_v20, %v5331_v19  ;;  %2076 = vmatpush.bf16.msra.mxu3 %v5604_v25  ;;  %v269_v18 = vld [vmem:[%s6680_s19 + $0x128] sm:$0xff] }
  0x2a   : > { %v5587_v26 = vld [vmem:[%s9735_s1 + $0x300] sm:$0xf]  ;;  %v6277_v27 = vld [vmem:[%s9735_s1 + $0x30c] sm:$0xf0]  ;;  %v5460_v35 = vor.u32 %v6245_v24, %v5459_v23  ;;  %1810 = vmatpush.bf16.msra.mxu0 %v5204_v30  ;;  %v263_v19 = vld [vmem:[%s6680_s19 + $0xf8] sm:$0xff] }
  0x2b   : > { %v5971_v28 = vld [vmem:[%s9735_s1 + $0x600] sm:$0xf]  ;;  %v6373_v29 = vld [vmem:[%s9735_s1 + $0x60c] sm:$0xf0]  ;;  %v5588_v39 = vor.u32 %v6277_v27, %v5587_v26  ;;  %1899 = vmatpush.bf16.msra.mxu1 %v5332_v34  ;;  %v6199_v27 = vld [vmem:[%s9735_s1 + $0xa4] sm:$0xf] }
  0x2c   : > { %v5827_v31 = vld [vmem:[%s9735_s1 + $0x4e0] sm:$0xf]  ;;  %v6337_v36 = vld [vmem:[%s9735_s1 + $0x4ec] sm:$0xf0]  ;;  %v5972_v43 = vor.u32 %v6373_v29, %v5971_v28  ;;  %1988 = vmatpush.bf16.msra.mxu2 %v5460_v35  ;;  %v5285_v29 = vld [vmem:[%s9735_s1 + $0xb0] sm:$0xf0] }
  0x2d   : > { %v5955_v37 = vld [vmem:[%s9735_s1 + $0x5e0] sm:$0xf]  ;;  %v6369_v38 = vld [vmem:[%s9735_s1 + $0x5ec] sm:$0xf0]  ;;  %v5828_v54 = vor.u32 %v6337_v36, %v5827_v31  ;;  %2077 = vmatpush.bf16.msra.mxu3 %v5588_v39  ;;  %v5288_v32 = vor.u32 %v6199_v27, %v5285_v29  ;;  %v281_v35 = vld [vmem:[%s6680_s19 + $0x188] sm:$0xff] }
  0x2e   : > { %v232_v40 = vld [vmem:[%s6680_s19] sm:$0xff]  ;;  %v234_v46 = vld [vmem:[%s6680_s19 + $0x10] sm:$0xff]  ;;  %v5956_v55 = vor.u32 %v6369_v38, %v5955_v37  ;;  %v275_v36 = vld [vmem:[%s6680_s19 + $0x158] sm:$0xff] }
  0x2f   : > { %v6694_v44 = vpack.c.bf16 %v239_v41, %v232_v40  ;;  %v240_v45 = vld [vmem:[%s6680_s19 + $0x40] sm:$0xff]  ;;  %v6701_v50 = vpack.c.bf16 %v241_v47, %v234_v46  ;;  %v242_v52 = vld [vmem:[%s6680_s19 + $0x50] sm:$0xff]  ;;  %2159 = vmatpush.bf16.msrb.mxu0 %v5828_v54  ;;  %v283_v39 = vld [vmem:[%s6680_s19 + $0x198] sm:$0xff] }
  0x30   : > { %v6699_v49 = vpack.c.bf16 %v240_v45, %v233_v42  ;;  %v6705_v53 = vpack.c.bf16 %v242_v52, %v235_v51  ;;  %2344 = vmatpush.bf16.msrb.mxu2 %v5972_v43  ;;  %2248 = vmatpush.bf16.msrb.mxu1 %v5956_v55  ;;  %v5811_v56 = vld [vmem:[%s9735_s1 + $0x4c0] sm:$0xf]  ;;  %v6333_v57 = vld [vmem:[%s9735_s1 + $0x4cc] sm:$0xf0]  ;;  %v277_v40 = vld [vmem:[%s6680_s19 + $0x168] sm:$0xff] }
  0x31   : > { %9986 = vst [vmem:[#allocation2_spill] sm:$0xff] %v6694_v44  ;;  %1811 = vmatmul.bf16.vlgmr.msra.gmra.mxu0 %v6694_v44  ;;  %2426 = vmatpush.bf16.msrb.mxu3 %v5320_v48  ;;  %v5812_v59 = vor.u32 %v6333_v57, %v5811_v56  ;;  %v5939_v61 = vld [vmem:[%s9735_s1 + $0x5c0] sm:$0xf]  ;;  %v6365_v62 = vld [vmem:[%s9735_s1 + $0x5cc] sm:$0xf0]  ;;  %v295_v48 = vld [vmem:[%s6680_s19 + $0x1f8] sm:$0xff] }
  0x32   : > { %9987 = vst [vmem:[#allocation3_spill] sm:$0xff] %v6699_v49  ;;  %1900 = vmatmul.bf16.vlgmr.msra.gmra.mxu1 %v6699_v49  ;;  %1989 = vmatmul.bf16.vlgmr.msra.gmra.mxu2 %v6701_v50  ;;  %v5940_v0 = vor.u32 %v6365_v62, %v5939_v61  ;;  %v246_v1 = vld [vmem:[%s6680_s19 + $0x70] sm:$0xff]  ;;  %v248_v5 = vld [vmem:[%s6680_s19 + $0x80] sm:$0xff]  ;;  %v289_v51 = vld [vmem:[%s6680_s19 + $0x1c8] sm:$0xff] }
  0x33   : > { %9988 = vst [vmem:[#allocation4_spill] sm:$0xff] %v6701_v50  ;;  %2078 = vmatmul.bf16.vlgmr.msra.gmra.mxu3 %v6705_v53  ;;  %2160 = vmatpush.bf16.msrb.mxu0 %v5812_v59  ;;  %v254_v4 = vld [vmem:[%s6680_s19 + $0xb0] sm:$0xff]  ;;  %v256_v8 = vld [vmem:[%s6680_s19 + $0xc0] sm:$0xff]  ;;  %v6737_v9 = vpack.c.bf16 %v253_v2, %v246_v1  ;;  %v6741_v11 = vpack.c.bf16 %v255_v6, %v248_v5  ;;  %v297_v55 = vld [vmem:[%s6680_s19 + $0x208] sm:$0xff] }
  0x34   : > { %9989 = vst [vmem:[#allocation5_spill] sm:$0xff] %v6705_v53  ;;  %2249 = vmatpush.bf16.msrb.mxu1 %v5940_v0  ;;  %v6739_v10 = vpack.c.bf16 %v254_v4, %v247_v3  ;;  %v6743_v12 = vpack.c.bf16 %v256_v8, %v249_v7  ;;  %v260_v13 = vld [vmem:[%s6680_s19 + $0xe0] sm:$0xff]  ;;  %v262_v17 = vld [vmem:[%s6680_s19 + $0xf0] sm:$0xff]  ;;  %v291_v56 = vld [vmem:[%s6680_s19 + $0x1d8] sm:$0xff] }
  0x35   : > { %2427 = vmatpush.bf16.msrb.mxu3 %v5304_v63  ;;  %9990 = vst [vmem:[#allocation6_spill] sm:$0xff] %v6737_v9  ;;  %v268_v16 = vld [vmem:[%s6680_s19 + $0x120] sm:$0xff]  ;;  %v270_v20 = vld [vmem:[%s6680_s19 + $0x130] sm:$0xff]  ;;  %v6757_v21 = vpack.c.bf16 %v267_v14, %v260_v13  ;;  %v6761_v23 = vpack.c.bf16 %v269_v18, %v262_v17  ;;  %v309_v8 = vld [vmem:[%s6680_s19 + $0x268] sm:$0xff] }
  0x36   : > { %9991 = vst [vmem:[#allocation7_spill] sm:$0xff] %v6739_v10  ;;  %v6759_v22 = vpack.c.bf16 %v268_v16, %v261_v15  ;;  %v6763_v24 = vpack.c.bf16 %v270_v20, %v263_v19  ;;  %v5795_v25 = vld [vmem:[%s9735_s1 + $0x4a0] sm:$0xf]  ;;  %v6329_v26 = vld [vmem:[%s9735_s1 + $0x4ac] sm:$0xf0]  ;;  %v303_v13 = vld [vmem:[%s6680_s19 + $0x238] sm:$0xff] }
  0x37   : > { %9992 = vst [vmem:[#allocation8_spill] sm:$0xff] %v6741_v11  ;;  %v5796_v28 = vor.u32 %v6329_v26, %v5795_v25  ;;  %v5923_v30 = vld [vmem:[%s9735_s1 + $0x5a0] sm:$0xf]  ;;  %v6361_v31 = vld [vmem:[%s9735_s1 + $0x5ac] sm:$0xf0]  ;;  %v311_v16 = vld [vmem:[%s6680_s19 + $0x278] sm:$0xff] }
  0x38   : > { %9993 = vst [vmem:[#allocation9_spill] sm:$0xff] %v6743_v12  ;;  %v5924_v33 = vor.u32 %v6361_v31, %v5923_v30  ;;  %v274_v34 = vld [vmem:[%s6680_s19 + $0x150] sm:$0xff]  ;;  %v276_v38 = vld [vmem:[%s6680_s19 + $0x160] sm:$0xff]  ;;  %v305_v17 = vld [vmem:[%s6680_s19 + $0x248] sm:$0xff] }
  0x39   : > { %9994 = vst [vmem:[#allocation10_spill] sm:$0xff] %v6757_v21  ;;  %2161 = vmatpush.bf16.msrb.mxu0 %v5796_v28  ;;  %2428 = vmatpush.bf16.msrb.mxu3 %v5288_v32  ;;  %v282_v37 = vld [vmem:[%s6680_s19 + $0x190] sm:$0xff]  ;;  %v284_v41 = vld [vmem:[%s6680_s19 + $0x1a0] sm:$0xff]  ;;  %v6795_v42 = vpack.c.bf16 %v281_v35, %v274_v34  ;;  %v6799_v45 = vpack.c.bf16 %v283_v39, %v276_v38  ;;  %v323_v28 = vld [vmem:[%s6680_s19 + $0x2d8] sm:$0xff] }
  0x3a   : > { %9995 = vst [vmem:[#allocation11_spill] sm:$0xff] %v6759_v22  ;;  %2250 = vmatpush.bf16.msrb.mxu1 %v5924_v33  ;;  %v6797_v43 = vpack.c.bf16 %v282_v37, %v275_v36  ;;  %v6801_v46 = vpack.c.bf16 %v284_v41, %v277_v40  ;;  %v288_v47 = vld [vmem:[%s6680_s19 + $0x1c0] sm:$0xff]  ;;  %v290_v54 = vld [vmem:[%s6680_s19 + $0x1d0] sm:$0xff]  ;;  %v317_v29 = vld [vmem:[%s6680_s19 + $0x2a8] sm:$0xff] }
  0x3b   : > { %9996 = vst [vmem:[#allocation12_spill] sm:$0xff] %v6761_v23  ;;  %v296_v52 = vld [vmem:[%s6680_s19 + $0x200] sm:$0xff]  ;;  %v298_v57 = vld [vmem:[%s6680_s19 + $0x210] sm:$0xff]  ;;  %v6815_v58 = vpack.c.bf16 %v295_v48, %v288_v47  ;;  %v6819_v60 = vpack.c.bf16 %v297_v55, %v290_v54  ;;  %v325_v32 = vld [vmem:[%s6680_s19 + $0x2e8] sm:$0xff] }
  0x3c   : > { %9997 = vst [vmem:[#allocation13_spill] sm:$0xff] %v6763_v24  ;;  %v6817_v59 = vpack.c.bf16 %v296_v52, %v289_v51  ;;  %v6821_v61 = vpack.c.bf16 %v298_v57, %v291_v56  ;;  %v5779_v62 = vld [vmem:[%s9735_s1 + $0x480] sm:$0xf]  ;;  %v6325_v63 = vld [vmem:[%s9735_s1 + $0x48c] sm:$0xf0]  ;;  %v319_v33 = vld [vmem:[%s6680_s19 + $0x2b8] sm:$0xff] }
  0x3d   : > { %9998 = vst [vmem:[#allocation14_spill] sm:$0xff] %v6795_v42  ;;  %v6195_v0 = vld [vmem:[%s9735_s1 + $0x84] sm:$0xf]  ;;  %v5780_v1 = vor.u32 %v6325_v63, %v5779_v62  ;;  %v5269_v2 = vld [vmem:[%s9735_s1 + $0x90] sm:$0xf0]  ;;  %v337_v57 = vld [vmem:[%s6680_s19 + $0x348] sm:$0xff] }
  0x3e   : > { %9999 = vst [vmem:[#allocation15_spill] sm:$0xff] %v6797_v43  ;;  %v5907_v3 = vld [vmem:[%s9735_s1 + $0x580] sm:$0xf]  ;;  %v6357_v4 = vld [vmem:[%s9735_s1 + $0x58c] sm:$0xf0]  ;;  %v5272_v5 = vor.u32 %v6195_v0, %v5269_v2  ;;  %v331_v62 = vld [vmem:[%s6680_s19 + $0x318] sm:$0xff] }
  0x3f   : > { %10000 = vst [vmem:[#allocation16_spill] sm:$0xff] %v6799_v45  ;;  %v5908_v6 = vor.u32 %v6357_v4, %v5907_v3  ;;  %2162 = vmatpush.bf16.msrb.mxu0 %v5780_v1  ;;  %v302_v7 = vld [vmem:[%s6680_s19 + $0x230] sm:$0xff]  ;;  %v304_v15 = vld [vmem:[%s6680_s19 + $0x240] sm:$0xff]  ;;  %v339_v1 = vld [vmem:[%s6680_s19 + $0x358] sm:$0xff] }
  0x40   : > { %10001 = vst [vmem:[#allocation17_spill] sm:$0xff] %v6801_v46  ;;  %2429 = vmatpush.bf16.msrb.mxu3 %v5272_v5  ;;  %v310_v14 = vld [vmem:[%s6680_s19 + $0x270] sm:$0xff]  ;;  %v312_v18 = vld [vmem:[%s6680_s19 + $0x280] sm:$0xff]  ;;  %v6853_v19 = vpack.c.bf16 %v309_v8, %v302_v7  ;;  %v6857_v25 = vpack.c.bf16 %v311_v16, %v304_v15  ;;  %v333_v2 = vld [vmem:[%s6680_s19 + $0x328] sm:$0xff] }
  0x41   : > { %1816 = vmatmul.bf16.gmra.mxu0 %v6737_v9  ;;  %10002 = vst [vmem:[#allocation18_spill] sm:$0xff] %v6815_v58  ;;  %2251 = vmatpush.bf16.msrb.mxu1 %v5908_v6  ;;  %v6855_v20 = vpack.c.bf16 %v310_v14, %v303_v13  ;;  %v6859_v26 = vpack.c.bf16 %v312_v18, %v305_v17  ;;  %v316_v27 = vld [vmem:[%s6680_s19 + $0x2a0] sm:$0xff]  ;;  %v318_v31 = vld [vmem:[%s6680_s19 + $0x2b0] sm:$0xff]  ;;  %v351_v14 = vld [vmem:[%s6680_s19 + $0x3b8] sm:$0xff] }
  0x42   : > { %1905 = vmatmul.bf16.gmra.mxu1 %v6739_v10  ;;  %1994 = vmatmul.bf16.gmra.mxu2 %v6741_v11  ;;  %10003 = vst [vmem:[#allocation19_spill] sm:$0xff] %v6817_v59  ;;  %v324_v30 = vld [vmem:[%s6680_s19 + $0x2e0] sm:$0xff]  ;;  %v326_v34 = vld [vmem:[%s6680_s19 + $0x2f0] sm:$0xff]  ;;  %v6873_v35 = vpack.c.bf16 %v323_v28, %v316_v27  ;;  %v6877_v37 = vpack.c.bf16 %v325_v32, %v318_v31  ;;  %v345_v15 = vld [vmem:[%s6680_s19 + $0x388] sm:$0xff] }
  0x43   : > { %2083 = vmatmul.bf16.gmra.mxu3 %v6743_v12  ;;  %10004 = vst [vmem:[#allocation20_spill] sm:$0xff] %v6819_v60  ;;  %v6875_v36 = vpack.c.bf16 %v324_v30, %v317_v29  ;;  %v6879_v38 = vpack.c.bf16 %v326_v34, %v319_v33  ;;  %v5763_v39 = vld [vmem:[%s9735_s1 + $0x460] sm:$0xf]  ;;  %v6321_v40 = vld [vmem:[%s9735_s1 + $0x46c] sm:$0xf0]  ;;  %v353_v27 = vld [vmem:[%s6680_s19 + $0x3c8] sm:$0xff] }
  0x44   : > { %10005 = vst [vmem:[#allocation21_spill] sm:$0xff] %v6821_v61  ;;  %v6191_v41 = vld [vmem:[%s9735_s1 + $0x64] sm:$0xf]  ;;  %v5764_v47 = vor.u32 %v6321_v40, %v5763_v39  ;;  %v5253_v48 = vld [vmem:[%s9735_s1 + $0x70] sm:$0xf0]  ;;  %v347_v28 = vld [vmem:[%s6680_s19 + $0x398] sm:$0xff] }
  0x45   : > { %10006 = vst [vmem:[#allocation22_spill] sm:$0xff] %v6853_v19  ;;  %v5256_v51 = vor.u32 %v6191_v41, %v5253_v48  ;;  %v5891_v52 = vld [vmem:[%s9735_s1 + $0x560] sm:$0xf]  ;;  %v6353_v54 = vld [vmem:[%s9735_s1 + $0x56c] sm:$0xf0] }
  0x46   : > { %10007 = vst [vmem:[#allocation23_spill] sm:$0xff] %v6855_v20  ;;  %2163 = vmatpush.bf16.msrb.mxu0 %v5764_v47  ;;  %v5892_v55 = vor.u32 %v6353_v54, %v5891_v52  ;;  %v330_v56 = vld [vmem:[%s6680_s19 + $0x310] sm:$0xff]  ;;  %v332_v0 = vld [vmem:[%s6680_s19 + $0x320] sm:$0xff] }
  0x47   : > { %10008 = vst [vmem:[#allocation24_spill] sm:$0xff] %v6857_v25  ;;  %2430 = vmatpush.bf16.msrb.mxu3 %v5256_v51  ;;  %v338_v63 = vld [vmem:[%s6680_s19 + $0x350] sm:$0xff]  ;;  %v340_v3 = vld [vmem:[%s6680_s19 + $0x360] sm:$0xff]  ;;  %v6911_v4 = vpack.c.bf16 %v337_v57, %v330_v56  ;;  %v6915_v6 = vpack.c.bf16 %v339_v1, %v332_v0 }
  0x48   : > { %10009 = vst [vmem:[#allocation25_spill] sm:$0xff] %v6859_v26  ;;  %2252 = vmatpush.bf16.msrb.mxu1 %v5892_v55  ;;  %v6913_v5 = vpack.c.bf16 %v338_v63, %v331_v62  ;;  %v6917_v7 = vpack.c.bf16 %v340_v3, %v333_v2  ;;  %v764_v8 = vld [vmem:[%s9736_s2] sm:$0xf]  ;;  %v346_v18 = vld [vmem:[%s6680_s19 + $0x390] sm:$0xff]  ;;  %v6187_v51 = vld [vmem:[%s9735_s1 + $0x44] sm:$0xf] }
  0x49   : > { %10010 = vst [vmem:[#allocation26_spill] sm:$0xff] %v6873_v35  ;;  %v344_v13 = vld [vmem:[%s6680_s19 + $0x380] sm:$0xff]  ;;  %v6929_v16 = vperm.slane %v764_v8, 0  ;;  %v354_v29 = vld [vmem:[%s6680_s19 + $0x3d0] sm:$0xff]  ;;  %v6940_v33 = vpack.c.bf16 %v353_v27, %v346_v18  ;;  %v359_v18 = vld [vmem:[%s6680_s19 + $0x3f8] sm:$0xff] }
  0x4a   : > { %10011 = vst [vmem:[#allocation27_spill] sm:$0xff] %v6875_v36  ;;  %v352_v17 = vld [vmem:[%s6680_s19 + $0x3c0] sm:$0xff]  ;;  %v6936_v30 = vpack.c.bf16 %v351_v14, %v344_v13  ;;  %v6943_v40 = vpack.c.bf16 %v354_v29, %v347_v28  ;;  %v6317_v48 = vld [vmem:[%s9735_s1 + $0x44c] sm:$0xf0]  ;;  %v5237_v54 = vld [vmem:[%s9735_s1 + $0x50] sm:$0xf0] }
  0x4b   : > { %10012 = vst [vmem:[#allocation28_spill] sm:$0xff] %v6877_v37  ;;  %v6938_v32 = vpack.c.bf16 %v352_v17, %v345_v15  ;;  %v5747_v47 = vld [vmem:[%s9735_s1 + $0x440] sm:$0xf]  ;;  %v5240_v56 = vor.u32 %v6187_v51, %v5237_v54  ;;  %v6349_v8 = vld [vmem:[%s9735_s1 + $0x54c] sm:$0xf0]  ;;  %v365_v17 = vld [vmem:[%s6680_s19 + $0x428] sm:$0xff] }
  0x4c   : > { %10013 = vst [vmem:[#allocation29_spill] sm:$0xff] %v6879_v38  ;;  %v5748_v52 = vor.u32 %v6317_v48, %v5747_v47  ;;  %v5875_v3 = vld [vmem:[%s9735_s1 + $0x540] sm:$0xf]  ;;  %v358_v15 = vld [vmem:[%s6680_s19 + $0x3f0] sm:$0xff]  ;;  %v367_v29 = vld [vmem:[%s6680_s19 + $0x438] sm:$0xff] }
  0x4d   : > { %10014 = vst [vmem:[#allocation30_spill] sm:$0xff] %v6911_v4  ;;  %2431 = vmatpush.bf16.msrb.mxu3 %v5240_v56  ;;  %v5876_v14 = vor.u32 %v6349_v8, %v5875_v3  ;;  %v366_v27 = vld [vmem:[%s6680_s19 + $0x430] sm:$0xff]  ;;  %v360_v28 = vld [vmem:[%s6680_s19 + $0x400] sm:$0xff] }
  0x4e   : > { %10015 = vst [vmem:[#allocation31_spill] sm:$0xff] %v6913_v5  ;;  %2164 = vmatpush.bf16.msrb.mxu0 %v5748_v52  ;;  %v6980_v52 = vpack.c.bf16 %v366_v27, %v359_v18  ;;  %v6982_v54 = vpack.c.bf16 %v367_v29, %v360_v28  ;;  %v372_v18 = vld [vmem:[%s6680_s19 + $0x460] sm:$0xff]  ;;  %v379_v27 = vld [vmem:[%s6680_s19 + $0x498] sm:$0xff]  ;;  %v373_v28 = vld [vmem:[%s6680_s19 + $0x468] sm:$0xff] }
  0x4f   : > { %10016 = vst [vmem:[#allocation32_spill] sm:$0xff] %v6915_v6  ;;  %2253 = vmatpush.bf16.msrb.mxu1 %v5876_v14  ;;  %v380_v29 = vld [vmem:[%s6680_s19 + $0x4a0] sm:$0xff] }
  0x50   : > { %10017 = vst [vmem:[#allocation33_spill] sm:$0xff] %v6917_v7 }
  0x51   : > { %1821 = vmatmul.bf16.gmra.mxu0 %v6757_v21  ;;  %10018 = vst [vmem:[#allocation34_spill] sm:$0xff] %v6936_v30 }
  0x52   : > { %1910 = vmatmul.bf16.gmra.mxu1 %v6759_v22  ;;  %1999 = vmatmul.bf16.gmra.mxu2 %v6761_v23  ;;  %10019 = vst [vmem:[#allocation35_spill] sm:$0xff] %v6938_v32 }
  0x53   : > { %2088 = vmatmul.bf16.gmra.mxu3 %v6763_v24  ;;  %10020 = vst [vmem:[#allocation36_spill] sm:$0xff] %v6940_v33 }
  0x54   : > { %10021 = vst [vmem:[#allocation37_spill] sm:$0xff] %v6943_v40 }
  0x55   : > { %10023 = vst [vmem:[#allocation39_spill] sm:$0xff] %v6980_v52 }
  0x56   : > { %10024 = vst [vmem:[#allocation40_spill] sm:$0xff] %v6982_v54 }
  0x61   : > { %1826 = vmatmul.bf16.gmra.mxu0 %v6795_v42 }
  0x62   : > { %1915 = vmatmul.bf16.gmra.mxu1 %v6797_v43  ;;  %2004 = vmatmul.bf16.gmra.mxu2 %v6799_v45 }
  0x63   : > { %2093 = vmatmul.bf16.gmra.mxu3 %v6801_v46 }
  0x71   : > { %1831 = vmatmul.bf16.gmra.mxu0 %v6815_v58 }
  0x72   : > { %1920 = vmatmul.bf16.gmra.mxu1 %v6817_v59  ;;  %2009 = vmatmul.bf16.gmra.mxu2 %v6819_v60 }
  0x73   : > { %2098 = vmatmul.bf16.gmra.mxu3 %v6821_v61 }
  0x81   : > { %1836 = vmatmul.bf16.gmra.mxu0 %v6853_v19 }
  0x82   : > { %1925 = vmatmul.bf16.gmra.mxu1 %v6855_v20  ;;  %2014 = vmatmul.bf16.gmra.mxu2 %v6857_v25 }
  0x83   : > { %2103 = vmatmul.bf16.gmra.mxu3 %v6859_v26 }
  0x91   : > { %1841 = vmatmul.bf16.gmra.mxu0 %v6873_v35 }
  0x92   : > { %1930 = vmatmul.bf16.gmra.mxu1 %v6875_v36  ;;  %2019 = vmatmul.bf16.gmra.mxu2 %v6877_v37 }
  0x93   : > { %2108 = vmatmul.bf16.gmra.mxu3 %v6879_v38 }
  0xa1   : > { %1846 = vmatmul.bf16.gmra.mxu0 %v6911_v4 }
  0xa2   : > { %1935 = vmatmul.bf16.gmra.mxu1 %v6913_v5  ;;  %2024 = vmatmul.bf16.gmra.mxu2 %v6915_v6 }
  0xa3   : > { %2113 = vmatmul.bf16.gmra.mxu3 %v6917_v7 }
  0xae   : > { %v1812_v31 = vpop.f32.mrf.mxu0 }
  0xaf   : > { %v1813_v34 = vadd.f32 %v1812_v31, %v6929_v16  ;;  %v1901_v39 = vpop.f32.mrf.mxu1  ;;  %v361_v31 = vld [vmem:[%s6680_s19 + $0x408] sm:$0xff] }
  0xb1   : > { %v1902_v41 = vadd.f32 %v1901_v39, %v1813_v34  ;;  %1851 = vmatmul.bf16.gmra.mxu0 %v6936_v30  ;;  %v368_v34 = vld [vmem:[%s6680_s19 + $0x440] sm:$0xff] }
  0xb2   : > { %1940 = vmatmul.bf16.gmra.mxu1 %v6938_v32  ;;  %2029 = vmatmul.bf16.gmra.mxu2 %v6940_v33 }
  0xb3   : > { %2118 = vmatmul.bf16.gmra.mxu3 %v6943_v40 }
  0xb5   : > { %v1990_v55 = vpop.f32.mrf.mxu2 }
  0xb6   : > { %v1991_v57 = vadd.f32 %v1990_v55, %v1902_v41  ;;  %v2079_v62 = vpop.f32.mrf.mxu3  ;;  %v1814_v63 = vpop.f32.mrf.mxu0  ;;  %v6978_v41 = vpack.c.bf16 %v365_v17, %v358_v15 }
  0xb7   : > { %v1815_v0 = vadd.f32 %v1814_v63, %v6929_v16  ;;  %v1903_v1 = vpop.f32.mrf.mxu1 }
  0xb8   : > { %v6962_v2 = vadd.f32 %v2079_v62, %v1991_v57  ;;  %10022 = vst [vmem:[#allocation38_spill] sm:$0xff] %v6978_v41  ;;  %v6985_v57 = vpack.c.bf16 %v368_v34, %v361_v31  ;;  %v374_v31 = vld [vmem:[%s6680_s19 + $0x470] sm:$0xff]  ;;  %v381_v34 = vld [vmem:[%s6680_s19 + $0x4a8] sm:$0xff] }
  0xb9   : > { %v1904_v13 = vadd.f32 %v1903_v1, %v1815_v0 }
  0xba   : > { %10025 = vst [vmem:[#allocation41_spill] sm:$0xff] %v6985_v57 }
  0xbd   : > { %v1992_v39 = vpop.f32.mrf.mxu2 }
  0xbe   : > { %v1993_v47 = vadd.f32 %v1992_v39, %v1904_v13  ;;  %v2081_v48 = vpop.f32.mrf.mxu3  ;;  %v1817_v51 = vpop.f32.mrf.mxu0  ;;  %v375_v39 = vld [vmem:[%s6680_s19 + $0x478] sm:$0xff] }
  0xbf   : > { %v1818_v55 = vadd.f32 %v1817_v51, %v6929_v16  ;;  %v1906_v56 = vpop.f32.mrf.mxu1  ;;  %v7004_v51 = vpack.c.bf16 %v379_v27, %v372_v18  ;;  %v6313_v18 = vld [vmem:[%s9735_s1 + $0x42c] sm:$0xf0]  ;;  %v6183_v27 = vld [vmem:[%s9735_s1 + $0x24] sm:$0xf] }
  0xc0   : > { %v6987_v62 = vadd.f32 %v2081_v48, %v1993_v47  ;;  %v382_v47 = vld [vmem:[%s6680_s19 + $0x4b0] sm:$0xff] }
  0xc1   : > { %v1907_v63 = vadd.f32 %v1906_v56, %v1818_v55  ;;  %1856 = vmatmul.bf16.gmra.mxu0 %v6978_v41  ;;  %10026 = vst [vmem:[#allocation42_spill] sm:$0xff] %v7004_v51 }
  0xc2   : > { %1945 = vmatmul.bf16.gmra.mxu1 %v6980_v52  ;;  %2034 = vmatmul.bf16.gmra.mxu2 %v6982_v54 }
  0xc3   : > { %2123 = vmatmul.bf16.gmra.mxu3 %v6985_v57 }
  0xc5   : > { %v1995_v0 = vpop.f32.mrf.mxu2 }
  0xc6   : > { %v1996_v1 = vadd.f32 %v1995_v0, %v1907_v63  ;;  %v2084_v3 = vpop.f32.mrf.mxu3  ;;  %v1819_v8 = vpop.f32.mrf.mxu0  ;;  %v7006_v0 = vpack.c.bf16 %v380_v29, %v373_v28  ;;  %v5221_v29 = vld [vmem:[%s9735_s1 + $0x30] sm:$0xf0] }
  0xc7   : > { %v1820_v13 = vadd.f32 %v1819_v8, %v6929_v16  ;;  %v1908_v14 = vpop.f32.mrf.mxu1  ;;  %v7008_v8 = vpack.c.bf16 %v381_v34, %v374_v31  ;;  %v5224_v34 = vor.u32 %v6183_v27, %v5221_v29  ;;  %v393_v27 = vld [vmem:[%s6680_s19 + $0x508] sm:$0xff]  ;;  %v394_v29 = vld [vmem:[%s6680_s19 + $0x510] sm:$0xff] }
  0xc8   : > { %v6994_v15 = vadd.f32 %v2084_v3, %v1996_v1  ;;  %10027 = vst [vmem:[#allocation43_spill] sm:$0xff] %v7006_v0 }
  0xc9   : > { %v1909_v17 = vadd.f32 %v1908_v14, %v1820_v13  ;;  %10028 = vst [vmem:[#allocation44_spill] sm:$0xff] %v7008_v8  ;;  %v7011_v13 = vpack.c.bf16 %v382_v47, %v375_v39  ;;  %2432 = vmatpush.bf16.msrb.mxu3 %v5224_v34  ;;  %v389_v34 = vld [vmem:[%s6680_s19 + $0x4e8] sm:$0xff] }
  0xcb   : > { %10029 = vst [vmem:[#allocation45_spill] sm:$0xff] %v7011_v13 }
  0xcd   : > { %v1997_v48 = vpop.f32.mrf.mxu2 }
  0xce   : > { %v1998_v55 = vadd.f32 %v1997_v48, %v1909_v17  ;;  %v2086_v56 = vpop.f32.mrf.mxu3  ;;  %v1822_v63 = vpop.f32.mrf.mxu0  ;;  %v5731_v17 = vld [vmem:[%s9735_s1 + $0x420] sm:$0xf] }
  0xcf   : > { %v1823_v1 = vadd.f32 %v1822_v63, %v6929_v16  ;;  %v1911_v3 = vpop.f32.mrf.mxu1  ;;  %v5732_v28 = vor.u32 %v6313_v18, %v5731_v17  ;;  %v386_v18 = vld [vmem:[%s6680_s19 + $0x4d0] sm:$0xff] }
  0xd0   : > { %v7013_v14 = vadd.f32 %v2086_v56, %v1998_v55 }
  0xd1   : > { %v1912_v57 = vadd.f32 %v1911_v3, %v1823_v1  ;;  %1861 = vmatmul.bf16.gmra.mxu0 %v7004_v51  ;;  %v5859_v1 = vld [vmem:[%s9735_s1 + $0x520] sm:$0xf] }
  0xd2   : > { %1950 = vmatmul.bf16.gmra.mxu1 %v7006_v0  ;;  %2039 = vmatmul.bf16.gmra.mxu2 %v7008_v8 }
  0xd3   : > { %2128 = vmatmul.bf16.gmra.mxu3 %v7011_v13  ;;  %2165 = vmatpush.bf16.msrb.mxu0 %v5732_v28  ;;  %v387_v28 = vld [vmem:[%s6680_s19 + $0x4d8] sm:$0xff]  ;;  %v7048_v13 = vpack.c.bf16 %v393_v27, %v386_v18 }
  0xd4   : > { %v7050_v52 = vpack.c.bf16 %v394_v29, %v387_v28 }
  0xd5   : > { %v2000_v31 = vpop.f32.mrf.mxu2  ;;  %10030 = vst [vmem:[#allocation46_spill] sm:$0xff] %v7048_v13 }
  0xd6   : > { %v2001_v39 = vadd.f32 %v2000_v31, %v1912_v57  ;;  %v2089_v47 = vpop.f32.mrf.mxu3  ;;  %v1824_v48 = vpop.f32.mrf.mxu0  ;;  %v6345_v57 = vld [vmem:[%s9735_s1 + $0x52c] sm:$0xf0]  ;;  %v388_v31 = vld [vmem:[%s6680_s19 + $0x4e0] sm:$0xff]  ;;  %10031 = vst [vmem:[#allocation47_spill] sm:$0xff] %v7050_v52 }
  0xd7   : > { %v1825_v55 = vadd.f32 %v1824_v48, %v6929_v16  ;;  %v1913_v56 = vpop.f32.mrf.mxu1  ;;  %v5860_v17 = vor.u32 %v6345_v57, %v5859_v1  ;;  %v395_v48 = vld [vmem:[%s6680_s19 + $0x518] sm:$0xff] }
  0xd8   : > { %v7032_v63 = vadd.f32 %v2089_v47, %v2001_v39  ;;  %v396_v39 = vld [vmem:[%s6680_s19 + $0x520] sm:$0xff]  ;;  %v7052_v40 = vpack.c.bf16 %v395_v48, %v388_v31  ;;  %v407_v48 = vld [vmem:[%s6680_s19 + $0x578] sm:$0xff] }
  0xd9   : > { %v1914_v3 = vadd.f32 %v1913_v56, %v1825_v55  ;;  %2254 = vmatpush.bf16.msrb.mxu1 %v5860_v17  ;;  %v7055_v1 = vpack.c.bf16 %v396_v39, %v389_v34  ;;  %v400_v31 = vld [vmem:[%s6680_s19 + $0x540] sm:$0xff]  ;;  %v401_v34 = vld [vmem:[%s6680_s19 + $0x548] sm:$0xff] }
  0xda   : > { %10032 = vst [vmem:[#allocation48_spill] sm:$0xff] %v7052_v40  ;;  %v408_v39 = vld [vmem:[%s6680_s19 + $0x580] sm:$0xff] }
  0xdb   : > { %10033 = vst [vmem:[#allocation49_spill] sm:$0xff] %v7055_v1  ;;  %v7076_v32 = vpack.c.bf16 %v408_v39, %v401_v34 }
  0xdd   : > { %v2002_v47 = vpop.f32.mrf.mxu2  ;;  %10035 = vst [vmem:[#allocation51_spill] sm:$0xff] %v7076_v32 }
  0xde   : > { %v2003_v8 = vadd.f32 %v2002_v47, %v1914_v3  ;;  %v2091_v0 = vpop.f32.mrf.mxu3  ;;  %v1827_v54 = vpop.f32.mrf.mxu0  ;;  %v402_v47 = vld [vmem:[%s6680_s19 + $0x550] sm:$0xff] }
  0xdf   : > { %v1828_v55 = vadd.f32 %v1827_v54, %v6929_v16  ;;  %v1916_v56 = vpop.f32.mrf.mxu1 }
  0xe0   : > { %v7057_v57 = vadd.f32 %v2091_v0, %v2003_v8 }
  0xe1   : > { %v1917_v17 = vadd.f32 %v1916_v56, %v1828_v55  ;;  %1866 = vmatmul.bf16.gmra.mxu0 %v7048_v13  ;;  %v409_v55 = vld [vmem:[%s6680_s19 + $0x588] sm:$0xff]  ;;  %v403_v56 = vld [vmem:[%s6680_s19 + $0x558] sm:$0xff] }
  0xe2   : > { %1955 = vmatmul.bf16.gmra.mxu1 %v7050_v52  ;;  %2044 = vmatmul.bf16.gmra.mxu2 %v7052_v40  ;;  %v410_v40 = vld [vmem:[%s6680_s19 + $0x590] sm:$0xff]  ;;  %v7074_v52 = vpack.c.bf16 %v407_v48, %v400_v31 }
  0xe3   : > { %2133 = vmatmul.bf16.gmra.mxu3 %v7055_v1  ;;  %v5205_v31 = vld [vmem:[%s9735_s1 + $0x10] sm:$0xf0] }
  0xe4   : > { %10034 = vst [vmem:[#allocation50_spill] sm:$0xff] %v7074_v52 }
  0xe5   : > { %v2005_v54 = vpop.f32.mrf.mxu2 }
  0xe6   : > { %v2006_v3 = vadd.f32 %v2005_v54, %v1917_v17  ;;  %v2094_v18 = vpop.f32.mrf.mxu3  ;;  %v1829_v0 = vpop.f32.mrf.mxu0 }
  0xe7   : > { %v1830_v8 = vadd.f32 %v1829_v0, %v6929_v16  ;;  %v1918_v27 = vpop.f32.mrf.mxu1  ;;  %v7078_v0 = vpack.c.bf16 %v409_v55, %v402_v47 }
  0xe8   : > { %v7064_v28 = vadd.f32 %v2094_v18, %v2006_v3 }
  0xe9   : > { %v1919_v29 = vadd.f32 %v1918_v27, %v1830_v8  ;;  %10036 = vst [vmem:[#allocation52_spill] sm:$0xff] %v7078_v0  ;;  %v7081_v8 = vpack.c.bf16 %v410_v40, %v403_v56  ;;  %v6179_v40 = vld [vmem:[%s9735_s1 + $0x4] sm:$0xf] }
  0xea   : > { %v5208_v34 = vor.u32 %v6179_v40, %v5205_v31  ;;  %v421_v40 = vld [vmem:[%s6680_s19 + $0x5e8] sm:$0xff]  ;;  %v422_v31 = vld [vmem:[%s6680_s19 + $0x5f0] sm:$0xff] }
  0xeb   : > { %10037 = vst [vmem:[#allocation53_spill] sm:$0xff] %v7081_v8 }
  0xec   : > { %2433 = vmatpush.bf16.msrb.mxu3 %v5208_v34  ;;  %v417_v34 = vld [vmem:[%s6680_s19 + $0x5c8] sm:$0xff] }
  0xed   : > { %v2007_v1 = vpop.f32.mrf.mxu2 }
  0xee   : > { %v2008_v17 = vadd.f32 %v2007_v1, %v1919_v29  ;;  %v2096_v54 = vpop.f32.mrf.mxu3  ;;  %v1832_v33 = vpop.f32.mrf.mxu0  ;;  %v5715_v1 = vld [vmem:[%s9735_s1 + $0x400] sm:$0xf] }
  0xef   : > { %v1833_v3 = vadd.f32 %v1832_v33, %v6929_v16  ;;  %v1921_v18 = vpop.f32.mrf.mxu1  ;;  %v6309_v33 = vld [vmem:[%s9735_s1 + $0x40c] sm:$0xf0] }
  0xf0   : > { %v7083_v27 = vadd.f32 %v2096_v54, %v2008_v17  ;;  %v5716_v29 = vor.u32 %v6309_v33, %v5715_v1  ;;  %v414_v33 = vld [vmem:[%s6680_s19 + $0x5b0] sm:$0xff] }
  0xf1   : > { %v1922_v7 = vadd.f32 %v1921_v18, %v1833_v3  ;;  %1871 = vmatmul.bf16.gmra.mxu0 %v7074_v52  ;;  %v5843_v3 = vld [vmem:[%s9735_s1 + $0x500] sm:$0xf] }
  0xf2   : > { %1960 = vmatmul.bf16.gmra.mxu1 %v7076_v32  ;;  %2049 = vmatmul.bf16.gmra.mxu2 %v7078_v0 }
  0xf3   : > { %2138 = vmatmul.bf16.gmra.mxu3 %v7081_v8  ;;  %2166 = vmatpush.bf16.msrb.mxu0 %v5716_v29  ;;  %v415_v29 = vld [vmem:[%s6680_s19 + $0x5b8] sm:$0xff]  ;;  %v7118_v8 = vpack.c.bf16 %v421_v40, %v414_v33 }
  0xf4   : > { %v7120_v5 = vpack.c.bf16 %v422_v31, %v415_v29 }
  0xf5   : > { %v2010_v48 = vpop.f32.mrf.mxu2  ;;  %10038 = vst [vmem:[#allocation54_spill] sm:$0xff] %v7118_v8 }
  0xf6   : > { %v2011_v39 = vadd.f32 %v2010_v48, %v1922_v7  ;;  %v2099_v47 = vpop.f32.mrf.mxu3  ;;  %v1834_v55 = vpop.f32.mrf.mxu0  ;;  %v6341_v7 = vld [vmem:[%s9735_s1 + $0x50c] sm:$0xf0]  ;;  %v416_v48 = vld [vmem:[%s6680_s19 + $0x5c0] sm:$0xff]  ;;  %10039 = vst [vmem:[#allocation55_spill] sm:$0xff] %v7120_v5 }
  0xf7   : > { %v1835_v56 = vadd.f32 %v1834_v55, %v6929_v16  ;;  %v1923_v17 = vpop.f32.mrf.mxu1  ;;  %v5844_v1 = vor.u32 %v6341_v7, %v5843_v3  ;;  %v423_v55 = vld [vmem:[%s6680_s19 + $0x5f8] sm:$0xff] }
  0xf8   : > { %v7102_v54 = vadd.f32 %v2099_v47, %v2011_v39  ;;  %v424_v39 = vld [vmem:[%s6680_s19 + $0x600] sm:$0xff]  ;;  %v7122_v38 = vpack.c.bf16 %v423_v55, %v416_v48  ;;  %v435_v55 = vld [vmem:[%s6680_s19 + $0x658] sm:$0xff] }
  0xf9   : > { %v1924_v18 = vadd.f32 %v1923_v17, %v1835_v56  ;;  %2255 = vmatpush.bf16.msrb.mxu1 %v5844_v1  ;;  %v7125_v3 = vpack.c.bf16 %v424_v39, %v417_v34  ;;  %v428_v48 = vld [vmem:[%s6680_s19 + $0x620] sm:$0xff]  ;;  %v429_v34 = vld [vmem:[%s6680_s19 + $0x628] sm:$0xff] }
  0xfa   : > { %10040 = vst [vmem:[#allocation56_spill] sm:$0xff] %v7122_v38  ;;  %v436_v39 = vld [vmem:[%s6680_s19 + $0x660] sm:$0xff] }
  0xfb   : > { %10041 = vst [vmem:[#allocation57_spill] sm:$0xff] %v7125_v3  ;;  %v7146_v36 = vpack.c.bf16 %v436_v39, %v429_v34  ;;  %v5829_v34 = vld [vmem:[%s9735_s1 + $0x4f0] sm:$0xf0] }
  0xfd   : > { %v2012_v47 = vpop.f32.mrf.mxu2  ;;  %10043 = vst [vmem:[#allocation59_spill] sm:$0xff] %v7146_v36 }
  0xfe   : > { %v2013_v0 = vadd.f32 %v2012_v47, %v1924_v18  ;;  %v2101_v32 = vpop.f32.mrf.mxu3  ;;  %v1837_v6 = vpop.f32.mrf.mxu0  ;;  %v430_v47 = vld [vmem:[%s6680_s19 + $0x630] sm:$0xff] }
  0xff   : > { %v1838_v56 = vadd.f32 %v1837_v6, %v6929_v16  ;;  %v1926_v17 = vpop.f32.mrf.mxu1 }
 0x100   : > { %v7127_v7 = vadd.f32 %v2101_v32, %v2013_v0 }
 0x101   : > { %v1927_v1 = vadd.f32 %v1926_v17, %v1838_v56  ;;  %1876 = vmatmul.bf16.gmra.mxu0 %v7118_v8  ;;  %v437_v56 = vld [vmem:[%s6680_s19 + $0x668] sm:$0xff]  ;;  %v431_v17 = vld [vmem:[%s6680_s19 + $0x638] sm:$0xff] }
 0x102   : > { %1965 = vmatmul.bf16.gmra.mxu1 %v7120_v5  ;;  %2054 = vmatmul.bf16.gmra.mxu2 %v7122_v38  ;;  %v438_v38 = vld [vmem:[%s6680_s19 + $0x670] sm:$0xff]  ;;  %v7144_v5 = vpack.c.bf16 %v435_v55, %v428_v48  ;;  %v6335_v55 = vld [vmem:[%s9735_s1 + $0x4e4] sm:$0xf] }
 0x103   : > { %2143 = vmatmul.bf16.gmra.mxu3 %v7125_v3  ;;  %v5445_v48 = vld [vmem:[%s9735_s1 + $0x1f0] sm:$0xf0] }
 0x104   : > { %10042 = vst [vmem:[#allocation58_spill] sm:$0xff] %v7144_v5 }
 0x105   : > { %v2015_v6 = vpop.f32.mrf.mxu2 }
 0x106   : > { %v2016_v18 = vadd.f32 %v2015_v6, %v1927_v1  ;;  %v2104_v33 = vpop.f32.mrf.mxu3  ;;  %v1839_v32 = vpop.f32.mrf.mxu0 }
 0x107   : > { %v1840_v0 = vadd.f32 %v1839_v32, %v6929_v16  ;;  %v1928_v40 = vpop.f32.mrf.mxu1  ;;  %v7148_v32 = vpack.c.bf16 %v437_v56, %v430_v47  ;;  %v5832_v56 = vor.u32 %v6335_v55, %v5829_v34  ;;  %v449_v55 = vld [vmem:[%s6680_s19 + $0x6c8] sm:$0xff]  ;;  %v443_v34 = vld [vmem:[%s6680_s19 + $0x698] sm:$0xff] }
 0x108   : > { %v7134_v29 = vadd.f32 %v2104_v33, %v2016_v18 }
 0x109   : > { %v1929_v31 = vadd.f32 %v1928_v40, %v1840_v0  ;;  %10044 = vst [vmem:[#allocation60_spill] sm:$0xff] %v7148_v32  ;;  %v7151_v0 = vpack.c.bf16 %v438_v38, %v431_v17  ;;  %v6239_v38 = vld [vmem:[%s9735_s1 + $0x1e4] sm:$0xf]  ;;  %2782 = vmatpush.bf16.msra.mxu3 %v5832_v56 }
 0x10a   : > { %v5448_v47 = vor.u32 %v6239_v38, %v5445_v48  ;;  %v452_v56 = vld [vmem:[%s6680_s19 + $0x6e0] sm:$0xff] }
 0x10b   : > { %10045 = vst [vmem:[#allocation61_spill] sm:$0xff] %v7151_v0 }
 0x10c   : > { %2515 = vmatpush.bf16.msra.mxu0 %v5448_v47  ;;  %v445_v47 = vld [vmem:[%s6680_s19 + $0x6a8] sm:$0xff] }
 0x10d   : > { %v2017_v3 = vpop.f32.mrf.mxu2 }
 0x10e   : > { %v2018_v1 = vadd.f32 %v2017_v3, %v1929_v31  ;;  %v2106_v6 = vpop.f32.mrf.mxu3  ;;  %v1842_v37 = vpop.f32.mrf.mxu0  ;;  %v6303_v3 = vld [vmem:[%s9735_s1 + $0x3e4] sm:$0xf] }
 0x10f   : > { %v1843_v18 = vadd.f32 %v1842_v37, %v6929_v16  ;;  %v1931_v33 = vpop.f32.mrf.mxu1  ;;  %v5701_v37 = vld [vmem:[%s9735_s1 + $0x3f0] sm:$0xf0] }
 0x110   : > { %v7153_v40 = vadd.f32 %v2106_v6, %v2018_v1  ;;  %v5704_v31 = vor.u32 %v6303_v3, %v5701_v37  ;;  %v6271_v37 = vld [vmem:[%s9735_s1 + $0x2e4] sm:$0xf] }
 0x111   : > { %v1932_v26 = vadd.f32 %v1931_v33, %v1843_v18  ;;  %1881 = vmatmul.bf16.gmra.mxu0 %v7144_v5 }
 0x112   : > { %1970 = vmatmul.bf16.gmra.mxu1 %v7146_v36  ;;  %2059 = vmatmul.bf16.gmra.mxu2 %v7148_v32 }
 0x113   : > { %2148 = vmatmul.bf16.gmra.mxu3 %v7151_v0  ;;  %2693 = vmatpush.bf16.msra.mxu2 %v5704_v31  ;;  %v442_v31 = vld [vmem:[%s6680_s19 + $0x690] sm:$0xff]  ;;  %v451_v0 = vld [vmem:[%s6680_s19 + $0x6d8] sm:$0xff] }
 0x115   : > { %v2020_v39 = vpop.f32.mrf.mxu2 }
 0x116   : > { %v2021_v17 = vadd.f32 %v2020_v39, %v1932_v26  ;;  %v2109_v1 = vpop.f32.mrf.mxu3  ;;  %v1844_v6 = vpop.f32.mrf.mxu0  ;;  %v5573_v26 = vld [vmem:[%s9735_s1 + $0x2f0] sm:$0xf0] }
 0x117   : > { %v1845_v18 = vadd.f32 %v1844_v6, %v6929_v16  ;;  %v1933_v33 = vpop.f32.mrf.mxu1  ;;  %v5576_v48 = vor.u32 %v6271_v37, %v5573_v26  ;;  %v450_v39 = vld [vmem:[%s6680_s19 + $0x6d0] sm:$0xff]  ;;  %v444_v6 = vld [vmem:[%s6680_s19 + $0x6a0] sm:$0xff]  ;;  %v7201_v37 = vpack.c.bf16 %v452_v56, %v445_v47  ;;  %v237_v47 = vld [vmem:[%s6680_s19 + $0x28] sm:$0xff] }
 0x118   : > { %v7178_v3 = vadd.f32 %v2109_v1, %v2021_v17  ;;  %v7194_v1 = vpack.c.bf16 %v449_v55, %v442_v31  ;;  %v7196_v20 = vpack.c.bf16 %v450_v39, %v443_v34  ;;  %v7198_v61 = vpack.c.bf16 %v451_v0, %v444_v6  ;;  %v236_v39 = vld [vmem:[%s6680_s19 + $0x20] sm:$0xff]  ;;  %v243_v6 = vld [vmem:[%s6680_s19 + $0x58] sm:$0xff] }
 0x119   : > { %v1934_v38 = vadd.f32 %v1933_v33, %v1845_v18  ;;  %2604 = vmatpush.bf16.msra.mxu1 %v5576_v48  ;;  %10049 = vst [vmem:[#allocation65_spill] sm:$0xff] %v7201_v37  ;;  %v244_v56 = vld [vmem:[%s6680_s19 + $0x60] sm:$0xff] }
 0x11a   : > { %10046 = vst [vmem:[#allocation62_spill] sm:$0xff] %v7194_v1 }
 0x11b   : > { %10047 = vst [vmem:[#allocation63_spill] sm:$0xff] %v7196_v20 }
 0x11c   : > { %10048 = vst [vmem:[#allocation64_spill] sm:$0xff] %v7198_v61 }
 0x11d   : > { %v2022_v17 = vpop.f32.mrf.mxu2 }
 0x11e   : > { %v2023_v32 = vadd.f32 %v2022_v17, %v1934_v38  ;;  %v2111_v36 = vpop.f32.mrf.mxu3  ;;  %v1847_v25 = vpop.f32.mrf.mxu0  ;;  %v238_v17 = vld [vmem:[%s6680_s19 + $0x30] sm:$0xff] }
 0x11f   : > { %v1848_v18 = vadd.f32 %v1847_v25, %v6929_v16  ;;  %v1936_v33 = vpop.f32.mrf.mxu1 }
 0x120   : > { %v7203_v26 = vadd.f32 %v2111_v36, %v2023_v32 }
 0x121   : > { %v1937_v48 = vadd.f32 %v1936_v33, %v1848_v18  ;;  %1886 = vmatmul.bf16.gmra.mxu0 %v7194_v1  ;;  %v245_v18 = vld [vmem:[%s6680_s19 + $0x68] sm:$0xff] }
 0x122   : > { %1975 = vmatmul.bf16.gmra.mxu1 %v7196_v20  ;;  %2064 = vmatmul.bf16.gmra.mxu2 %v7198_v61  ;;  %v7218_v61 = vpack.c.bf16 %v243_v6, %v236_v39  ;;  %v7222_v60 = vpack.c.bf16 %v245_v18, %v238_v17  ;;  %v5429_v39 = vld [vmem:[%s9735_s1 + $0x1d0] sm:$0xf0]  ;;  %v6331_v6 = vld [vmem:[%s9735_s1 + $0x4c4] sm:$0xf] }
 0x123   : > { %2153 = vmatmul.bf16.gmra.mxu3 %v7201_v37 }
 0x124   : > { %10050 = vst [vmem:[#allocation66_spill] sm:$0xff] %v7218_v61 }
 0x125   : > { %v2025_v25 = vpop.f32.mrf.mxu2  ;;  %10052 = vst [vmem:[#allocation68_spill] sm:$0xff] %v7222_v60 }
 0x126   : > { %v2026_v0 = vadd.f32 %v2025_v25, %v1937_v48  ;;  %v2114_v38 = vpop.f32.mrf.mxu3  ;;  %v1849_v31 = vpop.f32.mrf.mxu0  ;;  %v7220_v25 = vpack.c.bf16 %v244_v56, %v237_v47  ;;  %v5813_v47 = vld [vmem:[%s9735_s1 + $0x4d0] sm:$0xf0] }
 0x127   : > { %v1850_v36 = vadd.f32 %v1849_v31, %v6929_v16  ;;  %v1938_v32 = vpop.f32.mrf.mxu1  ;;  %v5816_v18 = vor.u32 %v6331_v6, %v5813_v47  ;;  %v250_v47 = vld [vmem:[%s6680_s19 + $0x90] sm:$0xff] }
 0x128   : > { %v7210_v55 = vadd.f32 %v2114_v38, %v2026_v0  ;;  %10051 = vst [vmem:[#allocation67_spill] sm:$0xff] %v7220_v25 }
 0x129   : > { %v1939_v34 = vadd.f32 %v1938_v32, %v1850_v36  ;;  %v6299_v32 = vld [vmem:[%s9735_s1 + $0x3c4] sm:$0xf]  ;;  %2783 = vmatpush.bf16.msra.mxu3 %v5816_v18 }
 0x12d   : > { %v2027_v33 = vpop.f32.mrf.mxu2 }
 0x12e   : > { %v2028_v37 = vadd.f32 %v2027_v33, %v1939_v34  ;;  %v2116_v20 = vpop.f32.mrf.mxu3  ;;  %v1852_v48 = vpop.f32.mrf.mxu0  ;;  %v5685_v34 = vld [vmem:[%s9735_s1 + $0x3d0] sm:$0xf0] }
 0x12f   : > { %v1853_v0 = vadd.f32 %v1852_v48, %v6929_v16  ;;  %v1941_v38 = vpop.f32.mrf.mxu1 }
 0x130   : > { %v7225_v31 = vadd.f32 %v2116_v20, %v2028_v37  ;;  %v6235_v20 = vld [vmem:[%s9735_s1 + $0x1c4] sm:$0xf]  ;;  %v5688_v37 = vor.u32 %v6299_v32, %v5685_v34 }
 0x131   : > { %v1942_v36 = vadd.f32 %v1941_v38, %v1853_v0  ;;  %2167 = vmatmul.bf16.vlgmr.msrb.gmra.mxu0 %v7218_v61  ;;  %v5432_v17 = vor.u32 %v6235_v20, %v5429_v39  ;;  %v6267_v20 = vld [vmem:[%s9735_s1 + $0x2c4] sm:$0xf] }
 0x132   : > { %2256 = vmatmul.bf16.vlgmr.msrb.gmra.mxu1 %v7220_v25  ;;  %5985 = vmatmul.msk.bf16.vlgmr.msrb.gmra.mxu2 %vm1754_vm0, %v7222_v60  ;;  %v259_v60 = vld [vmem:[%s6680_s19 + $0xd8] sm:$0xff] }
 0x133   : > { %2434 = vmatmul.bf16.vlgmr.msrb.gmra.mxu3 %v6694_v44  ;;  %2694 = vmatpush.bf16.msra.mxu2 %v5688_v37  ;;  %v251_v37 = vld [vmem:[%s6680_s19 + $0x98] sm:$0xff]  ;;  %v258_v44 = vld [vmem:[%s6680_s19 + $0xd0] sm:$0xff] }
 0x134   : > { %2516 = vmatpush.bf16.msra.mxu0 %v5432_v17  ;;  %v7267_v59 = vpack.c.bf16 %v258_v44, %v251_v37 }
 0x135   : > { %v2030_v56 = vpop.f32.mrf.mxu2 }
 0x136   : > { %v2031_v33 = vadd.f32 %v2030_v56, %v1942_v36  ;;  %v2119_v48 = vpop.f32.mrf.mxu3  ;;  %v1854_v0 = vpop.f32.mrf.mxu0  ;;  %v5557_v36 = vld [vmem:[%s9735_s1 + $0x2d0] sm:$0xf0]  ;;  %v257_v56 = vld [vmem:[%s6680_s19 + $0xc8] sm:$0xff]  ;;  %10054 = vst [vmem:[#allocation70_spill] sm:$0xff] %v7267_v59 }
 0x137   : > { %v1855_v38 = vadd.f32 %v1854_v0, %v6929_v16  ;;  %v1943_v32 = vpop.f32.mrf.mxu1  ;;  %v5560_v6 = vor.u32 %v6267_v20, %v5557_v36  ;;  %v252_v0 = vld [vmem:[%s6680_s19 + $0xa0] sm:$0xff]  ;;  %v7265_v18 = vpack.c.bf16 %v257_v56, %v250_v47 }
 0x138   : > { %v7251_v34 = vadd.f32 %v2119_v48, %v2031_v33  ;;  %v7269_v46 = vpack.c.bf16 %v259_v60, %v252_v0  ;;  %v264_v0 = vld [vmem:[%s6680_s19 + $0x100] sm:$0xff] }
 0x139   : > { %v1944_v39 = vadd.f32 %v1943_v32, %v1855_v38  ;;  %2605 = vmatpush.bf16.msra.mxu1 %v5560_v6  ;;  %10053 = vst [vmem:[#allocation69_spill] sm:$0xff] %v7265_v18 }
 0x13a   : > { %10055 = vst [vmem:[#allocation71_spill] sm:$0xff] %v7269_v46 }
 0x13d   : > { %v2032_v17 = vpop.f32.mrf.mxu2 }
 0x13e   : > { %v2033_v33 = vadd.f32 %v2032_v17, %v1944_v39  ;;  %v2121_v48 = vpop.f32.mrf.mxu3  ;;  %v1857_v25 = vpop.f32.mrf.mxu0  ;;  %v271_v17 = vld [vmem:[%s6680_s19 + $0x138] sm:$0xff] }
 0x13f   : > { %v1858_v38 = vadd.f32 %v1857_v25, %v6929_v16  ;;  %v1946_v32 = vpop.f32.mrf.mxu1 }
 0x140   : > { %v7272_v20 = vadd.f32 %v2121_v48, %v2033_v33  ;;  %v265_v33 = vld [vmem:[%s6680_s19 + $0x108] sm:$0xff]  ;;  %v272_v48 = vld [vmem:[%s6680_s19 + $0x140] sm:$0xff] }
 0x141   : > { %v1947_v36 = vadd.f32 %v1946_v32, %v1858_v38  ;;  %2172 = vmatmul.bf16.gmra.mxu0 %v7265_v18  ;;  %v266_v38 = vld [vmem:[%s6680_s19 + $0x110] sm:$0xff]  ;;  %v273_v32 = vld [vmem:[%s6680_s19 + $0x148] sm:$0xff] }
 0x142   : > { %2261 = vmatmul.bf16.gmra.mxu1 %v7267_v59  ;;  %5986 = vmatmul.msk.bf16.gmra.mxu2 %vm1754_vm0, %v7269_v46  ;;  %v7288_v46 = vpack.c.bf16 %v271_v17, %v264_v0  ;;  %v7292_v43 = vpack.c.bf16 %v273_v32, %v266_v38  ;;  %v6327_v0 = vld [vmem:[%s9735_s1 + $0x4a4] sm:$0xf]  ;;  %v5797_v17 = vld [vmem:[%s9735_s1 + $0x4b0] sm:$0xf0] }
 0x143   : > { %2439 = vmatmul.bf16.gmra.mxu3 %v6737_v9  ;;  %v5800_v38 = vor.u32 %v6327_v0, %v5797_v17  ;;  %v278_v17 = vld [vmem:[%s6680_s19 + $0x170] sm:$0xff] }
 0x144   : > { %10056 = vst [vmem:[#allocation72_spill] sm:$0xff] %v7288_v46 }
 0x145   : > { %v2035_v44 = vpop.f32.mrf.mxu2  ;;  %10058 = vst [vmem:[#allocation74_spill] sm:$0xff] %v7292_v43  ;;  %2784 = vmatpush.bf16.msra.mxu3 %v5800_v38 }
 0x146   : > { %v2036_v60 = vadd.f32 %v2035_v44, %v1947_v36  ;;  %v2124_v25 = vpop.f32.mrf.mxu3  ;;  %v1859_v39 = vpop.f32.mrf.mxu0  ;;  %v7290_v44 = vpack.c.bf16 %v272_v48, %v265_v33 }
 0x147   : > { %v1860_v6 = vadd.f32 %v1859_v39, %v6929_v16  ;;  %v1948_v47 = vpop.f32.mrf.mxu1 }
 0x148   : > { %v7280_v56 = vadd.f32 %v2124_v25, %v2036_v60  ;;  %10057 = vst [vmem:[#allocation73_spill] sm:$0xff] %v7290_v44 }
 0x149   : > { %v1949_v37 = vadd.f32 %v1948_v47, %v1860_v6  ;;  %v5669_v47 = vld [vmem:[%s9735_s1 + $0x3b0] sm:$0xf0] }
 0x14d   : > { %v2037_v59 = vpop.f32.mrf.mxu2 }
 0x14e   : > { %v2038_v9 = vadd.f32 %v2037_v59, %v1949_v37  ;;  %v2126_v45 = vpop.f32.mrf.mxu3  ;;  %v1862_v36 = vpop.f32.mrf.mxu0  ;;  %v6295_v59 = vld [vmem:[%s9735_s1 + $0x3a4] sm:$0xf]  ;;  %v5413_v37 = vld [vmem:[%s9735_s1 + $0x1b0] sm:$0xf0] }
 0x14f   : > { %v1863_v60 = vadd.f32 %v1862_v36, %v6929_v16  ;;  %v1951_v25 = vpop.f32.mrf.mxu1 }
 0x150   : > { %v7295_v39 = vadd.f32 %v2126_v45, %v2038_v9  ;;  %v6231_v9 = vld [vmem:[%s9735_s1 + $0x1a4] sm:$0xf]  ;;  %v5672_v45 = vor.u32 %v6295_v59, %v5669_v47 }
 0x151   : > { %v1952_v6 = vadd.f32 %v1951_v25, %v1863_v60  ;;  %2177 = vmatmul.bf16.gmra.mxu0 %v7288_v46  ;;  %v5416_v48 = vor.u32 %v6231_v9, %v5413_v37  ;;  %v6263_v9 = vld [vmem:[%s9735_s1 + $0x2a4] sm:$0xf] }
 0x152   : > { %2266 = vmatmul.bf16.gmra.mxu1 %v7290_v44  ;;  %5987 = vmatmul.msk.bf16.gmra.mxu2 %vm1754_vm0, %v7292_v43  ;;  %v287_v43 = vld [vmem:[%s6680_s19 + $0x1b8] sm:$0xff] }
 0x153   : > { %2444 = vmatmul.bf16.gmra.mxu3 %v6757_v21  ;;  %2695 = vmatpush.bf16.msra.mxu2 %v5672_v45  ;;  %v279_v45 = vld [vmem:[%s6680_s19 + $0x178] sm:$0xff]  ;;  %v286_v21 = vld [vmem:[%s6680_s19 + $0x1b0] sm:$0xff] }
 0x154   : > { %2517 = vmatpush.bf16.msra.mxu0 %v5416_v48  ;;  %v7337_v46 = vpack.c.bf16 %v286_v21, %v279_v45 }
 0x155   : > { %v2040_v33 = vpop.f32.mrf.mxu2 }
 0x156   : > { %v2041_v32 = vadd.f32 %v2040_v33, %v1952_v6  ;;  %v2129_v36 = vpop.f32.mrf.mxu3  ;;  %v1864_v60 = vpop.f32.mrf.mxu0  ;;  %v5541_v6 = vld [vmem:[%s9735_s1 + $0x2b0] sm:$0xf0]  ;;  %v285_v33 = vld [vmem:[%s6680_s19 + $0x1a8] sm:$0xff]  ;;  %10060 = vst [vmem:[#allocation76_spill] sm:$0xff] %v7337_v46 }
 0x157   : > { %v1865_v25 = vadd.f32 %v1864_v60, %v6929_v16  ;;  %v1953_v59 = vpop.f32.mrf.mxu1  ;;  %v5544_v0 = vor.u32 %v6263_v9, %v5541_v6  ;;  %v280_v60 = vld [vmem:[%s6680_s19 + $0x180] sm:$0xff]  ;;  %v7335_v38 = vpack.c.bf16 %v285_v33, %v278_v17 }
 0x158   : > { %v7321_v47 = vadd.f32 %v2129_v36, %v2041_v32  ;;  %v7339_v24 = vpack.c.bf16 %v287_v43, %v280_v60  ;;  %v292_v60 = vld [vmem:[%s6680_s19 + $0x1e0] sm:$0xff] }
 0x159   : > { %v1954_v37 = vadd.f32 %v1953_v59, %v1865_v25  ;;  %2606 = vmatpush.bf16.msra.mxu1 %v5544_v0  ;;  %10059 = vst [vmem:[#allocation75_spill] sm:$0xff] %v7335_v38 }
 0x15a   : > { %10061 = vst [vmem:[#allocation77_spill] sm:$0xff] %v7339_v24 }
 0x15d   : > { %v2042_v48 = vpop.f32.mrf.mxu2 }
 0x15e   : > { %v2043_v32 = vadd.f32 %v2042_v48, %v1954_v37  ;;  %v2131_v36 = vpop.f32.mrf.mxu3  ;;  %v1867_v44 = vpop.f32.mrf.mxu0  ;;  %v299_v48 = vld [vmem:[%s6680_s19 + $0x218] sm:$0xff] }
 0x15f   : > { %v1868_v25 = vadd.f32 %v1867_v44, %v6929_v16  ;;  %v1956_v59 = vpop.f32.mrf.mxu1 }
 0x160   : > { %v7342_v9 = vadd.f32 %v2131_v36, %v2043_v32  ;;  %v293_v32 = vld [vmem:[%s6680_s19 + $0x1e8] sm:$0xff]  ;;  %v300_v36 = vld [vmem:[%s6680_s19 + $0x220] sm:$0xff] }
 0x161   : > { %v1957_v6 = vadd.f32 %v1956_v59, %v1868_v25  ;;  %2182 = vmatmul.bf16.gmra.mxu0 %v7335_v38  ;;  %v294_v25 = vld [vmem:[%s6680_s19 + $0x1f0] sm:$0xff]  ;;  %v301_v59 = vld [vmem:[%s6680_s19 + $0x228] sm:$0xff] }
 0x162   : > { %10062 = vst [vmem:[#allocation78_spill] sm:$0xff] %v7342_v9  ;;  %2271 = vmatmul.bf16.gmra.mxu1 %v7337_v46  ;;  %5988 = vmatmul.msk.bf16.gmra.mxu2 %vm1754_vm0, %v7339_v24  ;;  %v7358_v24 = vpack.c.bf16 %v299_v48, %v292_v60  ;;  %v7362_v9 = vpack.c.bf16 %v301_v59, %v294_v25  ;;  %v6323_v60 = vld [vmem:[%s9735_s1 + $0x484] sm:$0xf]  ;;  %v5781_v48 = vld [vmem:[%s9735_s1 + $0x490] sm:$0xf0] }
 0x163   : > { %2449 = vmatmul.bf16.gmra.mxu3 %v6795_v42  ;;  %v5784_v25 = vor.u32 %v6323_v60, %v5781_v48  ;;  %v306_v48 = vld [vmem:[%s6680_s19 + $0x250] sm:$0xff] }
 0x164   : > { %10063 = vst [vmem:[#allocation79_spill] sm:$0xff] %v7358_v24 }
 0x165   : > { %v2045_v21 = vpop.f32.mrf.mxu2  ;;  %10065 = vst [vmem:[#allocation81_spill] sm:$0xff] %v7362_v9  ;;  %2785 = vmatpush.bf16.msra.mxu3 %v5784_v25 }
 0x166   : > { %v2046_v43 = vadd.f32 %v2045_v21, %v1957_v6  ;;  %v2134_v44 = vpop.f32.mrf.mxu3  ;;  %v1869_v37 = vpop.f32.mrf.mxu0  ;;  %v7360_v21 = vpack.c.bf16 %v300_v36, %v293_v32 }
 0x167   : > { %v1870_v0 = vadd.f32 %v1869_v37, %v6929_v16  ;;  %v1958_v17 = vpop.f32.mrf.mxu1 }
 0x168   : > { %v7350_v33 = vadd.f32 %v2134_v44, %v2046_v43  ;;  %10064 = vst [vmem:[#allocation80_spill] sm:$0xff] %v7360_v21 }
 0x169   : > { %v1959_v45 = vadd.f32 %v1958_v17, %v1870_v0  ;;  %v5653_v17 = vld [vmem:[%s9735_s1 + $0x390] sm:$0xf0] }
 0x16d   : > { %v2047_v46 = vpop.f32.mrf.mxu2 }
 0x16e   : > { %v2048_v42 = vadd.f32 %v2047_v46, %v1959_v45  ;;  %v2136_v38 = vpop.f32.mrf.mxu3  ;;  %v1872_v6 = vpop.f32.mrf.mxu0  ;;  %v6291_v46 = vld [vmem:[%s9735_s1 + $0x384] sm:$0xf]  ;;  %v5397_v45 = vld [vmem:[%s9735_s1 + $0x190] sm:$0xf0] }
 0x16f   : > { %v1873_v43 = vadd.f32 %v1872_v6, %v6929_v16  ;;  %v1961_v44 = vpop.f32.mrf.mxu1 }
 0x170   : > { %v7365_v37 = vadd.f32 %v2136_v38, %v2048_v42  ;;  %v6227_v42 = vld [vmem:[%s9735_s1 + $0x184] sm:$0xf]  ;;  %v5656_v38 = vor.u32 %v6291_v46, %v5653_v17 }
 0x171   : > { %v1962_v0 = vadd.f32 %v1961_v44, %v1873_v43  ;;  %2187 = vmatmul.bf16.gmra.mxu0 %v7358_v24  ;;  %v5400_v36 = vor.u32 %v6227_v42, %v5397_v45  ;;  %v6259_v42 = vld [vmem:[%s9735_s1 + $0x284] sm:$0xf] }
 0x172   : > { %2276 = vmatmul.bf16.gmra.mxu1 %v7360_v21  ;;  %5989 = vmatmul.msk.bf16.gmra.mxu2 %vm1754_vm0, %v7362_v9  ;;  %v315_v9 = vld [vmem:[%s6680_s19 + $0x298] sm:$0xff] }
 0x173   : > { %2454 = vmatmul.bf16.gmra.mxu3 %v6815_v58  ;;  %2696 = vmatpush.bf16.msra.mxu2 %v5656_v38  ;;  %v307_v38 = vld [vmem:[%s6680_s19 + $0x258] sm:$0xff]  ;;  %v314_v58 = vld [vmem:[%s6680_s19 + $0x290] sm:$0xff] }
 0x174   : > { %2518 = vmatpush.bf16.msra.mxu0 %v5400_v36  ;;  %v7407_v24 = vpack.c.bf16 %v314_v58, %v307_v38 }
 0x175   : > { %v2050_v32 = vpop.f32.mrf.mxu2 }
 0x176   : > { %v2051_v59 = vadd.f32 %v2050_v32, %v1962_v0  ;;  %v2139_v6 = vpop.f32.mrf.mxu3  ;;  %v1874_v43 = vpop.f32.mrf.mxu0  ;;  %v5525_v0 = vld [vmem:[%s9735_s1 + $0x290] sm:$0xf0]  ;;  %v313_v32 = vld [vmem:[%s6680_s19 + $0x288] sm:$0xff]  ;;  %10068 = vst [vmem:[#allocation84_spill] sm:$0xff] %v7407_v24 }
 0x177   : > { %v1875_v44 = vadd.f32 %v1874_v43, %v6929_v16  ;;  %v1963_v46 = vpop.f32.mrf.mxu1  ;;  %v5528_v60 = vor.u32 %v6259_v42, %v5525_v0  ;;  %v308_v43 = vld [vmem:[%s6680_s19 + $0x260] sm:$0xff]  ;;  %v7405_v25 = vpack.c.bf16 %v313_v32, %v306_v48 }
 0x178   : > { %v7391_v17 = vadd.f32 %v2139_v6, %v2051_v59 }
 0x179   : > { %v1964_v45 = vadd.f32 %v1963_v46, %v1875_v44  ;;  %2607 = vmatpush.bf16.msra.mxu1 %v5528_v60  ;;  %10067 = vst [vmem:[#allocation83_spill] sm:$0xff] %v7405_v25 }
 0x17a   : > { %10066 = vst [vmem:[#allocation82_spill] sm:$0xff] %v7391_v17  ;;  %v7409_v17 = vpack.c.bf16 %v315_v9, %v308_v43  ;;  %v320_v43 = vld [vmem:[%s6680_s19 + $0x2c0] sm:$0xff] }
 0x17c   : > { %10069 = vst [vmem:[#allocation85_spill] sm:$0xff] %v7409_v17 }
 0x17d   : > { %v2052_v36 = vpop.f32.mrf.mxu2 }
 0x17e   : > { %v2053_v59 = vadd.f32 %v2052_v36, %v1964_v45  ;;  %v2141_v6 = vpop.f32.mrf.mxu3  ;;  %v1877_v21 = vpop.f32.mrf.mxu0  ;;  %v327_v36 = vld [vmem:[%s6680_s19 + $0x2f8] sm:$0xff] }
 0x17f   : > { %v1878_v44 = vadd.f32 %v1877_v21, %v6929_v16  ;;  %v1966_v46 = vpop.f32.mrf.mxu1 }
 0x180   : > { %v7412_v42 = vadd.f32 %v2141_v6, %v2053_v59  ;;  %v321_v59 = vld [vmem:[%s6680_s19 + $0x2c8] sm:$0xff]  ;;  %v328_v6 = vld [vmem:[%s6680_s19 + $0x300] sm:$0xff] }
 0x181   : > { %v1967_v0 = vadd.f32 %v1966_v46, %v1878_v44  ;;  %2192 = vmatmul.bf16.gmra.mxu0 %v7405_v25  ;;  %v322_v44 = vld [vmem:[%s6680_s19 + $0x2d0] sm:$0xff]  ;;  %v329_v46 = vld [vmem:[%s6680_s19 + $0x308] sm:$0xff] }
 0x182   : > { %10070 = vst [vmem:[#allocation86_spill] sm:$0xff] %v7412_v42  ;;  %2281 = vmatmul.bf16.gmra.mxu1 %v7407_v24  ;;  %5990 = vmatmul.msk.bf16.gmra.mxu2 %vm1754_vm0, %v7409_v17  ;;  %v7428_v17 = vpack.c.bf16 %v327_v36, %v320_v43  ;;  %v7432_v42 = vpack.c.bf16 %v329_v46, %v322_v44  ;;  %v6319_v43 = vld [vmem:[%s9735_s1 + $0x464] sm:$0xf]  ;;  %v5765_v36 = vld [vmem:[%s9735_s1 + $0x470] sm:$0xf0] }
 0x183   : > { %2459 = vmatmul.bf16.gmra.mxu3 %v6853_v19  ;;  %v5768_v44 = vor.u32 %v6319_v43, %v5765_v36  ;;  %v334_v36 = vld [vmem:[%s6680_s19 + $0x330] sm:$0xff] }
 0x184   : > { %10071 = vst [vmem:[#allocation87_spill] sm:$0xff] %v7428_v17 }
 0x185   : > { %v2055_v58 = vpop.f32.mrf.mxu2  ;;  %10073 = vst [vmem:[#allocation89_spill] sm:$0xff] %v7432_v42  ;;  %2786 = vmatpush.bf16.msra.mxu3 %v5768_v44 }
 0x186   : > { %v2056_v9 = vadd.f32 %v2055_v58, %v1967_v0  ;;  %v2144_v21 = vpop.f32.mrf.mxu3  ;;  %v1879_v45 = vpop.f32.mrf.mxu0  ;;  %v7430_v58 = vpack.c.bf16 %v328_v6, %v321_v59 }
 0x187   : > { %v1880_v60 = vadd.f32 %v1879_v45, %v6929_v16  ;;  %v1968_v48 = vpop.f32.mrf.mxu1 }
 0x188   : > { %v7420_v32 = vadd.f32 %v2144_v21, %v2056_v9  ;;  %10072 = vst [vmem:[#allocation88_spill] sm:$0xff] %v7430_v58 }
 0x189   : > { %v1969_v38 = vadd.f32 %v1968_v48, %v1880_v60  ;;  %v5637_v48 = vld [vmem:[%s9735_s1 + $0x370] sm:$0xf0] }
 0x18d   : > { %v2057_v24 = vpop.f32.mrf.mxu2 }
 0x18e   : > { %v2058_v19 = vadd.f32 %v2057_v24, %v1969_v38  ;;  %v2146_v25 = vpop.f32.mrf.mxu3  ;;  %v1882_v0 = vpop.f32.mrf.mxu0  ;;  %v6287_v24 = vld [vmem:[%s9735_s1 + $0x364] sm:$0xf]  ;;  %v5381_v38 = vld [vmem:[%s9735_s1 + $0x170] sm:$0xf0] }
 0x18f   : > { %v1883_v9 = vadd.f32 %v1882_v0, %v6929_v16  ;;  %v1971_v21 = vpop.f32.mrf.mxu1 }
 0x190   : > { %v7435_v45 = vadd.f32 %v2146_v25, %v2058_v19  ;;  %v6223_v19 = vld [vmem:[%s9735_s1 + $0x164] sm:$0xf]  ;;  %v5640_v25 = vor.u32 %v6287_v24, %v5637_v48 }
 0x191   : > { %v1972_v60 = vadd.f32 %v1971_v21, %v1883_v9  ;;  %2197 = vmatmul.bf16.gmra.mxu0 %v7428_v17  ;;  %v5384_v6 = vor.u32 %v6223_v19, %v5381_v38  ;;  %v6255_v19 = vld [vmem:[%s9735_s1 + $0x264] sm:$0xf] }
 0x192   : > { %2286 = vmatmul.bf16.gmra.mxu1 %v7430_v58  ;;  %5991 = vmatmul.msk.bf16.gmra.mxu2 %vm1754_vm0, %v7432_v42  ;;  %v343_v42 = vld [vmem:[%s6680_s19 + $0x378] sm:$0xff] }
 0x193   : > { %2464 = vmatmul.bf16.gmra.mxu3 %v6873_v35  ;;  %2697 = vmatpush.bf16.msra.mxu2 %v5640_v25  ;;  %v335_v25 = vld [vmem:[%s6680_s19 + $0x338] sm:$0xff]  ;;  %v342_v35 = vld [vmem:[%s6680_s19 + $0x370] sm:$0xff] }
 0x194   : > { %2519 = vmatpush.bf16.msra.mxu0 %v5384_v6  ;;  %v7477_v17 = vpack.c.bf16 %v342_v35, %v335_v25 }
 0x195   : > { %v2060_v59 = vpop.f32.mrf.mxu2 }
 0x196   : > { %v2061_v46 = vadd.f32 %v2060_v59, %v1972_v60  ;;  %v2149_v0 = vpop.f32.mrf.mxu3  ;;  %v1884_v9 = vpop.f32.mrf.mxu0  ;;  %v5509_v60 = vld [vmem:[%s9735_s1 + $0x270] sm:$0xf0]  ;;  %v341_v59 = vld [vmem:[%s6680_s19 + $0x368] sm:$0xff]  ;;  %10076 = vst [vmem:[#allocation92_spill] sm:$0xff] %v7477_v17 }
 0x197   : > { %v1885_v21 = vadd.f32 %v1884_v9, %v6929_v16  ;;  %v1973_v24 = vpop.f32.mrf.mxu1  ;;  %v5512_v43 = vor.u32 %v6255_v19, %v5509_v60  ;;  %v336_v9 = vld [vmem:[%s6680_s19 + $0x340] sm:$0xff]  ;;  %v7475_v44 = vpack.c.bf16 %v341_v59, %v334_v36 }
 0x198   : > { %v7461_v48 = vadd.f32 %v2149_v0, %v2061_v46 }
 0x199   : > { %v1974_v38 = vadd.f32 %v1973_v24, %v1885_v21  ;;  %2608 = vmatpush.bf16.msra.mxu1 %v5512_v43  ;;  %10075 = vst [vmem:[#allocation91_spill] sm:$0xff] %v7475_v44 }
 0x19a   : > { %10074 = vst [vmem:[#allocation90_spill] sm:$0xff] %v7461_v48  ;;  %v7479_v48 = vpack.c.bf16 %v343_v42, %v336_v9  ;;  %v348_v9 = vld [vmem:[%s6680_s19 + $0x3a0] sm:$0xff] }
 0x19c   : > { %10077 = vst [vmem:[#allocation93_spill] sm:$0xff] %v7479_v48 }
 0x19d   : > { %v2062_v6 = vpop.f32.mrf.mxu2 }
 0x19e   : > { %v2063_v46 = vadd.f32 %v2062_v6, %v1974_v38  ;;  %v2151_v0 = vpop.f32.mrf.mxu3  ;;  %v1887_v58 = vpop.f32.mrf.mxu0  ;;  %v355_v6 = vld [vmem:[%s6680_s19 + $0x3d8] sm:$0xff] }
 0x19f   : > { %v1888_v21 = vadd.f32 %v1887_v58, %v6929_v16  ;;  %v1976_v24 = vpop.f32.mrf.mxu1 }
 0x1a0   : > { %v7482_v19 = vadd.f32 %v2151_v0, %v2063_v46  ;;  %v349_v46 = vld [vmem:[%s6680_s19 + $0x3a8] sm:$0xff]  ;;  %v356_v0 = vld [vmem:[%s6680_s19 + $0x3e0] sm:$0xff] }
 0x1a1   : > { %v1977_v60 = vadd.f32 %v1976_v24, %v1888_v21  ;;  %2202 = vmatmul.bf16.gmra.mxu0 %v7475_v44  ;;  %v350_v21 = vld [vmem:[%s6680_s19 + $0x3b0] sm:$0xff]  ;;  %v357_v24 = vld [vmem:[%s6680_s19 + $0x3e8] sm:$0xff] }
 0x1a2   : > { %10078 = vst [vmem:[#allocation94_spill] sm:$0xff] %v7482_v19  ;;  %2291 = vmatmul.bf16.gmra.mxu1 %v7477_v17  ;;  %5992 = vmatmul.msk.bf16.gmra.mxu2 %vm1754_vm0, %v7479_v48  ;;  %v7498_v48 = vpack.c.bf16 %v355_v6, %v348_v9  ;;  %v7502_v19 = vpack.c.bf16 %v357_v24, %v350_v21 }
 0x1a3   : > { %2469 = vmatmul.bf16.gmra.mxu3 %v6911_v4 }
 0x1a4   : > { %10079 = vst [vmem:[#allocation95_spill] sm:$0xff] %v7498_v48 }
 0x1a5   : > { %v2065_v35 = vpop.f32.mrf.mxu2  ;;  %10081 = vst [vmem:[#allocation97_spill] sm:$0xff] %v7502_v19 }
 0x1a6   : > { %v2066_v42 = vadd.f32 %v2065_v35, %v1977_v60  ;;  %v2154_v58 = vpop.f32.mrf.mxu3  ;;  %v1889_v38 = vpop.f32.mrf.mxu0  ;;  %v7500_v35 = vpack.c.bf16 %v356_v0, %v349_v46 }
 0x1a7   : > { %v1890_v43 = vadd.f32 %v1889_v38, %v6929_v16  ;;  %v1978_v36 = vpop.f32.mrf.mxu1 }
 0x1a8   : > { %v7490_v59 = vadd.f32 %v2154_v58, %v2066_v42  ;;  %10080 = vst [vmem:[#allocation96_spill] sm:$0xff] %v7500_v35 }
 0x1a9   : > { %v1979_v25 = vadd.f32 %v1978_v36, %v1890_v43  ;;  %v5365_v43 = vld [vmem:[%s9735_s1 + $0x150] sm:$0xf0]  ;;  %v6315_v36 = vld [vmem:[%s9735_s1 + $0x444] sm:$0xf] }
 0x1ad   : > { %v2067_v17 = vpop.f32.mrf.mxu2 }
 0x1ae   : > { %v2068_v4 = vadd.f32 %v2067_v17, %v1979_v25  ;;  %v2156_v44 = vpop.f32.mrf.mxu3  ;;  %v2168_v60 = vpop.f32.mrf.mxu0  ;;  %v6283_v17 = vld [vmem:[%s9735_s1 + $0x344] sm:$0xf]  ;;  %v5749_v25 = vld [vmem:[%s9735_s1 + $0x450] sm:$0xf0] }
 0x1af   : > { %v2169_v16 = vadd.f32 %v2168_v60, %v6962_v2  ;;  %v2257_v42 = vpop.f32.mrf.mxu1  ;;  %v5621_v2 = vld [vmem:[%s9735_s1 + $0x350] sm:$0xf0]  ;;  %v5752_v46 = vor.u32 %v6315_v36, %v5749_v25  ;;  %v363_v36 = vld [vmem:[%s6680_s19 + $0x418] sm:$0xff] }
 0x1b0   : > { %v7505_v58 = vadd.f32 %v2156_v44, %v2068_v4  ;;  %v6219_v4 = vld [vmem:[%s9735_s1 + $0x144] sm:$0xf]  ;;  %v5624_v44 = vor.u32 %v6283_v17, %v5621_v2  ;;  %v5493_v17 = vld [vmem:[%s9735_s1 + $0x250] sm:$0xf0] }
 0x1b1   : > { %v2258_v38 = vadd.f32 %v2257_v42, %v2169_v16  ;;  %2207 = vmatmul.bf16.gmra.mxu0 %v7498_v48  ;;  %v5368_v6 = vor.u32 %v6219_v4, %v5365_v43  ;;  %2787 = vmatpush.bf16.msra.mxu3 %v5752_v46  ;;  %v6251_v42 = vld [vmem:[%s9735_s1 + $0x244] sm:$0xf]  ;;  %v362_v4 = vld [vmem:[%s6680_s19 + $0x410] sm:$0xff]  ;;  %v369_v43 = vld [vmem:[%s6680_s19 + $0x448] sm:$0xff] }
 0x1b2   : > { %2296 = vmatmul.bf16.gmra.mxu1 %v7500_v35  ;;  %5993 = vmatmul.msk.bf16.gmra.mxu2 %vm1754_vm0, %v7502_v19  ;;  %v5496_v2 = vor.u32 %v6251_v42, %v5493_v17  ;;  %v370_v25 = vld [vmem:[%s6680_s19 + $0x450] sm:$0xff] }
 0x1b3   : > { %2474 = vmatmul.bf16.gmra.mxu3 %v6936_v30  ;;  %2698 = vmatpush.bf16.msra.mxu2 %v5624_v44  ;;  %v364_v44 = vld [vmem:[%s6680_s19 + $0x420] sm:$0xff]  ;;  %v7549_v19 = vpack.c.bf16 %v370_v25, %v363_v36 }
 0x1b4   : > { %2520 = vmatpush.bf16.msra.mxu0 %v5368_v6  ;;  %2609 = vmatpush.bf16.msra.mxu1 %v5496_v2  ;;  %v7545_v6 = vpack.c.bf16 %v369_v43, %v362_v4 }
 0x1b5   : > { %v2346_v9 = vpop.f32.mrf.mxu2  ;;  %10083 = vst [vmem:[#allocation99_spill] sm:$0xff] %v7549_v19 }
 0x1b6   : > { %v2347_v0 = vadd.f32 %v2346_v9, %v2258_v38  ;;  %v7530_v21 = vpop.f32.mrf.mxu3  ;;  %v2170_v24 = vpop.f32.mrf.mxu0  ;;  %v371_v9 = vld [vmem:[%s6680_s19 + $0x458] sm:$0xff]  ;;  %10082 = vst [vmem:[#allocation98_spill] sm:$0xff] %v7545_v6 }
 0x1b7   : > { %v2171_v60 = vadd.f32 %v2170_v24, %v6987_v62  ;;  %v2259_v16 = vpop.f32.mrf.mxu1  ;;  %v7551_v35 = vpack.c.bf16 %v371_v9, %v364_v44  ;;  %v376_v44 = vld [vmem:[%s6680_s19 + $0x480] sm:$0xff]  ;;  %v383_v9 = vld [vmem:[%s6680_s19 + $0x4b8] sm:$0xff] }
 0x1b8   : > { %v4295_v42 = vmax.f32 %v2347_v0, 0.0 }
 0x1b9   : > { %v2260_v38 = vadd.f32 %v2259_v16, %v2171_v60  ;;  %10084 = vst [vmem:[#allocation100_spill] sm:$0xff] %v7551_v35 }
 0x1bd   : > { %v2348_v62 = vpop.f32.mrf.mxu2 }
 0x1be   : > { %v2349_v46 = vadd.f32 %v2348_v62, %v2260_v38  ;;  %v7547_v24 = vpop.f32.mrf.mxu3  ;;  %v2173_v30 = vpop.f32.mrf.mxu0  ;;  %v377_v62 = vld [vmem:[%s6680_s19 + $0x488] sm:$0xff] }
 0x1bf   : > { %v2174_v60 = vadd.f32 %v2173_v30, %v6994_v15  ;;  %v2262_v16 = vpop.f32.mrf.mxu1 }
 0x1c0   : > { %v4299_v17 = vmax.f32 %v2349_v46, 0.0  ;;  %v384_v46 = vld [vmem:[%s6680_s19 + $0x4c0] sm:$0xff] }
 0x1c1   : > { %v2263_v2 = vadd.f32 %v2262_v16, %v2174_v60  ;;  %2212 = vmatmul.bf16.gmra.mxu0 %v7545_v6  ;;  %v378_v60 = vld [vmem:[%s6680_s19 + $0x490] sm:$0xff]  ;;  %v385_v16 = vld [vmem:[%s6680_s19 + $0x4c8] sm:$0xff] }
 0x1c2   : > { %v7555_v38 = vpack.c.bf16 %v4299_v17, %v4295_v42  ;;  %2301 = vmatmul.bf16.gmra.mxu1 %v7549_v19  ;;  %5994 = vmatmul.msk.bf16.gmra.mxu2 %vm1754_vm0, %v7551_v35  ;;  %v7570_v17 = vpack.c.bf16 %v383_v9, %v376_v44  ;;  %v7576_v35 = vpack.c.bf16 %v385_v16, %v378_v60  ;;  %v6279_v44 = vld [vmem:[%s9735_s1 + $0x324] sm:$0xf]  ;;  %v5349_v9 = vld [vmem:[%s9735_s1 + $0x130] sm:$0xf0] }
 0x1c3   : > { %2479 = vmatmul.bf16.gmra.mxu3 %v6978_v41 }
 0x1c4   : > { %10085 = vst [vmem:[#allocation101_spill] sm:$0xff] %v7555_v38 }
 0x1c5   : > { %v2351_v30 = vpop.f32.mrf.mxu2  ;;  %10086 = vst [vmem:[#allocation102_spill] sm:$0xff] %v7570_v17 }
 0x1c6   : > { %v2352_v15 = vadd.f32 %v2351_v30, %v2263_v2  ;;  %v7561_v0 = vpop.f32.mrf.mxu3  ;;  %v2175_v4 = vpop.f32.mrf.mxu0  ;;  %v7574_v30 = vpack.c.bf16 %v384_v46, %v377_v62  ;;  %10088 = vst [vmem:[#allocation104_spill] sm:$0xff] %v7576_v35  ;;  %v6311_v62 = vld [vmem:[%s9735_s1 + $0x424] sm:$0xf]  ;;  %v5733_v46 = vld [vmem:[%s9735_s1 + $0x430] sm:$0xf0] }
 0x1c7   : > { %v2176_v43 = vadd.f32 %v2175_v4, %v7013_v14  ;;  %v2264_v36 = vpop.f32.mrf.mxu1 }
 0x1c8   : > { %10087 = vst [vmem:[#allocation103_spill] sm:$0xff] %v7574_v30 }
 0x1c9   : > { %v2265_v25 = vadd.f32 %v2264_v36, %v2176_v43  ;;  %v4303_v43 = vmax.f32 %v2352_v15, 0.0 }
 0x1cd   : > { %v2353_v42 = vpop.f32.mrf.mxu2 }
 0x1ce   : > { %v2354_v38 = vadd.f32 %v2353_v42, %v2265_v25  ;;  %v7572_v41 = vpop.f32.mrf.mxu3  ;;  %v2178_v2 = vpop.f32.mrf.mxu0  ;;  %v5736_v42 = vor.u32 %v6311_v62, %v5733_v46  ;;  %v397_v62 = vld [vmem:[%s6680_s19 + $0x528] sm:$0xff]  ;;  %v391_v46 = vld [vmem:[%s6680_s19 + $0x4f8] sm:$0xff] }
 0x1cf   : > { %v2179_v14 = vadd.f32 %v2178_v2, %v7032_v63  ;;  %v2267_v4 = vpop.f32.mrf.mxu1  ;;  %v5605_v63 = vld [vmem:[%s9735_s1 + $0x330] sm:$0xf0] }
 0x1d0   : > { %v4307_v36 = vmax.f32 %v2354_v38, 0.0  ;;  %v6215_v38 = vld [vmem:[%s9735_s1 + $0x124] sm:$0xf]  ;;  %v5608_v15 = vor.u32 %v6279_v44, %v5605_v63  ;;  %2788 = vmatpush.bf16.msra.mxu3 %v5736_v42  ;;  %v5477_v63 = vld [vmem:[%s9735_s1 + $0x230] sm:$0xf0] }
 0x1d1   : > { %v2268_v19 = vadd.f32 %v2267_v4, %v2179_v14  ;;  %2217 = vmatmul.bf16.gmra.mxu0 %v7570_v17  ;;  %v5352_v16 = vor.u32 %v6215_v38, %v5349_v9  ;;  %v6247_v44 = vld [vmem:[%s9735_s1 + $0x224] sm:$0xf]  ;;  %v390_v9 = vld [vmem:[%s6680_s19 + $0x4f0] sm:$0xff] }
 0x1d2   : > { %2306 = vmatmul.bf16.gmra.mxu1 %v7574_v30  ;;  %5995 = vmatmul.msk.bf16.gmra.mxu2 %vm1754_vm0, %v7576_v35  ;;  %v7583_v25 = vpack.c.bf16 %v4307_v36, %v4303_v43  ;;  %v5480_v38 = vor.u32 %v6247_v44, %v5477_v63 }
 0x1d3   : > { %2484 = vmatmul.bf16.gmra.mxu3 %v7004_v51  ;;  %2699 = vmatpush.bf16.msra.mxu2 %v5608_v15  ;;  %v392_v15 = vld [vmem:[%s6680_s19 + $0x500] sm:$0xff] }
 0x1d4   : > { %10089 = vst [vmem:[#allocation105_spill] sm:$0xff] %v7583_v25  ;;  %2521 = vmatpush.bf16.msra.mxu0 %v5352_v16  ;;  %v399_v25 = vld [vmem:[%s6680_s19 + $0x538] sm:$0xff]  ;;  %2610 = vmatpush.bf16.msra.mxu1 %v5480_v38  ;;  %v7619_v16 = vpack.c.bf16 %v397_v62, %v390_v9 }
 0x1d5   : > { %v2356_v60 = vpop.f32.mrf.mxu2  ;;  %v7625_v30 = vpack.c.bf16 %v399_v25, %v392_v15  ;;  %v411_v15 = vld [vmem:[%s6680_s19 + $0x598] sm:$0xff] }
 0x1d6   : > { %v2357_v2 = vadd.f32 %v2356_v60, %v2268_v19  ;;  %v7604_v14 = vpop.f32.mrf.mxu3  ;;  %v2180_v4 = vpop.f32.mrf.mxu0  ;;  %v398_v60 = vld [vmem:[%s6680_s19 + $0x530] sm:$0xff]  ;;  %10090 = vst [vmem:[#allocation106_spill] sm:$0xff] %v7619_v16 }
 0x1d7   : > { %v2181_v43 = vadd.f32 %v2180_v4, %v7057_v57  ;;  %v2269_v36 = vpop.f32.mrf.mxu1  ;;  %v7623_v35 = vpack.c.bf16 %v398_v60, %v391_v46  ;;  %10092 = vst [vmem:[#allocation108_spill] sm:$0xff] %v7625_v30  ;;  %v404_v60 = vld [vmem:[%s6680_s19 + $0x560] sm:$0xff] }
 0x1d8   : > { %v4311_v44 = vmax.f32 %v2357_v2, 0.0 }
 0x1d9   : > { %v2270_v19 = vadd.f32 %v2269_v36, %v2181_v43  ;;  %10091 = vst [vmem:[#allocation107_spill] sm:$0xff] %v7623_v35 }
 0x1dd   : > { %v2358_v57 = vpop.f32.mrf.mxu2 }
 0x1de   : > { %v2359_v42 = vadd.f32 %v2358_v57, %v2270_v19  ;;  %v7621_v4 = vpop.f32.mrf.mxu3  ;;  %v2183_v51 = vpop.f32.mrf.mxu0  ;;  %v405_v57 = vld [vmem:[%s6680_s19 + $0x568] sm:$0xff] }
 0x1df   : > { %v2184_v43 = vadd.f32 %v2183_v51, %v7064_v28  ;;  %v2272_v36 = vpop.f32.mrf.mxu1 }
 0x1e0   : > { %v4315_v63 = vmax.f32 %v2359_v42, 0.0  ;;  %v412_v42 = vld [vmem:[%s6680_s19 + $0x5a0] sm:$0xff] }
 0x1e1   : > { %v2273_v38 = vadd.f32 %v2272_v36, %v2184_v43  ;;  %2222 = vmatmul.bf16.gmra.mxu0 %v7619_v16  ;;  %v406_v43 = vld [vmem:[%s6680_s19 + $0x570] sm:$0xff]  ;;  %v413_v36 = vld [vmem:[%s6680_s19 + $0x5a8] sm:$0xff] }
 0x1e2   : > { %2311 = vmatmul.bf16.gmra.mxu1 %v7623_v35  ;;  %5996 = vmatmul.msk.bf16.gmra.mxu2 %vm1754_vm0, %v7625_v30  ;;  %v7632_v25 = vpack.c.bf16 %v4315_v63, %v4311_v44  ;;  %v7644_v44 = vpack.c.bf16 %v411_v15, %v404_v60  ;;  %v5333_v15 = vld [vmem:[%s9735_s1 + $0x110] sm:$0xf0] }
 0x1e3   : > { %2489 = vmatmul.bf16.gmra.mxu3 %v7048_v13  ;;  %v7650_v13 = vpack.c.bf16 %v413_v36, %v406_v43 }
 0x1e4   : > { %10093 = vst [vmem:[#allocation109_spill] sm:$0xff] %v7632_v25 }
 0x1e5   : > { %v2361_v51 = vpop.f32.mrf.mxu2  ;;  %10094 = vst [vmem:[#allocation110_spill] sm:$0xff] %v7644_v44 }
 0x1e6   : > { %v2362_v28 = vadd.f32 %v2361_v51, %v2273_v38  ;;  %v7635_v2 = vpop.f32.mrf.mxu3  ;;  %v2185_v19 = vpop.f32.mrf.mxu0  ;;  %v7648_v51 = vpack.c.bf16 %v412_v42, %v405_v57  ;;  %10096 = vst [vmem:[#allocation112_spill] sm:$0xff] %v7650_v13  ;;  %v6307_v57 = vld [vmem:[%s9735_s1 + $0x404] sm:$0xf]  ;;  %v5717_v42 = vld [vmem:[%s9735_s1 + $0x410] sm:$0xf0] }
 0x1e7   : > { %v2186_v9 = vadd.f32 %v2185_v19, %v7083_v27  ;;  %v2274_v62 = vpop.f32.mrf.mxu1 }
 0x1e8   : > { %10095 = vst [vmem:[#allocation111_spill] sm:$0xff] %v7648_v51 }
 0x1e9   : > { %v2275_v46 = vadd.f32 %v2274_v62, %v2186_v9  ;;  %v4319_v9 = vmax.f32 %v2362_v28, 0.0  ;;  %v6211_v28 = vld [vmem:[%s9735_s1 + $0x104] sm:$0xf] }
 0x1ea   : > { %v5336_v36 = vor.u32 %v6211_v28, %v5333_v15  ;;  %v418_v15 = vld [vmem:[%s6680_s19 + $0x5d0] sm:$0xff] }
 0x1ec   : > { %2522 = vmatpush.bf16.msra.mxu0 %v5336_v36 }
 0x1ed   : > { %v2363_v30 = vpop.f32.mrf.mxu2 }
 0x1ee   : > { %v2364_v63 = vadd.f32 %v2363_v30, %v2275_v46  ;;  %v7646_v25 = vpop.f32.mrf.mxu3  ;;  %v2188_v38 = vpop.f32.mrf.mxu0  ;;  %v6275_v46 = vld [vmem:[%s9735_s1 + $0x304] sm:$0xf] }
 0x1ef   : > { %v2189_v27 = vadd.f32 %v2188_v38, %v7102_v54  ;;  %v2277_v19 = vpop.f32.mrf.mxu1  ;;  %v5589_v54 = vld [vmem:[%s9735_s1 + $0x310] sm:$0xf0] }
 0x1f0   : > { %v4323_v62 = vmax.f32 %v2364_v63, 0.0  ;;  %v5592_v60 = vor.u32 %v6275_v46, %v5589_v54  ;;  %v5720_v63 = vor.u32 %v6307_v57, %v5717_v42  ;;  %v6243_v46 = vld [vmem:[%s9735_s1 + $0x204] sm:$0xf]  ;;  %v5461_v54 = vld [vmem:[%s9735_s1 + $0x210] sm:$0xf0]  ;;  %v425_v57 = vld [vmem:[%s6680_s19 + $0x608] sm:$0xff] }
 0x1f1   : > { %v2278_v35 = vadd.f32 %v2277_v19, %v2189_v27  ;;  %2227 = vmatmul.bf16.gmra.mxu0 %v7644_v44  ;;  %v5464_v28 = vor.u32 %v6243_v46, %v5461_v54  ;;  %v419_v42 = vld [vmem:[%s6680_s19 + $0x5d8] sm:$0xff]  ;;  %v7693_v36 = vpack.c.bf16 %v425_v57, %v418_v15 }
 0x1f2   : > { %2316 = vmatmul.bf16.gmra.mxu1 %v7648_v51  ;;  %5997 = vmatmul.msk.bf16.gmra.mxu2 %vm1754_vm0, %v7650_v13  ;;  %v7657_v30 = vpack.c.bf16 %v4323_v62, %v4319_v9 }
 0x1f3   : > { %2494 = vmatmul.bf16.gmra.mxu3 %v7074_v52  ;;  %2700 = vmatpush.bf16.msra.mxu2 %v5592_v60  ;;  %v420_v60 = vld [vmem:[%s6680_s19 + $0x5e0] sm:$0xff]  ;;  %10098 = vst [vmem:[#allocation114_spill] sm:$0xff] %v7693_v36 }
 0x1f4   : > { %10097 = vst [vmem:[#allocation113_spill] sm:$0xff] %v7657_v30  ;;  %2789 = vmatpush.bf16.msra.mxu3 %v5720_v63  ;;  %v427_v30 = vld [vmem:[%s6680_s19 + $0x618] sm:$0xff]  ;;  %2611 = vmatpush.bf16.msra.mxu1 %v5464_v28 }
 0x1f5   : > { %v2366_v43 = vpop.f32.mrf.mxu2  ;;  %v7699_v51 = vpack.c.bf16 %v427_v30, %v420_v60  ;;  %v439_v60 = vld [vmem:[%s6680_s19 + $0x678] sm:$0xff] }
 0x1f6   : > { %v2367_v38 = vadd.f32 %v2366_v43, %v2278_v35  ;;  %v7678_v27 = vpop.f32.mrf.mxu3  ;;  %v2190_v19 = vpop.f32.mrf.mxu0  ;;  %v426_v43 = vld [vmem:[%s6680_s19 + $0x610] sm:$0xff] }
 0x1f7   : > { %v2191_v9 = vadd.f32 %v2190_v19, %v7127_v7  ;;  %v2279_v62 = vpop.f32.mrf.mxu1  ;;  %v7697_v13 = vpack.c.bf16 %v426_v43, %v419_v42  ;;  %10100 = vst [vmem:[#allocation116_spill] sm:$0xff] %v7699_v51  ;;  %v432_v43 = vld [vmem:[%s6680_s19 + $0x640] sm:$0xff] }
 0x1f8   : > { %v4327_v46 = vmax.f32 %v2367_v38, 0.0 }
 0x1f9   : > { %v2280_v35 = vadd.f32 %v2279_v62, %v2191_v9  ;;  %10099 = vst [vmem:[#allocation115_spill] sm:$0xff] %v7697_v13 }
 0x1fd   : > { %v2368_v7 = vpop.f32.mrf.mxu2 }
 0x1fe   : > { %v2369_v63 = vadd.f32 %v2368_v7, %v2280_v35  ;;  %v7695_v19 = vpop.f32.mrf.mxu3  ;;  %v2193_v52 = vpop.f32.mrf.mxu0  ;;  %v433_v7 = vld [vmem:[%s6680_s19 + $0x648] sm:$0xff] }
 0x1ff   : > { %v2194_v9 = vadd.f32 %v2193_v52, %v7134_v29  ;;  %v2282_v62 = vpop.f32.mrf.mxu1 }
 0x200   : > { %v4331_v54 = vmax.f32 %v2369_v63, 0.0  ;;  %v440_v63 = vld [vmem:[%s6680_s19 + $0x680] sm:$0xff] }
 0x201   : > { %v2283_v28 = vadd.f32 %v2282_v62, %v2194_v9  ;;  %2232 = vmatmul.bf16.gmra.mxu0 %v7693_v36  ;;  %v434_v9 = vld [vmem:[%s6680_s19 + $0x650] sm:$0xff]  ;;  %v441_v62 = vld [vmem:[%s6680_s19 + $0x688] sm:$0xff] }
 0x202   : > { %2321 = vmatmul.bf16.gmra.mxu1 %v7697_v13  ;;  %5998 = vmatmul.msk.bf16.gmra.mxu2 %vm1754_vm0, %v7699_v51  ;;  %v7706_v30 = vpack.c.bf16 %v4331_v54, %v4327_v46  ;;  %v7718_v46 = vpack.c.bf16 %v439_v60, %v432_v43  ;;  %v5957_v60 = vld [vmem:[%s9735_s1 + $0x5f0] sm:$0xf0] }
 0x203   : > { %2499 = vmatmul.bf16.gmra.mxu3 %v7118_v8  ;;  %v7724_v8 = vpack.c.bf16 %v441_v62, %v434_v9 }
 0x204   : > { %10101 = vst [vmem:[#allocation117_spill] sm:$0xff] %v7706_v30 }
 0x205   : > { %v2371_v52 = vpop.f32.mrf.mxu2  ;;  %10102 = vst [vmem:[#allocation118_spill] sm:$0xff] %v7718_v46 }
 0x206   : > { %v2372_v29 = vadd.f32 %v2371_v52, %v2283_v28  ;;  %v7709_v38 = vpop.f32.mrf.mxu3  ;;  %v2195_v35 = vpop.f32.mrf.mxu0  ;;  %v7722_v52 = vpack.c.bf16 %v440_v63, %v433_v7  ;;  %10104 = vst [vmem:[#allocation120_spill] sm:$0xff] %v7724_v8  ;;  %v5451_v7 = vld [vmem:[%s9735_s1 + $0x1e8] sm:$0xf]  ;;  %v6242_v63 = vld [vmem:[%s9735_s1 + $0x1f4] sm:$0xf0] }
 0x207   : > { %v2196_v15 = vadd.f32 %v2195_v35, %v7153_v40  ;;  %v2284_v57 = vpop.f32.mrf.mxu1 }
 0x208   : > { %10103 = vst [vmem:[#allocation119_spill] sm:$0xff] %v7722_v52 }
 0x209   : > { %v2285_v42 = vadd.f32 %v2284_v57, %v2196_v15  ;;  %v4335_v15 = vmax.f32 %v2372_v29, 0.0  ;;  %v6367_v29 = vld [vmem:[%s9735_s1 + $0x5e4] sm:$0xf] }
 0x20a   : > { %v5960_v62 = vor.u32 %v6367_v29, %v5957_v60  ;;  %v446_v60 = vld [vmem:[%s6680_s19 + $0x6b0] sm:$0xff] }
 0x20c   : > { %2871 = vmatpush.bf16.msrb.mxu0 %v5960_v62 }
 0x20d   : > { %v2373_v51 = vpop.f32.mrf.mxu2 }
 0x20e   : > { %v2374_v54 = vadd.f32 %v2373_v51, %v2285_v42  ;;  %v7720_v30 = vpop.f32.mrf.mxu3  ;;  %v2198_v28 = vpop.f32.mrf.mxu0  ;;  %v5323_v42 = vld [vmem:[%s9735_s1 + $0xe8] sm:$0xf] }
 0x20f   : > { %v2199_v40 = vadd.f32 %v2198_v28, %v7178_v3  ;;  %v2287_v35 = vpop.f32.mrf.mxu1  ;;  %v6210_v3 = vld [vmem:[%s9735_s1 + $0xf4] sm:$0xf0] }
 0x210   : > { %v4339_v57 = vmax.f32 %v2374_v54, 0.0  ;;  %v5324_v43 = vor.u32 %v6210_v3, %v5323_v42  ;;  %v5452_v54 = vor.u32 %v6242_v63, %v5451_v7  ;;  %v6371_v42 = vld [vmem:[%s9735_s1 + $0x604] sm:$0xf]  ;;  %v5973_v3 = vld [vmem:[%s9735_s1 + $0x610] sm:$0xf0]  ;;  %v453_v7 = vld [vmem:[%s6680_s19 + $0x6e8] sm:$0xff] }
 0x211   : > { %v2288_v13 = vadd.f32 %v2287_v35, %v2199_v40  ;;  %2237 = vmatmul.bf16.gmra.mxu0 %v7718_v46  ;;  %v5976_v29 = vor.u32 %v6371_v42, %v5973_v3  ;;  %v447_v63 = vld [vmem:[%s6680_s19 + $0x6b8] sm:$0xff]  ;;  %v7767_v62 = vpack.c.bf16 %v453_v7, %v446_v60 }
 0x212   : > { %2326 = vmatmul.bf16.gmra.mxu1 %v7722_v52  ;;  %5999 = vmatmul.msk.bf16.gmra.mxu2 %vm1754_vm0, %v7724_v8  ;;  %v7731_v51 = vpack.c.bf16 %v4339_v57, %v4335_v15 }
 0x213   : > { %2504 = vmatmul.bf16.gmra.mxu3 %v7144_v5  ;;  %3049 = vmatpush.bf16.msrb.mxu2 %v5324_v43  ;;  %v448_v43 = vld [vmem:[%s6680_s19 + $0x6c0] sm:$0xff]  ;;  %10106 = vst [vmem:[#allocation122_spill] sm:$0xff] %v7767_v62 }
 0x214   : > { %10105 = vst [vmem:[#allocation121_spill] sm:$0xff] %v7731_v51  ;;  %3138 = vmatpush.bf16.msrb.mxu3 %v5452_v54  ;;  %v455_v51 = vld [vmem:[%s6680_s19 + $0x6f8] sm:$0xff]  ;;  %2967 = vmatpush.bf16.msrb.mxu1 %v5976_v29 }
 0x215   : > { %v2376_v9 = vpop.f32.mrf.mxu2  ;;  %v7773_v52 = vpack.c.bf16 %v455_v51, %v448_v43 }
 0x216   : > { %v2377_v28 = vadd.f32 %v2376_v9, %v2288_v13  ;;  %v7752_v40 = vpop.f32.mrf.mxu3  ;;  %v2200_v35 = vpop.f32.mrf.mxu0  ;;  %v454_v9 = vld [vmem:[%s6680_s19 + $0x6f0] sm:$0xff] }
 0x217   : > { %v2201_v15 = vadd.f32 %v2200_v35, %v7203_v26  ;;  %v2289_v57 = vpop.f32.mrf.mxu1  ;;  %v7771_v8 = vpack.c.bf16 %v454_v9, %v447_v63  ;;  %10108 = vst [vmem:[#allocation124_spill] sm:$0xff] %v7773_v52 }
 0x218   : > { %v4343_v42 = vmax.f32 %v2377_v28, 0.0 }
 0x219   : > { %v2290_v13 = vadd.f32 %v2289_v57, %v2201_v15  ;;  %10107 = vst [vmem:[#allocation123_spill] sm:$0xff] %v7771_v8 }
 0x21d   : > { %v2378_v26 = vpop.f32.mrf.mxu2 }
 0x21e   : > { %v2379_v54 = vadd.f32 %v2378_v26, %v2290_v13  ;;  %v7769_v35 = vpop.f32.mrf.mxu3  ;;  %v2203_v5 = vpop.f32.mrf.mxu0 }
 0x21f   : > { %v2204_v15 = vadd.f32 %v2203_v5, %v7210_v55  ;;  %v2292_v57 = vpop.f32.mrf.mxu1 }
 0x220   : > { %v4347_v3 = vmax.f32 %v2379_v54, 0.0 }
 0x221   : > { %v2293_v46 = vadd.f32 %v2292_v57, %v2204_v15  ;;  %2242 = vmatmul.bf16.gmra.mxu0 %v7767_v62 }
 0x222   : > { %2331 = vmatmul.bf16.gmra.mxu1 %v7771_v8  ;;  %6000 = vmatmul.msk.bf16.gmra.mxu2 %vm1754_vm0, %v7773_v52  ;;  %v7780_v13 = vpack.c.bf16 %v4347_v3, %v4343_v42 }
 0x223   : > { %2509 = vmatmul.bf16.gmra.mxu3 %v7194_v1 }
 0x224   : > { %10109 = vst [vmem:[#allocation125_spill] sm:$0xff] %v7780_v13 }
 0x225   : > { %v2381_v29 = vpop.f32.mrf.mxu2 }
 0x226   : > { %v2382_v51 = vadd.f32 %v2381_v29, %v2293_v46  ;;  %v7783_v60 = vpop.f32.mrf.mxu3  ;;  %v2205_v5 = vpop.f32.mrf.mxu0  ;;  %v5307_v46 = vld [vmem:[%s9735_s1 + $0xc8] sm:$0xf]  ;;  %v6363_v29 = vld [vmem:[%s9735_s1 + $0x5c4] sm:$0xf] }
 0x227   : > { %v2206_v55 = vadd.f32 %v2205_v5, %v7225_v31  ;;  %v2294_v28 = vpop.f32.mrf.mxu1  ;;  %v5941_v5 = vld [vmem:[%s9735_s1 + $0x5d0] sm:$0xf0] }
 0x228   : > { %v4351_v57 = vmax.f32 %v2382_v51, 0.0 }
 0x229   : > { %v2295_v7 = vadd.f32 %v2294_v28, %v2206_v55  ;;  %v5435_v55 = vld [vmem:[%s9735_s1 + $0x1c8] sm:$0xf]  ;;  %v6238_v28 = vld [vmem:[%s9735_s1 + $0x1d4] sm:$0xf0] }
 0x22d   : > { %v2383_v63 = vpop.f32.mrf.mxu2 }
 0x22e   : > { %v2384_v9 = vadd.f32 %v2383_v63, %v2295_v7  ;;  %v7786_v43 = vpop.f32.mrf.mxu3  ;;  %v2208_v26 = vpop.f32.mrf.mxu0  ;;  %v5944_v63 = vor.u32 %v6363_v29, %v5941_v5 }
 0x22f   : > { %v2209_v54 = vadd.f32 %v2208_v26, %v7251_v34  ;;  %v2297_v15 = vpop.f32.mrf.mxu1  ;;  %v6206_v34 = vld [vmem:[%s9735_s1 + $0xd4] sm:$0xf0] }
 0x230   : > { %v4355_v42 = vmax.f32 %v2384_v9, 0.0  ;;  %v5308_v51 = vor.u32 %v6206_v34, %v5307_v46  ;;  %v5436_v9 = vor.u32 %v6238_v28, %v5435_v55  ;;  %2872 = vmatpush.bf16.msrb.mxu0 %v5944_v63 }
 0x231   : > { %v2298_v3 = vadd.f32 %v2297_v15, %v2209_v54  ;;  %2523 = vmatmul.bf16.vlgmr.msra.gmra.mxu0 %v6699_v49 }
 0x232   : > { %2612 = vmatmul.bf16.vlgmr.msra.gmra.mxu1 %v6701_v50  ;;  %2701 = vmatmul.bf16.vlgmr.msra.gmra.mxu2 %v6705_v53  ;;  %v7792_v31 = vpack.c.bf16 %v4355_v42, %v4351_v57 }
 0x233   : > { %2790 = vmatmul.bf16.vlgmr.msra.gmra.mxu3 %v7218_v61  ;;  %3050 = vmatpush.bf16.msrb.mxu2 %v5308_v51 }
 0x234   : > { %10110 = vst [vmem:[#allocation126_spill] sm:$0xff] %v7792_v31  ;;  %3139 = vmatpush.bf16.msrb.mxu3 %v5436_v9 }
 0x235   : > { %v2386_v7 = vpop.f32.mrf.mxu2 }
 0x236   : > { %v2387_v26 = vadd.f32 %v2386_v7, %v2298_v3  ;;  %v7813_v54 = vpop.f32.mrf.mxu3  ;;  %v2210_v15 = vpop.f32.mrf.mxu0 }
 0x237   : > { %v2211_v57 = vadd.f32 %v2210_v15, %v7272_v20  ;;  %v2299_v42 = vpop.f32.mrf.mxu1 }
 0x238   : > { %v4359_v5 = vmax.f32 %v2387_v26, 0.0 }
 0x239   : > { %v2300_v46 = vadd.f32 %v2299_v42, %v2211_v57 }
 0x23d   : > { %v2388_v34 = vpop.f32.mrf.mxu2 }
 0x23e   : > { %v2389_v31 = vadd.f32 %v2388_v34, %v2300_v46  ;;  %v7816_v13 = vpop.f32.mrf.mxu3  ;;  %v2213_v61 = vpop.f32.mrf.mxu0 }
 0x23f   : > { %v2214_v53 = vadd.f32 %v2213_v61, %v7280_v56  ;;  %v2302_v29 = vpop.f32.mrf.mxu1 }
 0x240   : > { %v4363_v3 = vmax.f32 %v2389_v31, 0.0 }
 0x241   : > { %v2303_v55 = vadd.f32 %v2302_v29, %v2214_v53  ;;  %2528 = vmatmul.bf16.gmra.mxu0 %v6739_v10 }
 0x242   : > { %2617 = vmatmul.bf16.gmra.mxu1 %v6741_v11  ;;  %2706 = vmatmul.bf16.gmra.mxu2 %v6743_v12  ;;  %v7822_v20 = vpack.c.bf16 %v4363_v3, %v4359_v5  ;;  %v10112_v5 = vld [vmem:[#allocation13_spill] sm:$0xff]  ;;  %v10114_v3 = vld [vmem:[#allocation72_spill] sm:$0xff] }
 0x243   : > { %2795 = vmatmul.bf16.gmra.mxu3 %v7265_v18 }
 0x244   : > { %10111 = vst [vmem:[#allocation127_spill] sm:$0xff] %v7822_v20 }
 0x245   : > { %v2391_v51 = vpop.f32.mrf.mxu2 }
 0x246   : > { %v2392_v28 = vadd.f32 %v2391_v51, %v2303_v55  ;;  %v7825_v7 = vpop.f32.mrf.mxu3  ;;  %v2215_v63 = vpop.f32.mrf.mxu0  ;;  %v5291_v55 = vld [vmem:[%s9735_s1 + $0xa8] sm:$0xf]  ;;  %v6359_v51 = vld [vmem:[%s9735_s1 + $0x5a4] sm:$0xf] }
 0x247   : > { %v2216_v61 = vadd.f32 %v2215_v63, %v7295_v39  ;;  %v2304_v56 = vpop.f32.mrf.mxu1  ;;  %v5925_v63 = vld [vmem:[%s9735_s1 + $0x5b0] sm:$0xf0] }
 0x248   : > { %v4367_v46 = vmax.f32 %v2392_v28, 0.0 }
 0x249   : > { %v2305_v31 = vadd.f32 %v2304_v56, %v2216_v61  ;;  %v5419_v61 = vld [vmem:[%s9735_s1 + $0x1a8] sm:$0xf]  ;;  %v6234_v56 = vld [vmem:[%s9735_s1 + $0x1b4] sm:$0xf0] }
 0x24d   : > { %v2393_v53 = vpop.f32.mrf.mxu2 }
 0x24e   : > { %v2394_v9 = vadd.f32 %v2393_v53, %v2305_v31  ;;  %v7828_v26 = vpop.f32.mrf.mxu3  ;;  %v2218_v15 = vpop.f32.mrf.mxu0  ;;  %v5928_v53 = vor.u32 %v6359_v51, %v5925_v63 }
 0x24f   : > { %v2219_v57 = vadd.f32 %v2218_v15, %v7321_v47  ;;  %v2307_v42 = vpop.f32.mrf.mxu1  ;;  %v6202_v47 = vld [vmem:[%s9735_s1 + $0xb4] sm:$0xf0] }
 0x250   : > { %v4371_v34 = vmax.f32 %v2394_v9, 0.0  ;;  %v5292_v28 = vor.u32 %v6202_v47, %v5291_v55  ;;  %v5420_v9 = vor.u32 %v6234_v56, %v5419_v61  ;;  %2873 = vmatpush.bf16.msrb.mxu0 %v5928_v53  ;;  %v10116_v56 = vld [vmem:[#allocation15_spill] sm:$0xff] }
 0x251   : > { %v2308_v29 = vadd.f32 %v2307_v42, %v2219_v57  ;;  %2533 = vmatmul.bf16.gmra.mxu0 %v6759_v22 }
 0x252   : > { %2622 = vmatmul.bf16.gmra.mxu1 %v6761_v23  ;;  %2711 = vmatmul.bf16.gmra.mxu2 %v10112_v5  ;;  %v7834_v39 = vpack.c.bf16 %v4371_v34, %v4367_v46  ;;  %v10115_v46 = vld [vmem:[#allocation78_spill] sm:$0xff] }
 0x253   : > { %2800 = vmatmul.bf16.gmra.mxu3 %v10114_v3  ;;  %3051 = vmatpush.bf16.msrb.mxu2 %v5292_v28  ;;  %v10117_v28 = vld [vmem:[#allocation16_spill] sm:$0xff] }
 0x254   : > { %10113 = vst [vmem:[#allocation128_spill] sm:$0xff] %v7834_v39  ;;  %3140 = vmatpush.bf16.msrb.mxu3 %v5420_v9  ;;  %v10120_v9 = vld [vmem:[#allocation75_spill] sm:$0xff] }
 0x255   : > { %v2396_v31 = vpop.f32.mrf.mxu2 }
 0x256   : > { %v2397_v15 = vadd.f32 %v2396_v31, %v2308_v29  ;;  %v7855_v57 = vpop.f32.mrf.mxu3  ;;  %v2220_v42 = vpop.f32.mrf.mxu0  ;;  %v10118_v31 = vld [vmem:[#allocation17_spill] sm:$0xff] }
 0x257   : > { %v2221_v34 = vadd.f32 %v2220_v42, %v10115_v46  ;;  %v2309_v55 = vpop.f32.mrf.mxu1 }
 0x258   : > { %v4375_v63 = vmax.f32 %v2397_v15, 0.0 }
 0x259   : > { %v2310_v47 = vadd.f32 %v2309_v55, %v2221_v34 }
 0x25d   : > { %v2398_v39 = vpop.f32.mrf.mxu2 }
 0x25e   : > { %v2399_v20 = vadd.f32 %v2398_v39, %v2310_v47  ;;  %v7858_v3 = vpop.f32.mrf.mxu3  ;;  %v2223_v5 = vpop.f32.mrf.mxu0 }
 0x25f   : > { %v2224_v23 = vadd.f32 %v2223_v5, %v7350_v33  ;;  %v2312_v51 = vpop.f32.mrf.mxu1 }
 0x260   : > { %v4379_v29 = vmax.f32 %v2399_v20, 0.0 }
 0x261   : > { %v2313_v61 = vadd.f32 %v2312_v51, %v2224_v23  ;;  %2538 = vmatmul.bf16.gmra.mxu0 %v10116_v56  ;;  %v10121_v51 = vld [vmem:[#allocation82_spill] sm:$0xff] }
 0x262   : > { %2627 = vmatmul.bf16.gmra.mxu1 %v10117_v28  ;;  %2716 = vmatmul.bf16.gmra.mxu2 %v10118_v31  ;;  %v7864_v53 = vpack.c.bf16 %v4379_v29, %v4375_v63  ;;  %v10122_v28 = vld [vmem:[#allocation19_spill] sm:$0xff] }
 0x263   : > { %2805 = vmatmul.bf16.gmra.mxu3 %v10120_v9 }
 0x264   : > { %10119 = vst [vmem:[#allocation78_spill] sm:$0xff] %v7864_v53 }
 0x265   : > { %v2401_v39 = vpop.f32.mrf.mxu2 }
 0x266   : > { %v2402_v42 = vadd.f32 %v2401_v39, %v2313_v61  ;;  %v7867_v46 = vpop.f32.mrf.mxu3  ;;  %v2225_v34 = vpop.f32.mrf.mxu0  ;;  %v10123_v61 = vld [vmem:[#allocation20_spill] sm:$0xff]  ;;  %v10124_v39 = vld [vmem:[#allocation21_spill] sm:$0xff] }
 0x267   : > { %v2226_v33 = vadd.f32 %v2225_v34, %v7365_v37  ;;  %v2314_v5 = vpop.f32.mrf.mxu1  ;;  %v10126_v34 = vld [vmem:[#allocation79_spill] sm:$0xff] }
 0x268   : > { %v4383_v29 = vmax.f32 %v2402_v42, 0.0  ;;  %v6198_v42 = vld [vmem:[%s9735_s1 + $0x94] sm:$0xf0] }
 0x269   : > { %v2315_v20 = vadd.f32 %v2314_v5, %v2226_v33  ;;  %v5275_v33 = vld [vmem:[%s9735_s1 + $0x88] sm:$0xf] }
 0x26a   : > { %v5276_v5 = vor.u32 %v6198_v42, %v5275_v33  ;;  %v10127_v33 = vld [vmem:[#allocation86_spill] sm:$0xff] }
 0x26c   : > { %3052 = vmatpush.bf16.msrb.mxu2 %v5276_v5  ;;  %v10129_v5 = vld [vmem:[#allocation24_spill] sm:$0xff] }
 0x26d   : > { %v2403_v23 = vpop.f32.mrf.mxu2 }
 0x26e   : > { %v2404_v15 = vadd.f32 %v2403_v23, %v2315_v20  ;;  %v7870_v55 = vpop.f32.mrf.mxu3  ;;  %v2228_v47 = vpop.f32.mrf.mxu0  ;;  %v5403_v20 = vld [vmem:[%s9735_s1 + $0x188] sm:$0xf]  ;;  %v6230_v23 = vld [vmem:[%s9735_s1 + $0x194] sm:$0xf0] }
 0x26f   : > { %v2229_v31 = vadd.f32 %v2228_v47, %v10121_v51  ;;  %v2317_v63 = vpop.f32.mrf.mxu1  ;;  %v5404_v51 = vor.u32 %v6230_v23, %v5403_v20  ;;  %v10128_v23 = vld [vmem:[#allocation23_spill] sm:$0xff] }
 0x270   : > { %v4387_v53 = vmax.f32 %v2404_v15, 0.0 }
 0x271   : > { %v2318_v9 = vadd.f32 %v2317_v63, %v2229_v31  ;;  %2543 = vmatmul.bf16.gmra.mxu0 %v10122_v28  ;;  %v6355_v31 = vld [vmem:[%s9735_s1 + $0x584] sm:$0xf]  ;;  %3141 = vmatpush.bf16.msrb.mxu3 %v5404_v51 }
 0x272   : > { %2632 = vmatmul.bf16.gmra.mxu1 %v10123_v61  ;;  %2721 = vmatmul.bf16.gmra.mxu2 %v10124_v39  ;;  %v7876_v37 = vpack.c.bf16 %v4387_v53, %v4383_v29  ;;  %v5909_v53 = vld [vmem:[%s9735_s1 + $0x590] sm:$0xf0] }
 0x273   : > { %2810 = vmatmul.bf16.gmra.mxu3 %v10126_v34  ;;  %v5912_v47 = vor.u32 %v6355_v31, %v5909_v53 }
 0x274   : > { %10125 = vst [vmem:[#allocation82_spill] sm:$0xff] %v7876_v37 }
 0x275   : > { %v2406_v15 = vpop.f32.mrf.mxu2  ;;  %2874 = vmatpush.bf16.msrb.mxu0 %v5912_v47 }
 0x276   : > { %v2407_v63 = vadd.f32 %v2406_v15, %v2318_v9  ;;  %v7897_v29 = vpop.f32.mrf.mxu3  ;;  %v2230_v37 = vpop.f32.mrf.mxu0 }
 0x277   : > { %v2231_v42 = vadd.f32 %v2230_v37, %v10127_v33  ;;  %v2319_v34 = vpop.f32.mrf.mxu1  ;;  %v10130_v37 = vld [vmem:[#allocation25_spill] sm:$0xff] }
 0x278   : > { %v4391_v53 = vmax.f32 %v2407_v63, 0.0 }
 0x279   : > { %v2320_v39 = vadd.f32 %v2319_v34, %v2231_v42  ;;  %v10132_v34 = vld [vmem:[#allocation83_spill] sm:$0xff] }
 0x27d   : > { %v2408_v61 = vpop.f32.mrf.mxu2 }
 0x27e   : > { %v2409_v18 = vadd.f32 %v2408_v61, %v2320_v39  ;;  %v7900_v12 = vpop.f32.mrf.mxu3  ;;  %v2233_v11 = vpop.f32.mrf.mxu0 }
 0x27f   : > { %v2234_v50 = vadd.f32 %v2233_v11, %v7420_v32  ;;  %v2322_v31 = vpop.f32.mrf.mxu1 }
 0x280   : > { %v4395_v9 = vmax.f32 %v2409_v18, 0.0 }
 0x281   : > { %v2323_v20 = vadd.f32 %v2322_v31, %v2234_v50  ;;  %2548 = vmatmul.bf16.gmra.mxu0 %v10128_v23  ;;  %v10133_v31 = vld [vmem:[#allocation90_spill] sm:$0xff] }
 0x282   : > { %2637 = vmatmul.bf16.gmra.mxu1 %v10129_v5  ;;  %2726 = vmatmul.bf16.gmra.mxu2 %v10130_v37  ;;  %v7906_v15 = vpack.c.bf16 %v4395_v9, %v4391_v53  ;;  %v10134_v5 = vld [vmem:[#allocation27_spill] sm:$0xff] }
 0x283   : > { %2815 = vmatmul.bf16.gmra.mxu3 %v10132_v34 }
 0x284   : > { %10131 = vst [vmem:[#allocation86_spill] sm:$0xff] %v7906_v15 }
 0x285   : > { %v2411_v61 = vpop.f32.mrf.mxu2 }
 0x286   : > { %v2412_v39 = vadd.f32 %v2411_v61, %v2323_v20  ;;  %v7909_v47 = vpop.f32.mrf.mxu3  ;;  %v2235_v51 = vpop.f32.mrf.mxu0  ;;  %v10135_v20 = vld [vmem:[#allocation28_spill] sm:$0xff]  ;;  %v10136_v61 = vld [vmem:[#allocation29_spill] sm:$0xff] }
 0x287   : > { %v2236_v11 = vadd.f32 %v2235_v51, %v7435_v45  ;;  %v2324_v32 = vpop.f32.mrf.mxu1  ;;  %v10138_v51 = vld [vmem:[#allocation87_spill] sm:$0xff] }
 0x288   : > { %v4399_v9 = vmax.f32 %v2412_v39, 0.0  ;;  %v6194_v39 = vld [vmem:[%s9735_s1 + $0x74] sm:$0xf0] }
 0x289   : > { %v2325_v18 = vadd.f32 %v2324_v32, %v2236_v11  ;;  %v5259_v11 = vld [vmem:[%s9735_s1 + $0x68] sm:$0xf] }
 0x28a   : > { %v5260_v32 = vor.u32 %v6194_v39, %v5259_v11  ;;  %v10139_v11 = vld [vmem:[#allocation94_spill] sm:$0xff] }
 0x28c   : > { %3053 = vmatpush.bf16.msrb.mxu2 %v5260_v32  ;;  %v10141_v32 = vld [vmem:[#allocation32_spill] sm:$0xff] }
 0x28d   : > { %v2413_v50 = vpop.f32.mrf.mxu2 }
 0x28e   : > { %v2414_v63 = vadd.f32 %v2413_v50, %v2325_v18  ;;  %v7912_v33 = vpop.f32.mrf.mxu3  ;;  %v2238_v42 = vpop.f32.mrf.mxu0  ;;  %v5387_v18 = vld [vmem:[%s9735_s1 + $0x168] sm:$0xf]  ;;  %v6226_v50 = vld [vmem:[%s9735_s1 + $0x174] sm:$0xf0] }
 0x28f   : > { %v2239_v37 = vadd.f32 %v2238_v42, %v10133_v31  ;;  %v2327_v53 = vpop.f32.mrf.mxu1  ;;  %v5388_v31 = vor.u32 %v6226_v50, %v5387_v18  ;;  %v10140_v50 = vld [vmem:[#allocation31_spill] sm:$0xff] }
 0x290   : > { %v4403_v15 = vmax.f32 %v2414_v63, 0.0 }
 0x291   : > { %v2328_v34 = vadd.f32 %v2327_v53, %v2239_v37  ;;  %2553 = vmatmul.bf16.gmra.mxu0 %v10134_v5  ;;  %v6351_v37 = vld [vmem:[%s9735_s1 + $0x564] sm:$0xf]  ;;  %3142 = vmatpush.bf16.msrb.mxu3 %v5388_v31 }
 0x292   : > { %2642 = vmatmul.bf16.gmra.mxu1 %v10135_v20  ;;  %2731 = vmatmul.bf16.gmra.mxu2 %v10136_v61  ;;  %v7918_v45 = vpack.c.bf16 %v4403_v15, %v4399_v9  ;;  %v5893_v15 = vld [vmem:[%s9735_s1 + $0x570] sm:$0xf0] }
 0x293   : > { %2820 = vmatmul.bf16.gmra.mxu3 %v10138_v51  ;;  %v5896_v42 = vor.u32 %v6351_v37, %v5893_v15 }
 0x294   : > { %10137 = vst [vmem:[#allocation90_spill] sm:$0xff] %v7918_v45 }
 0x295   : > { %v2416_v63 = vpop.f32.mrf.mxu2  ;;  %2875 = vmatpush.bf16.msrb.mxu0 %v5896_v42 }
 0x296   : > { %v2417_v53 = vadd.f32 %v2416_v63, %v2328_v34  ;;  %v7939_v9 = vpop.f32.mrf.mxu3  ;;  %v2240_v45 = vpop.f32.mrf.mxu0 }
 0x297   : > { %v2241_v39 = vadd.f32 %v2240_v45, %v10139_v11  ;;  %v2329_v51 = vpop.f32.mrf.mxu1  ;;  %v10142_v45 = vld [vmem:[#allocation33_spill] sm:$0xff] }
 0x298   : > { %v4407_v15 = vmax.f32 %v2417_v53, 0.0 }
 0x299   : > { %v2330_v61 = vadd.f32 %v2329_v51, %v2241_v39  ;;  %v10144_v51 = vld [vmem:[#allocation91_spill] sm:$0xff] }
 0x29d   : > { %v2418_v20 = vpop.f32.mrf.mxu2 }
 0x29e   : > { %v2419_v1 = vadd.f32 %v2418_v20, %v2330_v61  ;;  %v7942_v52 = vpop.f32.mrf.mxu3  ;;  %v2243_v8 = vpop.f32.mrf.mxu0 }
 0x29f   : > { %v2244_v5 = vadd.f32 %v2243_v8, %v7490_v59  ;;  %v2332_v37 = vpop.f32.mrf.mxu1 }
 0x2a0   : > { %v4411_v34 = vmax.f32 %v2419_v1, 0.0  ;;  %v7957_v1 = vld [vmem:[%s9736_s2] sm:$0xf] }
 0x2a1   : > { %v2333_v18 = vadd.f32 %v2332_v37, %v2244_v5  ;;  %2558 = vmatmul.bf16.gmra.mxu0 %v10140_v50  ;;  %10145 = vst [vmem:[#allocation129_spill] sm:$0xff] %v7957_v1  ;;  %v7960_v5 = vperm.slane %v7957_v1, 1 }
 0x2a2   : > { %2647 = vmatmul.bf16.gmra.mxu1 %v10141_v32  ;;  %2736 = vmatmul.bf16.gmra.mxu2 %v10142_v45  ;;  %v7948_v63 = vpack.c.bf16 %v4411_v34, %v4407_v15  ;;  %v10148_v45 = vld [vmem:[#allocation36_spill] sm:$0xff]  ;;  %v10149_v32 = vld [vmem:[#allocation37_spill] sm:$0xff] }
 0x2a3   : > { %2825 = vmatmul.bf16.gmra.mxu3 %v10144_v51  ;;  %v2436_v11 = vadd.f32 %v7530_v21, %v7960_v5  ;;  %v10147_v51 = vld [vmem:[#allocation35_spill] sm:$0xff] }
 0x2a4   : > { %10143 = vst [vmem:[#allocation94_spill] sm:$0xff] %v7948_v63  ;;  %v5243_v21 = vld [vmem:[%s9735_s1 + $0x48] sm:$0xf] }
 0x2a5   : > { %v2421_v20 = vpop.f32.mrf.mxu2 }
 0x2a6   : > { %v2422_v61 = vadd.f32 %v2421_v20, %v2333_v18  ;;  %v7951_v42 = vpop.f32.mrf.mxu3  ;;  %v2245_v31 = vpop.f32.mrf.mxu0 }
 0x2a7   : > { %v2246_v8 = vadd.f32 %v2245_v31, %v7505_v58  ;;  %v2334_v59 = vpop.f32.mrf.mxu1 }
 0x2a8   : > { %v4415_v20 = vmax.f32 %v2422_v61, 0.0  ;;  %v6190_v61 = vld [vmem:[%s9735_s1 + $0x54] sm:$0xf0] }
 0x2a9   : > { %v2335_v53 = vadd.f32 %v2334_v59, %v2246_v8  ;;  %v6347_v59 = vld [vmem:[%s9735_s1 + $0x544] sm:$0xf] }
 0x2ad   : > { %v2423_v39 = vpop.f32.mrf.mxu2 }
 0x2ae   : > { %v2424_v37 = vadd.f32 %v2423_v39, %v2335_v53  ;;  %v7964_v15 = vpop.f32.mrf.mxu3  ;;  %v2524_v34 = vpop.f32.mrf.mxu0  ;;  %v5244_v53 = vor.u32 %v6190_v61, %v5243_v21  ;;  %v5371_v39 = vld [vmem:[%s9735_s1 + $0x148] sm:$0xf] }
 0x2af   : > { %10146 = vst [vmem:[#allocation130_spill] sm:$0xff] %v7964_v15  ;;  %v2525_v18 = vadd.f32 %v2524_v34, %v2436_v11  ;;  %v2613_v58 = vpop.f32.mrf.mxu1  ;;  %v5877_v11 = vld [vmem:[%s9735_s1 + $0x550] sm:$0xf0]  ;;  %v2438_v34 = vadd.f32 %v7547_v24, %v7960_v5 }
 0x2b0   : > { %v4419_v31 = vmax.f32 %v2424_v37, 0.0  ;;  %v6222_v37 = vld [vmem:[%s9735_s1 + $0x154] sm:$0xf0]  ;;  %3054 = vmatpush.bf16.msrb.mxu2 %v5244_v53  ;;  %v10151_v53 = vld [vmem:[#allocation39_spill] sm:$0xff] }
 0x2b1   : > { %v2614_v63 = vadd.f32 %v2613_v58, %v2525_v18  ;;  %2563 = vmatmul.bf16.gmra.mxu0 %v10147_v51  ;;  %v5880_v58 = vor.u32 %v6347_v59, %v5877_v11  ;;  %v2441_v51 = vadd.f32 %v7561_v0, %v7960_v5 }
 0x2b2   : > { %2652 = vmatmul.bf16.gmra.mxu1 %v10148_v45  ;;  %2741 = vmatmul.bf16.gmra.mxu2 %v10149_v32  ;;  %v7969_v8 = vpack.c.bf16 %v4419_v31, %v4415_v20  ;;  %v5372_v20 = vor.u32 %v6222_v37, %v5371_v39  ;;  %v10152_v37 = vld [vmem:[#allocation40_spill] sm:$0xff] }
 0x2b3   : > { %2830 = vmatmul.bf16.gmra.mxu3 %v7498_v48  ;;  %2876 = vmatpush.bf16.msrb.mxu0 %v5880_v58  ;;  %v2446_v58 = vadd.f32 %v7604_v14, %v7960_v5  ;;  %v5227_v14 = vld [vmem:[%s9735_s1 + $0x28] sm:$0xf] }
 0x2b4   : > { %10150 = vst [vmem:[#allocation131_spill] sm:$0xff] %v7969_v8  ;;  %3143 = vmatpush.bf16.msrb.mxu3 %v5372_v20 }
 0x2b5   : > { %v2702_v18 = vpop.f32.mrf.mxu2 }
 0x2b6   : > { %v2703_v31 = vadd.f32 %v2702_v18, %v2614_v63  ;;  %v2791_v21 = vpop.f32.mrf.mxu3  ;;  %v2526_v61 = vpop.f32.mrf.mxu0 }
 0x2b7   : > { %v2527_v8 = vadd.f32 %v2526_v61, %v2438_v34  ;;  %v2615_v48 = vpop.f32.mrf.mxu1  ;;  %v10153_v34 = vld [vmem:[#allocation41_spill] sm:$0xff] }
 0x2b8   : > { %v7992_v32 = vadd.f32 %v2791_v21, %v2703_v31 }
 0x2b9   : > { %v2616_v45 = vadd.f32 %v2615_v48, %v2527_v8  ;;  %v2443_v48 = vadd.f32 %v7572_v41, %v7960_v5 }
 0x2bd   : > { %v2704_v1 = vpop.f32.mrf.mxu2 }
 0x2be   : > { %v2705_v15 = vadd.f32 %v2704_v1, %v2616_v45  ;;  %v2793_v24 = vpop.f32.mrf.mxu3  ;;  %v2529_v50 = vpop.f32.mrf.mxu0 }
 0x2bf   : > { %v2530_v59 = vadd.f32 %v2529_v50, %v2441_v51  ;;  %v2618_v11 = vpop.f32.mrf.mxu1 }
 0x2c0   : > { %v7996_v63 = vadd.f32 %v2793_v24, %v2705_v15 }
 0x2c1   : > { %v2619_v39 = vadd.f32 %v2618_v11, %v2530_v59  ;;  %2568 = vmatmul.bf16.gmra.mxu0 %v10151_v53 }
 0x2c2   : > { %2657 = vmatmul.bf16.gmra.mxu1 %v10152_v37  ;;  %2746 = vmatmul.bf16.gmra.mxu2 %v10153_v34 }
 0x2c3   : > { %2835 = vmatmul.bf16.gmra.mxu3 %v7545_v6 }
 0x2c5   : > { %v2707_v0 = vpop.f32.mrf.mxu2 }
 0x2c6   : > { %v2708_v45 = vadd.f32 %v2707_v0, %v2619_v39  ;;  %v2796_v1 = vpop.f32.mrf.mxu3  ;;  %v2531_v8 = vpop.f32.mrf.mxu0  ;;  %v10154_v39 = vld [vmem:[#allocation43_spill] sm:$0xff]  ;;  %v10155_v0 = vld [vmem:[#allocation44_spill] sm:$0xff] }
 0x2c7   : > { %v2532_v50 = vadd.f32 %v2531_v8, %v2443_v48  ;;  %v2620_v51 = vpop.f32.mrf.mxu1  ;;  %v10156_v48 = vld [vmem:[#allocation45_spill] sm:$0xff] }
 0x2c8   : > { %v8004_v15 = vadd.f32 %v2796_v1, %v2708_v45  ;;  %v6186_v45 = vld [vmem:[%s9735_s1 + $0x34] sm:$0xf0]  ;;  %v6343_v1 = vld [vmem:[%s9735_s1 + $0x524] sm:$0xf] }
 0x2c9   : > { %v2621_v18 = vadd.f32 %v2620_v51, %v2532_v50  ;;  %v5228_v8 = vor.u32 %v6186_v45, %v5227_v14  ;;  %v5861_v50 = vld [vmem:[%s9735_s1 + $0x530] sm:$0xf0]  ;;  %v5355_v51 = vld [vmem:[%s9735_s1 + $0x128] sm:$0xf] }
 0x2cb   : > { %3055 = vmatpush.bf16.msrb.mxu2 %v5228_v8  ;;  %v10157_v8 = vld [vmem:[#allocation47_spill] sm:$0xff] }
 0x2cd   : > { %v2709_v20 = vpop.f32.mrf.mxu2 }
 0x2ce   : > { %v2710_v31 = vadd.f32 %v2709_v20, %v2621_v18  ;;  %v2798_v21 = vpop.f32.mrf.mxu3  ;;  %v2534_v61 = vpop.f32.mrf.mxu0  ;;  %v6218_v18 = vld [vmem:[%s9735_s1 + $0x134] sm:$0xf0] }
 0x2cf   : > { %v2535_v24 = vadd.f32 %v2534_v61, %v2446_v58  ;;  %v2623_v59 = vpop.f32.mrf.mxu1  ;;  %v2448_v58 = vadd.f32 %v7621_v4, %v7960_v5 }
 0x2d0   : > { %v8008_v11 = vadd.f32 %v2798_v21, %v2710_v31  ;;  %v5864_v31 = vor.u32 %v6343_v1, %v5861_v50  ;;  %v5356_v21 = vor.u32 %v6218_v18, %v5355_v51  ;;  %v10158_v18 = vld [vmem:[#allocation48_spill] sm:$0xff] }
 0x2d1   : > { %v2624_v41 = vadd.f32 %v2623_v59, %v2535_v24  ;;  %2573 = vmatmul.bf16.gmra.mxu0 %v10154_v39 }
 0x2d2   : > { %2662 = vmatmul.bf16.gmra.mxu1 %v10155_v0  ;;  %2751 = vmatmul.bf16.gmra.mxu2 %v10156_v48  ;;  %v2451_v0 = vadd.f32 %v7635_v2, %v7960_v5  ;;  %v2453_v2 = vadd.f32 %v7646_v25, %v7960_v5 }
 0x2d3   : > { %2840 = vmatmul.bf16.gmra.mxu3 %v7570_v17  ;;  %2877 = vmatpush.bf16.msrb.mxu0 %v5864_v31 }
 0x2d4   : > { %3144 = vmatpush.bf16.msrb.mxu3 %v5356_v21 }
 0x2d5   : > { %v2712_v20 = vpop.f32.mrf.mxu2 }
 0x2d6   : > { %v2713_v61 = vadd.f32 %v2712_v20, %v2624_v41  ;;  %v2801_v24 = vpop.f32.mrf.mxu3  ;;  %v2536_v59 = vpop.f32.mrf.mxu0 }
 0x2d7   : > { %v2537_v14 = vadd.f32 %v2536_v59, %v2448_v58  ;;  %v2625_v45 = vpop.f32.mrf.mxu1  ;;  %v10159_v58 = vld [vmem:[#allocation49_spill] sm:$0xff] }
 0x2d8   : > { %v8034_v17 = vadd.f32 %v2801_v24, %v2713_v61  ;;  %v2456_v61 = vadd.f32 %v7678_v27, %v7960_v5  ;;  %v5211_v27 = vld [vmem:[%s9735_s1 + $0x8] sm:$0xf] }
 0x2d9   : > { %v2626_v48 = vadd.f32 %v2625_v45, %v2537_v14 }
 0x2dd   : > { %v2714_v6 = vpop.f32.mrf.mxu2 }
 0x2de   : > { %v2715_v34 = vadd.f32 %v2714_v6, %v2626_v48  ;;  %v2803_v4 = vpop.f32.mrf.mxu3  ;;  %v2539_v37 = vpop.f32.mrf.mxu0 }
 0x2df   : > { %v2540_v1 = vadd.f32 %v2539_v37, %v2451_v0  ;;  %v2628_v50 = vpop.f32.mrf.mxu1 }
 0x2e0   : > { %v8038_v41 = vadd.f32 %v2803_v4, %v2715_v34 }
 0x2e1   : > { %v2629_v51 = vadd.f32 %v2628_v50, %v2540_v1  ;;  %2578 = vmatmul.bf16.gmra.mxu0 %v10157_v8 }
 0x2e2   : > { %2667 = vmatmul.bf16.gmra.mxu1 %v10158_v18  ;;  %2756 = vmatmul.bf16.gmra.mxu2 %v10159_v58 }
 0x2e3   : > { %2845 = vmatmul.bf16.gmra.mxu3 %v7619_v16 }
 0x2e5   : > { %v2717_v20 = vpop.f32.mrf.mxu2 }
 0x2e6   : > { %v2718_v6 = vadd.f32 %v2717_v20, %v2629_v51  ;;  %v2806_v48 = vpop.f32.mrf.mxu3  ;;  %v2541_v31 = vpop.f32.mrf.mxu0  ;;  %v10160_v51 = vld [vmem:[#allocation51_spill] sm:$0xff]  ;;  %v10161_v20 = vld [vmem:[#allocation52_spill] sm:$0xff] }
 0x2e7   : > { %v2542_v37 = vadd.f32 %v2541_v31, %v2453_v2  ;;  %v2630_v0 = vpop.f32.mrf.mxu1  ;;  %v10162_v2 = vld [vmem:[#allocation53_spill] sm:$0xff] }
 0x2e8   : > { %v8046_v34 = vadd.f32 %v2806_v48, %v2718_v6  ;;  %v6182_v6 = vld [vmem:[%s9735_s1 + $0x14] sm:$0xf0]  ;;  %v6339_v48 = vld [vmem:[%s9735_s1 + $0x504] sm:$0xf] }
 0x2e9   : > { %v2631_v21 = vadd.f32 %v2630_v0, %v2542_v37  ;;  %v5212_v31 = vor.u32 %v6182_v6, %v5211_v27  ;;  %v5845_v37 = vld [vmem:[%s9735_s1 + $0x510] sm:$0xf0]  ;;  %v5339_v0 = vld [vmem:[%s9735_s1 + $0x108] sm:$0xf] }
 0x2eb   : > { %3056 = vmatpush.bf16.msrb.mxu2 %v5212_v31  ;;  %v10163_v31 = vld [vmem:[#allocation55_spill] sm:$0xff] }
 0x2ed   : > { %v2719_v24 = vpop.f32.mrf.mxu2 }
 0x2ee   : > { %v2720_v59 = vadd.f32 %v2719_v24, %v2631_v21  ;;  %v2808_v14 = vpop.f32.mrf.mxu3  ;;  %v2544_v45 = vpop.f32.mrf.mxu0  ;;  %v6214_v21 = vld [vmem:[%s9735_s1 + $0x114] sm:$0xf0] }
 0x2ef   : > { %v2545_v4 = vadd.f32 %v2544_v45, %v2456_v61  ;;  %v2633_v1 = vpop.f32.mrf.mxu1  ;;  %v2458_v61 = vadd.f32 %v7695_v19, %v7960_v5 }
 0x2f0   : > { %v8050_v50 = vadd.f32 %v2808_v14, %v2720_v59  ;;  %v5848_v59 = vor.u32 %v6339_v48, %v5845_v37  ;;  %v5340_v14 = vor.u32 %v6214_v21, %v5339_v0  ;;  %v10164_v21 = vld [vmem:[#allocation56_spill] sm:$0xff] }
 0x2f1   : > { %v2634_v25 = vadd.f32 %v2633_v1, %v2545_v4  ;;  %2583 = vmatmul.bf16.gmra.mxu0 %v10160_v51 }
 0x2f2   : > { %2672 = vmatmul.bf16.gmra.mxu1 %v10161_v20  ;;  %2761 = vmatmul.bf16.gmra.mxu2 %v10162_v2  ;;  %v2461_v20 = vadd.f32 %v7709_v38, %v7960_v5  ;;  %v2463_v38 = vadd.f32 %v7720_v30, %v7960_v5 }
 0x2f3   : > { %2850 = vmatmul.bf16.gmra.mxu3 %v7644_v44  ;;  %2878 = vmatpush.bf16.msrb.mxu0 %v5848_v59 }
 0x2f4   : > { %3145 = vmatpush.bf16.msrb.mxu3 %v5340_v14 }
 0x2f5   : > { %v2722_v24 = vpop.f32.mrf.mxu2 }
 0x2f6   : > { %v2723_v45 = vadd.f32 %v2722_v24, %v2634_v25  ;;  %v2811_v4 = vpop.f32.mrf.mxu3  ;;  %v2546_v1 = vpop.f32.mrf.mxu0 }
 0x2f7   : > { %v2547_v27 = vadd.f32 %v2546_v1, %v2458_v61  ;;  %v2635_v6 = vpop.f32.mrf.mxu1  ;;  %v10165_v61 = vld [vmem:[#allocation57_spill] sm:$0xff] }
 0x2f8   : > { %v8076_v44 = vadd.f32 %v2811_v4, %v2723_v45  ;;  %v2466_v45 = vadd.f32 %v7752_v40, %v7960_v5  ;;  %v5835_v40 = vld [vmem:[%s9735_s1 + $0x4e8] sm:$0xf] }
 0x2f9   : > { %v2636_v2 = vadd.f32 %v2635_v6, %v2547_v27 }
 0x2fd   : > { %v2724_v16 = vpop.f32.mrf.mxu2 }
 0x2fe   : > { %v2725_v58 = vadd.f32 %v2724_v16, %v2636_v2  ;;  %v2813_v19 = vpop.f32.mrf.mxu3  ;;  %v2549_v18 = vpop.f32.mrf.mxu0 }
 0x2ff   : > { %v2550_v48 = vadd.f32 %v2549_v18, %v2461_v20  ;;  %v2638_v37 = vpop.f32.mrf.mxu1 }
 0x300   : > { %v8080_v25 = vadd.f32 %v2813_v19, %v2725_v58 }
 0x301   : > { %v2639_v0 = vadd.f32 %v2638_v37, %v2550_v48  ;;  %2588 = vmatmul.bf16.gmra.mxu0 %v10163_v31 }
 0x302   : > { %2677 = vmatmul.bf16.gmra.mxu1 %v10164_v21  ;;  %2766 = vmatmul.bf16.gmra.mxu2 %v10165_v61 }
 0x303   : > { %2855 = vmatmul.bf16.gmra.mxu3 %v7693_v36  ;;  %v10172_v36 = vld [vmem:[#allocation65_spill] sm:$0xff] }
 0x305   : > { %v2727_v24 = vpop.f32.mrf.mxu2 }
 0x306   : > { %v2728_v16 = vadd.f32 %v2727_v24, %v2639_v0  ;;  %v2816_v2 = vpop.f32.mrf.mxu3  ;;  %v2551_v59 = vpop.f32.mrf.mxu0  ;;  %v10166_v0 = vld [vmem:[#allocation59_spill] sm:$0xff]  ;;  %v10167_v24 = vld [vmem:[#allocation60_spill] sm:$0xff] }
 0x307   : > { %v2552_v18 = vadd.f32 %v2551_v59, %v2463_v38  ;;  %v2640_v20 = vpop.f32.mrf.mxu1  ;;  %v10168_v38 = vld [vmem:[#allocation61_spill] sm:$0xff]  ;;  %v5579_v59 = vld [vmem:[%s9735_s1 + $0x2e8] sm:$0xf] }
 0x308   : > { %v8088_v58 = vadd.f32 %v2816_v2, %v2728_v16  ;;  %v10169_v16 = vld [vmem:[#allocation118_spill] sm:$0xff]  ;;  %v6338_v2 = vld [vmem:[%s9735_s1 + $0x4f4] sm:$0xf0] }
 0x309   : > { %v2641_v14 = vadd.f32 %v2640_v20, %v2552_v18  ;;  %v5836_v18 = vor.u32 %v6338_v2, %v5835_v40  ;;  %v6274_v20 = vld [vmem:[%s9735_s1 + $0x2f4] sm:$0xf0] }
 0x30b   : > { %3405 = vmatpush.bf16.msra.mxu2 %v5836_v18 }
 0x30d   : > { %v2729_v4 = vpop.f32.mrf.mxu2 }
 0x30e   : > { %v2730_v1 = vadd.f32 %v2729_v4, %v2641_v14  ;;  %v2818_v27 = vpop.f32.mrf.mxu3  ;;  %v2554_v6 = vpop.f32.mrf.mxu0  ;;  %v5963_v14 = vld [vmem:[%s9735_s1 + $0x5e8] sm:$0xf]  ;;  %v2468_v4 = vadd.f32 %v7769_v35, %v7960_v5  ;;  %v6306_v35 = vld [vmem:[%s9735_s1 + $0x3f4] sm:$0xf0] }
 0x30f   : > { %v2555_v19 = vadd.f32 %v2554_v6, %v2466_v45  ;;  %v2643_v48 = vpop.f32.mrf.mxu1  ;;  %v6370_v45 = vld [vmem:[%s9735_s1 + $0x5f4] sm:$0xf0] }
 0x310   : > { %v8092_v37 = vadd.f32 %v2818_v27, %v2730_v1  ;;  %v5580_v27 = vor.u32 %v6274_v20, %v5579_v59  ;;  %v5964_v6 = vor.u32 %v6370_v45, %v5963_v14 }
 0x311   : > { %v2644_v30 = vadd.f32 %v2643_v48, %v2555_v19  ;;  %2593 = vmatmul.bf16.gmra.mxu0 %v10166_v0 }
 0x312   : > { %2682 = vmatmul.bf16.gmra.mxu1 %v10167_v24  ;;  %2771 = vmatmul.bf16.gmra.mxu2 %v10168_v38  ;;  %v5707_v24 = vld [vmem:[%s9735_s1 + $0x3e8] sm:$0xf] }
 0x313   : > { %2860 = vmatmul.bf16.gmra.mxu3 %v10169_v16  ;;  %3227 = vmatpush.bf16.msra.mxu0 %v5580_v27  ;;  %v5708_v20 = vor.u32 %v6306_v35, %v5707_v24 }
 0x314   : > { %3494 = vmatpush.bf16.msra.mxu3 %v5964_v6 }
 0x315   : > { %v2732_v1 = vpop.f32.mrf.mxu2  ;;  %3316 = vmatpush.bf16.msra.mxu1 %v5708_v20 }
 0x316   : > { %v2733_v19 = vadd.f32 %v2732_v1, %v2644_v30  ;;  %v2821_v48 = vpop.f32.mrf.mxu3  ;;  %v2556_v40 = vpop.f32.mrf.mxu0  ;;  %v2471_v30 = vadd.f32 %v7783_v60, %v7960_v5  ;;  %v2473_v60 = vadd.f32 %v7786_v43, %v7960_v5 }
 0x317   : > { %v2557_v2 = vadd.f32 %v2556_v40, %v2468_v4  ;;  %v2645_v16 = vpop.f32.mrf.mxu1  ;;  %v10171_v40 = vld [vmem:[#allocation64_spill] sm:$0xff] }
 0x318   : > { %v8118_v38 = vadd.f32 %v2821_v48, %v2733_v19  ;;  %v10170_v48 = vld [vmem:[#allocation63_spill] sm:$0xff] }
 0x319   : > { %v2646_v59 = vadd.f32 %v2645_v16, %v2557_v2 }
 0x31d   : > { %v2734_v18 = vpop.f32.mrf.mxu2 }
 0x31e   : > { %v2735_v14 = vadd.f32 %v2734_v18, %v2646_v59  ;;  %v2823_v45 = vpop.f32.mrf.mxu3  ;;  %v2559_v4 = vpop.f32.mrf.mxu0 }
 0x31f   : > { %v2560_v1 = vadd.f32 %v2559_v4, %v2471_v30  ;;  %v2648_v27 = vpop.f32.mrf.mxu1 }
 0x320   : > { %v8128_v6 = vadd.f32 %v2823_v45, %v2735_v14  ;;  %v2476_v14 = vadd.f32 %v7813_v54, %v7960_v5  ;;  %v5819_v54 = vld [vmem:[%s9735_s1 + $0x4c8] sm:$0xf] }
 0x321   : > { %v2649_v19 = vadd.f32 %v2648_v27, %v2560_v1  ;;  %2598 = vmatmul.bf16.gmra.mxu0 %v10170_v48 }
 0x322   : > { %2687 = vmatmul.bf16.gmra.mxu1 %v10171_v40  ;;  %2776 = vmatmul.bf16.gmra.mxu2 %v10172_v36 }
 0x323   : > { %2865 = vmatmul.bf16.gmra.mxu3 %v7767_v62 }
 0x325   : > { %v2737_v24 = vpop.f32.mrf.mxu2 }
 0x326   : > { %v2738_v16 = vadd.f32 %v2737_v24, %v2649_v19  ;;  %v2826_v2 = vpop.f32.mrf.mxu3  ;;  %v2561_v35 = vpop.f32.mrf.mxu0  ;;  %v10173_v19 = vld [vmem:[#allocation67_spill] sm:$0xff]  ;;  %v10174_v24 = vld [vmem:[#allocation68_spill] sm:$0xff] }
 0x327   : > { %v2562_v59 = vadd.f32 %v2561_v35, %v2473_v60  ;;  %v2650_v20 = vpop.f32.mrf.mxu1  ;;  %v10175_v60 = vld [vmem:[#allocation2_spill] sm:$0xff]  ;;  %v5947_v35 = vld [vmem:[%s9735_s1 + $0x5c8] sm:$0xf] }
 0x328   : > { %v8136_v30 = vadd.f32 %v2826_v2, %v2738_v16  ;;  %v6334_v16 = vld [vmem:[%s9735_s1 + $0x4d4] sm:$0xf0] }
 0x329   : > { %v2651_v18 = vadd.f32 %v2650_v20, %v2562_v59  ;;  %v6270_v2 = vld [vmem:[%s9735_s1 + $0x2d4] sm:$0xf0]  ;;  %v2478_v20 = vadd.f32 %v7816_v13, %v7960_v5 }
 0x32a   : > { %v6366_v59 = vld [vmem:[%s9735_s1 + $0x5d4] sm:$0xf0] }
 0x32b   : > { %v6302_v13 = vld [vmem:[%s9735_s1 + $0x3d4] sm:$0xf0] }
 0x32d   : > { %v2739_v45 = vpop.f32.mrf.mxu2 }
 0x32e   : > { %v2740_v4 = vadd.f32 %v2739_v45, %v2651_v18  ;;  %v2828_v1 = vpop.f32.mrf.mxu3  ;;  %v2564_v27 = vpop.f32.mrf.mxu0  ;;  %v5948_v45 = vor.u32 %v6366_v59, %v5947_v35 }
 0x32f   : > { %v2565_v62 = vadd.f32 %v2564_v27, %v2476_v14  ;;  %v2653_v36 = vpop.f32.mrf.mxu1 }
 0x330   : > { %v8140_v40 = vadd.f32 %v2828_v1, %v2740_v4  ;;  %3495 = vmatpush.bf16.msra.mxu3 %v5948_v45 }
 0x331   : > { %v2654_v43 = vadd.f32 %v2653_v36, %v2565_v62  ;;  %2879 = vmatmul.bf16.vlgmr.msrb.gmra.mxu0 %v10173_v19  ;;  %v5563_v36 = vld [vmem:[%s9735_s1 + $0x2c8] sm:$0xf]  ;;  %v5820_v62 = vor.u32 %v6334_v16, %v5819_v54 }
 0x332   : > { %6001 = vmatmul.msk.bf16.vlgmr.msrb.gmra.mxu1 %vm1754_vm0, %v10174_v24  ;;  %3057 = vmatmul.bf16.vlgmr.msrb.gmra.mxu2 %v10175_v60  ;;  %v5564_v14 = vor.u32 %v6270_v2, %v5563_v36  ;;  %v5691_v60 = vld [vmem:[%s9735_s1 + $0x3c8] sm:$0xf] }
 0x333   : > { %3146 = vmatmul.bf16.vlgmr.msrb.gmra.mxu3 %v6699_v49  ;;  %3406 = vmatpush.bf16.msra.mxu2 %v5820_v62  ;;  %v5692_v2 = vor.u32 %v6302_v13, %v5691_v60 }
 0x334   : > { %3228 = vmatpush.bf16.msra.mxu0 %v5564_v14 }
 0x335   : > { %v2742_v18 = vpop.f32.mrf.mxu2  ;;  %3317 = vmatpush.bf16.msra.mxu1 %v5692_v2 }
 0x336   : > { %v2743_v4 = vadd.f32 %v2742_v18, %v2654_v43  ;;  %v2831_v1 = vpop.f32.mrf.mxu3  ;;  %v2566_v27 = vpop.f32.mrf.mxu0  ;;  %v2481_v43 = vadd.f32 %v7825_v7, %v7960_v5  ;;  %v2483_v7 = vadd.f32 %v7828_v26, %v7960_v5 }
 0x337   : > { %v2567_v54 = vadd.f32 %v2566_v27, %v2478_v20  ;;  %v2655_v16 = vpop.f32.mrf.mxu1  ;;  %v10177_v27 = vld [vmem:[#allocation71_spill] sm:$0xff] }
 0x338   : > { %v8167_v49 = vadd.f32 %v2831_v1, %v2743_v4  ;;  %v10176_v1 = vld [vmem:[#allocation70_spill] sm:$0xff] }
 0x339   : > { %v2656_v36 = vadd.f32 %v2655_v16, %v2567_v54  ;;  %v10178_v54 = vld [vmem:[#allocation6_spill] sm:$0xff] }
 0x33d   : > { %v2744_v62 = vpop.f32.mrf.mxu2 }
 0x33e   : > { %v2745_v35 = vadd.f32 %v2744_v62, %v2656_v36  ;;  %v2833_v59 = vpop.f32.mrf.mxu3  ;;  %v2569_v20 = vpop.f32.mrf.mxu0 }
 0x33f   : > { %v2570_v18 = vadd.f32 %v2569_v20, %v2481_v43  ;;  %v2658_v14 = vpop.f32.mrf.mxu1 }
 0x340   : > { %v8177_v45 = vadd.f32 %v2833_v59, %v2745_v35  ;;  %v2486_v59 = vadd.f32 %v7855_v57, %v7960_v5  ;;  %v5803_v57 = vld [vmem:[%s9735_s1 + $0x4a8] sm:$0xf] }
 0x341   : > { %v2659_v4 = vadd.f32 %v2658_v14, %v2570_v18  ;;  %2884 = vmatmul.bf16.gmra.mxu0 %v10176_v1 }
 0x342   : > { %6002 = vmatmul.msk.bf16.gmra.mxu1 %vm1754_vm0, %v10177_v27  ;;  %3062 = vmatmul.bf16.gmra.mxu2 %v10178_v54 }
 0x343   : > { %3151 = vmatmul.bf16.gmra.mxu3 %v6739_v10 }
 0x345   : > { %v2747_v60 = vpop.f32.mrf.mxu2 }
 0x346   : > { %v2748_v16 = vadd.f32 %v2747_v60, %v2659_v4  ;;  %v2836_v13 = vpop.f32.mrf.mxu3  ;;  %v2571_v36 = vpop.f32.mrf.mxu0  ;;  %v10179_v4 = vld [vmem:[#allocation73_spill] sm:$0xff]  ;;  %v10180_v60 = vld [vmem:[#allocation74_spill] sm:$0xff] }
 0x347   : > { %v2572_v2 = vadd.f32 %v2571_v36, %v2483_v7  ;;  %v2660_v43 = vpop.f32.mrf.mxu1  ;;  %v10181_v7 = vld [vmem:[#allocation10_spill] sm:$0xff]  ;;  %v6362_v36 = vld [vmem:[%s9735_s1 + $0x5b4] sm:$0xf0] }
 0x348   : > { %v8186_v62 = vadd.f32 %v2836_v13, %v2748_v16  ;;  %v6266_v16 = vld [vmem:[%s9735_s1 + $0x2b4] sm:$0xf0]  ;;  %v5931_v13 = vld [vmem:[%s9735_s1 + $0x5a8] sm:$0xf] }
 0x349   : > { %v2661_v35 = vadd.f32 %v2660_v43, %v2572_v2  ;;  %v2488_v2 = vadd.f32 %v7858_v3, %v7960_v5  ;;  %v6298_v3 = vld [vmem:[%s9735_s1 + $0x3b4] sm:$0xf0] }
 0x34d   : > { %v2749_v20 = vpop.f32.mrf.mxu2 }
 0x34e   : > { %v2750_v18 = vadd.f32 %v2749_v20, %v2661_v35  ;;  %v2838_v14 = vpop.f32.mrf.mxu3  ;;  %v2574_v54 = vpop.f32.mrf.mxu0 }
 0x34f   : > { %v2575_v10 = vadd.f32 %v2574_v54, %v2486_v59  ;;  %v2663_v27 = vpop.f32.mrf.mxu1  ;;  %v6330_v54 = vld [vmem:[%s9735_s1 + $0x4b4] sm:$0xf0]  ;;  %v5932_v59 = vor.u32 %v6362_v36, %v5931_v13 }
 0x350   : > { %v8190_v24 = vadd.f32 %v2838_v14, %v2750_v18 }
 0x351   : > { %v2664_v26 = vadd.f32 %v2663_v27, %v2575_v10  ;;  %2889 = vmatmul.bf16.gmra.mxu0 %v10179_v4  ;;  %v5547_v10 = vld [vmem:[%s9735_s1 + $0x2a8] sm:$0xf]  ;;  %v5804_v27 = vor.u32 %v6330_v54, %v5803_v57  ;;  %3496 = vmatpush.bf16.msra.mxu3 %v5932_v59 }
 0x352   : > { %6003 = vmatmul.msk.bf16.gmra.mxu1 %vm1754_vm0, %v10180_v60  ;;  %3067 = vmatmul.bf16.gmra.mxu2 %v10181_v7  ;;  %v5548_v35 = vor.u32 %v6266_v16, %v5547_v10  ;;  %v5675_v7 = vld [vmem:[%s9735_s1 + $0x3a8] sm:$0xf] }
 0x353   : > { %3156 = vmatmul.bf16.gmra.mxu3 %v6759_v22  ;;  %3407 = vmatpush.bf16.msra.mxu2 %v5804_v27  ;;  %v5676_v16 = vor.u32 %v6298_v3, %v5675_v7 }
 0x354   : > { %3229 = vmatpush.bf16.msra.mxu0 %v5548_v35 }
 0x355   : > { %v2752_v43 = vpop.f32.mrf.mxu2  ;;  %3318 = vmatpush.bf16.msra.mxu1 %v5676_v16 }
 0x356   : > { %v2753_v20 = vadd.f32 %v2752_v43, %v2664_v26  ;;  %v2841_v18 = vpop.f32.mrf.mxu3  ;;  %v2576_v14 = vpop.f32.mrf.mxu0  ;;  %v2491_v26 = vadd.f32 %v7867_v46, %v7960_v5  ;;  %v2493_v46 = vadd.f32 %v7870_v55, %v7960_v5 }
 0x357   : > { %v2577_v57 = vadd.f32 %v2576_v14, %v2488_v2  ;;  %v2665_v54 = vpop.f32.mrf.mxu1  ;;  %v10183_v14 = vld [vmem:[#allocation77_spill] sm:$0xff] }
 0x358   : > { %v8217_v22 = vadd.f32 %v2841_v18, %v2753_v20  ;;  %v10182_v18 = vld [vmem:[#allocation76_spill] sm:$0xff] }
 0x359   : > { %v2666_v10 = vadd.f32 %v2665_v54, %v2577_v57  ;;  %v10184_v57 = vld [vmem:[#allocation14_spill] sm:$0xff] }
 0x35d   : > { %v2754_v27 = vpop.f32.mrf.mxu2 }
 0x35e   : > { %v2755_v13 = vadd.f32 %v2754_v27, %v2666_v10  ;;  %v2843_v36 = vpop.f32.mrf.mxu3  ;;  %v2579_v2 = vpop.f32.mrf.mxu0 }
 0x35f   : > { %v2580_v43 = vadd.f32 %v2579_v2, %v2491_v26  ;;  %v2668_v35 = vpop.f32.mrf.mxu1 }
 0x360   : > { %v8227_v59 = vadd.f32 %v2843_v36, %v2755_v13  ;;  %v2496_v36 = vadd.f32 %v7897_v29, %v7960_v5  ;;  %v5787_v29 = vld [vmem:[%s9735_s1 + $0x488] sm:$0xf] }
 0x361   : > { %v2669_v20 = vadd.f32 %v2668_v35, %v2580_v43  ;;  %2894 = vmatmul.bf16.gmra.mxu0 %v10182_v18 }
 0x362   : > { %6004 = vmatmul.msk.bf16.gmra.mxu1 %vm1754_vm0, %v10183_v14  ;;  %3072 = vmatmul.bf16.gmra.mxu2 %v10184_v57 }
 0x363   : > { %3161 = vmatmul.bf16.gmra.mxu3 %v10116_v56 }
 0x365   : > { %v2757_v7 = vpop.f32.mrf.mxu2 }
 0x366   : > { %v2758_v54 = vadd.f32 %v2757_v7, %v2669_v20  ;;  %v2846_v3 = vpop.f32.mrf.mxu3  ;;  %v2581_v10 = vpop.f32.mrf.mxu0  ;;  %v10185_v20 = vld [vmem:[#allocation80_spill] sm:$0xff]  ;;  %v10186_v7 = vld [vmem:[#allocation81_spill] sm:$0xff] }
 0x367   : > { %v2582_v16 = vadd.f32 %v2581_v10, %v2493_v46  ;;  %v2670_v26 = vpop.f32.mrf.mxu1  ;;  %v10187_v46 = vld [vmem:[#allocation18_spill] sm:$0xff]  ;;  %v6358_v10 = vld [vmem:[%s9735_s1 + $0x594] sm:$0xf0] }
 0x368   : > { %v8236_v27 = vadd.f32 %v2846_v3, %v2758_v54  ;;  %v6262_v54 = vld [vmem:[%s9735_s1 + $0x294] sm:$0xf0]  ;;  %v5915_v3 = vld [vmem:[%s9735_s1 + $0x588] sm:$0xf] }
 0x369   : > { %v2671_v13 = vadd.f32 %v2670_v26, %v2582_v16  ;;  %v2498_v16 = vadd.f32 %v7900_v12, %v7960_v5  ;;  %v6294_v12 = vld [vmem:[%s9735_s1 + $0x394] sm:$0xf0] }
 0x36d   : > { %v2759_v2 = vpop.f32.mrf.mxu2 }
 0x36e   : > { %v2760_v43 = vadd.f32 %v2759_v2, %v2671_v13  ;;  %v2848_v35 = vpop.f32.mrf.mxu3  ;;  %v2584_v57 = vpop.f32.mrf.mxu0 }
 0x36f   : > { %v2585_v56 = vadd.f32 %v2584_v57, %v2496_v36  ;;  %v2673_v14 = vpop.f32.mrf.mxu1  ;;  %v6326_v57 = vld [vmem:[%s9735_s1 + $0x494] sm:$0xf0]  ;;  %v5916_v36 = vor.u32 %v6358_v10, %v5915_v3 }
 0x370   : > { %v8240_v60 = vadd.f32 %v2848_v35, %v2760_v43 }
 0x371   : > { %v2674_v55 = vadd.f32 %v2673_v14, %v2585_v56  ;;  %2899 = vmatmul.bf16.gmra.mxu0 %v10185_v20  ;;  %v5531_v56 = vld [vmem:[%s9735_s1 + $0x288] sm:$0xf]  ;;  %v5788_v14 = vor.u32 %v6326_v57, %v5787_v29  ;;  %3497 = vmatpush.bf16.msra.mxu3 %v5916_v36 }
 0x372   : > { %6005 = vmatmul.msk.bf16.gmra.mxu1 %vm1754_vm0, %v10186_v7  ;;  %3077 = vmatmul.bf16.gmra.mxu2 %v10187_v46  ;;  %v5532_v13 = vor.u32 %v6262_v54, %v5531_v56  ;;  %v5659_v46 = vld [vmem:[%s9735_s1 + $0x388] sm:$0xf] }
 0x373   : > { %3166 = vmatmul.bf16.gmra.mxu3 %v10122_v28  ;;  %3408 = vmatpush.bf16.msra.mxu2 %v5788_v14  ;;  %v5660_v54 = vor.u32 %v6294_v12, %v5659_v46 }
 0x374   : > { %3230 = vmatpush.bf16.msra.mxu0 %v5532_v13 }
 0x375   : > { %v2762_v26 = vpop.f32.mrf.mxu2  ;;  %3319 = vmatpush.bf16.msra.mxu1 %v5660_v54 }
 0x376   : > { %v2763_v2 = vadd.f32 %v2762_v26, %v2674_v55  ;;  %v2851_v43 = vpop.f32.mrf.mxu3  ;;  %v2586_v35 = vpop.f32.mrf.mxu0  ;;  %v2501_v55 = vadd.f32 %v7909_v47, %v7960_v5  ;;  %v2503_v47 = vadd.f32 %v7912_v33, %v7960_v5 }
 0x377   : > { %v2587_v29 = vadd.f32 %v2586_v35, %v2498_v16  ;;  %v2675_v57 = vpop.f32.mrf.mxu1  ;;  %v10189_v35 = vld [vmem:[#allocation85_spill] sm:$0xff] }
 0x378   : > { %v8267_v28 = vadd.f32 %v2851_v43, %v2763_v2  ;;  %v10188_v43 = vld [vmem:[#allocation84_spill] sm:$0xff] }
 0x379   : > { %v2676_v56 = vadd.f32 %v2675_v57, %v2587_v29  ;;  %v10190_v29 = vld [vmem:[#allocation22_spill] sm:$0xff] }
 0x37d   : > { %v2764_v14 = vpop.f32.mrf.mxu2 }
 0x37e   : > { %v2765_v3 = vadd.f32 %v2764_v14, %v2676_v56  ;;  %v2853_v10 = vpop.f32.mrf.mxu3  ;;  %v2589_v16 = vpop.f32.mrf.mxu0 }
 0x37f   : > { %v2590_v26 = vadd.f32 %v2589_v16, %v2501_v55  ;;  %v2678_v13 = vpop.f32.mrf.mxu1 }
 0x380   : > { %v8277_v36 = vadd.f32 %v2853_v10, %v2765_v3  ;;  %v2506_v10 = vadd.f32 %v7939_v9, %v7960_v5  ;;  %v5771_v9 = vld [vmem:[%s9735_s1 + $0x468] sm:$0xf] }
 0x381   : > { %v2679_v2 = vadd.f32 %v2678_v13, %v2590_v26  ;;  %2904 = vmatmul.bf16.gmra.mxu0 %v10188_v43 }
 0x382   : > { %6006 = vmatmul.msk.bf16.gmra.mxu1 %vm1754_vm0, %v10189_v35  ;;  %3082 = vmatmul.bf16.gmra.mxu2 %v10190_v29 }
 0x383   : > { %3171 = vmatmul.bf16.gmra.mxu3 %v10128_v23 }
 0x385   : > { %v2767_v46 = vpop.f32.mrf.mxu2 }
 0x386   : > { %v2768_v57 = vadd.f32 %v2767_v46, %v2679_v2  ;;  %v2856_v12 = vpop.f32.mrf.mxu3  ;;  %v2591_v56 = vpop.f32.mrf.mxu0  ;;  %v10191_v2 = vld [vmem:[#allocation88_spill] sm:$0xff]  ;;  %v10192_v46 = vld [vmem:[#allocation89_spill] sm:$0xff] }
 0x387   : > { %v2592_v54 = vadd.f32 %v2591_v56, %v2503_v47  ;;  %v2680_v55 = vpop.f32.mrf.mxu1  ;;  %v10193_v47 = vld [vmem:[#allocation26_spill] sm:$0xff]  ;;  %v5899_v56 = vld [vmem:[%s9735_s1 + $0x568] sm:$0xf] }
 0x388   : > { %v8286_v14 = vadd.f32 %v2856_v12, %v2768_v57  ;;  %v10194_v57 = vld [vmem:[#allocation27_spill] sm:$0xff]  ;;  %v6258_v12 = vld [vmem:[%s9735_s1 + $0x274] sm:$0xf0] }
 0x389   : > { %v2681_v3 = vadd.f32 %v2680_v55, %v2592_v54  ;;  %v6354_v54 = vld [vmem:[%s9735_s1 + $0x574] sm:$0xf0]  ;;  %v2508_v55 = vadd.f32 %v7942_v52, %v7960_v5 }
 0x38a   : > { %v6290_v52 = vld [vmem:[%s9735_s1 + $0x374] sm:$0xf0] }
 0x38d   : > { %v2769_v16 = vpop.f32.mrf.mxu2 }
 0x38e   : > { %v2770_v26 = vadd.f32 %v2769_v16, %v2681_v3  ;;  %v2858_v13 = vpop.f32.mrf.mxu3  ;;  %v2594_v29 = vpop.f32.mrf.mxu0  ;;  %v5900_v16 = vor.u32 %v6354_v54, %v5899_v56 }
 0x38f   : > { %v2595_v23 = vadd.f32 %v2594_v29, %v2506_v10  ;;  %v2683_v35 = vpop.f32.mrf.mxu1  ;;  %v6322_v29 = vld [vmem:[%s9735_s1 + $0x474] sm:$0xf0] }
 0x390   : > { %v8290_v7 = vadd.f32 %v2858_v13, %v2770_v26  ;;  %3498 = vmatpush.bf16.msra.mxu3 %v5900_v16 }
 0x391   : > { %v2684_v33 = vadd.f32 %v2683_v35, %v2595_v23  ;;  %2909 = vmatmul.bf16.gmra.mxu0 %v10191_v2  ;;  %v5515_v23 = vld [vmem:[%s9735_s1 + $0x268] sm:$0xf]  ;;  %v5772_v35 = vor.u32 %v6322_v29, %v5771_v9 }
 0x392   : > { %6007 = vmatmul.msk.bf16.gmra.mxu1 %vm1754_vm0, %v10192_v46  ;;  %3087 = vmatmul.bf16.gmra.mxu2 %v10193_v47  ;;  %v5516_v10 = vor.u32 %v6258_v12, %v5515_v23  ;;  %v5643_v46 = vld [vmem:[%s9735_s1 + $0x368] sm:$0xf] }
 0x393   : > { %3176 = vmatmul.bf16.gmra.mxu3 %v10194_v57  ;;  %3409 = vmatpush.bf16.msra.mxu2 %v5772_v35  ;;  %v5644_v12 = vor.u32 %v6290_v52, %v5643_v46  ;;  %v10198_v46 = vld [vmem:[#allocation31_spill] sm:$0xff] }
 0x394   : > { %3231 = vmatpush.bf16.msra.mxu0 %v5516_v10 }
 0x395   : > { %v2772_v3 = vpop.f32.mrf.mxu2  ;;  %3320 = vmatpush.bf16.msra.mxu1 %v5644_v12 }
 0x396   : > { %v2773_v26 = vadd.f32 %v2772_v3, %v2684_v33  ;;  %v2861_v13 = vpop.f32.mrf.mxu3  ;;  %v2596_v9 = vpop.f32.mrf.mxu0  ;;  %v2511_v33 = vadd.f32 %v7951_v42, %v7960_v5  ;;  %v10199_v42 = vld [vmem:[#allocation130_spill] sm:$0xff] }
 0x397   : > { %v2597_v29 = vadd.f32 %v2596_v9, %v2508_v55  ;;  %v2685_v57 = vpop.f32.mrf.mxu1  ;;  %v10196_v9 = vld [vmem:[#allocation93_spill] sm:$0xff] }
 0x398   : > { %v8317_v47 = vadd.f32 %v2861_v13, %v2773_v26  ;;  %v10195_v13 = vld [vmem:[#allocation92_spill] sm:$0xff] }
 0x399   : > { %v2686_v23 = vadd.f32 %v2685_v57, %v2597_v29  ;;  %v10197_v57 = vld [vmem:[#allocation30_spill] sm:$0xff]  ;;  %v2513_v29 = vadd.f32 %v10199_v42, %v7960_v5  ;;  %v10200_v5 = vld [vmem:[#allocation96_spill] sm:$0xff] }
 0x39a   : > { %v10202_v42 = vld [vmem:[#allocation34_spill] sm:$0xff] }
 0x39d   : > { %v2774_v35 = vpop.f32.mrf.mxu2 }
 0x39e   : > { %v2775_v56 = vadd.f32 %v2774_v35, %v2686_v23  ;;  %v2863_v54 = vpop.f32.mrf.mxu3  ;;  %v2599_v55 = vpop.f32.mrf.mxu0 }
 0x39f   : > { %v2600_v3 = vadd.f32 %v2599_v55, %v2511_v33  ;;  %v2688_v10 = vpop.f32.mrf.mxu1 }
 0x3a0   : > { %v8327_v16 = vadd.f32 %v2863_v54, %v2775_v56 }
 0x3a1   : > { %v2689_v26 = vadd.f32 %v2688_v10, %v2600_v3  ;;  %2914 = vmatmul.bf16.gmra.mxu0 %v10195_v13 }
 0x3a2   : > { %6008 = vmatmul.msk.bf16.gmra.mxu1 %vm1754_vm0, %v10196_v9  ;;  %3092 = vmatmul.bf16.gmra.mxu2 %v10197_v57 }
 0x3a3   : > { %3181 = vmatmul.bf16.gmra.mxu3 %v10198_v46 }
 0x3a5   : > { %v2777_v52 = vpop.f32.mrf.mxu2 }
 0x3a6   : > { %v2778_v23 = vadd.f32 %v2777_v52, %v2689_v26  ;;  %v2866_v12 = vpop.f32.mrf.mxu3  ;;  %v2601_v33 = vpop.f32.mrf.mxu0  ;;  %v10201_v26 = vld [vmem:[#allocation97_spill] sm:$0xff] }
 0x3a7   : > { %v2602_v35 = vadd.f32 %v2601_v33, %v2513_v29  ;;  %v2690_v56 = vpop.f32.mrf.mxu1  ;;  %v10203_v29 = vld [vmem:[#allocation129_spill] sm:$0xff] }
 0x3a8   : > { %v8336_v54 = vadd.f32 %v2866_v12, %v2778_v23  ;;  %v8346_v52 = vperm.slane %v10203_v29, 2  ;;  %v10204_v23 = vld [vmem:[#allocation35_spill] sm:$0xff] }
 0x3a9   : > { %v2691_v55 = vadd.f32 %v2690_v56, %v2602_v35  ;;  %v5883_v12 = vld [vmem:[%s9735_s1 + $0x548] sm:$0xf]  ;;  %v6350_v56 = vld [vmem:[%s9735_s1 + $0x554] sm:$0xf0] }
 0x3aa   : > { %v5884_v29 = vor.u32 %v6350_v56, %v5883_v12 }
 0x3ac   : > { %3499 = vmatpush.bf16.msra.mxu3 %v5884_v29 }
 0x3ad   : > { %v2779_v3 = vpop.f32.mrf.mxu2 }
 0x3ae   : > { %v2780_v10 = vadd.f32 %v2779_v3, %v2691_v55  ;;  %v2868_v61 = vpop.f32.mrf.mxu3  ;;  %v2880_v9 = vpop.f32.mrf.mxu0 }
 0x3af   : > { %v2881_v57 = vadd.f32 %v2880_v9, %v7992_v32  ;;  %v2969_v21 = vpop.f32.mrf.mxu1  ;;  %v5755_v32 = vld [vmem:[%s9735_s1 + $0x448] sm:$0xf] }
 0x3b0   : > { %v8339_v46 = vadd.f32 %v2868_v61, %v2780_v10  ;;  %v5499_v9 = vld [vmem:[%s9735_s1 + $0x248] sm:$0xf] }
 0x3b1   : > { %v2970_v13 = vadd.f32 %v2969_v21, %v2881_v57  ;;  %2919 = vmatmul.bf16.gmra.mxu0 %v10200_v5  ;;  %v6318_v21 = vld [vmem:[%s9735_s1 + $0x454] sm:$0xf0] }
 0x3b2   : > { %6009 = vmatmul.msk.bf16.gmra.mxu1 %vm1754_vm0, %v10201_v26  ;;  %3097 = vmatmul.bf16.gmra.mxu2 %v10202_v42  ;;  %v5756_v61 = vor.u32 %v6318_v21, %v5755_v32  ;;  %v6254_v57 = vld [vmem:[%s9735_s1 + $0x254] sm:$0xf0] }
 0x3b3   : > { %3186 = vmatmul.bf16.gmra.mxu3 %v10204_v23  ;;  %v5500_v35 = vor.u32 %v6254_v57, %v5499_v9  ;;  %v5627_v9 = vld [vmem:[%s9735_s1 + $0x348] sm:$0xf]  ;;  %v6286_v57 = vld [vmem:[%s9735_s1 + $0x354] sm:$0xf0]  ;;  %v4296_v26 = vmax.f32 %v2970_v13, 0.0  ;;  %v10209_v13 = vld [vmem:[#allocation38_spill] sm:$0xff] }
 0x3b4   : > { %3410 = vmatpush.bf16.msra.mxu2 %v5756_v61  ;;  %v5628_v42 = vor.u32 %v6286_v57, %v5627_v9 }
 0x3b5   : > { %v3058_v33 = vpop.f32.mrf.mxu2  ;;  %3232 = vmatpush.bf16.msra.mxu0 %v5500_v35 }
 0x3b6   : > { %v3059_v55 = vadd.f32 %v3058_v33, %v8346_v52  ;;  %v3147_v3 = vpop.f32.mrf.mxu3  ;;  %v2882_v10 = vpop.f32.mrf.mxu0  ;;  %3321 = vmatpush.bf16.msra.mxu1 %v5628_v42 }
 0x3b7   : > { %v2883_v32 = vadd.f32 %v2882_v10, %v7996_v63  ;;  %v2971_v21 = vpop.f32.mrf.mxu1 }
 0x3b8   : > { %v8369_v23 = vadd.f32 %v3147_v3, %v3059_v55 }
 0x3b9   : > { %v2972_v33 = vadd.f32 %v2971_v21, %v2883_v32  ;;  %v10208_v32 = vld [vmem:[#allocation100_spill] sm:$0xff] }
 0x3ba   : > { %10205 = vst [vmem:[#allocation130_spill] sm:$0xff] %v8369_v23  ;;  %v10207_v23 = vld [vmem:[#allocation99_spill] sm:$0xff] }
 0x3bb   : > { %v4300_v61 = vmax.f32 %v2972_v33, 0.0 }
 0x3bd   : > { %v8377_v12 = vpack.c.bf16 %v4300_v61, %v4296_v26  ;;  %v3060_v63 = vpop.f32.mrf.mxu2 }
 0x3be   : > { %v3061_v35 = vadd.f32 %v3060_v63, %v8346_v52  ;;  %v3149_v56 = vpop.f32.mrf.mxu3  ;;  %v2885_v55 = vpop.f32.mrf.mxu0 }
 0x3bf   : > { %10206 = vst [vmem:[#allocation129_spill] sm:$0xff] %v8377_v12  ;;  %v2886_v3 = vadd.f32 %v2885_v55, %v8004_v15  ;;  %v2974_v10 = vpop.f32.mrf.mxu1 }
 0x3c0   : > { %v8381_v29 = vadd.f32 %v3149_v56, %v3061_v35 }
 0x3c1   : > { %v2975_v5 = vadd.f32 %v2974_v10, %v2886_v3  ;;  %2924 = vmatmul.bf16.gmra.mxu0 %v10207_v23 }
 0x3c2   : > { %6010 = vmatmul.msk.bf16.gmra.mxu1 %vm1754_vm0, %v10208_v32  ;;  %3102 = vmatmul.bf16.gmra.mxu2 %v10209_v13 }
 0x3c3   : > { %3191 = vmatmul.bf16.gmra.mxu3 %v10151_v53  ;;  %v4304_v63 = vmax.f32 %v2975_v5, 0.0  ;;  %v10213_v5 = vld [vmem:[#allocation42_spill] sm:$0xff] }
 0x3c5   : > { %v3063_v26 = vpop.f32.mrf.mxu2 }
 0x3c6   : > { %v3064_v42 = vadd.f32 %v3063_v26, %v8346_v52  ;;  %v3152_v21 = vpop.f32.mrf.mxu3  ;;  %v2887_v9 = vpop.f32.mrf.mxu0 }
 0x3c7   : > { %v2888_v15 = vadd.f32 %v2887_v9, %v8008_v11  ;;  %v2976_v57 = vpop.f32.mrf.mxu1  ;;  %v10211_v11 = vld [vmem:[#allocation103_spill] sm:$0xff]  ;;  %v6250_v9 = vld [vmem:[%s9735_s1 + $0x234] sm:$0xf0] }
 0x3c8   : > { %v8390_v33 = vadd.f32 %v3152_v21, %v3064_v42  ;;  %v10212_v42 = vld [vmem:[#allocation104_spill] sm:$0xff]  ;;  %v5739_v21 = vld [vmem:[%s9735_s1 + $0x428] sm:$0xf] }
 0x3c9   : > { %v2977_v61 = vadd.f32 %v2976_v57, %v2888_v15  ;;  %v5867_v15 = vld [vmem:[%s9735_s1 + $0x528] sm:$0xf] }
 0x3cb   : > { %v4308_v35 = vmax.f32 %v2977_v61, 0.0 }
 0x3cd   : > { %v3065_v56 = vpop.f32.mrf.mxu2  ;;  %v8392_v55 = vpack.c.bf16 %v4308_v35, %v4304_v63  ;;  %v6346_v63 = vld [vmem:[%s9735_s1 + $0x534] sm:$0xf0] }
 0x3ce   : > { %v3066_v3 = vadd.f32 %v3065_v56, %v8346_v52  ;;  %v3154_v10 = vpop.f32.mrf.mxu3  ;;  %v2890_v12 = vpop.f32.mrf.mxu0 }
 0x3cf   : > { %10210 = vst [vmem:[#allocation132_spill] sm:$0xff] %v8392_v55  ;;  %v2891_v53 = vadd.f32 %v2890_v12, %v8034_v17  ;;  %v2979_v26 = vpop.f32.mrf.mxu1  ;;  %v6314_v17 = vld [vmem:[%s9735_s1 + $0x434] sm:$0xf0] }
 0x3d0   : > { %v8396_v13 = vadd.f32 %v3154_v10, %v3066_v3  ;;  %v5740_v12 = vor.u32 %v6314_v17, %v5739_v21  ;;  %v5868_v10 = vor.u32 %v6346_v63, %v5867_v15 }
 0x3d1   : > { %v2980_v32 = vadd.f32 %v2979_v26, %v2891_v53  ;;  %2929 = vmatmul.bf16.gmra.mxu0 %v10211_v11  ;;  %v5483_v53 = vld [vmem:[%s9735_s1 + $0x228] sm:$0xf] }
 0x3d2   : > { %6011 = vmatmul.msk.bf16.gmra.mxu1 %vm1754_vm0, %v10212_v42  ;;  %3107 = vmatmul.bf16.gmra.mxu2 %v10213_v5  ;;  %v5484_v61 = vor.u32 %v6250_v9, %v5483_v53  ;;  %v5611_v53 = vld [vmem:[%s9735_s1 + $0x328] sm:$0xf]  ;;  %v6282_v9 = vld [vmem:[%s9735_s1 + $0x334] sm:$0xf0] }
 0x3d3   : > { %3196 = vmatmul.bf16.gmra.mxu3 %v10154_v39  ;;  %3411 = vmatpush.bf16.msra.mxu2 %v5740_v12  ;;  %v5612_v55 = vor.u32 %v6282_v9, %v5611_v53  ;;  %v4312_v39 = vmax.f32 %v2980_v32, 0.0  ;;  %v10215_v42 = vld [vmem:[#allocation107_spill] sm:$0xff]  ;;  %v10217_v32 = vld [vmem:[#allocation46_spill] sm:$0xff] }
 0x3d4   : > { %3233 = vmatpush.bf16.msra.mxu0 %v5484_v61  ;;  %3500 = vmatpush.bf16.msra.mxu3 %v5868_v10 }
 0x3d5   : > { %v3068_v57 = vpop.f32.mrf.mxu2  ;;  %3322 = vmatpush.bf16.msra.mxu1 %v5612_v55 }
 0x3d6   : > { %v3069_v35 = vadd.f32 %v3068_v57, %v8346_v52  ;;  %v3157_v56 = vpop.f32.mrf.mxu3  ;;  %v2892_v3 = vpop.f32.mrf.mxu0 }
 0x3d7   : > { %v2893_v26 = vadd.f32 %v2892_v3, %v8038_v41  ;;  %v2981_v21 = vpop.f32.mrf.mxu1 }
 0x3d8   : > { %v8423_v17 = vadd.f32 %v3157_v56, %v3069_v35 }
 0x3d9   : > { %v2982_v57 = vadd.f32 %v2981_v21, %v2893_v26  ;;  %v10216_v26 = vld [vmem:[#allocation108_spill] sm:$0xff] }
 0x3db   : > { %v4316_v12 = vmax.f32 %v2982_v57, 0.0 }
 0x3dd   : > { %v3070_v15 = vpop.f32.mrf.mxu2  ;;  %v8431_v41 = vpack.c.bf16 %v4316_v12, %v4312_v39 }
 0x3de   : > { %v3071_v61 = vadd.f32 %v3070_v15, %v8346_v52  ;;  %v3159_v63 = vpop.f32.mrf.mxu3  ;;  %v2895_v35 = vpop.f32.mrf.mxu0 }
 0x3df   : > { %10214 = vst [vmem:[#allocation133_spill] sm:$0xff] %v8431_v41  ;;  %v2896_v56 = vadd.f32 %v2895_v35, %v8046_v34  ;;  %v2984_v3 = vpop.f32.mrf.mxu1 }
 0x3e0   : > { %v8435_v10 = vadd.f32 %v3159_v63, %v3071_v61 }
 0x3e1   : > { %v2985_v5 = vadd.f32 %v2984_v3, %v2896_v56  ;;  %2934 = vmatmul.bf16.gmra.mxu0 %v10215_v42 }
 0x3e2   : > { %6012 = vmatmul.msk.bf16.gmra.mxu1 %vm1754_vm0, %v10216_v26  ;;  %3112 = vmatmul.bf16.gmra.mxu2 %v10217_v32 }
 0x3e3   : > { %3201 = vmatmul.bf16.gmra.mxu3 %v10157_v8  ;;  %v4320_v15 = vmax.f32 %v2985_v5, 0.0  ;;  %v10221_v5 = vld [vmem:[#allocation50_spill] sm:$0xff] }
 0x3e5   : > { %v3073_v39 = vpop.f32.mrf.mxu2 }
 0x3e6   : > { %v3074_v55 = vadd.f32 %v3073_v39, %v8346_v52  ;;  %v3162_v21 = vpop.f32.mrf.mxu3  ;;  %v2897_v53 = vpop.f32.mrf.mxu0 }
 0x3e7   : > { %v2898_v34 = vadd.f32 %v2897_v53, %v8050_v50  ;;  %v2986_v9 = vpop.f32.mrf.mxu1  ;;  %v10219_v50 = vld [vmem:[#allocation111_spill] sm:$0xff]  ;;  %v6246_v53 = vld [vmem:[%s9735_s1 + $0x214] sm:$0xf0] }
 0x3e8   : > { %v8444_v57 = vadd.f32 %v3162_v21, %v3074_v55  ;;  %v10220_v55 = vld [vmem:[#allocation112_spill] sm:$0xff]  ;;  %v5723_v21 = vld [vmem:[%s9735_s1 + $0x408] sm:$0xf] }
 0x3e9   : > { %v2987_v12 = vadd.f32 %v2986_v9, %v2898_v34  ;;  %v5851_v34 = vld [vmem:[%s9735_s1 + $0x508] sm:$0xf] }
 0x3eb   : > { %v4324_v61 = vmax.f32 %v2987_v12, 0.0 }
 0x3ed   : > { %v3075_v63 = vpop.f32.mrf.mxu2  ;;  %v8446_v35 = vpack.c.bf16 %v4324_v61, %v4320_v15  ;;  %v6342_v15 = vld [vmem:[%s9735_s1 + $0x514] sm:$0xf0] }
 0x3ee   : > { %v3076_v56 = vadd.f32 %v3075_v63, %v8346_v52  ;;  %v3164_v3 = vpop.f32.mrf.mxu3  ;;  %v2900_v41 = vpop.f32.mrf.mxu0 }
 0x3ef   : > { %10218 = vst [vmem:[#allocation134_spill] sm:$0xff] %v8446_v35  ;;  %v2901_v8 = vadd.f32 %v2900_v41, %v8076_v44  ;;  %v2989_v39 = vpop.f32.mrf.mxu1  ;;  %v6310_v44 = vld [vmem:[%s9735_s1 + $0x414] sm:$0xf0] }
 0x3f0   : > { %v8450_v32 = vadd.f32 %v3164_v3, %v3076_v56  ;;  %v5724_v41 = vor.u32 %v6310_v44, %v5723_v21  ;;  %v5852_v3 = vor.u32 %v6342_v15, %v5851_v34 }
 0x3f1   : > { %v2990_v26 = vadd.f32 %v2989_v39, %v2901_v8  ;;  %2939 = vmatmul.bf16.gmra.mxu0 %v10219_v50  ;;  %v5467_v8 = vld [vmem:[%s9735_s1 + $0x208] sm:$0xf] }
 0x3f2   : > { %6013 = vmatmul.msk.bf16.gmra.mxu1 %vm1754_vm0, %v10220_v55  ;;  %3117 = vmatmul.bf16.gmra.mxu2 %v10221_v5  ;;  %v5468_v12 = vor.u32 %v6246_v53, %v5467_v8  ;;  %v5595_v8 = vld [vmem:[%s9735_s1 + $0x308] sm:$0xf]  ;;  %v6278_v53 = vld [vmem:[%s9735_s1 + $0x314] sm:$0xf0] }
 0x3f3   : > { %3206 = vmatmul.bf16.gmra.mxu3 %v10160_v51  ;;  %3412 = vmatpush.bf16.msra.mxu2 %v5724_v41  ;;  %v5596_v35 = vor.u32 %v6278_v53, %v5595_v8  ;;  %v4328_v51 = vmax.f32 %v2990_v26, 0.0  ;;  %v10223_v55 = vld [vmem:[#allocation115_spill] sm:$0xff]  ;;  %v10225_v26 = vld [vmem:[#allocation54_spill] sm:$0xff] }
 0x3f4   : > { %3234 = vmatpush.bf16.msra.mxu0 %v5468_v12  ;;  %3501 = vmatpush.bf16.msra.mxu3 %v5852_v3 }
 0x3f5   : > { %v3078_v9 = vpop.f32.mrf.mxu2  ;;  %3323 = vmatpush.bf16.msra.mxu1 %v5596_v35 }
 0x3f6   : > { %v3079_v61 = vadd.f32 %v3078_v9, %v8346_v52  ;;  %v3167_v63 = vpop.f32.mrf.mxu3  ;;  %v2902_v56 = vpop.f32.mrf.mxu0 }
 0x3f7   : > { %v2903_v39 = vadd.f32 %v2902_v56, %v8080_v25  ;;  %v2991_v21 = vpop.f32.mrf.mxu1 }
 0x3f8   : > { %v8477_v44 = vadd.f32 %v3167_v63, %v3079_v61 }
 0x3f9   : > { %v2992_v9 = vadd.f32 %v2991_v21, %v2903_v39  ;;  %v10224_v39 = vld [vmem:[#allocation116_spill] sm:$0xff] }
 0x3fb   : > { %v4332_v41 = vmax.f32 %v2992_v9, 0.0 }
 0x3fd   : > { %v3080_v34 = vpop.f32.mrf.mxu2  ;;  %v8485_v25 = vpack.c.bf16 %v4332_v41, %v4328_v51 }
 0x3fe   : > { %v3081_v12 = vadd.f32 %v3080_v34, %v8346_v52  ;;  %v3169_v15 = vpop.f32.mrf.mxu3  ;;  %v2905_v61 = vpop.f32.mrf.mxu0 }
 0x3ff   : > { %10222 = vst [vmem:[#allocation135_spill] sm:$0xff] %v8485_v25  ;;  %v2906_v63 = vadd.f32 %v2905_v61, %v8088_v58  ;;  %v2994_v56 = vpop.f32.mrf.mxu1 }
 0x400   : > { %v8489_v3 = vadd.f32 %v3169_v15, %v3081_v12 }
 0x401   : > { %v2995_v5 = vadd.f32 %v2994_v56, %v2906_v63  ;;  %2944 = vmatmul.bf16.gmra.mxu0 %v10223_v55 }
 0x402   : > { %6014 = vmatmul.msk.bf16.gmra.mxu1 %vm1754_vm0, %v10224_v39  ;;  %3122 = vmatmul.bf16.gmra.mxu2 %v10225_v26 }
 0x403   : > { %3211 = vmatmul.bf16.gmra.mxu3 %v10163_v31  ;;  %v4336_v34 = vmax.f32 %v2995_v5, 0.0  ;;  %v10229_v5 = vld [vmem:[#allocation58_spill] sm:$0xff] }
 0x405   : > { %v3083_v51 = vpop.f32.mrf.mxu2 }
 0x406   : > { %v3084_v35 = vadd.f32 %v3083_v51, %v8346_v52  ;;  %v3172_v21 = vpop.f32.mrf.mxu3  ;;  %v2907_v8 = vpop.f32.mrf.mxu0 }
 0x407   : > { %v2908_v58 = vadd.f32 %v2907_v8, %v8092_v37  ;;  %v2996_v53 = vpop.f32.mrf.mxu1  ;;  %v10227_v37 = vld [vmem:[#allocation119_spill] sm:$0xff]  ;;  %v6374_v8 = vld [vmem:[%s9735_s1 + $0x614] sm:$0xf0] }
 0x408   : > { %v8498_v9 = vadd.f32 %v3172_v21, %v3084_v35  ;;  %v10228_v35 = vld [vmem:[#allocation120_spill] sm:$0xff]  ;;  %v6240_v21 = vld [vmem:[%s9735_s1 + $0x1ec] sm:$0xf] }
 0x409   : > { %v2997_v41 = vadd.f32 %v2996_v53, %v2908_v58  ;;  %v6272_v58 = vld [vmem:[%s9735_s1 + $0x2ec] sm:$0xf] }
 0x40b   : > { %v4340_v12 = vmax.f32 %v2997_v41, 0.0 }
 0x40d   : > { %v3085_v15 = vpop.f32.mrf.mxu2  ;;  %v8500_v61 = vpack.c.bf16 %v4340_v12, %v4336_v34  ;;  %v5581_v34 = vld [vmem:[%s9735_s1 + $0x2f8] sm:$0xf0] }
 0x40e   : > { %v3086_v63 = vadd.f32 %v3085_v15, %v8346_v52  ;;  %v3174_v56 = vpop.f32.mrf.mxu3  ;;  %v2910_v25 = vpop.f32.mrf.mxu0 }
 0x40f   : > { %10226 = vst [vmem:[#allocation136_spill] sm:$0xff] %v8500_v61  ;;  %v2911_v31 = vadd.f32 %v2910_v25, %v8118_v38  ;;  %v2999_v51 = vpop.f32.mrf.mxu1  ;;  %v5453_v38 = vld [vmem:[%s9735_s1 + $0x1f8] sm:$0xf0] }
 0x410   : > { %v8504_v26 = vadd.f32 %v3174_v56, %v3086_v63  ;;  %v5456_v25 = vor.u32 %v6240_v21, %v5453_v38  ;;  %v5584_v56 = vor.u32 %v6272_v58, %v5581_v34 }
 0x411   : > { %v3000_v39 = vadd.f32 %v2999_v51, %v2911_v31  ;;  %2949 = vmatmul.bf16.gmra.mxu0 %v10227_v37  ;;  %v5979_v31 = vld [vmem:[%s9735_s1 + $0x608] sm:$0xf] }
 0x412   : > { %6015 = vmatmul.msk.bf16.gmra.mxu1 %vm1754_vm0, %v10228_v35  ;;  %3127 = vmatmul.bf16.gmra.mxu2 %v10229_v5  ;;  %v5980_v41 = vor.u32 %v6374_v8, %v5979_v31  ;;  %v6208_v31 = vld [vmem:[%s9735_s1 + $0xec] sm:$0xf]  ;;  %v5325_v8 = vld [vmem:[%s9735_s1 + $0xf8] sm:$0xf0] }
 0x413   : > { %3216 = vmatmul.bf16.gmra.mxu3 %v10166_v0  ;;  %3761 = vmatpush.bf16.msrb.mxu2 %v5456_v25  ;;  %v5328_v61 = vor.u32 %v6208_v31, %v5325_v8  ;;  %v4344_v0 = vmax.f32 %v3000_v39, 0.0  ;;  %v10231_v35 = vld [vmem:[#allocation123_spill] sm:$0xff]  ;;  %v10233_v39 = vld [vmem:[#allocation62_spill] sm:$0xff] }
 0x414   : > { %3590 = vmatpush.bf16.msrb.mxu0 %v5980_v41  ;;  %3850 = vmatpush.bf16.msrb.mxu3 %v5584_v56 }
 0x415   : > { %v3088_v53 = vpop.f32.mrf.mxu2  ;;  %3672 = vmatpush.bf16.msrb.mxu1 %v5328_v61 }
 0x416   : > { %v3089_v12 = vadd.f32 %v3088_v53, %v8346_v52  ;;  %v3177_v15 = vpop.f32.mrf.mxu3  ;;  %v2912_v63 = vpop.f32.mrf.mxu0 }
 0x417   : > { %v2913_v51 = vadd.f32 %v2912_v63, %v8128_v6  ;;  %v3001_v21 = vpop.f32.mrf.mxu1 }
 0x418   : > { %v8531_v38 = vadd.f32 %v3177_v15, %v3089_v12 }
 0x419   : > { %v3002_v53 = vadd.f32 %v3001_v21, %v2913_v51  ;;  %v10232_v51 = vld [vmem:[#allocation124_spill] sm:$0xff] }
 0x41b   : > { %v4348_v25 = vmax.f32 %v3002_v53, 0.0 }
 0x41d   : > { %v3090_v58 = vpop.f32.mrf.mxu2  ;;  %v8539_v6 = vpack.c.bf16 %v4348_v25, %v4344_v0 }
 0x41e   : > { %v3091_v41 = vadd.f32 %v3090_v58, %v8346_v52  ;;  %v3179_v34 = vpop.f32.mrf.mxu3  ;;  %v2915_v12 = vpop.f32.mrf.mxu0 }
 0x41f   : > { %10230 = vst [vmem:[#allocation137_spill] sm:$0xff] %v8539_v6  ;;  %v2916_v15 = vadd.f32 %v2915_v12, %v8136_v30  ;;  %v3004_v63 = vpop.f32.mrf.mxu1 }
 0x420   : > { %v8543_v56 = vadd.f32 %v3179_v34, %v3091_v41 }
 0x421   : > { %v3005_v5 = vadd.f32 %v3004_v63, %v2916_v15  ;;  %2954 = vmatmul.bf16.gmra.mxu0 %v10231_v35 }
 0x422   : > { %6016 = vmatmul.msk.bf16.gmra.mxu1 %vm1754_vm0, %v10232_v51  ;;  %3132 = vmatmul.bf16.gmra.mxu2 %v10233_v39 }
 0x423   : > { %3221 = vmatmul.bf16.gmra.mxu3 %v10170_v48  ;;  %v4352_v58 = vmax.f32 %v3005_v5, 0.0  ;;  %v6236_v5 = vld [vmem:[%s9735_s1 + $0x1cc] sm:$0xf] }
 0x425   : > { %v3093_v0 = vpop.f32.mrf.mxu2 }
 0x426   : > { %v3094_v61 = vadd.f32 %v3093_v0, %v8346_v52  ;;  %v3182_v21 = vpop.f32.mrf.mxu3  ;;  %v2917_v31 = vpop.f32.mrf.mxu0 }
 0x427   : > { %v2918_v30 = vadd.f32 %v2917_v31, %v8140_v40  ;;  %v3006_v8 = vpop.f32.mrf.mxu1  ;;  %v10235_v40 = vld [vmem:[#allocation4_spill] sm:$0xff]  ;;  %v5565_v31 = vld [vmem:[%s9735_s1 + $0x2d8] sm:$0xf0] }
 0x428   : > { %v8552_v53 = vadd.f32 %v3182_v21, %v3094_v61  ;;  %v10236_v61 = vld [vmem:[#allocation5_spill] sm:$0xff]  ;;  %v10237_v21 = vld [vmem:[#allocation66_spill] sm:$0xff] }
 0x429   : > { %v3007_v25 = vadd.f32 %v3006_v8, %v2918_v30 }
 0x42b   : > { %v4356_v41 = vmax.f32 %v3007_v25, 0.0 }
 0x42d   : > { %v3095_v34 = vpop.f32.mrf.mxu2  ;;  %v8554_v12 = vpack.c.bf16 %v4356_v41, %v4352_v58 }
 0x42e   : > { %v3096_v15 = vadd.f32 %v3095_v34, %v8346_v52  ;;  %v3184_v63 = vpop.f32.mrf.mxu3  ;;  %v2920_v6 = vpop.f32.mrf.mxu0 }
 0x42f   : > { %10234 = vst [vmem:[#allocation138_spill] sm:$0xff] %v8554_v12  ;;  %v2921_v48 = vadd.f32 %v2920_v6, %v8167_v49  ;;  %v3009_v0 = vpop.f32.mrf.mxu1  ;;  %v5437_v49 = vld [vmem:[%s9735_s1 + $0x1d8] sm:$0xf0] }
 0x430   : > { %v8558_v39 = vadd.f32 %v3184_v63, %v3096_v15  ;;  %v5440_v6 = vor.u32 %v6236_v5, %v5437_v49  ;;  %v5309_v5 = vld [vmem:[%s9735_s1 + $0xd8] sm:$0xf0] }
 0x431   : > { %v3010_v51 = vadd.f32 %v3009_v0, %v2921_v48  ;;  %3235 = vmatmul.bf16.vlgmr.msra.gmra.mxu0 %v10235_v40  ;;  %v6268_v48 = vld [vmem:[%s9735_s1 + $0x2cc] sm:$0xf] }
 0x432   : > { %3324 = vmatmul.bf16.vlgmr.msra.gmra.mxu1 %v10236_v61  ;;  %3413 = vmatmul.bf16.vlgmr.msra.gmra.mxu2 %v10237_v21  ;;  %v5568_v8 = vor.u32 %v6268_v48, %v5565_v31  ;;  %v6204_v0 = vld [vmem:[%s9735_s1 + $0xcc] sm:$0xf]  ;;  %v10239_v61 = vld [vmem:[#allocation8_spill] sm:$0xff] }
 0x433   : > { %3502 = vmatmul.bf16.vlgmr.msra.gmra.mxu3 %v10173_v19  ;;  %3762 = vmatpush.bf16.msrb.mxu2 %v5440_v6  ;;  %v5312_v48 = vor.u32 %v6204_v0, %v5309_v5  ;;  %v4360_v31 = vmax.f32 %v3010_v51, 0.0  ;;  %v10241_v51 = vld [vmem:[#allocation69_spill] sm:$0xff] }
 0x434   : > { %3851 = vmatpush.bf16.msrb.mxu3 %v5568_v8 }
 0x435   : > { %v3098_v30 = vpop.f32.mrf.mxu2  ;;  %3673 = vmatpush.bf16.msrb.mxu1 %v5312_v48 }
 0x436   : > { %v3099_v25 = vadd.f32 %v3098_v30, %v8346_v52  ;;  %v3187_v58 = vpop.f32.mrf.mxu3  ;;  %v2922_v41 = vpop.f32.mrf.mxu0 }
 0x437   : > { %v2923_v34 = vadd.f32 %v2922_v41, %v8177_v45  ;;  %v3011_v15 = vpop.f32.mrf.mxu1 }
 0x438   : > { %v8578_v63 = vadd.f32 %v3187_v58, %v3099_v25 }
 0x439   : > { %v3012_v49 = vadd.f32 %v3011_v15, %v2923_v34  ;;  %v10240_v34 = vld [vmem:[#allocation9_spill] sm:$0xff] }
 0x43b   : > { %v4364_v30 = vmax.f32 %v3012_v49, 0.0 }
 0x43d   : > { %v3100_v6 = vpop.f32.mrf.mxu2  ;;  %v8586_v12 = vpack.c.bf16 %v4364_v30, %v4360_v31 }
 0x43e   : > { %v3101_v45 = vadd.f32 %v3100_v6, %v8346_v52  ;;  %v3189_v8 = vpop.f32.mrf.mxu3  ;;  %v2925_v25 = vpop.f32.mrf.mxu0 }
 0x43f   : > { %10238 = vst [vmem:[#allocation4_spill] sm:$0xff] %v8586_v12  ;;  %v2926_v58 = vadd.f32 %v2925_v25, %v8186_v62  ;;  %v3014_v41 = vpop.f32.mrf.mxu1 }
 0x440   : > { %v8590_v19 = vadd.f32 %v3189_v8, %v3101_v45 }
 0x441   : > { %v3015_v21 = vadd.f32 %v3014_v41, %v2926_v58  ;;  %3240 = vmatmul.bf16.gmra.mxu0 %v10239_v61 }
 0x442   : > { %3329 = vmatmul.bf16.gmra.mxu1 %v10240_v34  ;;  %3418 = vmatmul.bf16.gmra.mxu2 %v10241_v51 }
 0x443   : > { %3507 = vmatmul.bf16.gmra.mxu3 %v10176_v1  ;;  %v4368_v6 = vmax.f32 %v3015_v21, 0.0  ;;  %v6232_v21 = vld [vmem:[%s9735_s1 + $0x1ac] sm:$0xf] }
 0x445   : > { %v3103_v15 = vpop.f32.mrf.mxu2 }
 0x446   : > { %v3104_v0 = vadd.f32 %v3103_v15, %v8346_v52  ;;  %v3192_v5 = vpop.f32.mrf.mxu3  ;;  %v2927_v49 = vpop.f32.mrf.mxu0 }
 0x447   : > { %v2928_v48 = vadd.f32 %v2927_v49, %v8190_v24  ;;  %v3016_v62 = vpop.f32.mrf.mxu1  ;;  %v10243_v24 = vld [vmem:[#allocation12_spill] sm:$0xff]  ;;  %v5549_v49 = vld [vmem:[%s9735_s1 + $0x2b8] sm:$0xf0] }
 0x448   : > { %v8598_v31 = vadd.f32 %v3192_v5, %v3104_v0  ;;  %v10244_v0 = vld [vmem:[#allocation13_spill] sm:$0xff]  ;;  %v10245_v5 = vld [vmem:[#allocation72_spill] sm:$0xff] }
 0x449   : > { %v3017_v30 = vadd.f32 %v3016_v62, %v2928_v48 }
 0x44b   : > { %v4372_v45 = vmax.f32 %v3017_v30, 0.0 }
 0x44d   : > { %v3105_v8 = vpop.f32.mrf.mxu2  ;;  %v8600_v25 = vpack.c.bf16 %v4372_v45, %v4368_v6 }
 0x44e   : > { %v3106_v58 = vadd.f32 %v3105_v8, %v8346_v52  ;;  %v3194_v41 = vpop.f32.mrf.mxu3  ;;  %v2930_v12 = vpop.f32.mrf.mxu0 }
 0x44f   : > { %10242 = vst [vmem:[#allocation8_spill] sm:$0xff] %v8600_v25  ;;  %v2931_v1 = vadd.f32 %v2930_v12, %v8217_v22  ;;  %v3019_v15 = vpop.f32.mrf.mxu1  ;;  %v5421_v22 = vld [vmem:[%s9735_s1 + $0x1b8] sm:$0xf0] }
 0x450   : > { %v8604_v51 = vadd.f32 %v3194_v41, %v3106_v58  ;;  %v5424_v12 = vor.u32 %v6232_v21, %v5421_v22  ;;  %v5293_v21 = vld [vmem:[%s9735_s1 + $0xb8] sm:$0xf0] }
 0x451   : > { %v3020_v34 = vadd.f32 %v3019_v15, %v2931_v1  ;;  %3245 = vmatmul.bf16.gmra.mxu0 %v10243_v24  ;;  %v6264_v1 = vld [vmem:[%s9735_s1 + $0x2ac] sm:$0xf] }
 0x452   : > { %3334 = vmatmul.bf16.gmra.mxu1 %v10244_v0  ;;  %3423 = vmatmul.bf16.gmra.mxu2 %v10245_v5  ;;  %v5552_v62 = vor.u32 %v6264_v1, %v5549_v49  ;;  %v6200_v15 = vld [vmem:[%s9735_s1 + $0xac] sm:$0xf]  ;;  %v10247_v0 = vld [vmem:[#allocation16_spill] sm:$0xff] }
 0x453   : > { %3512 = vmatmul.bf16.gmra.mxu3 %v10179_v4  ;;  %3763 = vmatpush.bf16.msrb.mxu2 %v5424_v12  ;;  %v5296_v1 = vor.u32 %v6200_v15, %v5293_v21  ;;  %v4376_v49 = vmax.f32 %v3020_v34, 0.0  ;;  %v10249_v34 = vld [vmem:[#allocation75_spill] sm:$0xff] }
 0x454   : > { %3852 = vmatpush.bf16.msrb.mxu3 %v5552_v62 }
 0x455   : > { %v3108_v48 = vpop.f32.mrf.mxu2  ;;  %3674 = vmatpush.bf16.msrb.mxu1 %v5296_v1 }
 0x456   : > { %v3109_v30 = vadd.f32 %v3108_v48, %v8346_v52  ;;  %v3197_v6 = vpop.f32.mrf.mxu3  ;;  %v2932_v45 = vpop.f32.mrf.mxu0 }
 0x457   : > { %v2933_v8 = vadd.f32 %v2932_v45, %v8227_v59  ;;  %v3021_v58 = vpop.f32.mrf.mxu1 }
 0x458   : > { %v8624_v41 = vadd.f32 %v3197_v6, %v3109_v30 }
 0x459   : > { %v3022_v22 = vadd.f32 %v3021_v58, %v2933_v8  ;;  %v10248_v8 = vld [vmem:[#allocation17_spill] sm:$0xff] }
 0x45b   : > { %v4380_v48 = vmax.f32 %v3022_v22, 0.0 }
 0x45d   : > { %v3110_v12 = vpop.f32.mrf.mxu2  ;;  %v8632_v25 = vpack.c.bf16 %v4380_v48, %v4376_v49 }
 0x45e   : > { %v3111_v59 = vadd.f32 %v3110_v12, %v8346_v52  ;;  %v3199_v62 = vpop.f32.mrf.mxu3  ;;  %v2935_v30 = vpop.f32.mrf.mxu0 }
 0x45f   : > { %10246 = vst [vmem:[#allocation12_spill] sm:$0xff] %v8632_v25  ;;  %v2936_v6 = vadd.f32 %v2935_v30, %v8236_v27  ;;  %v3024_v45 = vpop.f32.mrf.mxu1 }
 0x460   : > { %v8636_v4 = vadd.f32 %v3199_v62, %v3111_v59 }
 0x461   : > { %v3025_v5 = vadd.f32 %v3024_v45, %v2936_v6  ;;  %3250 = vmatmul.bf16.gmra.mxu0 %v10247_v0 }
 0x462   : > { %3339 = vmatmul.bf16.gmra.mxu1 %v10248_v8  ;;  %3428 = vmatmul.bf16.gmra.mxu2 %v10249_v34 }
 0x463   : > { %3517 = vmatmul.bf16.gmra.mxu3 %v10182_v18  ;;  %v4384_v12 = vmax.f32 %v3025_v5, 0.0  ;;  %v6228_v5 = vld [vmem:[%s9735_s1 + $0x18c] sm:$0xf] }
 0x465   : > { %v3113_v58 = vpop.f32.mrf.mxu2 }
 0x466   : > { %v3114_v15 = vadd.f32 %v3113_v58, %v8346_v52  ;;  %v3202_v21 = vpop.f32.mrf.mxu3  ;;  %v2937_v22 = vpop.f32.mrf.mxu0 }
 0x467   : > { %v2938_v1 = vadd.f32 %v2937_v22, %v8240_v60  ;;  %v3026_v27 = vpop.f32.mrf.mxu1  ;;  %v10251_v60 = vld [vmem:[#allocation20_spill] sm:$0xff]  ;;  %v5533_v22 = vld [vmem:[%s9735_s1 + $0x298] sm:$0xf0] }
 0x468   : > { %v8644_v49 = vadd.f32 %v3202_v21, %v3114_v15  ;;  %v10252_v15 = vld [vmem:[#allocation21_spill] sm:$0xff]  ;;  %v10253_v21 = vld [vmem:[#allocation79_spill] sm:$0xff] }
 0x469   : > { %v3027_v48 = vadd.f32 %v3026_v27, %v2938_v1 }
 0x46b   : > { %v4388_v59 = vmax.f32 %v3027_v48, 0.0 }
 0x46d   : > { %v3115_v62 = vpop.f32.mrf.mxu2  ;;  %v8646_v30 = vpack.c.bf16 %v4388_v59, %v4384_v12 }
 0x46e   : > { %v3116_v6 = vadd.f32 %v3115_v62, %v8346_v52  ;;  %v3204_v45 = vpop.f32.mrf.mxu3  ;;  %v2940_v25 = vpop.f32.mrf.mxu0 }
 0x46f   : > { %10250 = vst [vmem:[#allocation16_spill] sm:$0xff] %v8646_v30  ;;  %v2941_v18 = vadd.f32 %v2940_v25, %v8267_v28  ;;  %v3029_v58 = vpop.f32.mrf.mxu1  ;;  %v5405_v28 = vld [vmem:[%s9735_s1 + $0x198] sm:$0xf0] }
 0x470   : > { %v8650_v34 = vadd.f32 %v3204_v45, %v3116_v6  ;;  %v5408_v25 = vor.u32 %v6228_v5, %v5405_v28  ;;  %v5277_v5 = vld [vmem:[%s9735_s1 + $0x98] sm:$0xf0] }
 0x471   : > { %v3030_v8 = vadd.f32 %v3029_v58, %v2941_v18  ;;  %3255 = vmatmul.bf16.gmra.mxu0 %v10251_v60  ;;  %v6260_v18 = vld [vmem:[%s9735_s1 + $0x28c] sm:$0xf] }
 0x472   : > { %3344 = vmatmul.bf16.gmra.mxu1 %v10252_v15  ;;  %3433 = vmatmul.bf16.gmra.mxu2 %v10253_v21  ;;  %v5536_v27 = vor.u32 %v6260_v18, %v5533_v22  ;;  %v6196_v58 = vld [vmem:[%s9735_s1 + $0x8c] sm:$0xf]  ;;  %v10255_v15 = vld [vmem:[#allocation24_spill] sm:$0xff] }
 0x473   : > { %3522 = vmatmul.bf16.gmra.mxu3 %v10185_v20  ;;  %3764 = vmatpush.bf16.msrb.mxu2 %v5408_v25  ;;  %v5280_v18 = vor.u32 %v6196_v58, %v5277_v5  ;;  %v4392_v22 = vmax.f32 %v3030_v8, 0.0  ;;  %v10257_v8 = vld [vmem:[#allocation83_spill] sm:$0xff] }
 0x474   : > { %3853 = vmatpush.bf16.msrb.mxu3 %v5536_v27 }
 0x475   : > { %v3118_v1 = vpop.f32.mrf.mxu2  ;;  %3675 = vmatpush.bf16.msrb.mxu1 %v5280_v18 }
 0x476   : > { %v3119_v48 = vadd.f32 %v3118_v1, %v8346_v52  ;;  %v3207_v12 = vpop.f32.mrf.mxu3  ;;  %v2942_v59 = vpop.f32.mrf.mxu0 }
 0x477   : > { %v2943_v62 = vadd.f32 %v2942_v59, %v8277_v36  ;;  %v3031_v6 = vpop.f32.mrf.mxu1 }
 0x478   : > { %v8670_v45 = vadd.f32 %v3207_v12, %v3119_v48 }
 0x479   : > { %v3032_v28 = vadd.f32 %v3031_v6, %v2943_v62  ;;  %v10256_v62 = vld [vmem:[#allocation25_spill] sm:$0xff] }
 0x47b   : > { %v4396_v1 = vmax.f32 %v3032_v28, 0.0 }
 0x47d   : > { %v3120_v25 = vpop.f32.mrf.mxu2  ;;  %v8678_v30 = vpack.c.bf16 %v4396_v1, %v4392_v22 }
 0x47e   : > { %v3121_v36 = vadd.f32 %v3120_v25, %v8346_v52  ;;  %v3209_v27 = vpop.f32.mrf.mxu3  ;;  %v2945_v48 = vpop.f32.mrf.mxu0 }
 0x47f   : > { %10254 = vst [vmem:[#allocation20_spill] sm:$0xff] %v8678_v30  ;;  %v2946_v12 = vadd.f32 %v2945_v48, %v8286_v14  ;;  %v3034_v59 = vpop.f32.mrf.mxu1 }
 0x480   : > { %v8682_v20 = vadd.f32 %v3209_v27, %v3121_v36 }
 0x481   : > { %v3035_v21 = vadd.f32 %v3034_v59, %v2946_v12  ;;  %3260 = vmatmul.bf16.gmra.mxu0 %v10255_v15 }
 0x482   : > { %3349 = vmatmul.bf16.gmra.mxu1 %v10256_v62  ;;  %3438 = vmatmul.bf16.gmra.mxu2 %v10257_v8 }
 0x483   : > { %3527 = vmatmul.bf16.gmra.mxu3 %v10188_v43  ;;  %v4400_v25 = vmax.f32 %v3035_v21, 0.0  ;;  %v6224_v21 = vld [vmem:[%s9735_s1 + $0x16c] sm:$0xf] }
 0x485   : > { %v3123_v6 = vpop.f32.mrf.mxu2 }
 0x486   : > { %v3124_v58 = vadd.f32 %v3123_v6, %v8346_v52  ;;  %v3212_v5 = vpop.f32.mrf.mxu3  ;;  %v2947_v28 = vpop.f32.mrf.mxu0 }
 0x487   : > { %v2948_v18 = vadd.f32 %v2947_v28, %v8290_v7  ;;  %v3036_v14 = vpop.f32.mrf.mxu1  ;;  %v10259_v7 = vld [vmem:[#allocation28_spill] sm:$0xff]  ;;  %v5517_v28 = vld [vmem:[%s9735_s1 + $0x278] sm:$0xf0] }
 0x488   : > { %v8690_v22 = vadd.f32 %v3212_v5, %v3124_v58  ;;  %v10260_v58 = vld [vmem:[#allocation29_spill] sm:$0xff]  ;;  %v10261_v5 = vld [vmem:[#allocation87_spill] sm:$0xff] }
 0x489   : > { %v3037_v1 = vadd.f32 %v3036_v14, %v2948_v18 }
 0x48b   : > { %v4404_v36 = vmax.f32 %v3037_v1, 0.0 }
 0x48d   : > { %v3125_v27 = vpop.f32.mrf.mxu2  ;;  %v8692_v48 = vpack.c.bf16 %v4404_v36, %v4400_v25 }
 0x48e   : > { %v3126_v12 = vadd.f32 %v3125_v27, %v8346_v52  ;;  %v3214_v59 = vpop.f32.mrf.mxu3  ;;  %v2950_v30 = vpop.f32.mrf.mxu0 }
 0x48f   : > { %10258 = vst [vmem:[#allocation24_spill] sm:$0xff] %v8692_v48  ;;  %v2951_v43 = vadd.f32 %v2950_v30, %v8317_v47  ;;  %v3039_v6 = vpop.f32.mrf.mxu1  ;;  %v5389_v47 = vld [vmem:[%s9735_s1 + $0x178] sm:$0xf0] }
 0x490   : > { %v8696_v8 = vadd.f32 %v3214_v59, %v3126_v12  ;;  %v5392_v30 = vor.u32 %v6224_v21, %v5389_v47  ;;  %v5261_v21 = vld [vmem:[%s9735_s1 + $0x78] sm:$0xf0] }
 0x491   : > { %v3040_v62 = vadd.f32 %v3039_v6, %v2951_v43  ;;  %3265 = vmatmul.bf16.gmra.mxu0 %v10259_v7  ;;  %v6256_v43 = vld [vmem:[%s9735_s1 + $0x26c] sm:$0xf] }
 0x492   : > { %3354 = vmatmul.bf16.gmra.mxu1 %v10260_v58  ;;  %3443 = vmatmul.bf16.gmra.mxu2 %v10261_v5  ;;  %v5520_v14 = vor.u32 %v6256_v43, %v5517_v28  ;;  %v6192_v6 = vld [vmem:[%s9735_s1 + $0x6c] sm:$0xf]  ;;  %v10264_v58 = vld [vmem:[#allocation32_spill] sm:$0xff] }
 0x493   : > { %3532 = vmatmul.bf16.gmra.mxu3 %v10191_v2  ;;  %3765 = vmatpush.bf16.msrb.mxu2 %v5392_v30  ;;  %v5264_v43 = vor.u32 %v6192_v6, %v5261_v21  ;;  %v4408_v28 = vmax.f32 %v3040_v62, 0.0  ;;  %v10266_v62 = vld [vmem:[#allocation91_spill] sm:$0xff] }
 0x494   : > { %3854 = vmatpush.bf16.msrb.mxu3 %v5520_v14 }
 0x495   : > { %v3128_v18 = vpop.f32.mrf.mxu2  ;;  %3676 = vmatpush.bf16.msrb.mxu1 %v5264_v43 }
 0x496   : > { %v3129_v1 = vadd.f32 %v3128_v18, %v8346_v52  ;;  %v3217_v25 = vpop.f32.mrf.mxu3  ;;  %v2952_v36 = vpop.f32.mrf.mxu0 }
 0x497   : > { %v2953_v27 = vadd.f32 %v2952_v36, %v8327_v16  ;;  %v3041_v12 = vpop.f32.mrf.mxu1 }
 0x498   : > { %v8716_v59 = vadd.f32 %v3217_v25, %v3129_v1 }
 0x499   : > { %v3042_v47 = vadd.f32 %v3041_v12, %v2953_v27  ;;  %v10265_v27 = vld [vmem:[#allocation33_spill] sm:$0xff]  ;;  %v10267_v12 = vld [vmem:[#allocation92_spill] sm:$0xff] }
 0x49b   : > { %v4412_v18 = vmax.f32 %v3042_v47, 0.0 }
 0x49d   : > { %v3130_v30 = vpop.f32.mrf.mxu2  ;;  %v8724_v48 = vpack.c.bf16 %v4412_v18, %v4408_v28 }
 0x49e   : > { %v3131_v16 = vadd.f32 %v3130_v30, %v8346_v52  ;;  %v3219_v14 = vpop.f32.mrf.mxu3  ;;  %v2955_v1 = vpop.f32.mrf.mxu0 }
 0x49f   : > { %10262 = vst [vmem:[#allocation28_spill] sm:$0xff] %v8724_v48  ;;  %v2956_v25 = vadd.f32 %v2955_v1, %v8336_v54  ;;  %v3044_v36 = vpop.f32.mrf.mxu1 }
 0x4a0   : > { %v8728_v2 = vadd.f32 %v3219_v14, %v3131_v16 }
 0x4a1   : > { %v3045_v5 = vadd.f32 %v3044_v36, %v2956_v25  ;;  %3270 = vmatmul.bf16.gmra.mxu0 %v10264_v58 }
 0x4a2   : > { %10263 = vst [vmem:[#allocation139_spill] sm:$0xff] %v8728_v2  ;;  %3359 = vmatmul.bf16.gmra.mxu1 %v10265_v27  ;;  %3448 = vmatmul.bf16.gmra.mxu2 %v10266_v62  ;;  %v10269_v62 = vld [vmem:[#allocation130_spill] sm:$0xff] }
 0x4a3   : > { %3537 = vmatmul.bf16.gmra.mxu3 %v10267_v12  ;;  %v4416_v16 = vmax.f32 %v3045_v5, 0.0  ;;  %v10273_v5 = vld [vmem:[#allocation96_spill] sm:$0xff] }
 0x4a5   : > { %v3133_v6 = vpop.f32.mrf.mxu2 }
 0x4a6   : > { %v3134_v21 = vadd.f32 %v3133_v6, %v8346_v52  ;;  %v3222_v47 = vpop.f32.mrf.mxu3  ;;  %v2957_v43 = vpop.f32.mrf.mxu0 }
 0x4a7   : > { %v2958_v28 = vadd.f32 %v2957_v43, %v8339_v46  ;;  %v3046_v54 = vpop.f32.mrf.mxu1  ;;  %v10270_v46 = vld [vmem:[#allocation36_spill] sm:$0xff] }
 0x4a8   : > { %v8736_v18 = vadd.f32 %v3222_v47, %v3134_v21  ;;  %v10271_v21 = vld [vmem:[#allocation37_spill] sm:$0xff]  ;;  %v10272_v47 = vld [vmem:[#allocation95_spill] sm:$0xff] }
 0x4a9   : > { %v3047_v30 = vadd.f32 %v3046_v54, %v2958_v28 }
 0x4ab   : > { %v4420_v14 = vmax.f32 %v3047_v30, 0.0 }
 0x4ad   : > { %v3135_v1 = vpop.f32.mrf.mxu2  ;;  %v8738_v25 = vpack.c.bf16 %v4420_v14, %v4416_v16 }
 0x4ae   : > { %v3136_v36 = vadd.f32 %v3135_v1, %v8346_v52  ;;  %v3224_v48 = vpop.f32.mrf.mxu3  ;;  %v3236_v12 = vpop.f32.mrf.mxu0  ;;  %v6220_v52 = vld [vmem:[%s9735_s1 + $0x14c] sm:$0xf] }
 0x4af   : > { %10268 = vst [vmem:[#allocation140_spill] sm:$0xff] %v8738_v25  ;;  %v3237_v27 = vadd.f32 %v3236_v12, %v10269_v62  ;;  %v3325_v6 = vpop.f32.mrf.mxu1  ;;  %v5373_v62 = vld [vmem:[%s9735_s1 + $0x158] sm:$0xf0] }
 0x4b0   : > { %v8742_v58 = vadd.f32 %v3224_v48, %v3136_v36  ;;  %v6252_v48 = vld [vmem:[%s9735_s1 + $0x24c] sm:$0xf]  ;;  %v5501_v12 = vld [vmem:[%s9735_s1 + $0x258] sm:$0xf0] }
 0x4b1   : > { %v3326_v2 = vadd.f32 %v3325_v6, %v3237_v27  ;;  %3275 = vmatmul.bf16.gmra.mxu0 %v10270_v46  ;;  %v5376_v27 = vor.u32 %v6220_v52, %v5373_v62  ;;  %v5504_v28 = vor.u32 %v6252_v48, %v5501_v12  ;;  %v6188_v6 = vld [vmem:[%s9735_s1 + $0x4c] sm:$0xf]  ;;  %v5245_v52 = vld [vmem:[%s9735_s1 + $0x58] sm:$0xf0] }
 0x4b2   : > { %3364 = vmatmul.bf16.gmra.mxu1 %v10271_v21  ;;  %3453 = vmatmul.bf16.gmra.mxu2 %v10272_v47  ;;  %v5248_v48 = vor.u32 %v6188_v6, %v5245_v52  ;;  %v10275_v25 = vld [vmem:[#allocation41_spill] sm:$0xff]  ;;  %v10277_v47 = vld [vmem:[#allocation44_spill] sm:$0xff] }
 0x4b3   : > { %3542 = vmatmul.bf16.gmra.mxu3 %v10273_v5  ;;  %3766 = vmatpush.bf16.msrb.mxu2 %v5376_v27  ;;  %v10276_v5 = vld [vmem:[#allocation98_spill] sm:$0xff] }
 0x4b4   : > { %3855 = vmatpush.bf16.msrb.mxu3 %v5504_v28  ;;  %3677 = vmatpush.bf16.msrb.mxu1 %v5248_v48 }
 0x4b5   : > { %v3414_v43 = vpop.f32.mrf.mxu2 }
 0x4b6   : > { %v3415_v54 = vadd.f32 %v3414_v43, %v3326_v2  ;;  %v3503_v30 = vpop.f32.mrf.mxu3  ;;  %v3238_v16 = vpop.f32.mrf.mxu0 }
 0x4b7   : > { %v3239_v14 = vadd.f32 %v3238_v16, %v8381_v29  ;;  %v3327_v1 = vpop.f32.mrf.mxu1  ;;  %v10274_v16 = vld [vmem:[#allocation40_spill] sm:$0xff] }
 0x4b8   : > { %v8761_v36 = vadd.f32 %v3503_v30, %v3415_v54 }
 0x4b9   : > { %v3328_v62 = vadd.f32 %v3327_v1, %v3239_v14 }
 0x4bd   : > { %v3416_v2 = vpop.f32.mrf.mxu2 }
 0x4be   : > { %v3417_v12 = vadd.f32 %v3416_v2, %v3328_v62  ;;  %v3505_v27 = vpop.f32.mrf.mxu3  ;;  %v3241_v43 = vpop.f32.mrf.mxu0 }
 0x4bf   : > { %v3242_v29 = vadd.f32 %v3241_v43, %v8390_v33  ;;  %v3330_v28 = vpop.f32.mrf.mxu1 }
 0x4c0   : > { %v8770_v54 = vadd.f32 %v3505_v27, %v3417_v12 }
 0x4c1   : > { %v3331_v30 = vadd.f32 %v3330_v28, %v3242_v29  ;;  %3280 = vmatmul.bf16.gmra.mxu0 %v10274_v16 }
 0x4c2   : > { %3369 = vmatmul.bf16.gmra.mxu1 %v10275_v25  ;;  %3458 = vmatmul.bf16.gmra.mxu2 %v10276_v5 }
 0x4c3   : > { %3547 = vmatmul.bf16.gmra.mxu3 %v10207_v23 }
 0x4c5   : > { %v3419_v14 = vpop.f32.mrf.mxu2 }
 0x4c6   : > { %v3420_v1 = vadd.f32 %v3419_v14, %v3331_v30  ;;  %v3508_v6 = vpop.f32.mrf.mxu3  ;;  %v3243_v52 = vpop.f32.mrf.mxu0  ;;  %v10278_v30 = vld [vmem:[#allocation45_spill] sm:$0xff]  ;;  %v10279_v14 = vld [vmem:[#allocation102_spill] sm:$0xff] }
 0x4c7   : > { %v3244_v62 = vadd.f32 %v3243_v52, %v8396_v13  ;;  %v3332_v48 = vpop.f32.mrf.mxu1  ;;  %v6216_v13 = vld [vmem:[%s9735_s1 + $0x12c] sm:$0xf] }
 0x4c8   : > { %v8777_v33 = vadd.f32 %v3508_v6, %v3420_v1  ;;  %v5485_v6 = vld [vmem:[%s9735_s1 + $0x238] sm:$0xf0] }
 0x4c9   : > { %v3333_v2 = vadd.f32 %v3332_v48, %v3244_v62 }
 0x4cd   : > { %v3421_v12 = vpop.f32.mrf.mxu2 }
 0x4ce   : > { %v3422_v27 = vadd.f32 %v3421_v12, %v3333_v2  ;;  %v3510_v43 = vpop.f32.mrf.mxu3  ;;  %v3246_v29 = vpop.f32.mrf.mxu0 }
 0x4cf   : > { %v3247_v28 = vadd.f32 %v3246_v29, %v8423_v17  ;;  %v3335_v25 = vpop.f32.mrf.mxu1  ;;  %v5357_v17 = vld [vmem:[%s9735_s1 + $0x138] sm:$0xf0] }
 0x4d0   : > { %v8780_v5 = vadd.f32 %v3510_v43, %v3422_v27  ;;  %v5360_v1 = vor.u32 %v6216_v13, %v5357_v17  ;;  %v5229_v13 = vld [vmem:[%s9735_s1 + $0x38] sm:$0xf0] }
 0x4d1   : > { %v3336_v23 = vadd.f32 %v3335_v25, %v3247_v28  ;;  %3285 = vmatmul.bf16.gmra.mxu0 %v10277_v47  ;;  %v6248_v25 = vld [vmem:[%s9735_s1 + $0x22c] sm:$0xf] }
 0x4d2   : > { %3374 = vmatmul.bf16.gmra.mxu1 %v10278_v30  ;;  %3463 = vmatmul.bf16.gmra.mxu2 %v10279_v14  ;;  %v5488_v62 = vor.u32 %v6248_v25, %v5485_v6  ;;  %v6184_v28 = vld [vmem:[%s9735_s1 + $0x2c] sm:$0xf]  ;;  %v10282_v14 = vld [vmem:[#allocation106_spill] sm:$0xff]  ;;  %v10283_v30 = vld [vmem:[#allocation52_spill] sm:$0xff] }
 0x4d3   : > { %3552 = vmatmul.bf16.gmra.mxu3 %v10211_v11  ;;  %3767 = vmatpush.bf16.msrb.mxu2 %v5360_v1  ;;  %v5232_v25 = vor.u32 %v6184_v28, %v5229_v13  ;;  %v10281_v11 = vld [vmem:[#allocation49_spill] sm:$0xff] }
 0x4d4   : > { %3856 = vmatpush.bf16.msrb.mxu3 %v5488_v62 }
 0x4d5   : > { %v3424_v52 = vpop.f32.mrf.mxu2  ;;  %3678 = vmatpush.bf16.msrb.mxu1 %v5232_v25 }
 0x4d6   : > { %v3425_v48 = vadd.f32 %v3424_v52, %v3336_v23  ;;  %v3513_v2 = vpop.f32.mrf.mxu3  ;;  %v3248_v12 = vpop.f32.mrf.mxu0 }
 0x4d7   : > { %v3249_v27 = vadd.f32 %v3248_v12, %v8435_v10  ;;  %v3337_v43 = vpop.f32.mrf.mxu1  ;;  %v10280_v12 = vld [vmem:[#allocation48_spill] sm:$0xff] }
 0x4d8   : > { %v8799_v29 = vadd.f32 %v3513_v2, %v3425_v48 }
 0x4d9   : > { %v3338_v17 = vadd.f32 %v3337_v43, %v3249_v27 }
 0x4dd   : > { %v3426_v23 = vpop.f32.mrf.mxu2 }
 0x4de   : > { %v3427_v6 = vadd.f32 %v3426_v23, %v3338_v17  ;;  %v3515_v1 = vpop.f32.mrf.mxu3  ;;  %v3251_v52 = vpop.f32.mrf.mxu0 }
 0x4df   : > { %v3252_v10 = vadd.f32 %v3251_v52, %v8444_v57  ;;  %v3340_v62 = vpop.f32.mrf.mxu1 }
 0x4e0   : > { %v8808_v48 = vadd.f32 %v3515_v1, %v3427_v6 }
 0x4e1   : > { %v3341_v2 = vadd.f32 %v3340_v62, %v3252_v10  ;;  %3290 = vmatmul.bf16.gmra.mxu0 %v10280_v12 }
 0x4e2   : > { %3379 = vmatmul.bf16.gmra.mxu1 %v10281_v11  ;;  %3468 = vmatmul.bf16.gmra.mxu2 %v10282_v14 }
 0x4e3   : > { %3557 = vmatmul.bf16.gmra.mxu3 %v10215_v42 }
 0x4e5   : > { %v3429_v27 = vpop.f32.mrf.mxu2 }
 0x4e6   : > { %v3430_v43 = vadd.f32 %v3429_v27, %v3341_v2  ;;  %v3518_v28 = vpop.f32.mrf.mxu3  ;;  %v3253_v13 = vpop.f32.mrf.mxu0  ;;  %v10284_v2 = vld [vmem:[#allocation53_spill] sm:$0xff]  ;;  %v10285_v27 = vld [vmem:[#allocation110_spill] sm:$0xff] }
 0x4e7   : > { %v3254_v17 = vadd.f32 %v3253_v13, %v8450_v32  ;;  %v3342_v25 = vpop.f32.mrf.mxu1  ;;  %v6212_v32 = vld [vmem:[%s9735_s1 + $0x10c] sm:$0xf] }
 0x4e8   : > { %v8815_v57 = vadd.f32 %v3518_v28, %v3430_v43  ;;  %v5469_v28 = vld [vmem:[%s9735_s1 + $0x218] sm:$0xf0] }
 0x4e9   : > { %v3343_v23 = vadd.f32 %v3342_v25, %v3254_v17 }
 0x4ed   : > { %v3431_v6 = vpop.f32.mrf.mxu2 }
 0x4ee   : > { %v3432_v1 = vadd.f32 %v3431_v6, %v3343_v23  ;;  %v3520_v52 = vpop.f32.mrf.mxu3  ;;  %v3256_v10 = vpop.f32.mrf.mxu0 }
 0x4ef   : > { %v3257_v62 = vadd.f32 %v3256_v10, %v8477_v44  ;;  %v3345_v11 = vpop.f32.mrf.mxu1  ;;  %v5341_v44 = vld [vmem:[%s9735_s1 + $0x118] sm:$0xf0] }
 0x4f0   : > { %v8818_v14 = vadd.f32 %v3520_v52, %v3432_v1  ;;  %v5344_v43 = vor.u32 %v6212_v32, %v5341_v44  ;;  %v5213_v32 = vld [vmem:[%s9735_s1 + $0x18] sm:$0xf0] }
 0x4f1   : > { %v3346_v42 = vadd.f32 %v3345_v11, %v3257_v62  ;;  %3295 = vmatmul.bf16.gmra.mxu0 %v10283_v30  ;;  %v6244_v11 = vld [vmem:[%s9735_s1 + $0x20c] sm:$0xf] }
 0x4f2   : > { %3384 = vmatmul.bf16.gmra.mxu1 %v10284_v2  ;;  %3473 = vmatmul.bf16.gmra.mxu2 %v10285_v27  ;;  %v5472_v17 = vor.u32 %v6244_v11, %v5469_v28  ;;  %v6180_v62 = vld [vmem:[%s9735_s1 + $0xc] sm:$0xf]  ;;  %v10288_v27 = vld [vmem:[#allocation114_spill] sm:$0xff]  ;;  %v10289_v2 = vld [vmem:[#allocation60_spill] sm:$0xff] }
 0x4f3   : > { %3562 = vmatmul.bf16.gmra.mxu3 %v10219_v50  ;;  %3768 = vmatpush.bf16.msrb.mxu2 %v5344_v43  ;;  %v5216_v11 = vor.u32 %v6180_v62, %v5213_v32  ;;  %v10287_v50 = vld [vmem:[#allocation57_spill] sm:$0xff] }
 0x4f4   : > { %3857 = vmatpush.bf16.msrb.mxu3 %v5472_v17 }
 0x4f5   : > { %v3434_v13 = vpop.f32.mrf.mxu2  ;;  %3679 = vmatpush.bf16.msrb.mxu1 %v5216_v11 }
 0x4f6   : > { %v3435_v25 = vadd.f32 %v3434_v13, %v3346_v42  ;;  %v3523_v23 = vpop.f32.mrf.mxu3  ;;  %v3258_v6 = vpop.f32.mrf.mxu0 }
 0x4f7   : > { %v3259_v1 = vadd.f32 %v3258_v6, %v8489_v3  ;;  %v3347_v52 = vpop.f32.mrf.mxu1  ;;  %v10286_v6 = vld [vmem:[#allocation56_spill] sm:$0xff] }
 0x4f8   : > { %v8837_v10 = vadd.f32 %v3523_v23, %v3435_v25 }
 0x4f9   : > { %v3348_v44 = vadd.f32 %v3347_v52, %v3259_v1 }
 0x4fd   : > { %v3436_v42 = vpop.f32.mrf.mxu2 }
 0x4fe   : > { %v3437_v28 = vadd.f32 %v3436_v42, %v3348_v44  ;;  %v3525_v43 = vpop.f32.mrf.mxu3  ;;  %v3261_v13 = vpop.f32.mrf.mxu0 }
 0x4ff   : > { %v3262_v3 = vadd.f32 %v3261_v13, %v8498_v9  ;;  %v3350_v17 = vpop.f32.mrf.mxu1 }
 0x500   : > { %v8846_v25 = vadd.f32 %v3525_v43, %v3437_v28 }
 0x501   : > { %v3351_v23 = vadd.f32 %v3350_v17, %v3262_v3  ;;  %3300 = vmatmul.bf16.gmra.mxu0 %v10286_v6 }
 0x502   : > { %3389 = vmatmul.bf16.gmra.mxu1 %v10287_v50  ;;  %3478 = vmatmul.bf16.gmra.mxu2 %v10288_v27 }
 0x503   : > { %3567 = vmatmul.bf16.gmra.mxu3 %v10223_v55 }
 0x505   : > { %v3439_v1 = vpop.f32.mrf.mxu2 }
 0x506   : > { %v3440_v52 = vadd.f32 %v3439_v1, %v3351_v23  ;;  %v3528_v62 = vpop.f32.mrf.mxu3  ;;  %v3263_v32 = vpop.f32.mrf.mxu0  ;;  %v10290_v23 = vld [vmem:[#allocation61_spill] sm:$0xff]  ;;  %v10291_v1 = vld [vmem:[#allocation118_spill] sm:$0xff] }
 0x507   : > { %v3264_v44 = vadd.f32 %v3263_v32, %v8504_v26  ;;  %v3352_v11 = vpop.f32.mrf.mxu1  ;;  %v6368_v26 = vld [vmem:[%s9735_s1 + $0x5ec] sm:$0xf] }
 0x508   : > { %v8853_v9 = vadd.f32 %v3528_v62, %v3440_v52  ;;  %v5709_v62 = vld [vmem:[%s9735_s1 + $0x3f8] sm:$0xf0]  ;;  %v6372_v32 = vld [vmem:[%s9735_s1 + $0x60c] sm:$0xf] }
 0x509   : > { %v3353_v42 = vadd.f32 %v3352_v11, %v3264_v44  ;;  %v5981_v44 = vld [vmem:[%s9735_s1 + $0x618] sm:$0xf0] }
 0x50d   : > { %v3441_v28 = vpop.f32.mrf.mxu2 }
 0x50e   : > { %v3442_v43 = vadd.f32 %v3441_v28, %v3353_v42  ;;  %v3530_v13 = vpop.f32.mrf.mxu3  ;;  %v3266_v3 = vpop.f32.mrf.mxu0  ;;  %v5984_v28 = vor.u32 %v6372_v32, %v5981_v44 }
 0x50f   : > { %v3267_v17 = vadd.f32 %v3266_v3, %v8531_v38  ;;  %v3355_v50 = vpop.f32.mrf.mxu1  ;;  %v5965_v38 = vld [vmem:[%s9735_s1 + $0x5f8] sm:$0xf0] }
 0x510   : > { %v8856_v27 = vadd.f32 %v3530_v13, %v3442_v43  ;;  %v5968_v52 = vor.u32 %v6368_v26, %v5965_v38  ;;  %4213 = vmatpush.bf16.msra.mxu3 %v5984_v28 }
 0x511   : > { %v3356_v55 = vadd.f32 %v3355_v50, %v3267_v17  ;;  %3305 = vmatmul.bf16.gmra.mxu0 %v10289_v2  ;;  %v6304_v50 = vld [vmem:[%s9735_s1 + $0x3ec] sm:$0xf] }
 0x512   : > { %3394 = vmatmul.bf16.gmra.mxu1 %v10290_v23  ;;  %3483 = vmatmul.bf16.gmra.mxu2 %v10291_v1  ;;  %v5712_v42 = vor.u32 %v6304_v50, %v5709_v62  ;;  %v5837_v50 = vld [vmem:[%s9735_s1 + $0x4f8] sm:$0xf0]  ;;  %v10294_v1 = vld [vmem:[#allocation122_spill] sm:$0xff]  ;;  %v10295_v23 = vld [vmem:[#allocation68_spill] sm:$0xff] }
 0x513   : > { %3572 = vmatmul.bf16.gmra.mxu3 %v10227_v37  ;;  %4117 = vmatpush.bf16.msra.mxu2 %v5968_v52  ;;  %v6336_v37 = vld [vmem:[%s9735_s1 + $0x4ec] sm:$0xf] }
 0x514   : > { %3939 = vmatpush.bf16.msra.mxu0 %v5712_v42 }
 0x515   : > { %v3444_v11 = vpop.f32.mrf.mxu2 }
 0x516   : > { %v3445_v43 = vadd.f32 %v3444_v11, %v3356_v55  ;;  %v3533_v13 = vpop.f32.mrf.mxu3  ;;  %v3268_v3 = vpop.f32.mrf.mxu0  ;;  %v5840_v55 = vor.u32 %v6336_v37, %v5837_v50 }
 0x517   : > { %v3269_v17 = vadd.f32 %v3268_v3, %v8543_v56  ;;  %v3357_v26 = vpop.f32.mrf.mxu1  ;;  %v10293_v3 = vld [vmem:[#allocation65_spill] sm:$0xff] }
 0x518   : > { %v8881_v38 = vadd.f32 %v3533_v13, %v3445_v43  ;;  %4028 = vmatpush.bf16.msra.mxu1 %v5840_v55  ;;  %v10292_v13 = vld [vmem:[#allocation64_spill] sm:$0xff] }
 0x519   : > { %v3358_v62 = vadd.f32 %v3357_v26, %v3269_v17 }
 0x51d   : > { %v3446_v32 = vpop.f32.mrf.mxu2 }
 0x51e   : > { %v3447_v52 = vadd.f32 %v3446_v32, %v3358_v62  ;;  %v3535_v44 = vpop.f32.mrf.mxu3  ;;  %v3271_v56 = vpop.f32.mrf.mxu0 }
 0x51f   : > { %v3272_v11 = vadd.f32 %v3271_v56, %v8552_v53  ;;  %v3360_v42 = vpop.f32.mrf.mxu1 }
 0x520   : > { %v8890_v28 = vadd.f32 %v3535_v44, %v3447_v52 }
 0x521   : > { %v3361_v43 = vadd.f32 %v3360_v42, %v3272_v11  ;;  %3310 = vmatmul.bf16.gmra.mxu0 %v10292_v13 }
 0x522   : > { %3399 = vmatmul.bf16.gmra.mxu1 %v10293_v3  ;;  %3488 = vmatmul.bf16.gmra.mxu2 %v10294_v1 }
 0x523   : > { %3577 = vmatmul.bf16.gmra.mxu3 %v10231_v35 }
 0x525   : > { %v3449_v37 = vpop.f32.mrf.mxu2 }
 0x526   : > { %v3450_v17 = vadd.f32 %v3449_v37, %v3361_v43  ;;  %v3538_v26 = vpop.f32.mrf.mxu3  ;;  %v3273_v50 = vpop.f32.mrf.mxu0  ;;  %v10296_v43 = vld [vmem:[#allocation2_spill] sm:$0xff]  ;;  %v6364_v37 = vld [vmem:[%s9735_s1 + $0x5cc] sm:$0xf] }
 0x527   : > { %v3274_v62 = vadd.f32 %v3273_v50, %v8558_v39  ;;  %v3362_v55 = vpop.f32.mrf.mxu1  ;;  %v10297_v39 = vld [vmem:[#allocation3_spill] sm:$0xff] }
 0x528   : > { %v8897_v53 = vadd.f32 %v3538_v26, %v3450_v17  ;;  %v5693_v26 = vld [vmem:[%s9735_s1 + $0x3d8] sm:$0xf0] }
 0x529   : > { %v3363_v32 = vadd.f32 %v3362_v55, %v3274_v62 }
 0x52d   : > { %v3451_v52 = vpop.f32.mrf.mxu2 }
 0x52e   : > { %v3452_v44 = vadd.f32 %v3451_v52, %v3363_v32  ;;  %v3540_v56 = vpop.f32.mrf.mxu3  ;;  %v3276_v11 = vpop.f32.mrf.mxu0 }
 0x52f   : > { %v3277_v42 = vadd.f32 %v3276_v11, %v8578_v63  ;;  %v3365_v3 = vpop.f32.mrf.mxu1  ;;  %v5949_v63 = vld [vmem:[%s9735_s1 + $0x5d8] sm:$0xf0]  ;;  %v6332_v11 = vld [vmem:[%s9735_s1 + $0x4cc] sm:$0xf] }
 0x530   : > { %v8900_v1 = vadd.f32 %v3540_v56, %v3452_v44  ;;  %v5952_v17 = vor.u32 %v6364_v37, %v5949_v63 }
 0x531   : > { %v3366_v35 = vadd.f32 %v3365_v3, %v3277_v42  ;;  %6017 = vmatmul.msk.bf16.vlgmr.msrb.gmra.mxu0 %vm1754_vm0, %v10295_v23  ;;  %v6300_v3 = vld [vmem:[%s9735_s1 + $0x3cc] sm:$0xf]  ;;  %v5821_v42 = vld [vmem:[%s9735_s1 + $0x4d8] sm:$0xf0] }
 0x532   : > { %3680 = vmatmul.bf16.vlgmr.msrb.gmra.mxu1 %v10296_v43  ;;  %3769 = vmatmul.bf16.vlgmr.msrb.gmra.mxu2 %v10297_v39  ;;  %v5696_v62 = vor.u32 %v6300_v3, %v5693_v26  ;;  %v5824_v39 = vor.u32 %v6332_v11, %v5821_v42 }
 0x533   : > { %3858 = vmatmul.bf16.vlgmr.msrb.gmra.mxu3 %v10235_v40  ;;  %4118 = vmatpush.bf16.msra.mxu2 %v5952_v17 }
 0x534   : > { %3940 = vmatpush.bf16.msra.mxu0 %v5696_v62  ;;  %4029 = vmatpush.bf16.msra.mxu1 %v5824_v39  ;;  %v10298_v62 = vld [vmem:[#allocation71_spill] sm:$0xff] }
 0x535   : > { %v3454_v50 = vpop.f32.mrf.mxu2 }
 0x536   : > { %v3455_v40 = vadd.f32 %v3454_v50, %v3366_v35  ;;  %v3543_v55 = vpop.f32.mrf.mxu3  ;;  %v3278_v32 = vpop.f32.mrf.mxu0 }
 0x537   : > { %v3279_v52 = vadd.f32 %v3278_v32, %v8590_v19  ;;  %v3367_v44 = vpop.f32.mrf.mxu1 }
 0x538   : > { %v8920_v56 = vadd.f32 %v3543_v55, %v3455_v40  ;;  %v10299_v40 = vld [vmem:[#allocation6_spill] sm:$0xff]  ;;  %v10300_v55 = vld [vmem:[#allocation7_spill] sm:$0xff] }
 0x539   : > { %v3368_v43 = vadd.f32 %v3367_v44, %v3279_v52 }
 0x53d   : > { %v3456_v35 = vpop.f32.mrf.mxu2 }
 0x53e   : > { %v3457_v37 = vadd.f32 %v3456_v35, %v3368_v43  ;;  %v3545_v63 = vpop.f32.mrf.mxu3  ;;  %v3281_v3 = vpop.f32.mrf.mxu0 }
 0x53f   : > { %v3282_v19 = vadd.f32 %v3281_v3, %v8598_v31  ;;  %v3370_v17 = vpop.f32.mrf.mxu1 }
 0x540   : > { %v8929_v26 = vadd.f32 %v3545_v63, %v3457_v37 }
 0x541   : > { %v3371_v50 = vadd.f32 %v3370_v17, %v3282_v19  ;;  %6018 = vmatmul.msk.bf16.gmra.mxu0 %vm1754_vm0, %v10298_v62 }
 0x542   : > { %3685 = vmatmul.bf16.gmra.mxu1 %v10299_v40  ;;  %3774 = vmatmul.bf16.gmra.mxu2 %v10300_v55  ;;  %v10301_v55 = vld [vmem:[#allocation74_spill] sm:$0xff] }
 0x543   : > { %3863 = vmatmul.bf16.gmra.mxu3 %v10239_v61 }
 0x545   : > { %v3459_v32 = vpop.f32.mrf.mxu2 }
 0x546   : > { %v3460_v52 = vadd.f32 %v3459_v32, %v3371_v50  ;;  %v3548_v44 = vpop.f32.mrf.mxu3  ;;  %v3283_v11 = vpop.f32.mrf.mxu0  ;;  %v10302_v50 = vld [vmem:[#allocation10_spill] sm:$0xff]  ;;  %v6360_v32 = vld [vmem:[%s9735_s1 + $0x5ac] sm:$0xf] }
 0x547   : > { %v3284_v42 = vadd.f32 %v3283_v11, %v8604_v51  ;;  %v3372_v31 = vpop.f32.mrf.mxu1  ;;  %v10303_v51 = vld [vmem:[#allocation11_spill] sm:$0xff]  ;;  %v5677_v11 = vld [vmem:[%s9735_s1 + $0x3b8] sm:$0xf0] }
 0x548   : > { %v8937_v43 = vadd.f32 %v3548_v44, %v3460_v52  ;;  %v6296_v52 = vld [vmem:[%s9735_s1 + $0x3ac] sm:$0xf] }
 0x549   : > { %v3373_v39 = vadd.f32 %v3372_v31, %v3284_v42  ;;  %v5680_v31 = vor.u32 %v6296_v52, %v5677_v11 }
 0x54b   : > { %3941 = vmatpush.bf16.msra.mxu0 %v5680_v31  ;;  %v10304_v31 = vld [vmem:[#allocation77_spill] sm:$0xff] }
 0x54d   : > { %v3461_v35 = vpop.f32.mrf.mxu2 }
 0x54e   : > { %v3462_v37 = vadd.f32 %v3461_v35, %v3373_v39  ;;  %v3550_v63 = vpop.f32.mrf.mxu3  ;;  %v3286_v3 = vpop.f32.mrf.mxu0 }
 0x54f   : > { %v3287_v19 = vadd.f32 %v3286_v3, %v8624_v41  ;;  %v3375_v17 = vpop.f32.mrf.mxu1  ;;  %v5933_v41 = vld [vmem:[%s9735_s1 + $0x5b8] sm:$0xf0] }
 0x550   : > { %v8940_v40 = vadd.f32 %v3550_v63, %v3462_v37  ;;  %v5936_v44 = vor.u32 %v6360_v32, %v5933_v41 }
 0x551   : > { %v3376_v61 = vadd.f32 %v3375_v17, %v3287_v19  ;;  %6019 = vmatmul.msk.bf16.gmra.mxu0 %vm1754_vm0, %v10301_v55  ;;  %v6328_v19 = vld [vmem:[%s9735_s1 + $0x4ac] sm:$0xf]  ;;  %v5805_v17 = vld [vmem:[%s9735_s1 + $0x4b8] sm:$0xf0] }
 0x552   : > { %3690 = vmatmul.bf16.gmra.mxu1 %v10302_v50  ;;  %3779 = vmatmul.bf16.gmra.mxu2 %v10303_v51  ;;  %v5808_v51 = vor.u32 %v6328_v19, %v5805_v17 }
 0x553   : > { %3868 = vmatmul.bf16.gmra.mxu3 %v10243_v24  ;;  %4119 = vmatpush.bf16.msra.mxu2 %v5936_v44 }
 0x554   : > { %4030 = vmatpush.bf16.msra.mxu1 %v5808_v51 }
 0x555   : > { %v3464_v42 = vpop.f32.mrf.mxu2 }
 0x556   : > { %v3465_v24 = vadd.f32 %v3464_v42, %v3376_v61  ;;  %v3553_v39 = vpop.f32.mrf.mxu3  ;;  %v3288_v35 = vpop.f32.mrf.mxu0 }
 0x557   : > { %v3289_v37 = vadd.f32 %v3288_v35, %v8636_v4  ;;  %v3377_v63 = vpop.f32.mrf.mxu1 }
 0x558   : > { %v8960_v3 = vadd.f32 %v3553_v39, %v3465_v24  ;;  %v10305_v24 = vld [vmem:[#allocation14_spill] sm:$0xff]  ;;  %v10306_v39 = vld [vmem:[#allocation15_spill] sm:$0xff] }
 0x559   : > { %v3378_v50 = vadd.f32 %v3377_v63, %v3289_v37 }
 0x55d   : > { %v3466_v61 = vpop.f32.mrf.mxu2 }
 0x55e   : > { %v3467_v32 = vadd.f32 %v3466_v61, %v3378_v50  ;;  %v3555_v41 = vpop.f32.mrf.mxu3  ;;  %v3291_v52 = vpop.f32.mrf.mxu0 }
 0x55f   : > { %v3292_v4 = vadd.f32 %v3291_v52, %v8644_v49  ;;  %v3380_v44 = vpop.f32.mrf.mxu1 }
 0x560   : > { %v8969_v11 = vadd.f32 %v3555_v41, %v3467_v32 }
 0x561   : > { %v3381_v42 = vadd.f32 %v3380_v44, %v3292_v4  ;;  %6020 = vmatmul.msk.bf16.gmra.mxu0 %vm1754_vm0, %v10304_v31 }
 0x562   : > { %3695 = vmatmul.bf16.gmra.mxu1 %v10305_v24  ;;  %3784 = vmatmul.bf16.gmra.mxu2 %v10306_v39  ;;  %v10307_v39 = vld [vmem:[#allocation81_spill] sm:$0xff] }
 0x563   : > { %3873 = vmatmul.bf16.gmra.mxu3 %v10247_v0 }
 0x565   : > { %v3469_v35 = vpop.f32.mrf.mxu2 }
 0x566   : > { %v3470_v37 = vadd.f32 %v3469_v35, %v3381_v42  ;;  %v3558_v63 = vpop.f32.mrf.mxu3  ;;  %v3293_v19 = vpop.f32.mrf.mxu0  ;;  %v10308_v42 = vld [vmem:[#allocation18_spill] sm:$0xff]  ;;  %v6356_v35 = vld [vmem:[%s9735_s1 + $0x58c] sm:$0xf] }
 0x567   : > { %v3294_v17 = vadd.f32 %v3293_v19, %v8650_v34  ;;  %v3382_v49 = vpop.f32.mrf.mxu1  ;;  %v10309_v34 = vld [vmem:[#allocation19_spill] sm:$0xff]  ;;  %v5661_v19 = vld [vmem:[%s9735_s1 + $0x398] sm:$0xf0] }
 0x568   : > { %v8977_v50 = vadd.f32 %v3558_v63, %v3470_v37  ;;  %v6292_v37 = vld [vmem:[%s9735_s1 + $0x38c] sm:$0xf] }
 0x569   : > { %v3383_v51 = vadd.f32 %v3382_v49, %v3294_v17  ;;  %v5664_v49 = vor.u32 %v6292_v37, %v5661_v19 }
 0x56b   : > { %3942 = vmatpush.bf16.msra.mxu0 %v5664_v49  ;;  %v10310_v49 = vld [vmem:[#allocation85_spill] sm:$0xff] }
 0x56d   : > { %v3471_v61 = vpop.f32.mrf.mxu2 }
 0x56e   : > { %v3472_v32 = vadd.f32 %v3471_v61, %v3383_v51  ;;  %v3560_v41 = vpop.f32.mrf.mxu3  ;;  %v3296_v52 = vpop.f32.mrf.mxu0 }
 0x56f   : > { %v3297_v4 = vadd.f32 %v3296_v52, %v8670_v45  ;;  %v3385_v44 = vpop.f32.mrf.mxu1  ;;  %v5917_v45 = vld [vmem:[%s9735_s1 + $0x598] sm:$0xf0] }
 0x570   : > { %v8980_v24 = vadd.f32 %v3560_v41, %v3472_v32  ;;  %v5920_v63 = vor.u32 %v6356_v35, %v5917_v45 }
 0x571   : > { %v3386_v0 = vadd.f32 %v3385_v44, %v3297_v4  ;;  %6021 = vmatmul.msk.bf16.gmra.mxu0 %vm1754_vm0, %v10307_v39  ;;  %v6324_v4 = vld [vmem:[%s9735_s1 + $0x48c] sm:$0xf]  ;;  %v5789_v44 = vld [vmem:[%s9735_s1 + $0x498] sm:$0xf0] }
 0x572   : > { %3700 = vmatmul.bf16.gmra.mxu1 %v10308_v42  ;;  %3789 = vmatmul.bf16.gmra.mxu2 %v10309_v34  ;;  %v5792_v34 = vor.u32 %v6324_v4, %v5789_v44 }
 0x573   : > { %3878 = vmatmul.bf16.gmra.mxu3 %v10251_v60  ;;  %4120 = vmatpush.bf16.msra.mxu2 %v5920_v63 }
 0x574   : > { %4031 = vmatpush.bf16.msra.mxu1 %v5792_v34 }
 0x575   : > { %v3474_v17 = vpop.f32.mrf.mxu2 }
 0x576   : > { %v3475_v60 = vadd.f32 %v3474_v17, %v3386_v0  ;;  %v3563_v51 = vpop.f32.mrf.mxu3  ;;  %v3298_v61 = vpop.f32.mrf.mxu0 }
 0x577   : > { %v3299_v32 = vadd.f32 %v3298_v61, %v8682_v20  ;;  %v3387_v41 = vpop.f32.mrf.mxu1 }
 0x578   : > { %v9000_v52 = vadd.f32 %v3563_v51, %v3475_v60  ;;  %v10311_v60 = vld [vmem:[#allocation22_spill] sm:$0xff]  ;;  %v10312_v51 = vld [vmem:[#allocation23_spill] sm:$0xff] }
 0x579   : > { %v3388_v42 = vadd.f32 %v3387_v41, %v3299_v32 }
 0x57d   : > { %v3476_v0 = vpop.f32.mrf.mxu2 }
 0x57e   : > { %v3477_v35 = vadd.f32 %v3476_v0, %v3388_v42  ;;  %v3565_v45 = vpop.f32.mrf.mxu3  ;;  %v3301_v37 = vpop.f32.mrf.mxu0 }
 0x57f   : > { %v3302_v20 = vadd.f32 %v3301_v37, %v8690_v22  ;;  %v3390_v63 = vpop.f32.mrf.mxu1 }
 0x580   : > { %v9009_v19 = vadd.f32 %v3565_v45, %v3477_v35 }
 0x581   : > { %v3391_v17 = vadd.f32 %v3390_v63, %v3302_v20  ;;  %6022 = vmatmul.msk.bf16.gmra.mxu0 %vm1754_vm0, %v10310_v49 }
 0x582   : > { %3705 = vmatmul.bf16.gmra.mxu1 %v10311_v60  ;;  %3794 = vmatmul.bf16.gmra.mxu2 %v10312_v51  ;;  %v10313_v51 = vld [vmem:[#allocation89_spill] sm:$0xff] }
 0x583   : > { %3883 = vmatmul.bf16.gmra.mxu3 %v10255_v15 }
 0x585   : > { %v3479_v61 = vpop.f32.mrf.mxu2 }
 0x586   : > { %v3480_v32 = vadd.f32 %v3479_v61, %v3391_v17  ;;  %v3568_v41 = vpop.f32.mrf.mxu3  ;;  %v3303_v4 = vpop.f32.mrf.mxu0  ;;  %v10314_v17 = vld [vmem:[#allocation26_spill] sm:$0xff]  ;;  %v6352_v61 = vld [vmem:[%s9735_s1 + $0x56c] sm:$0xf] }
 0x587   : > { %v3304_v44 = vadd.f32 %v3303_v4, %v8696_v8  ;;  %v3392_v22 = vpop.f32.mrf.mxu1  ;;  %v10315_v8 = vld [vmem:[#allocation27_spill] sm:$0xff]  ;;  %v5645_v4 = vld [vmem:[%s9735_s1 + $0x378] sm:$0xf0] }
 0x588   : > { %v9017_v42 = vadd.f32 %v3568_v41, %v3480_v32  ;;  %v6288_v32 = vld [vmem:[%s9735_s1 + $0x36c] sm:$0xf] }
 0x589   : > { %v3393_v34 = vadd.f32 %v3392_v22, %v3304_v44  ;;  %v5648_v22 = vor.u32 %v6288_v32, %v5645_v4 }
 0x58b   : > { %3943 = vmatpush.bf16.msra.mxu0 %v5648_v22 }
 0x58d   : > { %v3481_v0 = vpop.f32.mrf.mxu2 }
 0x58e   : > { %v3482_v35 = vadd.f32 %v3481_v0, %v3393_v34  ;;  %v3570_v45 = vpop.f32.mrf.mxu3  ;;  %v3306_v37 = vpop.f32.mrf.mxu0 }
 0x58f   : > { %v3307_v20 = vadd.f32 %v3306_v37, %v8716_v59  ;;  %v3395_v63 = vpop.f32.mrf.mxu1  ;;  %v5901_v59 = vld [vmem:[%s9735_s1 + $0x578] sm:$0xf0] }
 0x590   : > { %v9020_v60 = vadd.f32 %v3570_v45, %v3482_v35  ;;  %v5904_v41 = vor.u32 %v6352_v61, %v5901_v59  ;;  %v10316_v35 = vld [vmem:[#allocation139_spill] sm:$0xff] }
 0x591   : > { %v3396_v15 = vadd.f32 %v3395_v63, %v3307_v20  ;;  %6023 = vmatmul.msk.bf16.gmra.mxu0 %vm1754_vm0, %v10313_v51  ;;  %v6320_v63 = vld [vmem:[%s9735_s1 + $0x46c] sm:$0xf] }
 0x592   : > { %3710 = vmatmul.bf16.gmra.mxu1 %v10314_v17  ;;  %3799 = vmatmul.bf16.gmra.mxu2 %v10315_v8  ;;  %v5773_v17 = vld [vmem:[%s9735_s1 + $0x478] sm:$0xf0] }
 0x593   : > { %3888 = vmatmul.bf16.gmra.mxu3 %v10259_v7  ;;  %4121 = vmatpush.bf16.msra.mxu2 %v5904_v41  ;;  %v5776_v61 = vor.u32 %v6320_v63, %v5773_v17 }
 0x595   : > { %v3484_v44 = vpop.f32.mrf.mxu2  ;;  %4032 = vmatpush.bf16.msra.mxu1 %v5776_v61 }
 0x596   : > { %v3485_v7 = vadd.f32 %v3484_v44, %v3396_v15  ;;  %v3573_v34 = vpop.f32.mrf.mxu3  ;;  %v3308_v0 = vpop.f32.mrf.mxu0 }
 0x597   : > { %v3309_v45 = vadd.f32 %v3308_v0, %v10316_v35  ;;  %v3397_v37 = vpop.f32.mrf.mxu1  ;;  %v10318_v0 = vld [vmem:[#allocation30_spill] sm:$0xff]  ;;  %v10319_v35 = vld [vmem:[#allocation31_spill] sm:$0xff] }
 0x598   : > { %v9040_v20 = vadd.f32 %v3573_v34, %v3485_v7  ;;  %v10317_v34 = vld [vmem:[#allocation93_spill] sm:$0xff] }
 0x599   : > { %v3398_v8 = vadd.f32 %v3397_v37, %v3309_v45  ;;  %v10320_v45 = vld [vmem:[#allocation32_spill] sm:$0xff] }
 0x59d   : > { %v3486_v15 = vpop.f32.mrf.mxu2 }
 0x59e   : > { %v3487_v59 = vadd.f32 %v3486_v15, %v3398_v8  ;;  %v3575_v32 = vpop.f32.mrf.mxu3  ;;  %v3311_v41 = vpop.f32.mrf.mxu0 }
 0x59f   : > { %v3312_v4 = vadd.f32 %v3311_v41, %v8736_v18  ;;  %v3400_v44 = vpop.f32.mrf.mxu1 }
 0x5a0   : > { %v9049_v22 = vadd.f32 %v3575_v32, %v3487_v59 }
 0x5a1   : > { %v3401_v7 = vadd.f32 %v3400_v44, %v3312_v4  ;;  %6024 = vmatmul.msk.bf16.gmra.mxu0 %vm1754_vm0, %v10317_v34 }
 0x5a2   : > { %3715 = vmatmul.bf16.gmra.mxu1 %v10318_v0  ;;  %3804 = vmatmul.bf16.gmra.mxu2 %v10319_v35  ;;  %v6418_v0 = vld [vmem:[%s9736_s2] sm:$0xf] }
 0x5a3   : > { %3893 = vmatmul.bf16.gmra.mxu3 %v10320_v45  ;;  %v9062_v35 = vperm.slane %v6418_v0, 3 }
 0x5a5   : > { %v3489_v37 = vpop.f32.mrf.mxu2 }
 0x5a6   : > { %v3490_v63 = vadd.f32 %v3489_v37, %v3401_v7  ;;  %v3578_v17 = vpop.f32.mrf.mxu3  ;;  %v3313_v8 = vpop.f32.mrf.mxu0 }
 0x5a7   : > { %v3314_v61 = vadd.f32 %v3313_v8, %v8742_v58  ;;  %v3402_v18 = vpop.f32.mrf.mxu1  ;;  %v10321_v58 = vld [vmem:[#allocation97_spill] sm:$0xff]  ;;  %v10323_v8 = vld [vmem:[#allocation35_spill] sm:$0xff] }
 0x5a8   : > { %v9057_v15 = vadd.f32 %v3578_v17, %v3490_v63  ;;  %v10322_v17 = vld [vmem:[#allocation34_spill] sm:$0xff] }
 0x5a9   : > { %v3403_v59 = vadd.f32 %v3402_v18, %v3314_v61  ;;  %v6348_v61 = vld [vmem:[%s9735_s1 + $0x54c] sm:$0xf] }
 0x5aa   : > { %v6284_v18 = vld [vmem:[%s9735_s1 + $0x34c] sm:$0xf] }
 0x5ad   : > { %v3491_v32 = vpop.f32.mrf.mxu2 }
 0x5ae   : > { %v3492_v41 = vadd.f32 %v3491_v32, %v3403_v59  ;;  %v3580_v4 = vpop.f32.mrf.mxu3  ;;  %v3592_v44 = vpop.f32.mrf.mxu0  ;;  %v5629_v32 = vld [vmem:[%s9735_s1 + $0x358] sm:$0xf0] }
 0x5af   : > { %v3593_v7 = vadd.f32 %v3592_v44, %v8761_v36  ;;  %v3681_v45 = vpop.f32.mrf.mxu1  ;;  %v5885_v36 = vld [vmem:[%s9735_s1 + $0x558] sm:$0xf0] }
 0x5b0   : > { %v9065_v37 = vadd.f32 %v3580_v4, %v3492_v41  ;;  %v3682_v63 = vadd.f32 %v3681_v45, %v9062_v35  ;;  %v5888_v59 = vor.u32 %v6348_v61, %v5885_v36  ;;  %v5632_v4 = vor.u32 %v6284_v18, %v5629_v32  ;;  %v6316_v61 = vld [vmem:[%s9735_s1 + $0x44c] sm:$0xf]  ;;  %v5757_v36 = vld [vmem:[%s9735_s1 + $0x458] sm:$0xf0] }
 0x5b1   : > { %6025 = vmatmul.msk.bf16.gmra.mxu0 %vm1754_vm0, %v10321_v58  ;;  %v4297_v58 = vmax.f32 %v3593_v7, 0.0 }
 0x5b2   : > { %3720 = vmatmul.bf16.gmra.mxu1 %v10322_v17  ;;  %3809 = vmatmul.bf16.gmra.mxu2 %v10323_v8 }
 0x5b3   : > { %3898 = vmatmul.bf16.gmra.mxu3 %v10270_v46  ;;  %4122 = vmatpush.bf16.msra.mxu2 %v5888_v59 }
 0x5b4   : > { %3944 = vmatpush.bf16.msra.mxu0 %v5632_v4 }
 0x5b5   : > { %v3770_v41 = vpop.f32.mrf.mxu2 }
 0x5b6   : > { %v3771_v46 = vadd.f32 %v3770_v41, %v3682_v63  ;;  %v3859_v44 = vpop.f32.mrf.mxu3  ;;  %v3594_v0 = vpop.f32.mrf.mxu0  ;;  %v5760_v63 = vor.u32 %v6316_v61, %v5757_v36 }
 0x5b7   : > { %v3595_v45 = vadd.f32 %v3594_v0, %v8770_v54  ;;  %v3683_v17 = vpop.f32.mrf.mxu1 }
 0x5b8   : > { %v9086_v8 = vadd.f32 %v3859_v44, %v3771_v46  ;;  %4033 = vmatpush.bf16.msra.mxu1 %v5760_v63  ;;  %v3684_v54 = vadd.f32 %v3683_v17, %v9062_v35 }
 0x5b9   : > { %v4301_v18 = vmax.f32 %v3595_v45, 0.0  ;;  %v10327_v45 = vld [vmem:[#allocation38_spill] sm:$0xff] }
 0x5ba   : > { %10324 = vst [vmem:[#allocation130_spill] sm:$0xff] %v9086_v8  ;;  %v10326_v8 = vld [vmem:[#allocation100_spill] sm:$0xff] }
 0x5bb   : > { %v9094_v32 = vpack.c.bf16 %v4301_v18, %v4297_v58  ;;  %v10328_v58 = vld [vmem:[#allocation39_spill] sm:$0xff] }
 0x5bd   : > { %10325 = vst [vmem:[#allocation36_spill] sm:$0xff] %v9094_v32  ;;  %v3772_v59 = vpop.f32.mrf.mxu2 }
 0x5be   : > { %v3773_v41 = vadd.f32 %v3772_v59, %v3684_v54  ;;  %v3861_v4 = vpop.f32.mrf.mxu3  ;;  %v3597_v46 = vpop.f32.mrf.mxu0 }
 0x5bf   : > { %v3598_v44 = vadd.f32 %v3597_v46, %v8777_v33  ;;  %v3686_v0 = vpop.f32.mrf.mxu1 }
 0x5c0   : > { %v9098_v21 = vadd.f32 %v3861_v4, %v3773_v41  ;;  %v3687_v7 = vadd.f32 %v3686_v0, %v9062_v35 }
 0x5c1   : > { %6026 = vmatmul.msk.bf16.gmra.mxu0 %vm1754_vm0, %v10326_v8  ;;  %v4305_v59 = vmax.f32 %v3598_v44, 0.0  ;;  %v10330_v8 = vld [vmem:[#allocation104_spill] sm:$0xff]  ;;  %v10331_v44 = vld [vmem:[#allocation42_spill] sm:$0xff] }
 0x5c2   : > { %3725 = vmatmul.bf16.gmra.mxu1 %v10327_v45  ;;  %3814 = vmatmul.bf16.gmra.mxu2 %v10328_v58 }
 0x5c3   : > { %3903 = vmatmul.bf16.gmra.mxu3 %v10274_v16 }
 0x5c5   : > { %v3775_v17 = vpop.f32.mrf.mxu2 }
 0x5c6   : > { %v3776_v61 = vadd.f32 %v3775_v17, %v3687_v7  ;;  %v3864_v36 = vpop.f32.mrf.mxu3  ;;  %v3599_v18 = vpop.f32.mrf.mxu0 }
 0x5c7   : > { %v3600_v33 = vadd.f32 %v3599_v18, %v8780_v5  ;;  %v3688_v63 = vpop.f32.mrf.mxu1 }
 0x5c8   : > { %v9107_v54 = vadd.f32 %v3864_v36, %v3776_v61  ;;  %v3689_v46 = vadd.f32 %v3688_v63, %v9062_v35  ;;  %v10332_v61 = vld [vmem:[#allocation43_spill] sm:$0xff] }
 0x5c9   : > { %v4309_v41 = vmax.f32 %v3600_v33, 0.0  ;;  %v6344_v36 = vld [vmem:[%s9735_s1 + $0x52c] sm:$0xf]  ;;  %v5613_v33 = vld [vmem:[%s9735_s1 + $0x338] sm:$0xf0] }
 0x5cb   : > { %v9109_v4 = vpack.c.bf16 %v4309_v41, %v4305_v59 }
 0x5cd   : > { %10329 = vst [vmem:[#allocation40_spill] sm:$0xff] %v9109_v4  ;;  %v3777_v0 = vpop.f32.mrf.mxu2  ;;  %v10338_v4 = vld [vmem:[#allocation112_spill] sm:$0xff] }
 0x5ce   : > { %v3778_v45 = vadd.f32 %v3777_v0, %v3689_v46  ;;  %v3866_v58 = vpop.f32.mrf.mxu3  ;;  %v3602_v32 = vpop.f32.mrf.mxu0 }
 0x5cf   : > { %v3603_v16 = vadd.f32 %v3602_v32, %v8799_v29  ;;  %v3691_v7 = vpop.f32.mrf.mxu1  ;;  %v5869_v29 = vld [vmem:[%s9735_s1 + $0x538] sm:$0xf0]  ;;  %v6280_v32 = vld [vmem:[%s9735_s1 + $0x32c] sm:$0xf] }
 0x5d0   : > { %v9113_v17 = vadd.f32 %v3866_v58, %v3778_v45  ;;  %v3692_v5 = vadd.f32 %v3691_v7, %v9062_v35  ;;  %v5872_v18 = vor.u32 %v6344_v36, %v5869_v29  ;;  %v5616_v59 = vor.u32 %v6280_v32, %v5613_v33  ;;  %v6312_v7 = vld [vmem:[%s9735_s1 + $0x42c] sm:$0xf] }
 0x5d1   : > { %6027 = vmatmul.msk.bf16.gmra.mxu0 %vm1754_vm0, %v10330_v8 }
 0x5d2   : > { %3730 = vmatmul.bf16.gmra.mxu1 %v10331_v44  ;;  %3819 = vmatmul.bf16.gmra.mxu2 %v10332_v61  ;;  %v5741_v44 = vld [vmem:[%s9735_s1 + $0x438] sm:$0xf0]  ;;  %v4313_v61 = vmax.f32 %v3603_v16, 0.0 }
 0x5d3   : > { %3908 = vmatmul.bf16.gmra.mxu3 %v10277_v47  ;;  %4123 = vmatpush.bf16.msra.mxu2 %v5872_v18 }
 0x5d4   : > { %3945 = vmatpush.bf16.msra.mxu0 %v5616_v59 }
 0x5d5   : > { %v3780_v63 = vpop.f32.mrf.mxu2 }
 0x5d6   : > { %v3781_v47 = vadd.f32 %v3780_v63, %v3692_v5  ;;  %v3869_v41 = vpop.f32.mrf.mxu3  ;;  %v3604_v46 = vpop.f32.mrf.mxu0  ;;  %v5744_v5 = vor.u32 %v6312_v7, %v5741_v44  ;;  %v10336_v7 = vld [vmem:[#allocation47_spill] sm:$0xff] }
 0x5d7   : > { %v3605_v0 = vadd.f32 %v3604_v46, %v8808_v48  ;;  %v3693_v45 = vpop.f32.mrf.mxu1  ;;  %v10334_v46 = vld [vmem:[#allocation108_spill] sm:$0xff] }
 0x5d8   : > { %v9134_v58 = vadd.f32 %v3869_v41, %v3781_v47  ;;  %4034 = vmatpush.bf16.msra.mxu1 %v5744_v5  ;;  %v3694_v48 = vadd.f32 %v3693_v45, %v9062_v35 }
 0x5d9   : > { %v4317_v36 = vmax.f32 %v3605_v0, 0.0  ;;  %v10335_v0 = vld [vmem:[#allocation46_spill] sm:$0xff] }
 0x5db   : > { %v9142_v29 = vpack.c.bf16 %v4317_v36, %v4313_v61 }
 0x5dd   : > { %10333 = vst [vmem:[#allocation44_spill] sm:$0xff] %v9142_v29  ;;  %v3782_v32 = vpop.f32.mrf.mxu2 }
 0x5de   : > { %v3783_v18 = vadd.f32 %v3782_v32, %v3694_v48  ;;  %v3871_v33 = vpop.f32.mrf.mxu3  ;;  %v3607_v63 = vpop.f32.mrf.mxu0 }
 0x5df   : > { %v3608_v59 = vadd.f32 %v3607_v63, %v8815_v57  ;;  %v3696_v47 = vpop.f32.mrf.mxu1 }
 0x5e0   : > { %v9146_v41 = vadd.f32 %v3871_v33, %v3783_v18  ;;  %v3697_v16 = vadd.f32 %v3696_v47, %v9062_v35 }
 0x5e1   : > { %6028 = vmatmul.msk.bf16.gmra.mxu0 %vm1754_vm0, %v10334_v46  ;;  %v4321_v32 = vmax.f32 %v3608_v59, 0.0  ;;  %v10339_v59 = vld [vmem:[#allocation50_spill] sm:$0xff] }
 0x5e2   : > { %3735 = vmatmul.bf16.gmra.mxu1 %v10335_v0  ;;  %3824 = vmatmul.bf16.gmra.mxu2 %v10336_v7 }
 0x5e3   : > { %3913 = vmatmul.bf16.gmra.mxu3 %v10280_v12 }
 0x5e5   : > { %v3785_v45 = vpop.f32.mrf.mxu2 }
 0x5e6   : > { %v3786_v44 = vadd.f32 %v3785_v45, %v3697_v16  ;;  %v3874_v61 = vpop.f32.mrf.mxu3  ;;  %v3609_v36 = vpop.f32.mrf.mxu0 }
 0x5e7   : > { %v3610_v57 = vadd.f32 %v3609_v36, %v8818_v14  ;;  %v3698_v5 = vpop.f32.mrf.mxu1 }
 0x5e8   : > { %v9155_v48 = vadd.f32 %v3874_v61, %v3786_v44  ;;  %v3699_v63 = vadd.f32 %v3698_v5, %v9062_v35  ;;  %v10340_v44 = vld [vmem:[#allocation51_spill] sm:$0xff] }
 0x5e9   : > { %v4325_v18 = vmax.f32 %v3610_v57, 0.0  ;;  %v6340_v61 = vld [vmem:[%s9735_s1 + $0x50c] sm:$0xf]  ;;  %v5597_v57 = vld [vmem:[%s9735_s1 + $0x318] sm:$0xf0] }
 0x5eb   : > { %v9157_v33 = vpack.c.bf16 %v4325_v18, %v4321_v32 }
 0x5ed   : > { %10337 = vst [vmem:[#allocation48_spill] sm:$0xff] %v9157_v33  ;;  %v3787_v47 = vpop.f32.mrf.mxu2  ;;  %v10346_v33 = vld [vmem:[#allocation120_spill] sm:$0xff] }
 0x5ee   : > { %v3788_v0 = vadd.f32 %v3787_v47, %v3699_v63  ;;  %v3876_v7 = vpop.f32.mrf.mxu3  ;;  %v3612_v29 = vpop.f32.mrf.mxu0 }
 0x5ef   : > { %v3613_v12 = vadd.f32 %v3612_v29, %v8837_v10  ;;  %v3701_v16 = vpop.f32.mrf.mxu1  ;;  %v5853_v10 = vld [vmem:[%s9735_s1 + $0x518] sm:$0xf0]  ;;  %v6276_v29 = vld [vmem:[%s9735_s1 + $0x30c] sm:$0xf] }
 0x5f0   : > { %v9161_v45 = vadd.f32 %v3876_v7, %v3788_v0  ;;  %v3702_v14 = vadd.f32 %v3701_v16, %v9062_v35  ;;  %v5856_v36 = vor.u32 %v6340_v61, %v5853_v10  ;;  %v5600_v32 = vor.u32 %v6276_v29, %v5597_v57  ;;  %v6308_v16 = vld [vmem:[%s9735_s1 + $0x40c] sm:$0xf] }
 0x5f1   : > { %6029 = vmatmul.msk.bf16.gmra.mxu0 %vm1754_vm0, %v10338_v4 }
 0x5f2   : > { %3740 = vmatmul.bf16.gmra.mxu1 %v10339_v59  ;;  %3829 = vmatmul.bf16.gmra.mxu2 %v10340_v44  ;;  %v5725_v59 = vld [vmem:[%s9735_s1 + $0x418] sm:$0xf0]  ;;  %v4329_v44 = vmax.f32 %v3613_v12, 0.0 }
 0x5f3   : > { %3918 = vmatmul.bf16.gmra.mxu3 %v10283_v30  ;;  %4124 = vmatpush.bf16.msra.mxu2 %v5856_v36 }
 0x5f4   : > { %3946 = vmatpush.bf16.msra.mxu0 %v5600_v32 }
 0x5f5   : > { %v3790_v5 = vpop.f32.mrf.mxu2 }
 0x5f6   : > { %v3791_v30 = vadd.f32 %v3790_v5, %v3702_v14  ;;  %v3879_v18 = vpop.f32.mrf.mxu3  ;;  %v3614_v63 = vpop.f32.mrf.mxu0  ;;  %v5728_v14 = vor.u32 %v6308_v16, %v5725_v59  ;;  %v10344_v16 = vld [vmem:[#allocation55_spill] sm:$0xff] }
 0x5f7   : > { %v3615_v47 = vadd.f32 %v3614_v63, %v8846_v25  ;;  %v3703_v0 = vpop.f32.mrf.mxu1  ;;  %v10342_v63 = vld [vmem:[#allocation116_spill] sm:$0xff] }
 0x5f8   : > { %v9182_v7 = vadd.f32 %v3879_v18, %v3791_v30  ;;  %4035 = vmatpush.bf16.msra.mxu1 %v5728_v14  ;;  %v3704_v25 = vadd.f32 %v3703_v0, %v9062_v35 }
 0x5f9   : > { %v4333_v61 = vmax.f32 %v3615_v47, 0.0  ;;  %v10343_v47 = vld [vmem:[#allocation54_spill] sm:$0xff] }
 0x5fb   : > { %v9190_v10 = vpack.c.bf16 %v4333_v61, %v4329_v44 }
 0x5fd   : > { %10341 = vst [vmem:[#allocation52_spill] sm:$0xff] %v9190_v10  ;;  %v3792_v29 = vpop.f32.mrf.mxu2 }
 0x5fe   : > { %v3793_v36 = vadd.f32 %v3792_v29, %v3704_v25  ;;  %v3881_v57 = vpop.f32.mrf.mxu3  ;;  %v3617_v5 = vpop.f32.mrf.mxu0 }
 0x5ff   : > { %v3618_v32 = vadd.f32 %v3617_v5, %v8853_v9  ;;  %v3706_v30 = vpop.f32.mrf.mxu1 }
 0x600   : > { %v9194_v18 = vadd.f32 %v3881_v57, %v3793_v36  ;;  %v3707_v12 = vadd.f32 %v3706_v30, %v9062_v35 }
 0x601   : > { %6030 = vmatmul.msk.bf16.gmra.mxu0 %vm1754_vm0, %v10342_v63  ;;  %v4337_v29 = vmax.f32 %v3618_v32, 0.0  ;;  %v10347_v32 = vld [vmem:[#allocation58_spill] sm:$0xff] }
 0x602   : > { %3745 = vmatmul.bf16.gmra.mxu1 %v10343_v47  ;;  %3834 = vmatmul.bf16.gmra.mxu2 %v10344_v16 }
 0x603   : > { %3923 = vmatmul.bf16.gmra.mxu3 %v10286_v6 }
 0x605   : > { %v3795_v0 = vpop.f32.mrf.mxu2 }
 0x606   : > { %v3796_v59 = vadd.f32 %v3795_v0, %v3707_v12  ;;  %v3884_v44 = vpop.f32.mrf.mxu3  ;;  %v3619_v61 = vpop.f32.mrf.mxu0 }
 0x607   : > { %v3620_v9 = vadd.f32 %v3619_v61, %v8856_v27  ;;  %v3708_v14 = vpop.f32.mrf.mxu1 }
 0x608   : > { %v9203_v25 = vadd.f32 %v3884_v44, %v3796_v59  ;;  %v3709_v5 = vadd.f32 %v3708_v14, %v9062_v35  ;;  %v10348_v59 = vld [vmem:[#allocation59_spill] sm:$0xff]  ;;  %v6398_v44 = vld [vmem:[%s9737_s3 + $0xb8] sm:$0xff] }
 0x609   : > { %v4341_v36 = vmax.f32 %v3620_v9, 0.0  ;;  %4925 = vmatpush.bf16.msrb.mxu2 %v6398_v44 }
 0x60b   : > { %v9205_v57 = vpack.c.bf16 %v4341_v36, %v4337_v29 }
 0x60d   : > { %10345 = vst [vmem:[#allocation56_spill] sm:$0xff] %v9205_v57  ;;  %v3797_v30 = vpop.f32.mrf.mxu2  ;;  %v10353_v57 = vld [vmem:[#allocation5_spill] sm:$0xff] }
 0x60e   : > { %v3798_v47 = vadd.f32 %v3797_v30, %v3709_v5  ;;  %v3886_v16 = vpop.f32.mrf.mxu3  ;;  %v3622_v10 = vpop.f32.mrf.mxu0  ;;  %v6390_v30 = vld [vmem:[%s9737_s3 + $0x78] sm:$0xff] }
 0x60f   : > { %v3623_v6 = vadd.f32 %v3622_v10, %v8881_v38  ;;  %v3711_v12 = vpop.f32.mrf.mxu1  ;;  %v6382_v38 = vld [vmem:[%s9737_s3 + $0x38] sm:$0xff]  ;;  %4836 = vmatpush.bf16.msrb.mxu1 %v6390_v30 }
 0x610   : > { %v9209_v0 = vadd.f32 %v3886_v16, %v3798_v47  ;;  %v3712_v27 = vadd.f32 %v3711_v12, %v9062_v35  ;;  %v6406_v10 = vld [vmem:[%s9737_s3 + $0xf8] sm:$0xff]  ;;  %4747 = vmatpush.bf16.msrb.mxu0 %v6382_v38 }
 0x611   : > { %6031 = vmatmul.msk.bf16.gmra.mxu0 %vm1754_vm0, %v10346_v33  ;;  %5014 = vmatpush.bf16.msrb.mxu3 %v6406_v10  ;;  %v4345_v47 = vmax.f32 %v3623_v6, 0.0 }
 0x612   : > { %3750 = vmatmul.bf16.gmra.mxu1 %v10347_v32  ;;  %3839 = vmatmul.bf16.gmra.mxu2 %v10348_v59 }
 0x613   : > { %3928 = vmatmul.bf16.gmra.mxu3 %v10289_v2 }
 0x615   : > { %v3800_v61 = vpop.f32.mrf.mxu2 }
 0x616   : > { %v3801_v9 = vadd.f32 %v3800_v61, %v3712_v27  ;;  %v3889_v14 = vpop.f32.mrf.mxu3  ;;  %v3624_v29 = vpop.f32.mrf.mxu0 }
 0x617   : > { %v3625_v2 = vadd.f32 %v3624_v29, %v8890_v28  ;;  %v3713_v36 = vpop.f32.mrf.mxu1  ;;  %v10352_v29 = vld [vmem:[#allocation63_spill] sm:$0xff] }
 0x618   : > { %v9227_v5 = vadd.f32 %v3889_v14, %v3801_v9  ;;  %v3714_v32 = vadd.f32 %v3713_v36, %v9062_v35  ;;  %v10350_v9 = vld [vmem:[#allocation124_spill] sm:$0xff]  ;;  %v10351_v14 = vld [vmem:[#allocation62_spill] sm:$0xff] }
 0x619   : > { %v4349_v16 = vmax.f32 %v3625_v2, 0.0 }
 0x61b   : > { %v9232_v12 = vpack.c.bf16 %v4349_v16, %v4345_v47 }
 0x61d   : > { %10349 = vst [vmem:[#allocation60_spill] sm:$0xff] %v9232_v12  ;;  %v3802_v27 = vpop.f32.mrf.mxu2 }
 0x61e   : > { %v3803_v59 = vadd.f32 %v3802_v27, %v3714_v32  ;;  %v3891_v44 = vpop.f32.mrf.mxu3  ;;  %v3627_v38 = vpop.f32.mrf.mxu0 }
 0x61f   : > { %v3628_v28 = vadd.f32 %v3627_v38, %v8897_v53  ;;  %v3716_v10 = vpop.f32.mrf.mxu1 }
 0x620   : > { %v9236_v61 = vadd.f32 %v3891_v44, %v3803_v59  ;;  %v3717_v6 = vadd.f32 %v3716_v10, %v9062_v35 }
 0x621   : > { %6032 = vmatmul.msk.bf16.gmra.mxu0 %vm1754_vm0, %v10350_v9  ;;  %v4353_v27 = vmax.f32 %v3628_v28, 0.0  ;;  %v10355_v28 = vld [vmem:[#allocation67_spill] sm:$0xff] }
 0x622   : > { %3755 = vmatmul.bf16.gmra.mxu1 %v10351_v14  ;;  %3844 = vmatmul.bf16.gmra.mxu2 %v10352_v29 }
 0x623   : > { %3933 = vmatmul.bf16.gmra.mxu3 %v10292_v13 }
 0x625   : > { %v3805_v2 = vpop.f32.mrf.mxu2 }
 0x626   : > { %v3806_v36 = vadd.f32 %v3805_v2, %v3717_v6  ;;  %v3894_v30 = vpop.f32.mrf.mxu3  ;;  %v3629_v47 = vpop.f32.mrf.mxu0 }
 0x627   : > { %v3630_v53 = vadd.f32 %v3629_v47, %v8900_v1  ;;  %v3718_v16 = vpop.f32.mrf.mxu1 }
 0x628   : > { %v9245_v32 = vadd.f32 %v3894_v30, %v3806_v36  ;;  %v3719_v38 = vadd.f32 %v3718_v16, %v9062_v35  ;;  %v10354_v36 = vld [vmem:[#allocation66_spill] sm:$0xff]  ;;  %v6397_v30 = vld [vmem:[%s9737_s3 + $0xb0] sm:$0xff] }
 0x629   : > { %v4357_v59 = vmax.f32 %v3630_v53, 0.0  ;;  %4926 = vmatpush.bf16.msrb.mxu2 %v6397_v30 }
 0x62b   : > { %v9247_v44 = vpack.c.bf16 %v4357_v59, %v4353_v27 }
 0x62d   : > { %v3807_v10 = vpop.f32.mrf.mxu2 }
 0x62e   : > { %v3808_v14 = vadd.f32 %v3807_v10, %v3719_v38  ;;  %v3896_v29 = vpop.f32.mrf.mxu3  ;;  %v3632_v12 = vpop.f32.mrf.mxu0  ;;  %v6389_v38 = vld [vmem:[%s9737_s3 + $0x70] sm:$0xff] }
 0x62f   : > { %v3633_v13 = vadd.f32 %v3632_v12, %v8920_v56  ;;  %v3721_v6 = vpop.f32.mrf.mxu1  ;;  %v6381_v56 = vld [vmem:[%s9737_s3 + $0x30] sm:$0xff]  ;;  %4837 = vmatpush.bf16.msrb.mxu1 %v6389_v38 }
 0x630   : > { %v9251_v2 = vadd.f32 %v3896_v29, %v3808_v14  ;;  %v3722_v1 = vadd.f32 %v3721_v6, %v9062_v35  ;;  %4748 = vmatpush.bf16.msrb.mxu0 %v6381_v56 }
 0x631   : > { %3947 = vmatmul.bf16.vlgmr.msra.gmra.mxu0 %v10353_v57  ;;  %v6405_v57 = vld [vmem:[%s9737_s3 + $0xf0] sm:$0xff]  ;;  %v4361_v10 = vmax.f32 %v3633_v13, 0.0  ;;  %v10357_v13 = vld [vmem:[#allocation69_spill] sm:$0xff] }
 0x632   : > { %4036 = vmatmul.bf16.vlgmr.msra.gmra.mxu1 %v10354_v36  ;;  %4125 = vmatmul.bf16.vlgmr.msra.gmra.mxu2 %v10355_v28 }
 0x633   : > { %6033 = vmatmul.msk.bf16.vlgmr.msra.gmra.mxu3 %vm1754_vm0, %v10295_v23 }
 0x634   : > { %5015 = vmatpush.bf16.msrb.mxu3 %v6405_v57 }
 0x635   : > { %v3810_v12 = vpop.f32.mrf.mxu2 }
 0x636   : > { %v3811_v47 = vadd.f32 %v3810_v12, %v3722_v1  ;;  %v3899_v53 = vpop.f32.mrf.mxu3  ;;  %v3634_v16 = vpop.f32.mrf.mxu0  ;;  %v10356_v12 = vld [vmem:[#allocation9_spill] sm:$0xff] }
 0x637   : > { %v3635_v23 = vadd.f32 %v3634_v16, %v8929_v26  ;;  %v3723_v27 = vpop.f32.mrf.mxu1 }
 0x638   : > { %v9269_v59 = vadd.f32 %v3899_v53, %v3811_v47  ;;  %v3724_v6 = vadd.f32 %v3723_v27, %v9062_v35  ;;  %v10358_v53 = vld [vmem:[#allocation70_spill] sm:$0xff] }
 0x639   : > { %v4365_v14 = vmax.f32 %v3635_v23, 0.0 }
 0x63b   : > { %v9274_v29 = vpack.c.bf16 %v4365_v14, %v4361_v10 }
 0x63d   : > { %v3812_v1 = vpop.f32.mrf.mxu2 }
 0x63e   : > { %v3813_v36 = vadd.f32 %v3812_v1, %v3724_v6  ;;  %v3901_v28 = vpop.f32.mrf.mxu3  ;;  %v3637_v30 = vpop.f32.mrf.mxu0 }
 0x63f   : > { %v3638_v26 = vadd.f32 %v3637_v30, %v8937_v43  ;;  %v3726_v56 = vpop.f32.mrf.mxu1 }
 0x640   : > { %v9278_v57 = vadd.f32 %v3901_v28, %v3813_v36  ;;  %v3727_v47 = vadd.f32 %v3726_v56, %v9062_v35 }
 0x641   : > { %3952 = vmatmul.bf16.gmra.mxu0 %v10356_v12  ;;  %v4369_v6 = vmax.f32 %v3638_v26, 0.0  ;;  %v10361_v26 = vld [vmem:[#allocation73_spill] sm:$0xff] }
 0x642   : > { %4041 = vmatmul.bf16.gmra.mxu1 %v10357_v13  ;;  %4130 = vmatmul.bf16.gmra.mxu2 %v10358_v53 }
 0x643   : > { %6034 = vmatmul.msk.bf16.gmra.mxu3 %vm1754_vm0, %v10298_v62 }
 0x645   : > { %v3815_v16 = vpop.f32.mrf.mxu2 }
 0x646   : > { %v3816_v23 = vadd.f32 %v3815_v16, %v3727_v47  ;;  %v3904_v27 = vpop.f32.mrf.mxu3  ;;  %v3639_v38 = vpop.f32.mrf.mxu0  ;;  %v10359_v16 = vld [vmem:[#allocation13_spill] sm:$0xff] }
 0x647   : > { %v3640_v43 = vadd.f32 %v3639_v38, %v8940_v40  ;;  %v3728_v10 = vpop.f32.mrf.mxu1  ;;  %v6404_v38 = vld [vmem:[%s9737_s3 + $0xe8] sm:$0xff] }
 0x648   : > { %v9287_v14 = vadd.f32 %v3904_v27, %v3816_v23  ;;  %v3729_v28 = vadd.f32 %v3728_v10, %v9062_v35  ;;  %v10360_v23 = vld [vmem:[#allocation72_spill] sm:$0xff]  ;;  %v6396_v27 = vld [vmem:[%s9737_s3 + $0xa8] sm:$0xff]  ;;  %5016 = vmatpush.bf16.msrb.mxu3 %v6404_v38 }
 0x649   : > { %v4373_v1 = vmax.f32 %v3640_v43, 0.0  ;;  %4927 = vmatpush.bf16.msrb.mxu2 %v6396_v27 }
 0x64b   : > { %v9289_v36 = vpack.c.bf16 %v4373_v1, %v4369_v6 }
 0x64d   : > { %v3817_v30 = vpop.f32.mrf.mxu2 }
 0x64e   : > { %v3818_v56 = vadd.f32 %v3817_v30, %v3729_v28  ;;  %v3906_v12 = vpop.f32.mrf.mxu3  ;;  %v3642_v13 = vpop.f32.mrf.mxu0 }
 0x64f   : > { %v3643_v62 = vadd.f32 %v3642_v13, %v8960_v3  ;;  %v3731_v47 = vpop.f32.mrf.mxu1  ;;  %v6380_v3 = vld [vmem:[%s9737_s3 + $0x28] sm:$0xff] }
 0x650   : > { %v9293_v53 = vadd.f32 %v3906_v12, %v3818_v56  ;;  %v3732_v40 = vadd.f32 %v3731_v47, %v9062_v35  ;;  %4749 = vmatpush.bf16.msrb.mxu0 %v6380_v3  ;;  %v6388_v56 = vld [vmem:[%s9737_s3 + $0x68] sm:$0xff] }
 0x651   : > { %3957 = vmatmul.bf16.gmra.mxu0 %v10359_v16  ;;  %v4377_v12 = vmax.f32 %v3643_v62, 0.0  ;;  %4838 = vmatpush.bf16.msrb.mxu1 %v6388_v56  ;;  %v10363_v62 = vld [vmem:[#allocation75_spill] sm:$0xff] }
 0x652   : > { %4046 = vmatmul.bf16.gmra.mxu1 %v10360_v23  ;;  %4135 = vmatmul.bf16.gmra.mxu2 %v10361_v26 }
 0x653   : > { %6035 = vmatmul.msk.bf16.gmra.mxu3 %vm1754_vm0, %v10301_v55 }
 0x655   : > { %v3820_v43 = vpop.f32.mrf.mxu2 }
 0x656   : > { %v3821_v10 = vadd.f32 %v3820_v43, %v3732_v40  ;;  %v3909_v6 = vpop.f32.mrf.mxu3  ;;  %v3644_v1 = vpop.f32.mrf.mxu0  ;;  %v10362_v43 = vld [vmem:[#allocation17_spill] sm:$0xff] }
 0x657   : > { %v3645_v55 = vadd.f32 %v3644_v1, %v8969_v11  ;;  %v3733_v28 = vpop.f32.mrf.mxu1 }
 0x658   : > { %v9311_v30 = vadd.f32 %v3909_v6, %v3821_v10  ;;  %v3734_v16 = vadd.f32 %v3733_v28, %v9062_v35  ;;  %v10364_v6 = vld [vmem:[#allocation76_spill] sm:$0xff] }
 0x659   : > { %v4381_v13 = vmax.f32 %v3645_v55, 0.0 }
 0x65b   : > { %v9316_v47 = vpack.c.bf16 %v4381_v13, %v4377_v12 }
 0x65d   : > { %v3822_v40 = vpop.f32.mrf.mxu2 }
 0x65e   : > { %v3823_v23 = vadd.f32 %v3822_v40, %v3734_v16  ;;  %v3911_v26 = vpop.f32.mrf.mxu3  ;;  %v3647_v27 = vpop.f32.mrf.mxu0 }
 0x65f   : > { %v3648_v11 = vadd.f32 %v3647_v27, %v8977_v50  ;;  %v3736_v3 = vpop.f32.mrf.mxu1 }
 0x660   : > { %v9320_v38 = vadd.f32 %v3911_v26, %v3823_v23  ;;  %v3737_v10 = vadd.f32 %v3736_v3, %v9062_v35 }
 0x661   : > { %3962 = vmatmul.bf16.gmra.mxu0 %v10362_v43  ;;  %v4385_v16 = vmax.f32 %v3648_v11, 0.0  ;;  %v10367_v11 = vld [vmem:[#allocation80_spill] sm:$0xff] }
 0x662   : > { %4051 = vmatmul.bf16.gmra.mxu1 %v10363_v62  ;;  %4140 = vmatmul.bf16.gmra.mxu2 %v10364_v6 }
 0x663   : > { %6036 = vmatmul.msk.bf16.gmra.mxu3 %vm1754_vm0, %v10304_v31 }
 0x665   : > { %v3825_v1 = vpop.f32.mrf.mxu2 }
 0x666   : > { %v3826_v55 = vadd.f32 %v3825_v1, %v3737_v10  ;;  %v3914_v28 = vpop.f32.mrf.mxu3  ;;  %v3649_v56 = vpop.f32.mrf.mxu0  ;;  %v10365_v1 = vld [vmem:[#allocation21_spill] sm:$0xff] }
 0x667   : > { %v3650_v50 = vadd.f32 %v3649_v56, %v8980_v24  ;;  %v3738_v12 = vpop.f32.mrf.mxu1  ;;  %v6403_v56 = vld [vmem:[%s9737_s3 + $0xe0] sm:$0xff] }
 0x668   : > { %v9329_v13 = vadd.f32 %v3914_v28, %v3826_v55  ;;  %v3739_v26 = vadd.f32 %v3738_v12, %v9062_v35  ;;  %v10366_v55 = vld [vmem:[#allocation79_spill] sm:$0xff]  ;;  %v6395_v28 = vld [vmem:[%s9737_s3 + $0xa0] sm:$0xff]  ;;  %5017 = vmatpush.bf16.msrb.mxu3 %v6403_v56 }
 0x669   : > { %v4389_v40 = vmax.f32 %v3650_v50, 0.0  ;;  %4928 = vmatpush.bf16.msrb.mxu2 %v6395_v28 }
 0x66b   : > { %v9331_v23 = vpack.c.bf16 %v4389_v40, %v4385_v16 }
 0x66d   : > { %v3827_v27 = vpop.f32.mrf.mxu2 }
 0x66e   : > { %v3828_v3 = vadd.f32 %v3827_v27, %v3739_v26  ;;  %v3916_v43 = vpop.f32.mrf.mxu3  ;;  %v3652_v62 = vpop.f32.mrf.mxu0 }
 0x66f   : > { %v3653_v31 = vadd.f32 %v3652_v62, %v9000_v52  ;;  %v3741_v10 = vpop.f32.mrf.mxu1  ;;  %v6379_v52 = vld [vmem:[%s9737_s3 + $0x20] sm:$0xff] }
 0x670   : > { %v9335_v6 = vadd.f32 %v3916_v43, %v3828_v3  ;;  %v3742_v24 = vadd.f32 %v3741_v10, %v9062_v35  ;;  %4750 = vmatpush.bf16.msrb.mxu0 %v6379_v52  ;;  %v6387_v3 = vld [vmem:[%s9737_s3 + $0x60] sm:$0xff] }
 0x671   : > { %3967 = vmatmul.bf16.gmra.mxu0 %v10365_v1  ;;  %v4393_v43 = vmax.f32 %v3653_v31, 0.0  ;;  %4839 = vmatpush.bf16.msrb.mxu1 %v6387_v3  ;;  %v10369_v31 = vld [vmem:[#allocation83_spill] sm:$0xff] }
 0x672   : > { %4056 = vmatmul.bf16.gmra.mxu1 %v10366_v55  ;;  %4145 = vmatmul.bf16.gmra.mxu2 %v10367_v11 }
 0x673   : > { %6037 = vmatmul.msk.bf16.gmra.mxu3 %vm1754_vm0, %v10307_v39 }
 0x675   : > { %v3830_v50 = vpop.f32.mrf.mxu2 }
 0x676   : > { %v3831_v12 = vadd.f32 %v3830_v50, %v3742_v24  ;;  %v3919_v16 = vpop.f32.mrf.mxu3  ;;  %v3654_v40 = vpop.f32.mrf.mxu0  ;;  %v10368_v50 = vld [vmem:[#allocation25_spill] sm:$0xff] }
 0x677   : > { %v3655_v39 = vadd.f32 %v3654_v40, %v9009_v19  ;;  %v3743_v26 = vpop.f32.mrf.mxu1 }
 0x678   : > { %v9353_v27 = vadd.f32 %v3919_v16, %v3831_v12  ;;  %v3744_v1 = vadd.f32 %v3743_v26, %v9062_v35  ;;  %v10370_v16 = vld [vmem:[#allocation84_spill] sm:$0xff] }
 0x679   : > { %v4397_v62 = vmax.f32 %v3655_v39, 0.0 }
 0x67b   : > { %v9358_v10 = vpack.c.bf16 %v4397_v62, %v4393_v43 }
 0x67d   : > { %v3832_v24 = vpop.f32.mrf.mxu2 }
 0x67e   : > { %v3833_v55 = vadd.f32 %v3832_v24, %v3744_v1  ;;  %v3921_v11 = vpop.f32.mrf.mxu3  ;;  %v3657_v28 = vpop.f32.mrf.mxu0 }
 0x67f   : > { %v3658_v19 = vadd.f32 %v3657_v28, %v9017_v42  ;;  %v3746_v52 = vpop.f32.mrf.mxu1 }
 0x680   : > { %v9362_v56 = vadd.f32 %v3921_v11, %v3833_v55  ;;  %v3747_v12 = vadd.f32 %v3746_v52, %v9062_v35 }
 0x681   : > { %3972 = vmatmul.bf16.gmra.mxu0 %v10368_v50  ;;  %v4401_v1 = vmax.f32 %v3658_v19, 0.0  ;;  %v10373_v19 = vld [vmem:[#allocation88_spill] sm:$0xff] }
 0x682   : > { %4061 = vmatmul.bf16.gmra.mxu1 %v10369_v31  ;;  %4150 = vmatmul.bf16.gmra.mxu2 %v10370_v16 }
 0x683   : > { %6038 = vmatmul.msk.bf16.gmra.mxu3 %vm1754_vm0, %v10310_v49 }
 0x685   : > { %v3835_v40 = vpop.f32.mrf.mxu2 }
 0x686   : > { %v3836_v39 = vadd.f32 %v3835_v40, %v3747_v12  ;;  %v3924_v26 = vpop.f32.mrf.mxu3  ;;  %v3659_v3 = vpop.f32.mrf.mxu0  ;;  %v10371_v40 = vld [vmem:[#allocation29_spill] sm:$0xff] }
 0x687   : > { %v3660_v42 = vadd.f32 %v3659_v3, %v9020_v60  ;;  %v3748_v43 = vpop.f32.mrf.mxu1  ;;  %v6402_v3 = vld [vmem:[%s9737_s3 + $0xd8] sm:$0xff] }
 0x688   : > { %v9371_v62 = vadd.f32 %v3924_v26, %v3836_v39  ;;  %v3749_v11 = vadd.f32 %v3748_v43, %v9062_v35  ;;  %v10372_v39 = vld [vmem:[#allocation87_spill] sm:$0xff]  ;;  %v6394_v26 = vld [vmem:[%s9737_s3 + $0x98] sm:$0xff]  ;;  %5018 = vmatpush.bf16.msrb.mxu3 %v6402_v3 }
 0x689   : > { %v4405_v24 = vmax.f32 %v3660_v42, 0.0  ;;  %4929 = vmatpush.bf16.msrb.mxu2 %v6394_v26 }
 0x68b   : > { %v9373_v55 = vpack.c.bf16 %v4405_v24, %v4401_v1 }
 0x68d   : > { %v3837_v28 = vpop.f32.mrf.mxu2 }
 0x68e   : > { %v3838_v52 = vadd.f32 %v3837_v28, %v3749_v11  ;;  %v3926_v50 = vpop.f32.mrf.mxu3  ;;  %v3662_v31 = vpop.f32.mrf.mxu0 }
 0x68f   : > { %v3663_v49 = vadd.f32 %v3662_v31, %v9040_v20  ;;  %v3751_v12 = vpop.f32.mrf.mxu1  ;;  %v6378_v20 = vld [vmem:[%s9737_s3 + $0x18] sm:$0xff] }
 0x690   : > { %v9377_v16 = vadd.f32 %v3926_v50, %v3838_v52  ;;  %v3752_v60 = vadd.f32 %v3751_v12, %v9062_v35  ;;  %4751 = vmatpush.bf16.msrb.mxu0 %v6378_v20  ;;  %v6386_v31 = vld [vmem:[%s9737_s3 + $0x58] sm:$0xff] }
 0x691   : > { %3977 = vmatmul.bf16.gmra.mxu0 %v10371_v40  ;;  %v4409_v52 = vmax.f32 %v3663_v49, 0.0  ;;  %4840 = vmatpush.bf16.msrb.mxu1 %v6386_v31  ;;  %v10375_v49 = vld [vmem:[#allocation33_spill] sm:$0xff] }
 0x692   : > { %4066 = vmatmul.bf16.gmra.mxu1 %v10372_v39  ;;  %4155 = vmatmul.bf16.gmra.mxu2 %v10373_v19 }
 0x693   : > { %6039 = vmatmul.msk.bf16.gmra.mxu3 %vm1754_vm0, %v10313_v51 }
 0x695   : > { %v3840_v42 = vpop.f32.mrf.mxu2 }
 0x696   : > { %v3841_v43 = vadd.f32 %v3840_v42, %v3752_v60  ;;  %v3929_v1 = vpop.f32.mrf.mxu3  ;;  %v3664_v24 = vpop.f32.mrf.mxu0 }
 0x697   : > { %v3665_v51 = vadd.f32 %v3664_v24, %v9049_v22  ;;  %v3753_v11 = vpop.f32.mrf.mxu1 }
 0x698   : > { %v9395_v28 = vadd.f32 %v3929_v1, %v3841_v43  ;;  %v3754_v40 = vadd.f32 %v3753_v11, %v9062_v35  ;;  %v10376_v43 = vld [vmem:[#allocation91_spill] sm:$0xff]  ;;  %v10377_v1 = vld [vmem:[#allocation92_spill] sm:$0xff] }
 0x699   : > { %v4413_v50 = vmax.f32 %v3665_v51, 0.0 }
 0x69b   : > { %v9400_v12 = vpack.c.bf16 %v4413_v50, %v4409_v52 }
 0x69d   : > { %10374 = vst [vmem:[#allocation64_spill] sm:$0xff] %v9400_v12  ;;  %v3842_v60 = vpop.f32.mrf.mxu2 }
 0x69e   : > { %v3843_v39 = vadd.f32 %v3842_v60, %v3754_v40  ;;  %v3931_v19 = vpop.f32.mrf.mxu3  ;;  %v3667_v26 = vpop.f32.mrf.mxu0 }
 0x69f   : > { %v3668_v22 = vadd.f32 %v3667_v26, %v9057_v15  ;;  %v3756_v20 = vpop.f32.mrf.mxu1 }
 0x6a0   : > { %v9404_v3 = vadd.f32 %v3931_v19, %v3843_v39  ;;  %v3757_v42 = vadd.f32 %v3756_v20, %v9062_v35 }
 0x6a1   : > { %3982 = vmatmul.bf16.gmra.mxu0 %v10375_v49  ;;  %v4417_v40 = vmax.f32 %v3668_v22, 0.0  ;;  %v10381_v22 = vld [vmem:[#allocation96_spill] sm:$0xff] }
 0x6a2   : > { %4071 = vmatmul.bf16.gmra.mxu1 %v10376_v43  ;;  %4160 = vmatmul.bf16.gmra.mxu2 %v10377_v1 }
 0x6a3   : > { %6040 = vmatmul.msk.bf16.gmra.mxu3 %vm1754_vm0, %v10317_v34  ;;  %v10378_v34 = vld [vmem:[#allocation130_spill] sm:$0xff] }
 0x6a5   : > { %v3845_v24 = vpop.f32.mrf.mxu2 }
 0x6a6   : > { %v3846_v51 = vadd.f32 %v3845_v24, %v3757_v42  ;;  %v3934_v11 = vpop.f32.mrf.mxu3  ;;  %v3669_v52 = vpop.f32.mrf.mxu0 }
 0x6a7   : > { %v3670_v15 = vadd.f32 %v3669_v52, %v9065_v37  ;;  %v3758_v50 = vpop.f32.mrf.mxu1  ;;  %v10379_v37 = vld [vmem:[#allocation37_spill] sm:$0xff]  ;;  %v6377_v52 = vld [vmem:[%s9737_s3 + $0x10] sm:$0xff] }
 0x6a8   : > { %v9413_v31 = vadd.f32 %v3934_v11, %v3846_v51  ;;  %v3759_v19 = vadd.f32 %v3758_v50, %v9062_v35  ;;  %v10380_v51 = vld [vmem:[#allocation95_spill] sm:$0xff]  ;;  %v10382_v11 = vld [vmem:[#allocation97_spill] sm:$0xff]  ;;  %v6393_v35 = vld [vmem:[%s9737_s3 + $0x90] sm:$0xff]  ;;  %4752 = vmatpush.bf16.msrb.mxu0 %v6377_v52 }
 0x6a9   : > { %v4421_v60 = vmax.f32 %v3670_v15, 0.0  ;;  %v6401_v15 = vld [vmem:[%s9737_s3 + $0xd0] sm:$0xff]  ;;  %4930 = vmatpush.bf16.msrb.mxu2 %v6393_v35  ;;  %v10383_v52 = vld [vmem:[#allocation41_spill] sm:$0xff] }
 0x6aa   : > { %5019 = vmatpush.bf16.msrb.mxu3 %v6401_v15 }
 0x6ab   : > { %v9415_v39 = vpack.c.bf16 %v4421_v60, %v4417_v40 }
 0x6ad   : > { %v3847_v26 = vpop.f32.mrf.mxu2 }
 0x6ae   : > { %v3848_v20 = vadd.f32 %v3847_v26, %v3759_v19  ;;  %v3936_v49 = vpop.f32.mrf.mxu3  ;;  %v3948_v43 = vpop.f32.mrf.mxu0 }
 0x6af   : > { %v3949_v1 = vadd.f32 %v3948_v43, %v10378_v34  ;;  %v4037_v42 = vpop.f32.mrf.mxu1  ;;  %v6385_v34 = vld [vmem:[%s9737_s3 + $0x50] sm:$0xff] }
 0x6b0   : > { %v9419_v24 = vadd.f32 %v3936_v49, %v3848_v20  ;;  %4841 = vmatpush.bf16.msrb.mxu1 %v6385_v34 }
 0x6b1   : > { %v4038_v12 = vadd.f32 %v4037_v42, %v3949_v1  ;;  %3987 = vmatmul.bf16.gmra.mxu0 %v10379_v37 }
 0x6b2   : > { %4076 = vmatmul.bf16.gmra.mxu1 %v10380_v51  ;;  %4165 = vmatmul.bf16.gmra.mxu2 %v10381_v22 }
 0x6b3   : > { %6041 = vmatmul.msk.bf16.gmra.mxu3 %vm1754_vm0, %v10382_v11 }
 0x6b5   : > { %v4126_v50 = vpop.f32.mrf.mxu2 }
 0x6b6   : > { %v4127_v40 = vadd.f32 %v4126_v50, %v4038_v12  ;;  %v4215_v60 = vpop.f32.mrf.mxu3  ;;  %v3950_v19 = vpop.f32.mrf.mxu0  ;;  %v10384_v50 = vld [vmem:[#allocation98_spill] sm:$0xff] }
 0x6b7   : > { %v3951_v26 = vadd.f32 %v3950_v19, %v9098_v21  ;;  %v4039_v20 = vpop.f32.mrf.mxu1 }
 0x6b8   : > { %v4216_v49 = vadd.f32 %v4215_v60, %v4127_v40  ;;  %v10385_v40 = vld [vmem:[#allocation99_spill] sm:$0xff]  ;;  %v10386_v60 = vld [vmem:[#allocation100_spill] sm:$0xff] }
 0x6b9   : > { %v4040_v43 = vadd.f32 %v4039_v20, %v3951_v26 }
 0x6ba   : > { %v4298_v21 = vmax.f32 %v4216_v49, 0.0 }
 0x6bd   : > { %v4128_v1 = vpop.f32.mrf.mxu2 }
 0x6be   : > { %v4129_v42 = vadd.f32 %v4128_v1, %v4040_v43  ;;  %v4217_v37 = vpop.f32.mrf.mxu3  ;;  %v3953_v51 = vpop.f32.mrf.mxu0 }
 0x6bf   : > { %v3954_v22 = vadd.f32 %v3953_v51, %v9107_v54  ;;  %v4042_v12 = vpop.f32.mrf.mxu1 }
 0x6c0   : > { %v4218_v11 = vadd.f32 %v4217_v37, %v4129_v42 }
 0x6c1   : > { %v4043_v35 = vadd.f32 %v4042_v12, %v3954_v22  ;;  %3992 = vmatmul.bf16.gmra.mxu0 %v10383_v52 }
 0x6c2   : > { %v4302_v15 = vmax.f32 %v4218_v11, 0.0  ;;  %4081 = vmatmul.bf16.gmra.mxu1 %v10384_v50  ;;  %4170 = vmatmul.bf16.gmra.mxu2 %v10385_v40 }
 0x6c3   : > { %6042 = vmatmul.msk.bf16.gmra.mxu3 %vm1754_vm0, %v10386_v60  ;;  %v10388_v60 = vld [vmem:[#allocation102_spill] sm:$0xff] }
 0x6c4   : > { %v9445_v19 = vpack.c.bf16 %v4302_v15, %v4298_v21  ;;  %v10387_v21 = vld [vmem:[#allocation45_spill] sm:$0xff] }
 0x6c5   : > { %v4131_v26 = vpop.f32.mrf.mxu2 }
 0x6c6   : > { %v4132_v20 = vadd.f32 %v4131_v26, %v4043_v35  ;;  %v4220_v43 = vpop.f32.mrf.mxu3  ;;  %v3955_v54 = vpop.f32.mrf.mxu0  ;;  %v10389_v26 = vld [vmem:[#allocation103_spill] sm:$0xff] }
 0x6c7   : > { %v3956_v34 = vadd.f32 %v3955_v54, %v9113_v17  ;;  %v4044_v1 = vpop.f32.mrf.mxu1  ;;  %v6392_v17 = vld [vmem:[%s9737_s3 + $0x88] sm:$0xff] }
 0x6c8   : > { %v4221_v42 = vadd.f32 %v4220_v43, %v4132_v20  ;;  %v6400_v20 = vld [vmem:[%s9737_s3 + $0xc8] sm:$0xff]  ;;  %4931 = vmatpush.bf16.msrb.mxu2 %v6392_v17  ;;  %v10391_v17 = vld [vmem:[#allocation106_spill] sm:$0xff] }
 0x6c9   : > { %v4045_v37 = vadd.f32 %v4044_v1, %v3956_v34  ;;  %5020 = vmatpush.bf16.msrb.mxu3 %v6400_v20 }
 0x6ca   : > { %v4306_v15 = vmax.f32 %v4221_v42, 0.0 }
 0x6cd   : > { %v4133_v49 = vpop.f32.mrf.mxu2 }
 0x6ce   : > { %v4134_v51 = vadd.f32 %v4133_v49, %v4045_v37  ;;  %v4222_v22 = vpop.f32.mrf.mxu3  ;;  %v3958_v12 = vpop.f32.mrf.mxu0 }
 0x6cf   : > { %v3959_v11 = vadd.f32 %v3958_v12, %v9134_v58  ;;  %v4047_v52 = vpop.f32.mrf.mxu1  ;;  %v6376_v58 = vld [vmem:[%s9737_s3 + $0x8] sm:$0xff] }
 0x6d0   : > { %v4223_v50 = vadd.f32 %v4222_v22, %v4134_v51  ;;  %4753 = vmatpush.bf16.msrb.mxu0 %v6376_v58  ;;  %v6384_v22 = vld [vmem:[%s9737_s3 + $0x48] sm:$0xff] }
 0x6d1   : > { %v4048_v40 = vadd.f32 %v4047_v52, %v3959_v11  ;;  %3997 = vmatmul.bf16.gmra.mxu0 %v10387_v21  ;;  %4842 = vmatpush.bf16.msrb.mxu1 %v6384_v22  ;;  %v10392_v58 = vld [vmem:[#allocation107_spill] sm:$0xff] }
 0x6d2   : > { %v4310_v35 = vmax.f32 %v4223_v50, 0.0  ;;  %4086 = vmatmul.bf16.gmra.mxu1 %v10388_v60  ;;  %4175 = vmatmul.bf16.gmra.mxu2 %v10389_v26  ;;  %v10390_v60 = vld [vmem:[#allocation49_spill] sm:$0xff] }
 0x6d3   : > { %6043 = vmatmul.msk.bf16.gmra.mxu3 %vm1754_vm0, %v10330_v8 }
 0x6d4   : > { %v9463_v43 = vpack.c.bf16 %v4310_v35, %v4306_v15 }
 0x6d5   : > { %v4136_v54 = vpop.f32.mrf.mxu2 }
 0x6d6   : > { %v4137_v34 = vadd.f32 %v4136_v54, %v4048_v40  ;;  %v4225_v1 = vpop.f32.mrf.mxu3  ;;  %v3960_v8 = vpop.f32.mrf.mxu0 }
 0x6d7   : > { %v3961_v42 = vadd.f32 %v3960_v8, %v9146_v41  ;;  %v4049_v37 = vpop.f32.mrf.mxu1 }
 0x6d8   : > { %v4226_v49 = vadd.f32 %v4225_v1, %v4137_v34 }
 0x6d9   : > { %v4050_v51 = vadd.f32 %v4049_v37, %v3961_v42 }
 0x6da   : > { %v4314_v41 = vmax.f32 %v4226_v49, 0.0 }
 0x6dd   : > { %v4138_v12 = vpop.f32.mrf.mxu2 }
 0x6de   : > { %v4139_v11 = vadd.f32 %v4138_v12, %v4050_v51  ;;  %v4227_v52 = vpop.f32.mrf.mxu3  ;;  %v3963_v50 = vpop.f32.mrf.mxu0 }
 0x6df   : > { %v3964_v21 = vadd.f32 %v3963_v50, %v9155_v48  ;;  %v4052_v40 = vpop.f32.mrf.mxu1 }
 0x6e0   : > { %v4228_v15 = vadd.f32 %v4227_v52, %v4139_v11 }
 0x6e1   : > { %v4053_v35 = vadd.f32 %v4052_v40, %v3964_v21  ;;  %4002 = vmatmul.bf16.gmra.mxu0 %v10390_v60  ;;  %v10393_v40 = vld [vmem:[#allocation53_spill] sm:$0xff]  ;;  %v10394_v60 = vld [vmem:[#allocation110_spill] sm:$0xff] }
 0x6e2   : > { %v4318_v26 = vmax.f32 %v4228_v15, 0.0  ;;  %4091 = vmatmul.bf16.gmra.mxu1 %v10391_v17  ;;  %4180 = vmatmul.bf16.gmra.mxu2 %v10392_v58 }
 0x6e3   : > { %6044 = vmatmul.msk.bf16.gmra.mxu3 %vm1754_vm0, %v10334_v46 }
 0x6e4   : > { %v9475_v20 = vpack.c.bf16 %v4318_v26, %v4314_v41  ;;  %v10395_v41 = vld [vmem:[#allocation111_spill] sm:$0xff]  ;;  %v6399_v26 = vld [vmem:[%s9737_s3 + $0xc0] sm:$0xff] }
 0x6e5   : > { %v4141_v54 = vpop.f32.mrf.mxu2  ;;  %5021 = vmatpush.bf16.msrb.mxu3 %v6399_v26 }
 0x6e6   : > { %v4142_v34 = vadd.f32 %v4141_v54, %v4053_v35  ;;  %v4230_v1 = vpop.f32.mrf.mxu3  ;;  %v3965_v48 = vpop.f32.mrf.mxu0 }
 0x6e7   : > { %v3966_v8 = vadd.f32 %v3965_v48, %v9161_v45  ;;  %v4054_v42 = vpop.f32.mrf.mxu1  ;;  %v6391_v45 = vld [vmem:[%s9737_s3 + $0x80] sm:$0xff] }
 0x6e8   : > { %v4231_v37 = vadd.f32 %v4230_v1, %v4142_v34  ;;  %4932 = vmatpush.bf16.msrb.mxu2 %v6391_v45 }
 0x6e9   : > { %v4055_v51 = vadd.f32 %v4054_v42, %v3966_v8 }
 0x6ea   : > { %v4322_v15 = vmax.f32 %v4231_v37, 0.0  ;;  %v6383_v37 = vld [vmem:[%s9737_s3 + $0x40] sm:$0xff] }
 0x6eb   : > { %4843 = vmatpush.bf16.msrb.mxu1 %v6383_v37 }
 0x6ed   : > { %v4143_v49 = vpop.f32.mrf.mxu2 }
 0x6ee   : > { %v4144_v22 = vadd.f32 %v4143_v49, %v4055_v51  ;;  %v4232_v12 = vpop.f32.mrf.mxu3  ;;  %v3968_v11 = vpop.f32.mrf.mxu0 }
 0x6ef   : > { %v3969_v52 = vadd.f32 %v3968_v11, %v9182_v7  ;;  %v4057_v50 = vpop.f32.mrf.mxu1  ;;  %v6375_v7 = vld [vmem:[%s9737_s3] sm:$0xff] }
 0x6f0   : > { %v4233_v21 = vadd.f32 %v4232_v12, %v4144_v22  ;;  %4754 = vmatpush.bf16.msrb.mxu0 %v6375_v7 }
 0x6f1   : > { %v4058_v46 = vadd.f32 %v4057_v50, %v3969_v52  ;;  %4007 = vmatmul.bf16.gmra.mxu0 %v10393_v40 }
 0x6f2   : > { %v4326_v35 = vmax.f32 %v4233_v21, 0.0  ;;  %4096 = vmatmul.bf16.gmra.mxu1 %v10394_v60  ;;  %4185 = vmatmul.bf16.gmra.mxu2 %v10395_v41 }
 0x6f3   : > { %6045 = vmatmul.msk.bf16.gmra.mxu3 %vm1754_vm0, %v10338_v4 }
 0x6f4   : > { %v9493_v17 = vpack.c.bf16 %v4326_v35, %v4322_v15  ;;  %v10397_v15 = vld [vmem:[#allocation114_spill] sm:$0xff]  ;;  %v10398_v35 = vld [vmem:[#allocation115_spill] sm:$0xff] }
 0x6f5   : > { %v4146_v58 = vpop.f32.mrf.mxu2 }
 0x6f6   : > { %v4147_v54 = vadd.f32 %v4146_v58, %v4058_v46  ;;  %v4235_v34 = vpop.f32.mrf.mxu3  ;;  %v3970_v4 = vpop.f32.mrf.mxu0  ;;  %v10396_v46 = vld [vmem:[#allocation57_spill] sm:$0xff] }
 0x6f7   : > { %v3971_v1 = vadd.f32 %v3970_v4, %v9194_v18  ;;  %v4059_v48 = vpop.f32.mrf.mxu1 }
 0x6f8   : > { %v4236_v8 = vadd.f32 %v4235_v34, %v4147_v54 }
 0x6f9   : > { %v4060_v42 = vadd.f32 %v4059_v48, %v3971_v1 }
 0x6fa   : > { %v4330_v18 = vmax.f32 %v4236_v8, 0.0 }
 0x6fd   : > { %v4148_v51 = vpop.f32.mrf.mxu2 }
 0x6fe   : > { %v4149_v49 = vadd.f32 %v4148_v51, %v4060_v42  ;;  %v4237_v22 = vpop.f32.mrf.mxu3  ;;  %v3973_v12 = vpop.f32.mrf.mxu0 }
 0x6ff   : > { %v3974_v11 = vadd.f32 %v3973_v12, %v9203_v25  ;;  %v4062_v52 = vpop.f32.mrf.mxu1 }
 0x700   : > { %v4238_v50 = vadd.f32 %v4237_v22, %v4149_v49  ;;  %v10399_v49 = vld [vmem:[#allocation61_spill] sm:$0xff] }
 0x701   : > { %v4063_v21 = vadd.f32 %v4062_v52, %v3974_v11  ;;  %4012 = vmatmul.bf16.gmra.mxu0 %v10396_v46  ;;  %v10400_v11 = vld [vmem:[#allocation118_spill] sm:$0xff]  ;;  %v10401_v52 = vld [vmem:[#allocation119_spill] sm:$0xff] }
 0x702   : > { %v4334_v40 = vmax.f32 %v4238_v50, 0.0  ;;  %4101 = vmatmul.bf16.gmra.mxu1 %v10397_v15  ;;  %4190 = vmatmul.bf16.gmra.mxu2 %v10398_v35 }
 0x703   : > { %6046 = vmatmul.msk.bf16.gmra.mxu3 %vm1754_vm0, %v10342_v63 }
 0x704   : > { %v9505_v60 = vpack.c.bf16 %v4334_v40, %v4330_v18 }
 0x705   : > { %v4151_v41 = vpop.f32.mrf.mxu2 }
 0x706   : > { %v4152_v45 = vadd.f32 %v4151_v41, %v4063_v21  ;;  %v4240_v7 = vpop.f32.mrf.mxu3  ;;  %v3975_v25 = vpop.f32.mrf.mxu0 }
 0x707   : > { %v3976_v26 = vadd.f32 %v3975_v25, %v9209_v0  ;;  %v4064_v58 = vpop.f32.mrf.mxu1 }
 0x708   : > { %v4241_v54 = vadd.f32 %v4240_v7, %v4152_v45 }
 0x709   : > { %v4065_v34 = vadd.f32 %v4064_v58, %v3976_v26 }
 0x70a   : > { %v4338_v22 = vmax.f32 %v4241_v54, 0.0 }
 0x70d   : > { %v4153_v4 = vpop.f32.mrf.mxu2 }
 0x70e   : > { %v4154_v1 = vadd.f32 %v4153_v4, %v4065_v34  ;;  %v4242_v48 = vpop.f32.mrf.mxu3  ;;  %v3978_v8 = vpop.f32.mrf.mxu0  ;;  %v10402_v34 = vld [vmem:[#allocation65_spill] sm:$0xff] }
 0x70f   : > { %v3979_v42 = vadd.f32 %v3978_v8, %v9227_v5  ;;  %v4067_v37 = vpop.f32.mrf.mxu1  ;;  %v10404_v8 = vld [vmem:[#allocation123_spill] sm:$0xff] }
 0x710   : > { %v4243_v51 = vadd.f32 %v4242_v48, %v4154_v1  ;;  %v10403_v48 = vld [vmem:[#allocation122_spill] sm:$0xff] }
 0x711   : > { %v4068_v63 = vadd.f32 %v4067_v37, %v3979_v42  ;;  %4017 = vmatmul.bf16.gmra.mxu0 %v10399_v49 }
 0x712   : > { %v4342_v12 = vmax.f32 %v4243_v51, 0.0  ;;  %4106 = vmatmul.bf16.gmra.mxu1 %v10400_v11  ;;  %4195 = vmatmul.bf16.gmra.mxu2 %v10401_v52 }
 0x713   : > { %6047 = vmatmul.msk.bf16.gmra.mxu3 %vm1754_vm0, %v10346_v33 }
 0x714   : > { %v9514_v0 = vpack.c.bf16 %v4342_v12, %v4338_v22 }
 0x715   : > { %v4156_v50 = vpop.f32.mrf.mxu2 }
 0x716   : > { %v4157_v21 = vadd.f32 %v4156_v50, %v4068_v63  ;;  %v4245_v46 = vpop.f32.mrf.mxu3  ;;  %v3980_v5 = vpop.f32.mrf.mxu0 }
 0x717   : > { %v3981_v18 = vadd.f32 %v3980_v5, %v9236_v61  ;;  %v4069_v40 = vpop.f32.mrf.mxu1 }
 0x718   : > { %v4246_v15 = vadd.f32 %v4245_v46, %v4157_v21 }
 0x719   : > { %v4070_v35 = vadd.f32 %v4069_v40, %v3981_v18  ;;  %v10405_v40 = vld [vmem:[#allocation101_spill] sm:$0xff] }
 0x71a   : > { %v4346_v4 = vmax.f32 %v4246_v15, 0.0 }
 0x71d   : > { %v4158_v41 = vpop.f32.mrf.mxu2 }
 0x71e   : > { %v4159_v45 = vadd.f32 %v4158_v41, %v4070_v35  ;;  %v4247_v7 = vpop.f32.mrf.mxu3  ;;  %v3983_v25 = vpop.f32.mrf.mxu0  ;;  %v10406_v41 = vld [vmem:[#allocation129_spill] sm:$0xff] }
 0x71f   : > { %v3984_v26 = vadd.f32 %v3983_v25, %v9245_v32  ;;  %v4072_v58 = vpop.f32.mrf.mxu1 }
 0x720   : > { %v4248_v54 = vadd.f32 %v4247_v7, %v4159_v45  ;;  %v10407_v45 = vld [vmem:[#allocation36_spill] sm:$0xff] }
 0x721   : > { %v4073_v33 = vadd.f32 %v4072_v58, %v3984_v26  ;;  %4022 = vmatmul.bf16.gmra.mxu0 %v10402_v34 }
 0x722   : > { %v4350_v1 = vmax.f32 %v4248_v54, 0.0  ;;  %4111 = vmatmul.bf16.gmra.mxu1 %v10403_v48  ;;  %4200 = vmatmul.bf16.gmra.mxu2 %v10404_v8 }
 0x723   : > { %6048 = vmatmul.msk.bf16.gmra.mxu3 %vm1754_vm0, %v10350_v9 }
 0x724   : > { %v9523_v61 = vpack.c.bf16 %v4350_v1, %v4346_v4 }
 0x725   : > { %v4161_v42 = vpop.f32.mrf.mxu2 }
 0x726   : > { %v4162_v37 = vadd.f32 %v4161_v42, %v4073_v33  ;;  %v4250_v51 = vpop.f32.mrf.mxu3  ;;  %v3985_v32 = vpop.f32.mrf.mxu0 }
 0x727   : > { %v3986_v63 = vadd.f32 %v3985_v32, %v9251_v2  ;;  %v4074_v49 = vpop.f32.mrf.mxu1  ;;  %v10408_v32 = vld [vmem:[#allocation105_spill] sm:$0xff] }
 0x728   : > { %v4251_v22 = vadd.f32 %v4250_v51, %v4162_v37 }
 0x729   : > { %v4075_v12 = vadd.f32 %v4074_v49, %v3986_v63 }
 0x72a   : > { %v4354_v15 = vmax.f32 %v4251_v22, 0.0  ;;  %v10409_v22 = vld [vmem:[#allocation132_spill] sm:$0xff] }
 0x72d   : > { %v4163_v11 = vpop.f32.mrf.mxu2 }
 0x72e   : > { %v4164_v52 = vadd.f32 %v4163_v11, %v4075_v12  ;;  %v4252_v50 = vpop.f32.mrf.mxu3  ;;  %v3988_v21 = vpop.f32.mrf.mxu0  ;;  %v10410_v12 = vld [vmem:[#allocation40_spill] sm:$0xff] }
 0x72f   : > { %v3989_v46 = vadd.f32 %v3988_v21, %v9269_v59  ;;  %v4077_v5 = vpop.f32.mrf.mxu1 }
 0x730   : > { %v4253_v18 = vadd.f32 %v4252_v50, %v4164_v52 }
 0x731   : > { %v4078_v9 = vadd.f32 %v4077_v5, %v3989_v46  ;;  %4755 = vmatmul.bf16.vlgmr.msrb.gmra.mxu0 %v10405_v40 }
 0x732   : > { %v4358_v35 = vmax.f32 %v4253_v18, 0.0  ;;  %4844 = vmatmul.bf16.vlgmr.msrb.gmra.mxu1 %v10406_v41  ;;  %4933 = vmatmul.bf16.vlgmr.msrb.gmra.mxu2 %v10407_v45 }
 0x733   : > { %5022 = vmatmul.bf16.vlgmr.msrb.gmra.mxu3 %v9445_v19 }
 0x734   : > { %v9531_v2 = vpack.c.bf16 %v4358_v35, %v4354_v15 }
 0x735   : > { %v4166_v7 = vpop.f32.mrf.mxu2 }
 0x736   : > { %v4167_v25 = vadd.f32 %v4166_v7, %v4078_v9  ;;  %v4255_v26 = vpop.f32.mrf.mxu3  ;;  %v3990_v58 = vpop.f32.mrf.mxu0 }
 0x737   : > { %v3991_v59 = vadd.f32 %v3990_v58, %v9278_v57  ;;  %v4079_v54 = vpop.f32.mrf.mxu1 }
 0x738   : > { %v4256_v33 = vadd.f32 %v4255_v26, %v4167_v25  ;;  %v10411_v25 = vld [vmem:[#allocation109_spill] sm:$0xff] }
 0x739   : > { %v4080_v34 = vadd.f32 %v4079_v54, %v3991_v59  ;;  %v10412_v59 = vld [vmem:[#allocation133_spill] sm:$0xff]  ;;  %v10413_v54 = vld [vmem:[#allocation44_spill] sm:$0xff] }
 0x73a   : > { %v4362_v63 = vmax.f32 %v4256_v33, 0.0 }
 0x73d   : > { %v4168_v4 = vpop.f32.mrf.mxu2 }
 0x73e   : > { %v4169_v1 = vadd.f32 %v4168_v4, %v4080_v34  ;;  %v4257_v48 = vpop.f32.mrf.mxu3  ;;  %v3993_v8 = vpop.f32.mrf.mxu0 }
 0x73f   : > { %v3994_v42 = vadd.f32 %v3993_v8, %v9287_v14  ;;  %v4082_v37 = vpop.f32.mrf.mxu1 }
 0x740   : > { %v4258_v51 = vadd.f32 %v4257_v48, %v4169_v1 }
 0x741   : > { %v4083_v19 = vadd.f32 %v4082_v37, %v3994_v42  ;;  %4760 = vmatmul.bf16.gmra.mxu0 %v10408_v32 }
 0x742   : > { %v4366_v49 = vmax.f32 %v4258_v51, 0.0  ;;  %4849 = vmatmul.bf16.gmra.mxu1 %v10409_v22  ;;  %4938 = vmatmul.bf16.gmra.mxu2 %v10410_v12  ;;  %v10414_v12 = vld [vmem:[#allocation113_spill] sm:$0xff] }
 0x743   : > { %5027 = vmatmul.bf16.gmra.mxu3 %v9463_v43 }
 0x744   : > { %v9539_v57 = vpack.c.bf16 %v4366_v49, %v4362_v63 }
 0x745   : > { %v4171_v11 = vpop.f32.mrf.mxu2 }
 0x746   : > { %v4172_v52 = vadd.f32 %v4171_v11, %v4083_v19  ;;  %v4260_v50 = vpop.f32.mrf.mxu3  ;;  %v3995_v21 = vpop.f32.mrf.mxu0 }
 0x747   : > { %v3996_v14 = vadd.f32 %v3995_v21, %v9293_v53  ;;  %v4084_v46 = vpop.f32.mrf.mxu1  ;;  %v10416_v21 = vld [vmem:[#allocation48_spill] sm:$0xff] }
 0x748   : > { %v4261_v5 = vadd.f32 %v4260_v50, %v4172_v52  ;;  %v10415_v50 = vld [vmem:[#allocation134_spill] sm:$0xff] }
 0x749   : > { %v4085_v18 = vadd.f32 %v4084_v46, %v3996_v14 }
 0x74a   : > { %v4370_v26 = vmax.f32 %v4261_v5, 0.0 }
 0x74d   : > { %v4173_v9 = vpop.f32.mrf.mxu2 }
 0x74e   : > { %v4174_v40 = vadd.f32 %v4173_v9, %v4085_v18  ;;  %v4262_v15 = vpop.f32.mrf.mxu3  ;;  %v3998_v35 = vpop.f32.mrf.mxu0 }
 0x74f   : > { %v3999_v41 = vadd.f32 %v3998_v35, %v9311_v30  ;;  %v4087_v45 = vpop.f32.mrf.mxu1 }
 0x750   : > { %v4263_v7 = vadd.f32 %v4262_v15, %v4174_v40 }
 0x751   : > { %v4088_v43 = vadd.f32 %v4087_v45, %v3999_v41  ;;  %4765 = vmatmul.bf16.gmra.mxu0 %v10411_v25 }
 0x752   : > { %v4374_v58 = vmax.f32 %v4263_v7, 0.0  ;;  %4854 = vmatmul.bf16.gmra.mxu1 %v10412_v59  ;;  %4943 = vmatmul.bf16.gmra.mxu2 %v10413_v54 }
 0x753   : > { %5032 = vmatmul.bf16.gmra.mxu3 %v9475_v20 }
 0x754   : > { %v9547_v53 = vpack.c.bf16 %v4374_v58, %v4370_v26  ;;  %v10417_v58 = vld [vmem:[#allocation117_spill] sm:$0xff] }
 0x755   : > { %v4176_v33 = vpop.f32.mrf.mxu2 }
 0x756   : > { %v4177_v34 = vadd.f32 %v4176_v33, %v4088_v43  ;;  %v4265_v4 = vpop.f32.mrf.mxu3  ;;  %v4000_v1 = vpop.f32.mrf.mxu0  ;;  %v10418_v33 = vld [vmem:[#allocation135_spill] sm:$0xff] }
 0x757   : > { %v4001_v30 = vadd.f32 %v4000_v1, %v9320_v38  ;;  %v4089_v48 = vpop.f32.mrf.mxu1 }
 0x758   : > { %v4266_v8 = vadd.f32 %v4265_v4, %v4177_v34  ;;  %v10419_v34 = vld [vmem:[#allocation52_spill] sm:$0xff] }
 0x759   : > { %v4090_v42 = vadd.f32 %v4089_v48, %v4001_v30 }
 0x75a   : > { %v4378_v11 = vmax.f32 %v4266_v8, 0.0 }
 0x75d   : > { %v4178_v37 = vpop.f32.mrf.mxu2 }
 0x75e   : > { %v4179_v51 = vadd.f32 %v4178_v37, %v4090_v42  ;;  %v4267_v19 = vpop.f32.mrf.mxu3  ;;  %v4003_v32 = vpop.f32.mrf.mxu0 }
 0x75f   : > { %v4004_v63 = vadd.f32 %v4003_v32, %v9329_v13  ;;  %v4092_v49 = vpop.f32.mrf.mxu1 }
 0x760   : > { %v4268_v22 = vadd.f32 %v4267_v19, %v4179_v51 }
 0x761   : > { %v4093_v20 = vadd.f32 %v4092_v49, %v4004_v63  ;;  %4770 = vmatmul.bf16.gmra.mxu0 %v10414_v12  ;;  %v10420_v12 = vld [vmem:[#allocation121_spill] sm:$0xff] }
 0x762   : > { %v4382_v52 = vmax.f32 %v4268_v22, 0.0  ;;  %4859 = vmatmul.bf16.gmra.mxu1 %v10415_v50  ;;  %4948 = vmatmul.bf16.gmra.mxu2 %v10416_v21  ;;  %v10421_v50 = vld [vmem:[#allocation136_spill] sm:$0xff] }
 0x763   : > { %5037 = vmatmul.bf16.gmra.mxu3 %v9493_v17  ;;  %v10422_v21 = vld [vmem:[#allocation56_spill] sm:$0xff] }
 0x764   : > { %v9555_v38 = vpack.c.bf16 %v4382_v52, %v4378_v11 }
 0x765   : > { %v4181_v14 = vpop.f32.mrf.mxu2 }
 0x766   : > { %v4182_v46 = vadd.f32 %v4181_v14, %v4093_v20  ;;  %v4270_v5 = vpop.f32.mrf.mxu3  ;;  %v4005_v18 = vpop.f32.mrf.mxu0 }
 0x767   : > { %v4006_v13 = vadd.f32 %v4005_v18, %v9335_v6  ;;  %v4094_v9 = vpop.f32.mrf.mxu1 }
 0x768   : > { %v4271_v40 = vadd.f32 %v4270_v5, %v4182_v46 }
 0x769   : > { %v4095_v15 = vadd.f32 %v4094_v9, %v4006_v13 }
 0x76a   : > { %v4386_v59 = vmax.f32 %v4271_v40, 0.0 }
 0x76d   : > { %v4183_v35 = vpop.f32.mrf.mxu2 }
 0x76e   : > { %v4184_v41 = vadd.f32 %v4183_v35, %v4095_v15  ;;  %v4272_v45 = vpop.f32.mrf.mxu3  ;;  %v4008_v7 = vpop.f32.mrf.mxu0 }
 0x76f   : > { %v4009_v43 = vadd.f32 %v4008_v7, %v9353_v27  ;;  %v4097_v25 = vpop.f32.mrf.mxu1 }
 0x770   : > { %v4273_v26 = vadd.f32 %v4272_v45, %v4184_v41 }
 0x771   : > { %v4098_v17 = vadd.f32 %v4097_v25, %v4009_v43  ;;  %4775 = vmatmul.bf16.gmra.mxu0 %v10417_v58 }
 0x772   : > { %v4390_v54 = vmax.f32 %v4273_v26, 0.0  ;;  %4864 = vmatmul.bf16.gmra.mxu1 %v10418_v33  ;;  %4953 = vmatmul.bf16.gmra.mxu2 %v10419_v34  ;;  %v10423_v26 = vld [vmem:[#allocation125_spill] sm:$0xff] }
 0x773   : > { %5042 = vmatmul.bf16.gmra.mxu3 %v9505_v60 }
 0x774   : > { %v9563_v6 = vpack.c.bf16 %v4390_v54, %v4386_v59  ;;  %v10424_v59 = vld [vmem:[#allocation137_spill] sm:$0xff]  ;;  %v10425_v54 = vld [vmem:[#allocation60_spill] sm:$0xff] }
 0x775   : > { %v4186_v4 = vpop.f32.mrf.mxu2 }
 0x776   : > { %v4187_v1 = vadd.f32 %v4186_v4, %v4098_v17  ;;  %v4275_v30 = vpop.f32.mrf.mxu3  ;;  %v4010_v48 = vpop.f32.mrf.mxu0 }
 0x777   : > { %v4011_v27 = vadd.f32 %v4010_v48, %v9362_v56  ;;  %v4099_v8 = vpop.f32.mrf.mxu1 }
 0x778   : > { %v4276_v42 = vadd.f32 %v4275_v30, %v4187_v1 }
 0x779   : > { %v4100_v37 = vadd.f32 %v4099_v8, %v4011_v27 }
 0x77a   : > { %v4394_v11 = vmax.f32 %v4276_v42, 0.0 }
 0x77d   : > { %v4188_v51 = vpop.f32.mrf.mxu2 }
 0x77e   : > { %v4189_v19 = vadd.f32 %v4188_v51, %v4100_v37  ;;  %v4277_v32 = vpop.f32.mrf.mxu3  ;;  %v4013_v63 = vpop.f32.mrf.mxu0 }
 0x77f   : > { %v4014_v49 = vadd.f32 %v4013_v63, %v9371_v62  ;;  %v4102_v22 = vpop.f32.mrf.mxu1 }
 0x780   : > { %v4278_v20 = vadd.f32 %v4277_v32, %v4189_v19 }
 0x781   : > { %v4103_v60 = vadd.f32 %v4102_v22, %v4014_v49  ;;  %4780 = vmatmul.bf16.gmra.mxu0 %v10420_v12  ;;  %v10426_v49 = vld [vmem:[#allocation126_spill] sm:$0xff] }
 0x782   : > { %v4398_v52 = vmax.f32 %v4278_v20, 0.0  ;;  %4869 = vmatmul.bf16.gmra.mxu1 %v10421_v50  ;;  %4958 = vmatmul.bf16.gmra.mxu2 %v10422_v21 }
 0x783   : > { %5047 = vmatmul.bf16.gmra.mxu3 %v9514_v0 }
 0x784   : > { %v9571_v56 = vpack.c.bf16 %v4398_v52, %v4394_v11 }
 0x785   : > { %v4191_v14 = vpop.f32.mrf.mxu2 }
 0x786   : > { %v4192_v46 = vadd.f32 %v4191_v14, %v4103_v60  ;;  %v4280_v5 = vpop.f32.mrf.mxu3  ;;  %v4015_v18 = vpop.f32.mrf.mxu0  ;;  %v10427_v60 = vld [vmem:[#allocation138_spill] sm:$0xff] }
 0x787   : > { %v4016_v62 = vadd.f32 %v4015_v18, %v9377_v16  ;;  %v4104_v13 = vpop.f32.mrf.mxu1 }
 0x788   : > { %v4281_v9 = vadd.f32 %v4280_v5, %v4192_v46  ;;  %v9593_v5 = vld [vmem:[%s9738_s4] ss:$0 sm:$0xff] }
 0x789   : > { %v4105_v40 = vadd.f32 %v4104_v13, %v4016_v62 }
 0x78a   : > { %v4402_v17 = vmax.f32 %v4281_v9, 0.0 }
 0x78d   : > { %v4193_v15 = vpop.f32.mrf.mxu2 }
 0x78e   : > { %v4194_v35 = vadd.f32 %v4193_v15, %v4105_v40  ;;  %v4282_v41 = vpop.f32.mrf.mxu3  ;;  %v4018_v45 = vpop.f32.mrf.mxu0  ;;  %v10428_v15 = vld [vmem:[#allocation127_spill] sm:$0xff] }
 0x78f   : > { %v4019_v7 = vadd.f32 %v4018_v45, %v9395_v28  ;;  %v4107_v43 = vpop.f32.mrf.mxu1 }
 0x790   : > { %v4283_v25 = vadd.f32 %v4282_v41, %v4194_v35  ;;  %v10429_v41 = vld [vmem:[#allocation4_spill] sm:$0xff] }
 0x791   : > { %v4108_v0 = vadd.f32 %v4107_v43, %v4019_v7  ;;  %4785 = vmatmul.bf16.gmra.mxu0 %v10423_v26 }
 0x792   : > { %v4406_v58 = vmax.f32 %v4283_v25, 0.0  ;;  %4874 = vmatmul.bf16.gmra.mxu1 %v10424_v59  ;;  %4963 = vmatmul.bf16.gmra.mxu2 %v10425_v54 }
 0x793   : > { %5052 = vmatmul.bf16.gmra.mxu3 %v9523_v61 }
 0x794   : > { %v9579_v16 = vpack.c.bf16 %v4406_v58, %v4402_v17 }
 0x795   : > { %v4196_v33 = vpop.f32.mrf.mxu2 }
 0x796   : > { %v4197_v34 = vadd.f32 %v4196_v33, %v4108_v0  ;;  %v4285_v4 = vpop.f32.mrf.mxu3  ;;  %v4020_v1 = vpop.f32.mrf.mxu0 }
 0x797   : > { %v4021_v28 = vadd.f32 %v4020_v1, %v9404_v3  ;;  %v4109_v30 = vpop.f32.mrf.mxu1 }
 0x798   : > { %v4286_v48 = vadd.f32 %v4285_v4, %v4197_v34 }
 0x799   : > { %v4110_v27 = vadd.f32 %v4109_v30, %v4021_v28  ;;  %v10430_v30 = vld [vmem:[#allocation128_spill] sm:$0xff] }
 0x79a   : > { %v4410_v22 = vmax.f32 %v4286_v48, 0.0  ;;  %v10431_v48 = vld [vmem:[#allocation8_spill] sm:$0xff] }
 0x79d   : > { %v4198_v8 = vpop.f32.mrf.mxu2 }
 0x79e   : > { %v4199_v42 = vadd.f32 %v4198_v8, %v4110_v27  ;;  %v4287_v37 = vpop.f32.mrf.mxu3  ;;  %v4023_v51 = vpop.f32.mrf.mxu0 }
 0x79f   : > { %v4024_v19 = vadd.f32 %v4023_v51, %v9413_v31  ;;  %v4112_v32 = vpop.f32.mrf.mxu1 }
 0x7a0   : > { %v4288_v63 = vadd.f32 %v4287_v37, %v4199_v42 }
 0x7a1   : > { %v4113_v61 = vadd.f32 %v4112_v32, %v4024_v19  ;;  %4790 = vmatmul.bf16.gmra.mxu0 %v10426_v49 }
 0x7a2   : > { %v4414_v20 = vmax.f32 %v4288_v63, 0.0  ;;  %4879 = vmatmul.bf16.gmra.mxu1 %v10427_v60  ;;  %4968 = vmatmul.bf16.gmra.mxu2 %v9247_v44 }
 0x7a3   : > { %5057 = vmatmul.bf16.gmra.mxu3 %v9531_v2 }
 0x7a4   : > { %v9587_v3 = vpack.c.bf16 %v4414_v20, %v4410_v22 }
 0x7a5   : > { %v4201_v12 = vpop.f32.mrf.mxu2 }
 0x7a6   : > { %v4202_v11 = vadd.f32 %v4201_v12, %v4113_v61  ;;  %v4290_v52 = vpop.f32.mrf.mxu3  ;;  %v4025_v50 = vpop.f32.mrf.mxu0 }
 0x7a7   : > { %v4026_v31 = vadd.f32 %v4025_v50, %v9419_v24  ;;  %v4114_v21 = vpop.f32.mrf.mxu1 }
 0x7a8   : > { %v4291_v14 = vadd.f32 %v4290_v52, %v4202_v11  ;;  %v10432_v11 = vld [vmem:[#allocation78_spill] sm:$0xff]  ;;  %v10433_v52 = vld [vmem:[#allocation12_spill] sm:$0xff] }
 0x7a9   : > { %v4115_v46 = vadd.f32 %v4114_v21, %v4026_v31 }
 0x7aa   : > { %v4418_v24 = vmax.f32 %v4291_v14, 0.0 }
 0x7ad   : > { %v4203_v44 = vpop.f32.mrf.mxu2 }
 0x7ae   : > { %v4204_v18 = vadd.f32 %v4203_v44, %v4115_v46  ;;  %v4292_v2 = vpop.f32.mrf.mxu3  ;;  %v4756_v62 = vpop.f32.mrf.mxu0 }
 0x7af   : > { %v4845_v13 = vpop.f32.mrf.mxu1  ;;  %v4757_v40 = vadd.f32 %v9593_v5, %v4756_v62 }
 0x7b0   : > { %v4293_v9 = vadd.f32 %v4292_v2, %v4204_v18 }
 0x7b1   : > { %4795 = vmatmul.bf16.gmra.mxu0 %v10428_v15  ;;  %v4846_v45 = vadd.f32 %v4845_v13, %v4757_v40 }
 0x7b2   : > { %v4422_v35 = vmax.f32 %v4293_v9, 0.0  ;;  %4884 = vmatmul.bf16.gmra.mxu1 %v10429_v41  ;;  %4973 = vmatmul.bf16.gmra.mxu2 %v9274_v29  ;;  %v10435_v41 = vld [vmem:[#allocation16_spill] sm:$0xff] }
 0x7b3   : > { %5062 = vmatmul.bf16.gmra.mxu3 %v9539_v57 }
 0x7b4   : > { %v9601_v7 = vpack.c.bf16 %v4422_v35, %v4418_v24  ;;  %v10434_v35 = vld [vmem:[#allocation82_spill] sm:$0xff] }
 0x7b5   : > { %v4934_v43 = vpop.f32.mrf.mxu2 }
 0x7b6   : > { %v4935_v25 = vadd.f32 %v4934_v43, %v4846_v45  ;;  %v5023_v0 = vpop.f32.mrf.mxu3  ;;  %v4758_v26 = vpop.f32.mrf.mxu0 }
 0x7b7   : > { %v4847_v17 = vpop.f32.mrf.mxu1  ;;  %v4759_v57 = vadd.f32 %v9593_v5, %v4758_v26 }
 0x7b8   : > { %v5024_v29 = vadd.f32 %v5023_v0, %v4935_v25 }
 0x7b9   : > { %v4848_v58 = vadd.f32 %v4847_v17, %v4759_v57 }
 0x7ba   : > { %5104 = vst.msk [vmem:[%s9606_s17] sm:$0xff] %vm5103_vm1, %v5024_v29 }
 0x7bd   : > { %v4936_v59 = vpop.f32.mrf.mxu2 }
 0x7be   : > { %v4937_v54 = vadd.f32 %v4936_v59, %v4848_v58  ;;  %v5025_v33 = vpop.f32.mrf.mxu3  ;;  %v4761_v34 = vpop.f32.mrf.mxu0 }
 0x7bf   : > { %v4850_v4 = vpop.f32.mrf.mxu1  ;;  %v4762_v28 = vadd.f32 %v9593_v5, %v4761_v34 }
 0x7c0   : > { %v5026_v1 = vadd.f32 %v5025_v33, %v4937_v54 }
 0x7c1   : > { %4800 = vmatmul.bf16.gmra.mxu0 %v10430_v30  ;;  %v4851_v27 = vadd.f32 %v4850_v4, %v4762_v28  ;;  %v10437_v28 = vld [vmem:[#allocation20_spill] sm:$0xff] }
 0x7c2   : > { %5105 = vst.msk [vmem:[%s9606_s17 + $0x8] sm:$0xff] %vm5103_vm1, %v5026_v1  ;;  %4889 = vmatmul.bf16.gmra.mxu1 %v10431_v48  ;;  %4978 = vmatmul.bf16.gmra.mxu2 %v9289_v36  ;;  %v10436_v1 = vld [vmem:[#allocation86_spill] sm:$0xff] }
 0x7c3   : > { %5067 = vmatmul.bf16.gmra.mxu3 %v9547_v53 }
 0x7c5   : > { %v4939_v8 = vpop.f32.mrf.mxu2 }
 0x7c6   : > { %v4940_v42 = vadd.f32 %v4939_v8, %v4851_v27  ;;  %v5028_v37 = vpop.f32.mrf.mxu3  ;;  %v4763_v51 = vpop.f32.mrf.mxu0 }
 0x7c7   : > { %v4852_v19 = vpop.f32.mrf.mxu1  ;;  %v4764_v63 = vadd.f32 %v9593_v5, %v4763_v51 }
 0x7c8   : > { %v5029_v32 = vadd.f32 %v5028_v37, %v4940_v42 }
 0x7c9   : > { %v4853_v61 = vadd.f32 %v4852_v19, %v4764_v63 }
 0x7ca   : > { %5106 = vst.msk [vmem:[%s9606_s17 + $0x10] sm:$0xff] %vm5103_vm1, %v5029_v32 }
 0x7cd   : > { %v4941_v49 = vpop.f32.mrf.mxu2 }
 0x7ce   : > { %v4942_v22 = vadd.f32 %v4941_v49, %v4853_v61  ;;  %v5030_v20 = vpop.f32.mrf.mxu3  ;;  %v4766_v60 = vpop.f32.mrf.mxu0 }
 0x7cf   : > { %v4855_v36 = vpop.f32.mrf.mxu1  ;;  %v4767_v12 = vadd.f32 %v9593_v5, %v4766_v60  ;;  %v10438_v60 = vld [vmem:[#allocation90_spill] sm:$0xff] }
 0x7d0   : > { %v5031_v53 = vadd.f32 %v5030_v20, %v4942_v22 }
 0x7d1   : > { %4805 = vmatmul.bf16.gmra.mxu0 %v10432_v11  ;;  %v4856_v50 = vadd.f32 %v4855_v36, %v4767_v12  ;;  %v10439_v36 = vld [vmem:[#allocation24_spill] sm:$0xff] }
 0x7d2   : > { %5107 = vst.msk [vmem:[%s9606_s17 + $0x18] sm:$0xff] %vm5103_vm1, %v5031_v53  ;;  %4894 = vmatmul.bf16.gmra.mxu1 %v10433_v52  ;;  %4983 = vmatmul.bf16.gmra.mxu2 %v9316_v47 }
 0x7d3   : > { %5072 = vmatmul.bf16.gmra.mxu3 %v9555_v38 }
 0x7d5   : > { %v4944_v31 = vpop.f32.mrf.mxu2 }
 0x7d6   : > { %v4945_v21 = vadd.f32 %v4944_v31, %v4856_v50  ;;  %v5033_v14 = vpop.f32.mrf.mxu3  ;;  %v4768_v46 = vpop.f32.mrf.mxu0 }
 0x7d7   : > { %v4857_v44 = vpop.f32.mrf.mxu1  ;;  %v4769_v2 = vadd.f32 %v9593_v5, %v4768_v46 }
 0x7d8   : > { %v5034_v18 = vadd.f32 %v5033_v14, %v4945_v21 }
 0x7d9   : > { %v4858_v62 = vadd.f32 %v4857_v44, %v4769_v2 }
 0x7da   : > { %5108 = vst.msk [vmem:[%s9606_s17 + $0x20] sm:$0xff] %vm5103_vm1, %v5034_v18 }
 0x7dd   : > { %v4946_v13 = vpop.f32.mrf.mxu2 }
 0x7de   : > { %v4947_v9 = vadd.f32 %v4946_v13, %v4858_v62  ;;  %v5035_v40 = vpop.f32.mrf.mxu3  ;;  %v4771_v15 = vpop.f32.mrf.mxu0 }
 0x7df   : > { %v4860_v47 = vpop.f32.mrf.mxu1  ;;  %v4772_v24 = vadd.f32 %v9593_v5, %v4771_v15  ;;  %v10442_v15 = vld [vmem:[#allocation64_spill] sm:$0xff] }
 0x7e0   : > { %v5036_v38 = vadd.f32 %v5035_v40, %v4947_v9  ;;  %v10440_v9 = vld [vmem:[#allocation94_spill] sm:$0xff]  ;;  %v10441_v40 = vld [vmem:[#allocation28_spill] sm:$0xff] }
 0x7e1   : > { %4810 = vmatmul.bf16.gmra.mxu0 %v10434_v35  ;;  %v4861_v45 = vadd.f32 %v4860_v47, %v4772_v24 }
 0x7e2   : > { %5109 = vst.msk [vmem:[%s9606_s17 + $0x28] sm:$0xff] %vm5103_vm1, %v5036_v38  ;;  %4899 = vmatmul.bf16.gmra.mxu1 %v10435_v41  ;;  %4988 = vmatmul.bf16.gmra.mxu2 %v9331_v23 }
 0x7e3   : > { %5077 = vmatmul.bf16.gmra.mxu3 %v9563_v6 }
 0x7e5   : > { %v4949_v43 = vpop.f32.mrf.mxu2 }
 0x7e6   : > { %v4950_v25 = vadd.f32 %v4949_v43, %v4861_v45  ;;  %v5038_v0 = vpop.f32.mrf.mxu3  ;;  %v4773_v26 = vpop.f32.mrf.mxu0 }
 0x7e7   : > { %v4862_v17 = vpop.f32.mrf.mxu1  ;;  %v4774_v57 = vadd.f32 %v9593_v5, %v4773_v26 }
 0x7e8   : > { %v5039_v29 = vadd.f32 %v5038_v0, %v4950_v25 }
 0x7e9   : > { %v4863_v58 = vadd.f32 %v4862_v17, %v4774_v57 }
 0x7ea   : > { %5110 = vst.msk [vmem:[%s9606_s17 + $0x30] sm:$0xff] %vm5103_vm1, %v5039_v29 }
 0x7ed   : > { %v4951_v59 = vpop.f32.mrf.mxu2 }
 0x7ee   : > { %v4952_v54 = vadd.f32 %v4951_v59, %v4863_v58  ;;  %v5040_v33 = vpop.f32.mrf.mxu3  ;;  %v4776_v34 = vpop.f32.mrf.mxu0 }
 0x7ef   : > { %v4865_v23 = vpop.f32.mrf.mxu1  ;;  %v4777_v4 = vadd.f32 %v9593_v5, %v4776_v34 }
 0x7f0   : > { %v5041_v6 = vadd.f32 %v5040_v33, %v4952_v54  ;;  %v10443_v54 = vld [vmem:[#allocation131_spill] sm:$0xff]  ;;  %v10444_v33 = vld [vmem:[#allocation140_spill] sm:$0xff] }
 0x7f1   : > { %4815 = vmatmul.bf16.gmra.mxu0 %v10436_v1  ;;  %v4866_v30 = vadd.f32 %v4865_v23, %v4777_v4 }
 0x7f2   : > { %5111 = vst.msk [vmem:[%s9606_s17 + $0x38] sm:$0xff] %vm5103_vm1, %v5041_v6  ;;  %4904 = vmatmul.bf16.gmra.mxu1 %v10437_v28  ;;  %4993 = vmatmul.bf16.gmra.mxu2 %v9358_v10 }
 0x7f3   : > { %5082 = vmatmul.bf16.gmra.mxu3 %v9571_v56 }
 0x7f5   : > { %v4954_v48 = vpop.f32.mrf.mxu2 }
 0x7f6   : > { %v4955_v27 = vadd.f32 %v4954_v48, %v4866_v30  ;;  %v5043_v8 = vpop.f32.mrf.mxu3  ;;  %v4778_v42 = vpop.f32.mrf.mxu0 }
 0x7f7   : > { %v4867_v37 = vpop.f32.mrf.mxu1  ;;  %v4779_v19 = vadd.f32 %v9593_v5, %v4778_v42 }
 0x7f8   : > { %v5044_v51 = vadd.f32 %v5043_v8, %v4955_v27 }
 0x7f9   : > { %v4868_v32 = vadd.f32 %v4867_v37, %v4779_v19 }
 0x7fa   : > { %5112 = vst.msk [vmem:[%s9606_s17 + $0x40] sm:$0xff] %vm5103_vm1, %v5044_v51 }
 0x7fd   : > { %v4956_v63 = vpop.f32.mrf.mxu2 }
 0x7fe   : > { %v4957_v61 = vadd.f32 %v4956_v63, %v4868_v32  ;;  %v5045_v49 = vpop.f32.mrf.mxu3  ;;  %v4781_v22 = vpop.f32.mrf.mxu0 }
 0x7ff   : > { %v4870_v10 = vpop.f32.mrf.mxu1  ;;  %v4782_v20 = vadd.f32 %v9593_v5, %v4781_v22 }
 0x800   : > { %v5046_v56 = vadd.f32 %v5045_v49, %v4957_v61 }
 0x801   : > { %4820 = vmatmul.bf16.gmra.mxu0 %v10438_v60  ;;  %v4871_v53 = vadd.f32 %v4870_v10, %v4782_v20 }
 0x802   : > { %5113 = vst.msk [vmem:[%s9606_s17 + $0x48] sm:$0xff] %vm5103_vm1, %v5046_v56  ;;  %4909 = vmatmul.bf16.gmra.mxu1 %v10439_v36  ;;  %4998 = vmatmul.bf16.gmra.mxu2 %v9373_v55 }
 0x803   : > { %5087 = vmatmul.bf16.gmra.mxu3 %v9579_v16 }
 0x805   : > { %v4959_v12 = vpop.f32.mrf.mxu2 }
 0x806   : > { %v4960_v11 = vadd.f32 %v4959_v12, %v4871_v53  ;;  %v5048_v52 = vpop.f32.mrf.mxu3  ;;  %v4783_v50 = vpop.f32.mrf.mxu0 }
 0x807   : > { %v4872_v31 = vpop.f32.mrf.mxu1  ;;  %v4784_v14 = vadd.f32 %v9593_v5, %v4783_v50 }
 0x808   : > { %v5049_v21 = vadd.f32 %v5048_v52, %v4960_v11 }
 0x809   : > { %v4873_v46 = vadd.f32 %v4872_v31, %v4784_v14 }
 0x80a   : > { %5114 = vst.msk [vmem:[%s9606_s17 + $0x50] sm:$0xff] %vm5103_vm1, %v5049_v21 }
 0x80d   : > { %v4961_v44 = vpop.f32.mrf.mxu2 }
 0x80e   : > { %v4962_v18 = vadd.f32 %v4961_v44, %v4873_v46  ;;  %v5050_v2 = vpop.f32.mrf.mxu3  ;;  %v4786_v62 = vpop.f32.mrf.mxu0 }
 0x80f   : > { %v4875_v55 = vpop.f32.mrf.mxu1  ;;  %v4787_v13 = vadd.f32 %v9593_v5, %v4786_v62 }
 0x810   : > { %v5051_v16 = vadd.f32 %v5050_v2, %v4962_v18 }
 0x811   : > { %4825 = vmatmul.bf16.gmra.mxu0 %v10440_v9  ;;  %v4876_v47 = vadd.f32 %v4875_v55, %v4787_v13 }
 0x812   : > { %5115 = vst.msk [vmem:[%s9606_s17 + $0x58] sm:$0xff] %vm5103_vm1, %v5051_v16  ;;  %4914 = vmatmul.bf16.gmra.mxu1 %v10441_v40  ;;  %5003 = vmatmul.bf16.gmra.mxu2 %v10442_v15 }
 0x813   : > { %5092 = vmatmul.bf16.gmra.mxu3 %v9587_v3 }
 0x815   : > { %v4964_v38 = vpop.f32.mrf.mxu2 }
 0x816   : > { %v4965_v24 = vadd.f32 %v4964_v38, %v4876_v47  ;;  %v5053_v35 = vpop.f32.mrf.mxu3  ;;  %v4788_v41 = vpop.f32.mrf.mxu0 }
 0x817   : > { %v4877_v45 = vpop.f32.mrf.mxu1  ;;  %v4789_v25 = vadd.f32 %v9593_v5, %v4788_v41 }
 0x818   : > { %v5054_v43 = vadd.f32 %v5053_v35, %v4965_v24 }
 0x819   : > { %v4878_v0 = vadd.f32 %v4877_v45, %v4789_v25 }
 0x81a   : > { %5116 = vst.msk [vmem:[%s9606_s17 + $0x60] sm:$0xff] %vm5103_vm1, %v5054_v43 }
 0x81d   : > { %v4966_v26 = vpop.f32.mrf.mxu2 }
 0x81e   : > { %v4967_v17 = vadd.f32 %v4966_v26, %v4878_v0  ;;  %v5055_v29 = vpop.f32.mrf.mxu3  ;;  %v4791_v57 = vpop.f32.mrf.mxu0 }
 0x81f   : > { %v4880_v58 = vpop.f32.mrf.mxu1  ;;  %v4792_v59 = vadd.f32 %v9593_v5, %v4791_v57 }
 0x820   : > { %v5056_v3 = vadd.f32 %v5055_v29, %v4967_v17 }
 0x821   : > { %4830 = vmatmul.bf16.gmra.mxu0 %v10443_v54  ;;  %v4881_v34 = vadd.f32 %v4880_v58, %v4792_v59 }
 0x822   : > { %5117 = vst.msk [vmem:[%s9606_s17 + $0x68] sm:$0xff] %vm5103_vm1, %v5056_v3  ;;  %4919 = vmatmul.bf16.gmra.mxu1 %v10444_v33  ;;  %5008 = vmatmul.bf16.gmra.mxu2 %v9415_v39 }
 0x823   : > { %5097 = vmatmul.bf16.gmra.mxu3 %v9601_v7 }
 0x825   : > { %v4969_v23 = vpop.f32.mrf.mxu2 }
 0x826   : > { %v4970_v6 = vadd.f32 %v4969_v23, %v4881_v34  ;;  %v5058_v4 = vpop.f32.mrf.mxu3  ;;  %v4793_v1 = vpop.f32.mrf.mxu0 }
 0x827   : > { %v4882_v28 = vpop.f32.mrf.mxu1  ;;  %v4794_v48 = vadd.f32 %v9593_v5, %v4793_v1 }
 0x828   : > { %v5059_v30 = vadd.f32 %v5058_v4, %v4970_v6 }
 0x829   : > { %v4883_v27 = vadd.f32 %v4882_v28, %v4794_v48 }
 0x82a   : > { %5118 = vst.msk [vmem:[%s9606_s17 + $0x70] sm:$0xff] %vm5103_vm1, %v5059_v30 }
 0x82d   : > { %v4971_v8 = vpop.f32.mrf.mxu2 }
 0x82e   : > { %v4972_v42 = vadd.f32 %v4971_v8, %v4883_v27  ;;  %v5060_v37 = vpop.f32.mrf.mxu3  ;;  %v4796_v39 = vpop.f32.mrf.mxu0 }
 0x82f   : > { %v4885_v51 = vpop.f32.mrf.mxu1  ;;  %v4797_v19 = vadd.f32 %v9593_v5, %v4796_v39 }
 0x830   : > { %v5061_v7 = vadd.f32 %v5060_v37, %v4972_v42 }
 0x831   : > { %v4886_v32 = vadd.f32 %v4885_v51, %v4797_v19 }
 0x832   : > { %5119 = vst.msk [vmem:[%s9606_s17 + $0x78] sm:$0xff] %vm5103_vm1, %v5061_v7 }
 0x835   : > { %v4974_v63 = vpop.f32.mrf.mxu2 }
 0x836   : > { %v4975_v61 = vadd.f32 %v4974_v63, %v4886_v32  ;;  %v5063_v49 = vpop.f32.mrf.mxu3  ;;  %v4798_v22 = vpop.f32.mrf.mxu0 }
 0x837   : > { %v4887_v10 = vpop.f32.mrf.mxu1  ;;  %v4799_v20 = vadd.f32 %v9593_v5, %v4798_v22 }
 0x838   : > { %v5064_v56 = vadd.f32 %v5063_v49, %v4975_v61 }
 0x839   : > { %v4888_v60 = vadd.f32 %v4887_v10, %v4799_v20 }
 0x83a   : > { %5120 = vst.msk [vmem:[%s9606_s17 + $0x80] sm:$0xff] %vm5103_vm1, %v5064_v56 }
 0x83d   : > { %v4976_v36 = vpop.f32.mrf.mxu2 }
 0x83e   : > { %v4977_v53 = vadd.f32 %v4976_v36, %v4888_v60  ;;  %v5065_v12 = vpop.f32.mrf.mxu3  ;;  %v4801_v11 = vpop.f32.mrf.mxu0 }
 0x83f   : > { %v4890_v52 = vpop.f32.mrf.mxu1  ;;  %v4802_v31 = vadd.f32 %v9593_v5, %v4801_v11 }
 0x840   : > { %v5066_v50 = vadd.f32 %v5065_v12, %v4977_v53 }
 0x841   : > { %v4891_v21 = vadd.f32 %v4890_v52, %v4802_v31 }
 0x842   : > { %5121 = vst.msk [vmem:[%s9606_s17 + $0x88] sm:$0xff] %vm5103_vm1, %v5066_v50 }
 0x845   : > { %v4979_v14 = vpop.f32.mrf.mxu2 }
 0x846   : > { %v4980_v46 = vadd.f32 %v4979_v14, %v4891_v21  ;;  %v5068_v44 = vpop.f32.mrf.mxu3  ;;  %v4803_v18 = vpop.f32.mrf.mxu0 }
 0x847   : > { %v4892_v2 = vpop.f32.mrf.mxu1  ;;  %v4804_v55 = vadd.f32 %v9593_v5, %v4803_v18 }
 0x848   : > { %v5069_v62 = vadd.f32 %v5068_v44, %v4980_v46 }
 0x849   : > { %v4893_v16 = vadd.f32 %v4892_v2, %v4804_v55 }
 0x84a   : > { %5122 = vst.msk [vmem:[%s9606_s17 + $0x90] sm:$0xff] %vm5103_vm1, %v5069_v62 }
 0x84d   : > { %v4981_v13 = vpop.f32.mrf.mxu2 }
 0x84e   : > { %v4982_v9 = vadd.f32 %v4981_v13, %v4893_v16  ;;  %v5070_v40 = vpop.f32.mrf.mxu3  ;;  %v4806_v15 = vpop.f32.mrf.mxu0 }
 0x84f   : > { %v4895_v47 = vpop.f32.mrf.mxu1  ;;  %v4807_v24 = vadd.f32 %v9593_v5, %v4806_v15 }
 0x850   : > { %v5071_v38 = vadd.f32 %v5070_v40, %v4982_v9 }
 0x851   : > { %v4896_v35 = vadd.f32 %v4895_v47, %v4807_v24 }
 0x852   : > { %5123 = vst.msk [vmem:[%s9606_s17 + $0x98] sm:$0xff] %vm5103_vm1, %v5071_v38 }
 0x855   : > { %v4984_v41 = vpop.f32.mrf.mxu2 }
 0x856   : > { %v4985_v45 = vadd.f32 %v4984_v41, %v4896_v35  ;;  %v5073_v43 = vpop.f32.mrf.mxu3  ;;  %v4808_v25 = vpop.f32.mrf.mxu0 }
 0x857   : > { %v4897_v0 = vpop.f32.mrf.mxu1  ;;  %v4809_v17 = vadd.f32 %v9593_v5, %v4808_v25 }
 0x858   : > { %v5074_v26 = vadd.f32 %v5073_v43, %v4985_v45 }
 0x859   : > { %v4898_v29 = vadd.f32 %v4897_v0, %v4809_v17 }
 0x85a   : > { %5124 = vst.msk [vmem:[%s9606_s17 + $0xa0] sm:$0xff] %vm5103_vm1, %v5074_v26 }
 0x85d   : > { %v4986_v57 = vpop.f32.mrf.mxu2 }
 0x85e   : > { %v4987_v58 = vadd.f32 %v4986_v57, %v4898_v29  ;;  %v5075_v3 = vpop.f32.mrf.mxu3  ;;  %v4811_v59 = vpop.f32.mrf.mxu0 }
 0x85f   : > { %v4900_v54 = vpop.f32.mrf.mxu1  ;;  %v4812_v34 = vadd.f32 %v9593_v5, %v4811_v59 }
 0x860   : > { %v5076_v33 = vadd.f32 %v5075_v3, %v4987_v58 }
 0x861   : > { %v4901_v23 = vadd.f32 %v4900_v54, %v4812_v34 }
 0x862   : > { %5125 = vst.msk [vmem:[%s9606_s17 + $0xa8] sm:$0xff] %vm5103_vm1, %v5076_v33 }
 0x865   : > { %v4989_v6 = vpop.f32.mrf.mxu2 }
 0x866   : > { %v4990_v4 = vadd.f32 %v4989_v6, %v4901_v23  ;;  %v5078_v1 = vpop.f32.mrf.mxu3  ;;  %v4813_v28 = vpop.f32.mrf.mxu0 }
 0x867   : > { %v4902_v30 = vpop.f32.mrf.mxu1  ;;  %v4814_v27 = vadd.f32 %v9593_v5, %v4813_v28 }
 0x868   : > { %v5079_v48 = vadd.f32 %v5078_v1, %v4990_v4 }
 0x869   : > { %v4903_v8 = vadd.f32 %v4902_v30, %v4814_v27 }
 0x86a   : > { %5126 = vst.msk [vmem:[%s9606_s17 + $0xb0] sm:$0xff] %vm5103_vm1, %v5079_v48 }
 0x86d   : > { %v4991_v42 = vpop.f32.mrf.mxu2 }
 0x86e   : > { %v4992_v37 = vadd.f32 %v4991_v42, %v4903_v8  ;;  %v5080_v39 = vpop.f32.mrf.mxu3  ;;  %v4816_v51 = vpop.f32.mrf.mxu0 }
 0x86f   : > { %v4905_v7 = vpop.f32.mrf.mxu1  ;;  %v4817_v32 = vadd.f32 %v9593_v5, %v4816_v51 }
 0x870   : > { %v5081_v19 = vadd.f32 %v5080_v39, %v4992_v37 }
 0x871   : > { %v4906_v63 = vadd.f32 %v4905_v7, %v4817_v32 }
 0x872   : > { %5127 = vst.msk [vmem:[%s9606_s17 + $0xb8] sm:$0xff] %vm5103_vm1, %v5081_v19 }
 0x875   : > { %v4994_v61 = vpop.f32.mrf.mxu2 }
 0x876   : > { %v4995_v49 = vadd.f32 %v4994_v61, %v4906_v63  ;;  %v5083_v22 = vpop.f32.mrf.mxu3  ;;  %v4818_v10 = vpop.f32.mrf.mxu0 }
 0x877   : > { %v4907_v56 = vpop.f32.mrf.mxu1  ;;  %v4819_v60 = vadd.f32 %v9593_v5, %v4818_v10 }
 0x878   : > { %v5084_v20 = vadd.f32 %v5083_v22, %v4995_v49 }
 0x879   : > { %v4908_v36 = vadd.f32 %v4907_v56, %v4819_v60 }
 0x87a   : > { %5128 = vst.msk [vmem:[%s9606_s17 + $0xc0] sm:$0xff] %vm5103_vm1, %v5084_v20 }
 0x87d   : > { %v4996_v53 = vpop.f32.mrf.mxu2 }
 0x87e   : > { %v4997_v12 = vadd.f32 %v4996_v53, %v4908_v36  ;;  %v5085_v11 = vpop.f32.mrf.mxu3  ;;  %v4821_v52 = vpop.f32.mrf.mxu0 }
 0x87f   : > { %v4910_v50 = vpop.f32.mrf.mxu1  ;;  %v4822_v21 = vadd.f32 %v9593_v5, %v4821_v52 }
 0x880   : > { %v5086_v31 = vadd.f32 %v5085_v11, %v4997_v12 }
 0x881   : > { %v4911_v14 = vadd.f32 %v4910_v50, %v4822_v21 }
 0x882   : > { %5129 = vst.msk [vmem:[%s9606_s17 + $0xc8] sm:$0xff] %vm5103_vm1, %v5086_v31 }
 0x885   : > { %v4999_v46 = vpop.f32.mrf.mxu2 }
 0x886   : > { %v5000_v44 = vadd.f32 %v4999_v46, %v4911_v14  ;;  %v5088_v18 = vpop.f32.mrf.mxu3  ;;  %v4823_v2 = vpop.f32.mrf.mxu0 }
 0x887   : > { %v4912_v62 = vpop.f32.mrf.mxu1  ;;  %v4824_v16 = vadd.f32 %v9593_v5, %v4823_v2 }
 0x888   : > { %v5089_v55 = vadd.f32 %v5088_v18, %v5000_v44 }
 0x889   : > { %v4913_v13 = vadd.f32 %v4912_v62, %v4824_v16 }
 0x88a   : > { %5130 = vst.msk [vmem:[%s9606_s17 + $0xd0] sm:$0xff] %vm5103_vm1, %v5089_v55 }
 0x88d   : > { %v5001_v9 = vpop.f32.mrf.mxu2 }
 0x88e   : > { %v5002_v40 = vadd.f32 %v5001_v9, %v4913_v13  ;;  %v5090_v15 = vpop.f32.mrf.mxu3  ;;  %v4826_v47 = vpop.f32.mrf.mxu0 }
 0x88f   : > { %v4915_v38 = vpop.f32.mrf.mxu1  ;;  %v4827_v35 = vadd.f32 %v9593_v5, %v4826_v47 }
 0x890   : > { %v5091_v24 = vadd.f32 %v5090_v15, %v5002_v40 }
 0x891   : > { %v4916_v41 = vadd.f32 %v4915_v38, %v4827_v35 }
 0x892   : > { %5131 = vst.msk [vmem:[%s9606_s17 + $0xd8] sm:$0xff] %vm5103_vm1, %v5091_v24 }
 0x895   : > { %v5004_v45 = vpop.f32.mrf.mxu2 }
 0x896   : > { %v5005_v43 = vadd.f32 %v5004_v45, %v4916_v41  ;;  %v5093_v25 = vpop.f32.mrf.mxu3  ;;  %v4828_v0 = vpop.f32.mrf.mxu0 }
 0x897   : > { %v4917_v26 = vpop.f32.mrf.mxu1  ;;  %v4829_v29 = vadd.f32 %v9593_v5, %v4828_v0 }
 0x898   : > { %v5094_v17 = vadd.f32 %v5093_v25, %v5005_v43 }
 0x899   : > { %v4918_v57 = vadd.f32 %v4917_v26, %v4829_v29 }
 0x89a   : > { %5132 = vst.msk [vmem:[%s9606_s17 + $0xe0] sm:$0xff] %vm5103_vm1, %v5094_v17 }
 0x89d   : > { %v5006_v58 = vpop.f32.mrf.mxu2 }
 0x89e   : > { %v5007_v3 = vadd.f32 %v5006_v58, %v4918_v57  ;;  %v5095_v59 = vpop.f32.mrf.mxu3  ;;  %v4831_v54 = vpop.f32.mrf.mxu0 }
 0x89f   : > { %v4832_v34 = vadd.f32 %v9593_v5, %v4831_v54  ;;  %v4920_v23 = vpop.f32.mrf.mxu1 }
 0x8a0   : > { %v5096_v33 = vadd.f32 %v5095_v59, %v5007_v3 }
 0x8a1   : > { %v4921_v6 = vadd.f32 %v4920_v23, %v4832_v34 }
 0x8a2   : > { %5133 = vst.msk [vmem:[%s9606_s17 + $0xe8] sm:$0xff] %vm5103_vm1, %v5096_v33 }
 0x8a5   : > { %v5009_v4 = vpop.f32.mrf.mxu2 }
 0x8a6   : > { %v5010_v1 = vadd.f32 %v5009_v4, %v4921_v6  ;;  %v5098_v28 = vpop.f32.mrf.mxu3  ;;  %v4833_v30 = vpop.f32.mrf.mxu0 }
 0x8a7   : > { %v4834_v27 = vadd.f32 %v9593_v5, %v4833_v30  ;;  %v4922_v8 = vpop.f32.mrf.mxu1 }
 0x8a8   : > { %v5099_v48 = vadd.f32 %v5098_v28, %v5010_v1 }
 0x8a9   : > { %v4923_v42 = vadd.f32 %v4922_v8, %v4834_v27 }
 0x8aa   : > { %5134 = vst.msk [vmem:[%s9606_s17 + $0xf0] sm:$0xff] %vm5103_vm1, %v5099_v48 }
 0x8ad   : > { %v5011_v37 = vpop.f32.mrf.mxu2 }
 0x8ae   : > { %v5012_v39 = vadd.f32 %v5011_v37, %v4923_v42  ;;  %v5100_v51 = vpop.f32.mrf.mxu3 }
 0x8b0   : > { %v5101_v7 = vadd.f32 %v5100_v51, %v5012_v39 }
 0x8b2   : > { %5135 = vst.msk [vmem:[%s9606_s17 + $0xf8] sm:$0xff] %vm5103_vm1, %v5101_v7 }
 0x8b3 PF: > { %s15_s18 = sadd.s32 1, %s6425_s18  }
 0x8b4   : > { %p12_p4 = scmp.ge.s32.totalorder %s15_s18, 4  }
 0x8b6   :  { %14 = sbr.rel (!%p12_p4) target bundleno = 1 (0x1), region = 70 }

</bundles_post_ra>
